<compile_context>
chip_gen: v7x
topology: tpu7x:2x2x1
jax: 0.10.0
libtpu: 0.0.40
codegen_flags: <defaults>
</compile_context>

<pallas_src>
import numpy as np
import jax
import jax.numpy as jnp
from jax.experimental import pallas as pl
from jax.experimental.pallas import tpu as pltpu

EPS = 1e-5


def _round_up(x, m):
    return ((x + m - 1) // m) * m


def _vmem_budget_bytes():
    """~75% of this generation's VMEM (v7x ~48 MiB, v5e/v6e ~96 MiB)."""
    try:
        cap = int(getattr(pltpu.get_tpu_info(), "vmem_capacity_bytes", 0))
    except Exception:
        cap = 0
    if cap <= 0:
        cap = 64 * 1024 * 1024
    return max(32 * 1024 * 1024, min(cap * 3 // 4, 100 * 1024 * 1024))


def _pick_row_tile(H, Wp, budget_bytes):
    """Largest row tile T (divisor of H) whose live intermediates fit the budget."""
    per_row = Wp * 3400                                  # ~live f32 bytes / padded row
    max_rows = max(1, budget_bytes // (3 * per_row))     # headroom for double buffers
    cap = min(max_rows, max(8, H // 2)) if H >= 16 else min(max_rows, H)
    best = 1
    for t in range(1, H + 1):
        if H % t == 0 and t <= cap:
            best = t
    return best


# --------------------------------------------------------------------------
# In-kernel helpers (operate on jnp values living in VMEM / vregs)
# --------------------------------------------------------------------------
def _conv3x3_relu(xpad, w3, shift):
    """3x3 conv (stride 1) + shift + ReLU on a zero-bordered (R, Wp, Cin) slab.

    Column taps are folded into K: 3 matmuls with K=3*Cin (one per ky).
    w3: (3, 3*Cin, Cout) bf16; shift: (1, Cout) f32.
    Returns (R-2, Wp, Cout) f32; padding-column outputs are garbage and must
    be masked or dropped by the caller.  Roll wrap-around only lands on
    padding columns, which are zero before every conv.
    """
    R, Wp, Cin = xpad.shape
    Rout = R - 2
    Cout = w3.shape[2]
    shiftcat = jnp.concatenate(
        [jnp.roll(xpad, 1, axis=1), xpad, jnp.roll(xpad, -1, axis=1)],
        axis=-1).astype(jnp.bfloat16)                            # (R, Wp, 3*Cin)
    acc = jnp.dot(shiftcat[0:Rout].reshape(Rout * Wp, 3 * Cin), w3[0],
                  preferred_element_type=jnp.float32)
    for ky in (1, 2):                                            # static unroll
        acc = acc + jnp.dot(
            shiftcat[ky:ky + Rout].reshape(Rout * Wp, 3 * Cin), w3[ky],
            preferred_element_type=jnp.float32)
    return jnp.maximum(acc + shift, 0.0).reshape(Rout, Wp, Cout)


def _avgpool3x3(xwin):
    """3x3 avg pool (stride 1, count_include_pad) on zero-bordered (R, Wp, C)."""
    R, Wp, C = xwin.shape
    Rout = R - 2
    csum = jnp.roll(xwin, 1, axis=1) + xwin + jnp.roll(xwin, -1, axis=1)
    return (csum[0:Rout] + csum[1:Rout + 1] + csum[2:Rout + 2]) * (1.0 / 9.0)


# --------------------------------------------------------------------------
# Fused Inception kernel: one grid step == one (image, row-tile)
# --------------------------------------------------------------------------
def _make_kernel(H, W, T, Cin):
    TP4 = T + 4                               # row window: tile + 2-row halo each side

    def kernel(x_ref, w1_ref, s1_ref, wB2_ref, sB2_ref, wC2_ref, sC2_ref,
               wC3_ref, sC3_ref, wD_ref, sD_ref, o_ref):
        Wp = x_ref.shape[1]
        out_D = wD_ref.shape[1]
        row0 = pl.program_id(1) * T           # first padded row of this window

        # (T+4, Wp, Cin) window; out-of-image rows/cols are physically zero.
        xwin = x_ref[pl.ds(row0, TP4)]

        # 1 inside the real image, 0 on the padding ring (interior columns
        # start at the 8-aligned offset 8 -- keeps slices/stores unmasked).
        img_row = jax.lax.broadcasted_iota(jnp.int32, (TP4, Wp, 1), 0) + row0 - 2
        cc = jax.lax.broadcasted_iota(jnp.int32, (TP4, Wp, 1), 1)
        win_mask = ((img_row >= 0) & (img_row < H)
                    & (cc >= 8) & (cc < 8 + W)).astype(jnp.float32)

        # ---- fused stage-1 1x1 convs: A1|B1|C1 -> one (K=Cin, N=192) matmul ----
        xf = xwin.reshape(TP4 * Wp, Cin).astype(jnp.bfloat16)
        s1 = jnp.maximum(
            jnp.dot(xf, w1_ref[...], preferred_element_type=jnp.float32)
            + s1_ref[...], 0.0).reshape(TP4, Wp, 192) * win_mask
        a, b1p, c1p = s1[..., 0:64], s1[..., 64:128], s1[..., 128:192]

        # ---- branch B: 1x1 -> 3x3 ---------------------------------------------
        b2 = _conv3x3_relu(b1p, wB2_ref[...], sB2_ref[...])[1:T + 1]   # (T,Wp,outB)

        # ---- branch C: 1x1 -> 3x3 -> 3x3 ----------------------------------------
        c2 = _conv3x3_relu(c1p, wC2_ref[...], sC2_ref[...])            # (T+2,Wp,96)
        c2 = c2 * win_mask[1:TP4 - 1]          # re-impose zero border before conv 2
        c3 = _conv3x3_relu(c2, wC3_ref[...], sC3_ref[...])             # (T, Wp, 96)

        # ---- branch D: avgpool3x3 -> 1x1 ----------------------------------------
        pooled = _avgpool3x3(xwin[1:TP4 - 1])                          # (T, Wp, Cin)
        d = jnp.maximum(
            jnp.dot(pooled.reshape(T * Wp, Cin).astype(jnp.bfloat16),
                    wD_ref[...], preferred_element_type=jnp.float32)
            + sD_ref[...], 0.0).reshape(T, Wp, out_D)

        # ---- lane-dense concat + sublane-aligned interior store -----------------
        cat = jnp.concatenate([a[2:T + 2], b2, c3, d], axis=-1)        # (T, Wp, Ctot)
        o_ref[...] = cat[:, 8:8 + W, :]

    return kernel


# --------------------------------------------------------------------------
# pallas_call wrapper (NCHW in / NCHW out; pad + transpose glue in plain JAX)
# --------------------------------------------------------------------------
def inception_forward(x_nchw, params):
    N, Cin, H, W = x_nchw.shape
    wA, sA = params["A1"]
    wB1, sB1 = params["B1"]
    wB2, sB2 = params["B2"]
    wC1, sC1 = params["C1"]
    wC2, sC2 = params["C2"]
    wC3, sC3 = params["C3"]
    wD, sD = params["D1"]
    out_B, out_D = wB2.shape[2], wD.shape[1]
    Ctot = 64 + out_B + 96 + out_D

    # Operand packing: fuse the stage-1 weights, fold 3x3 column taps into K,
    # cast all matmul weights to bf16 (f32 accumulation in-kernel).
    w1 = jnp.concatenate([wA, wB1, wC1], axis=1).astype(jnp.bfloat16)   # (Cin,192)
    s1 = jnp.concatenate([sA, sB1, sC1], axis=1)                        # (1, 192)
    wB2k = wB2.reshape(3, 3 * 64, out_B).astype(jnp.bfloat16)
    wC2k = wC2.reshape(3, 3 * 64, 96).astype(jnp.bfloat16)
    wC3k = wC3.reshape(3, 3 * 96, 96).astype(jnp.bfloat16)
    wDk = wD.astype(jnp.bfloat16)

    # Spatial padding: 2 zero rows top/bottom (2-row halo for chained 3x3s),
    # 8 zero cols on the left (sublane-aligned interior) + >=1 on the right.
    Hp = H + 4
    Wp = _round_up(W + 9, 8)
    x = jnp.transpose(x_nchw, (0, 2, 3, 1))                             # NCHW->NHWC
    xpad = jnp.pad(x, ((0, 0), (2, 2), (8, Wp - W - 8), (0, 0)))

    budget = _vmem_budget_bytes()
    T = _pick_row_tile(H, Wp, budget)                                   # row tile
    R = H // T

    kernel = _make_kernel(H, W, T, Cin)

    def wspec(arr):
        return pl.BlockSpec(arr.shape, lambda n, r: (0,) * arr.ndim)

    out = pl.pallas_call(
        kernel,
        out_shape=jax.ShapeDtypeStruct((N, H, W, Ctot), jnp.float32),
        grid=(N, R),
        in_specs=[pl.BlockSpec((None, Hp, Wp, Cin), lambda n, r: (n, 0, 0, 0)),
                  wspec(w1), wspec(s1),
                  wspec(wB2k), wspec(sB2),
                  wspec(wC2k), wspec(sC2),
                  wspec(wC3k), wspec(sC3),
                  wspec(wDk), wspec(sD)],
        out_specs=pl.BlockSpec((None, T, W, Ctot), lambda n, r: (n, r, 0, 0)),
        compiler_params=pltpu.CompilerParams(
            dimension_semantics=("parallel", "parallel"),
            vmem_limit_bytes=budget),
    )(xpad, w1, s1, wB2k, sB2, wC2k, sC2, wC3k, sC3, wDk, sD)
    return jnp.transpose(out, (0, 3, 1, 2))                             # NHWC->NCHW


# --------------------------------------------------------------------------
# Parameter construction (deterministic, eval-mode BN folded into weights)
# --------------------------------------------------------------------------
def init_conv_bn(key, cin, cout, ksize):
    k1, k2, k3, k4, k5, k6 = jax.random.split(key, 6)
    bound = 1.0 / np.sqrt(cin * ksize * ksize)
    if ksize == 1:
        w = jax.random.uniform(k1, (cin, cout), jnp.float32, -bound, bound)
    else:
        w = jax.random.uniform(k1, (ksize * ksize, cin, cout), jnp.float32,
                               -bound, bound)
    b = jax.random.uniform(k2, (cout,), jnp.float32, -bound, bound)
    gamma = jax.random.uniform(k3, (cout,), jnp.float32, 0.5, 1.5)
    beta = jax.random.uniform(k4, (cout,), jnp.float32, -0.5, 0.5)
    mean = jax.random.uniform(k5, (cout,), jnp.float32, -0.5, 0.5)
    var = jax.random.uniform(k6, (cout,), jnp.float32, 0.5, 1.5)
    scale = gamma / jnp.sqrt(var + EPS)
    shift = beta - mean * scale + b * scale
    return w * scale, shift.reshape(1, cout)     # BN scale folded into conv weights


def init_inception_params(key, in_channels, out_B, out_D):
    keys = jax.random.split(key, 7)
    return {
        "A1": init_conv_bn(keys[0], in_channels, 64, 1),
        "B1": init_conv_bn(keys[1], in_channels, 64, 1),
        "B2": init_conv_bn(keys[2], 64, out_B, 3),
        "C1": init_conv_bn(keys[3], in_channels, 64, 1),
        "C2": init_conv_bn(keys[4], 64, 96, 3),
        "C3": init_conv_bn(keys[5], 96, 96, 3),
        "D1": init_conv_bn(keys[6], in_channels, out_D, 1),
    }


# --------------------------------------------------------------------------
# Pure-JAX reference (same deliberate bf16-input / f32-accum conv precision)
# --------------------------------------------------------------------------
def _ref_conv_relu(x_nhwc, w, shift, ksize):
    if ksize == 1:
        wh = w.reshape(1, 1, w.shape[0], w.shape[1])
        pad = "VALID"
    else:
        wh = w.reshape(3, 3, w.shape[1], w.shape[2])
        pad = "SAME"
    y = jax.lax.conv_general_dilated(
        x_nhwc.astype(jnp.bfloat16), wh.astype(jnp.bfloat16), (1, 1), pad,
        dimension_numbers=("NHWC", "HWIO", "NHWC"),
        preferred_element_type=jnp.float32)
    return jnp.maximum(y + shift.reshape(1, 1, 1, -1), 0.0)


def _ref_avgpool3(x_nhwc):
    s = jax.lax.reduce_window(x_nhwc, 0.0, jax.lax.add,
                              (1, 3, 3, 1), (1, 1, 1, 1),
                              ((0, 0), (1, 1), (1, 1), (0, 0)))
    return s / 9.0


def inception_reference(x_nchw, params):
    x = jnp.transpose(x_nchw, (0, 2, 3, 1))
    a = _ref_conv_relu(x, *params["A1"], 1)
    b = _ref_conv_relu(_ref_conv_relu(x, *params["B1"], 1), *params["B2"], 3)
    c = _ref_conv_relu(
        _ref_conv_relu(_ref_conv_relu(x, *params["C1"], 1), *params["C2"], 3),
        *params["C3"], 3)
    d = _ref_conv_relu(_ref_avgpool3(x), *params["D1"], 1)
    out = jnp.concatenate([a, b, c, d], axis=-1)
    return jnp.transpose(out, (0, 3, 1, 2))


# --------------------------------------------------------------------------
if __name__ == "__main__":
    N, in_channels, H, W = 2, 4, 16, 16
    out_B, out_D = 64, 32

    key = jax.random.PRNGKey(0)
    kx, kp = jax.random.split(key)
    x = jax.random.normal(kx, (N, in_channels, H, W), jnp.float32)   # NCHW input
    params = init_inception_params(kp, in_channels, out_B, out_D)

    fwd = jax.jit(inception_forward)
    out = jax.block_until_ready(fwd(x, params))

    ref = jax.block_until_ready(inception_reference(x, params))
    assert out.shape == (N, 64 + out_B + 96 + out_D, H, W), out.shape
    # bf16 MXU inputs / f32 accumulation in both kernel and reference.
    np.testing.assert_allclose(np.asarray(out), np.asarray(ref),
                               rtol=2e-2, atol=2e-2)

    print("KERNEL_OK")
</pallas_src>

<mosaic_0001>
module attributes {stable_mosaic.version = 11 : i64} {
  func.func @kernel(%arg0: i32, %arg1: i32, %arg2: memref<1x20x32x4xf32, #tpu.memory_space<vmem>>, %arg3: memref<4x192xbf16, #tpu.memory_space<vmem>>, %arg4: memref<1x192xf32, #tpu.memory_space<vmem>>, %arg5: memref<3x192x64xbf16, #tpu.memory_space<vmem>>, %arg6: memref<1x64xf32, #tpu.memory_space<vmem>>, %arg7: memref<3x192x96xbf16, #tpu.memory_space<vmem>>, %arg8: memref<1x96xf32, #tpu.memory_space<vmem>>, %arg9: memref<3x288x96xbf16, #tpu.memory_space<vmem>>, %arg10: memref<1x96xf32, #tpu.memory_space<vmem>>, %arg11: memref<4x32xbf16, #tpu.memory_space<vmem>>, %arg12: memref<1x32xf32, #tpu.memory_space<vmem>>, %arg13: memref<1x8x16x256xf32, #tpu.memory_space<vmem>>) attributes {dimension_semantics = [#tpu.dimension_semantics<parallel>, #tpu.dimension_semantics<parallel>], iteration_bounds = array<i64: 2, 2>, scalar_prefetch = 0 : i64, scratch_operands = 0 : i64, tpu.core_type = #tpu.core_type<tc>, window_params = [{transform_indices = @transform_0, window_bounds = array<i64: 1, 20, 32, 4>}, {pipeline_mode = #tpu.pipeline_mode<synchronous>, transform_indices = @transform_1, window_bounds = array<i64: 4, 192>}, {pipeline_mode = #tpu.pipeline_mode<synchronous>, transform_indices = @transform_2, window_bounds = array<i64: 1, 192>}, {pipeline_mode = #tpu.pipeline_mode<synchronous>, transform_indices = @transform_3, window_bounds = array<i64: 3, 192, 64>}, {pipeline_mode = #tpu.pipeline_mode<synchronous>, transform_indices = @transform_4, window_bounds = array<i64: 1, 64>}, {pipeline_mode = #tpu.pipeline_mode<synchronous>, transform_indices = @transform_5, window_bounds = array<i64: 3, 192, 96>}, {pipeline_mode = #tpu.pipeline_mode<synchronous>, transform_indices = @transform_6, window_bounds = array<i64: 1, 96>}, {pipeline_mode = #tpu.pipeline_mode<synchronous>, transform_indices = @transform_7, window_bounds = array<i64: 3, 288, 96>}, {pipeline_mode = #tpu.pipeline_mode<synchronous>, transform_indices = @transform_8, window_bounds = array<i64: 1, 96>}, {pipeline_mode = #tpu.pipeline_mode<synchronous>, transform_indices = @transform_9, window_bounds = array<i64: 4, 32>}, {pipeline_mode = #tpu.pipeline_mode<synchronous>, transform_indices = @transform_10, window_bounds = array<i64: 1, 32>}, {transform_indices = @transform_11, window_bounds = array<i64: 1, 8, 16, 256>}]} {
    %c8_i32 = arith.constant 8 : i32
    %0 = arith.muli %arg1, %c8_i32 : i32
    %c0 = arith.constant 0 : index
    %1 = arith.index_cast %0 : i32 to index
    %c0_0 = arith.constant 0 : index
    %c0_1 = arith.constant 0 : index
    %2 = vector.load %arg2[%c0, %1, %c0_0, %c0_1] : memref<1x20x32x4xf32, #tpu.memory_space<vmem>>, vector<1x12x32x4xf32>
    %3 = vector.shape_cast %2 : vector<1x12x32x4xf32> to vector<12x32x4xf32>
    %4 = tpu.iota {dimensions = array<i32: 0>} : vector<12x32x1xi32>
    %5 = vector.broadcast %0 : i32 to vector<12x32x1xi32>
    %6 = arith.addi %4, %5 : vector<12x32x1xi32>
    %c2_i32 = arith.constant 2 : i32
    %7 = vector.broadcast %c2_i32 : i32 to vector<12x32x1xi32>
    %8 = arith.subi %6, %7 : vector<12x32x1xi32>
    %9 = tpu.iota {dimensions = array<i32: 1>} : vector<12x32x1xi32>
    %c0_i32 = arith.constant 0 : i32
    %10 = vector.broadcast %c0_i32 : i32 to vector<12x32x1xi32>
    %11 = arith.cmpi sge, %8, %10 : vector<12x32x1xi32>
    %c16_i32 = arith.constant 16 : i32
    %12 = vector.broadcast %c16_i32 : i32 to vector<12x32x1xi32>
    %13 = arith.cmpi slt, %8, %12 : vector<12x32x1xi32>
    %14 = arith.andi %11, %13 : vector<12x32x1xi1>
    %c8_i32_2 = arith.constant 8 : i32
    %15 = vector.broadcast %c8_i32_2 : i32 to vector<12x32x1xi32>
    %16 = arith.cmpi sge, %9, %15 : vector<12x32x1xi32>
    %17 = arith.andi %14, %16 : vector<12x32x1xi1>
    %c24_i32 = arith.constant 24 : i32
    %18 = vector.broadcast %c24_i32 : i32 to vector<12x32x1xi32>
    %19 = arith.cmpi slt, %9, %18 : vector<12x32x1xi32>
    %20 = arith.andi %17, %19 : vector<12x32x1xi1>
    %21 = arith.extui %20 : vector<12x32x1xi1> to vector<12x32x1xi32>
    %22 = arith.sitofp %21 : vector<12x32x1xi32> to vector<12x32x1xf32>
    %23 = vector.shape_cast %3 : vector<12x32x4xf32> to vector<384x4xf32>
    %24 = arith.truncf %23 : vector<384x4xf32> to vector<384x4xbf16>
    %c0_3 = arith.constant 0 : index
    %c0_4 = arith.constant 0 : index
    %25 = vector.load %arg3[%c0_3, %c0_4] : memref<4x192xbf16, #tpu.memory_space<vmem>>, vector<4x192xbf16>
    %cst = arith.constant dense<0.000000e+00> : vector<384x192xf32>
    %26 = tpu.matmul %24, %25, %cst {dimension_numbers = #tpu.dot_dimension_numbers<[1], [0], [0], [1], [0, 0, 1, 1], [], []>} : vector<384x4xbf16>, vector<4x192xbf16>, vector<384x192xf32> -> vector<384x192xf32>
    %c0_5 = arith.constant 0 : index
    %c0_6 = arith.constant 0 : index
    %27 = vector.load %arg4[%c0_5, %c0_6] : memref<1x192xf32, #tpu.memory_space<vmem>>, vector<1x192xf32>
    %28 = vector.broadcast %27 : vector<1x192xf32> to vector<384x192xf32>
    %29 = arith.addf %26, %28 : vector<384x192xf32>
    %cst_7 = arith.constant 0.000000e+00 : f32
    %30 = vector.broadcast %cst_7 : f32 to vector<384x192xf32>
    %31 = arith.maximumf %29, %30 : vector<384x192xf32>
    %32 = vector.shape_cast %31 : vector<384x192xf32> to vector<12x32x192xf32>
    %33 = vector.broadcast %22 : vector<12x32x1xf32> to vector<12x32x192xf32>
    %34 = arith.mulf %32, %33 : vector<12x32x192xf32>
    %35 = vector.extract_strided_slice %34 {offsets = [0, 0, 0], sizes = [12, 32, 64], strides = [1, 1, 1]} : vector<12x32x192xf32> to vector<12x32x64xf32>
    %36 = vector.extract_strided_slice %34 {offsets = [0, 0, 64], sizes = [12, 32, 64], strides = [1, 1, 1]} : vector<12x32x192xf32> to vector<12x32x64xf32>
    %37 = vector.extract_strided_slice %34 {offsets = [0, 0, 128], sizes = [12, 32, 64], strides = [1, 1, 1]} : vector<12x32x192xf32> to vector<12x32x64xf32>
    %c0_8 = arith.constant 0 : index
    %c0_9 = arith.constant 0 : index
    %c0_10 = arith.constant 0 : index
    %38 = vector.load %arg5[%c0_8, %c0_9, %c0_10] : memref<3x192x64xbf16, #tpu.memory_space<vmem>>, vector<3x192x64xbf16>
    %c0_11 = arith.constant 0 : index
    %c0_12 = arith.constant 0 : index
    %39 = vector.load %arg6[%c0_11, %c0_12] : memref<1x64xf32, #tpu.memory_space<vmem>>, vector<1x64xf32>
    %40 = vector.extract_strided_slice %36 {offsets = [0, 31, 0], sizes = [12, 1, 64], strides = [1, 1, 1]} : vector<12x32x64xf32> to vector<12x1x64xf32>
    %41 = vector.extract_strided_slice %36 {offsets = [0, 0, 0], sizes = [12, 31, 64], strides = [1, 1, 1]} : vector<12x32x64xf32> to vector<12x31x64xf32>
    %42 = tpu.concatenate %40, %41 in 1 : vector<12x1x64xf32>, vector<12x31x64xf32> -> vector<12x32x64xf32>
    %43 = vector.extract_strided_slice %36 {offsets = [0, 1, 0], sizes = [12, 31, 64], strides = [1, 1, 1]} : vector<12x32x64xf32> to vector<12x31x64xf32>
    %44 = vector.extract_strided_slice %36 {offsets = [0, 0, 0], sizes = [12, 1, 64], strides = [1, 1, 1]} : vector<12x32x64xf32> to vector<12x1x64xf32>
    %45 = tpu.concatenate %43, %44 in 1 : vector<12x31x64xf32>, vector<12x1x64xf32> -> vector<12x32x64xf32>
    %46 = tpu.concatenate %42, %36, %45 in 2 : vector<12x32x64xf32>, vector<12x32x64xf32>, vector<12x32x64xf32> -> vector<12x32x192xf32>
    %47 = arith.truncf %46 : vector<12x32x192xf32> to vector<12x32x192xbf16>
    %48 = vector.extract_strided_slice %47 {offsets = [0, 0, 0], sizes = [10, 32, 192], strides = [1, 1, 1]} : vector<12x32x192xbf16> to vector<10x32x192xbf16>
    %49 = vector.shape_cast %48 : vector<10x32x192xbf16> to vector<320x192xbf16>
    %50 = vector.extract_strided_slice %38 {offsets = [0, 0, 0], sizes = [1, 192, 64], strides = [1, 1, 1]} : vector<3x192x64xbf16> to vector<1x192x64xbf16>
    %51 = vector.shape_cast %50 : vector<1x192x64xbf16> to vector<192x64xbf16>
    %cst_13 = arith.constant dense<0.000000e+00> : vector<320x64xf32>
    %52 = tpu.matmul %49, %51, %cst_13 {dimension_numbers = #tpu.dot_dimension_numbers<[1], [0], [0], [1], [0, 0, 1, 1], [], []>} : vector<320x192xbf16>, vector<192x64xbf16>, vector<320x64xf32> -> vector<320x64xf32>
    %53 = vector.extract_strided_slice %47 {offsets = [1, 0, 0], sizes = [10, 32, 192], strides = [1, 1, 1]} : vector<12x32x192xbf16> to vector<10x32x192xbf16>
    %54 = vector.shape_cast %53 : vector<10x32x192xbf16> to vector<320x192xbf16>
    %55 = vector.extract_strided_slice %38 {offsets = [1, 0, 0], sizes = [1, 192, 64], strides = [1, 1, 1]} : vector<3x192x64xbf16> to vector<1x192x64xbf16>
    %56 = vector.shape_cast %55 : vector<1x192x64xbf16> to vector<192x64xbf16>
    %cst_14 = arith.constant dense<0.000000e+00> : vector<320x64xf32>
    %57 = tpu.matmul %54, %56, %cst_14 {dimension_numbers = #tpu.dot_dimension_numbers<[1], [0], [0], [1], [0, 0, 1, 1], [], []>} : vector<320x192xbf16>, vector<192x64xbf16>, vector<320x64xf32> -> vector<320x64xf32>
    %58 = arith.addf %52, %57 : vector<320x64xf32>
    %59 = vector.extract_strided_slice %47 {offsets = [2, 0, 0], sizes = [10, 32, 192], strides = [1, 1, 1]} : vector<12x32x192xbf16> to vector<10x32x192xbf16>
    %60 = vector.shape_cast %59 : vector<10x32x192xbf16> to vector<320x192xbf16>
    %61 = vector.extract_strided_slice %38 {offsets = [2, 0, 0], sizes = [1, 192, 64], strides = [1, 1, 1]} : vector<3x192x64xbf16> to vector<1x192x64xbf16>
    %62 = vector.shape_cast %61 : vector<1x192x64xbf16> to vector<192x64xbf16>
    %cst_15 = arith.constant dense<0.000000e+00> : vector<320x64xf32>
    %63 = tpu.matmul %60, %62, %cst_15 {dimension_numbers = #tpu.dot_dimension_numbers<[1], [0], [0], [1], [0, 0, 1, 1], [], []>} : vector<320x192xbf16>, vector<192x64xbf16>, vector<320x64xf32> -> vector<320x64xf32>
    %64 = arith.addf %58, %63 : vector<320x64xf32>
    %65 = vector.broadcast %39 : vector<1x64xf32> to vector<320x64xf32>
    %66 = arith.addf %64, %65 : vector<320x64xf32>
    %cst_16 = arith.constant 0.000000e+00 : f32
    %67 = vector.broadcast %cst_16 : f32 to vector<320x64xf32>
    %68 = arith.maximumf %66, %67 : vector<320x64xf32>
    %69 = vector.shape_cast %68 : vector<320x64xf32> to vector<10x32x64xf32>
    %70 = vector.extract_strided_slice %69 {offsets = [1, 0, 0], sizes = [8, 32, 64], strides = [1, 1, 1]} : vector<10x32x64xf32> to vector<8x32x64xf32>
    %c0_17 = arith.constant 0 : index
    %c0_18 = arith.constant 0 : index
    %c0_19 = arith.constant 0 : index
    %71 = vector.load %arg7[%c0_17, %c0_18, %c0_19] : memref<3x192x96xbf16, #tpu.memory_space<vmem>>, vector<3x192x96xbf16>
    %c0_20 = arith.constant 0 : index
    %c0_21 = arith.constant 0 : index
    %72 = vector.load %arg8[%c0_20, %c0_21] : memref<1x96xf32, #tpu.memory_space<vmem>>, vector<1x96xf32>
    %73 = vector.extract_strided_slice %37 {offsets = [0, 31, 0], sizes = [12, 1, 64], strides = [1, 1, 1]} : vector<12x32x64xf32> to vector<12x1x64xf32>
    %74 = vector.extract_strided_slice %37 {offsets = [0, 0, 0], sizes = [12, 31, 64], strides = [1, 1, 1]} : vector<12x32x64xf32> to vector<12x31x64xf32>
    %75 = tpu.concatenate %73, %74 in 1 : vector<12x1x64xf32>, vector<12x31x64xf32> -> vector<12x32x64xf32>
    %76 = vector.extract_strided_slice %37 {offsets = [0, 1, 0], sizes = [12, 31, 64], strides = [1, 1, 1]} : vector<12x32x64xf32> to vector<12x31x64xf32>
    %77 = vector.extract_strided_slice %37 {offsets = [0, 0, 0], sizes = [12, 1, 64], strides = [1, 1, 1]} : vector<12x32x64xf32> to vector<12x1x64xf32>
    %78 = tpu.concatenate %76, %77 in 1 : vector<12x31x64xf32>, vector<12x1x64xf32> -> vector<12x32x64xf32>
    %79 = tpu.concatenate %75, %37, %78 in 2 : vector<12x32x64xf32>, vector<12x32x64xf32>, vector<12x32x64xf32> -> vector<12x32x192xf32>
    %80 = arith.truncf %79 : vector<12x32x192xf32> to vector<12x32x192xbf16>
    %81 = vector.extract_strided_slice %80 {offsets = [0, 0, 0], sizes = [10, 32, 192], strides = [1, 1, 1]} : vector<12x32x192xbf16> to vector<10x32x192xbf16>
    %82 = vector.shape_cast %81 : vector<10x32x192xbf16> to vector<320x192xbf16>
    %83 = vector.extract_strided_slice %71 {offsets = [0, 0, 0], sizes = [1, 192, 96], strides = [1, 1, 1]} : vector<3x192x96xbf16> to vector<1x192x96xbf16>
    %84 = vector.shape_cast %83 : vector<1x192x96xbf16> to vector<192x96xbf16>
    %cst_22 = arith.constant dense<0.000000e+00> : vector<320x96xf32>
    %85 = tpu.matmul %82, %84, %cst_22 {dimension_numbers = #tpu.dot_dimension_numbers<[1], [0], [0], [1], [0, 0, 1, 1], [], []>} : vector<320x192xbf16>, vector<192x96xbf16>, vector<320x96xf32> -> vector<320x96xf32>
    %86 = vector.extract_strided_slice %80 {offsets = [1, 0, 0], sizes = [10, 32, 192], strides = [1, 1, 1]} : vector<12x32x192xbf16> to vector<10x32x192xbf16>
    %87 = vector.shape_cast %86 : vector<10x32x192xbf16> to vector<320x192xbf16>
    %88 = vector.extract_strided_slice %71 {offsets = [1, 0, 0], sizes = [1, 192, 96], strides = [1, 1, 1]} : vector<3x192x96xbf16> to vector<1x192x96xbf16>
    %89 = vector.shape_cast %88 : vector<1x192x96xbf16> to vector<192x96xbf16>
    %cst_23 = arith.constant dense<0.000000e+00> : vector<320x96xf32>
    %90 = tpu.matmul %87, %89, %cst_23 {dimension_numbers = #tpu.dot_dimension_numbers<[1], [0], [0], [1], [0, 0, 1, 1], [], []>} : vector<320x192xbf16>, vector<192x96xbf16>, vector<320x96xf32> -> vector<320x96xf32>
    %91 = arith.addf %85, %90 : vector<320x96xf32>
    %92 = vector.extract_strided_slice %80 {offsets = [2, 0, 0], sizes = [10, 32, 192], strides = [1, 1, 1]} : vector<12x32x192xbf16> to vector<10x32x192xbf16>
    %93 = vector.shape_cast %92 : vector<10x32x192xbf16> to vector<320x192xbf16>
    %94 = vector.extract_strided_slice %71 {offsets = [2, 0, 0], sizes = [1, 192, 96], strides = [1, 1, 1]} : vector<3x192x96xbf16> to vector<1x192x96xbf16>
    %95 = vector.shape_cast %94 : vector<1x192x96xbf16> to vector<192x96xbf16>
    %cst_24 = arith.constant dense<0.000000e+00> : vector<320x96xf32>
    %96 = tpu.matmul %93, %95, %cst_24 {dimension_numbers = #tpu.dot_dimension_numbers<[1], [0], [0], [1], [0, 0, 1, 1], [], []>} : vector<320x192xbf16>, vector<192x96xbf16>, vector<320x96xf32> -> vector<320x96xf32>
    %97 = arith.addf %91, %96 : vector<320x96xf32>
    %98 = vector.broadcast %72 : vector<1x96xf32> to vector<320x96xf32>
    %99 = arith.addf %97, %98 : vector<320x96xf32>
    %cst_25 = arith.constant 0.000000e+00 : f32
    %100 = vector.broadcast %cst_25 : f32 to vector<320x96xf32>
    %101 = arith.maximumf %99, %100 : vector<320x96xf32>
    %102 = vector.shape_cast %101 : vector<320x96xf32> to vector<10x32x96xf32>
    %103 = vector.extract_strided_slice %22 {offsets = [1, 0, 0], sizes = [10, 32, 1], strides = [1, 1, 1]} : vector<12x32x1xf32> to vector<10x32x1xf32>
    %104 = vector.broadcast %103 : vector<10x32x1xf32> to vector<10x32x96xf32>
    %105 = arith.mulf %102, %104 : vector<10x32x96xf32>
    %c0_26 = arith.constant 0 : index
    %c0_27 = arith.constant 0 : index
    %c0_28 = arith.constant 0 : index
    %106 = vector.load %arg9[%c0_26, %c0_27, %c0_28] : memref<3x288x96xbf16, #tpu.memory_space<vmem>>, vector<3x288x96xbf16>
    %c0_29 = arith.constant 0 : index
    %c0_30 = arith.constant 0 : index
    %107 = vector.load %arg10[%c0_29, %c0_30] : memref<1x96xf32, #tpu.memory_space<vmem>>, vector<1x96xf32>
    %108 = vector.extract_strided_slice %105 {offsets = [0, 31, 0], sizes = [10, 1, 96], strides = [1, 1, 1]} : vector<10x32x96xf32> to vector<10x1x96xf32>
    %109 = vector.extract_strided_slice %105 {offsets = [0, 0, 0], sizes = [10, 31, 96], strides = [1, 1, 1]} : vector<10x32x96xf32> to vector<10x31x96xf32>
    %110 = tpu.concatenate %108, %109 in 1 : vector<10x1x96xf32>, vector<10x31x96xf32> -> vector<10x32x96xf32>
    %111 = vector.extract_strided_slice %105 {offsets = [0, 1, 0], sizes = [10, 31, 96], strides = [1, 1, 1]} : vector<10x32x96xf32> to vector<10x31x96xf32>
    %112 = vector.extract_strided_slice %105 {offsets = [0, 0, 0], sizes = [10, 1, 96], strides = [1, 1, 1]} : vector<10x32x96xf32> to vector<10x1x96xf32>
    %113 = tpu.concatenate %111, %112 in 1 : vector<10x31x96xf32>, vector<10x1x96xf32> -> vector<10x32x96xf32>
    %114 = tpu.concatenate %110, %105, %113 in 2 : vector<10x32x96xf32>, vector<10x32x96xf32>, vector<10x32x96xf32> -> vector<10x32x288xf32>
    %115 = arith.truncf %114 : vector<10x32x288xf32> to vector<10x32x288xbf16>
    %116 = vector.extract_strided_slice %115 {offsets = [0, 0, 0], sizes = [8, 32, 288], strides = [1, 1, 1]} : vector<10x32x288xbf16> to vector<8x32x288xbf16>
    %117 = vector.shape_cast %116 : vector<8x32x288xbf16> to vector<256x288xbf16>
    %118 = vector.extract_strided_slice %106 {offsets = [0, 0, 0], sizes = [1, 288, 96], strides = [1, 1, 1]} : vector<3x288x96xbf16> to vector<1x288x96xbf16>
    %119 = vector.shape_cast %118 : vector<1x288x96xbf16> to vector<288x96xbf16>
    %cst_31 = arith.constant dense<0.000000e+00> : vector<256x96xf32>
    %120 = tpu.matmul %117, %119, %cst_31 {dimension_numbers = #tpu.dot_dimension_numbers<[1], [0], [0], [1], [0, 0, 1, 1], [], []>} : vector<256x288xbf16>, vector<288x96xbf16>, vector<256x96xf32> -> vector<256x96xf32>
    %121 = vector.extract_strided_slice %115 {offsets = [1, 0, 0], sizes = [8, 32, 288], strides = [1, 1, 1]} : vector<10x32x288xbf16> to vector<8x32x288xbf16>
    %122 = vector.shape_cast %121 : vector<8x32x288xbf16> to vector<256x288xbf16>
    %123 = vector.extract_strided_slice %106 {offsets = [1, 0, 0], sizes = [1, 288, 96], strides = [1, 1, 1]} : vector<3x288x96xbf16> to vector<1x288x96xbf16>
    %124 = vector.shape_cast %123 : vector<1x288x96xbf16> to vector<288x96xbf16>
    %cst_32 = arith.constant dense<0.000000e+00> : vector<256x96xf32>
    %125 = tpu.matmul %122, %124, %cst_32 {dimension_numbers = #tpu.dot_dimension_numbers<[1], [0], [0], [1], [0, 0, 1, 1], [], []>} : vector<256x288xbf16>, vector<288x96xbf16>, vector<256x96xf32> -> vector<256x96xf32>
    %126 = arith.addf %120, %125 : vector<256x96xf32>
    %127 = vector.extract_strided_slice %115 {offsets = [2, 0, 0], sizes = [8, 32, 288], strides = [1, 1, 1]} : vector<10x32x288xbf16> to vector<8x32x288xbf16>
    %128 = vector.shape_cast %127 : vector<8x32x288xbf16> to vector<256x288xbf16>
    %129 = vector.extract_strided_slice %106 {offsets = [2, 0, 0], sizes = [1, 288, 96], strides = [1, 1, 1]} : vector<3x288x96xbf16> to vector<1x288x96xbf16>
    %130 = vector.shape_cast %129 : vector<1x288x96xbf16> to vector<288x96xbf16>
    %cst_33 = arith.constant dense<0.000000e+00> : vector<256x96xf32>
    %131 = tpu.matmul %128, %130, %cst_33 {dimension_numbers = #tpu.dot_dimension_numbers<[1], [0], [0], [1], [0, 0, 1, 1], [], []>} : vector<256x288xbf16>, vector<288x96xbf16>, vector<256x96xf32> -> vector<256x96xf32>
    %132 = arith.addf %126, %131 : vector<256x96xf32>
    %133 = vector.broadcast %107 : vector<1x96xf32> to vector<256x96xf32>
    %134 = arith.addf %132, %133 : vector<256x96xf32>
    %cst_34 = arith.constant 0.000000e+00 : f32
    %135 = vector.broadcast %cst_34 : f32 to vector<256x96xf32>
    %136 = arith.maximumf %134, %135 : vector<256x96xf32>
    %137 = vector.shape_cast %136 : vector<256x96xf32> to vector<8x32x96xf32>
    %138 = vector.extract_strided_slice %3 {offsets = [1, 0, 0], sizes = [10, 32, 4], strides = [1, 1, 1]} : vector<12x32x4xf32> to vector<10x32x4xf32>
    %139 = vector.extract_strided_slice %138 {offsets = [0, 31, 0], sizes = [10, 1, 4], strides = [1, 1, 1]} : vector<10x32x4xf32> to vector<10x1x4xf32>
    %140 = vector.extract_strided_slice %138 {offsets = [0, 0, 0], sizes = [10, 31, 4], strides = [1, 1, 1]} : vector<10x32x4xf32> to vector<10x31x4xf32>
    %141 = tpu.concatenate %139, %140 in 1 : vector<10x1x4xf32>, vector<10x31x4xf32> -> vector<10x32x4xf32>
    %142 = arith.addf %141, %138 : vector<10x32x4xf32>
    %143 = vector.extract_strided_slice %138 {offsets = [0, 1, 0], sizes = [10, 31, 4], strides = [1, 1, 1]} : vector<10x32x4xf32> to vector<10x31x4xf32>
    %144 = vector.extract_strided_slice %138 {offsets = [0, 0, 0], sizes = [10, 1, 4], strides = [1, 1, 1]} : vector<10x32x4xf32> to vector<10x1x4xf32>
    %145 = tpu.concatenate %143, %144 in 1 : vector<10x31x4xf32>, vector<10x1x4xf32> -> vector<10x32x4xf32>
    %146 = arith.addf %142, %145 : vector<10x32x4xf32>
    %147 = vector.extract_strided_slice %146 {offsets = [0, 0, 0], sizes = [8, 32, 4], strides = [1, 1, 1]} : vector<10x32x4xf32> to vector<8x32x4xf32>
    %148 = vector.extract_strided_slice %146 {offsets = [1, 0, 0], sizes = [8, 32, 4], strides = [1, 1, 1]} : vector<10x32x4xf32> to vector<8x32x4xf32>
    %149 = arith.addf %147, %148 : vector<8x32x4xf32>
    %150 = vector.extract_strided_slice %146 {offsets = [2, 0, 0], sizes = [8, 32, 4], strides = [1, 1, 1]} : vector<10x32x4xf32> to vector<8x32x4xf32>
    %151 = arith.addf %149, %150 : vector<8x32x4xf32>
    %cst_35 = arith.constant 0.111111112 : f32
    %152 = vector.broadcast %cst_35 : f32 to vector<8x32x4xf32>
    %153 = arith.mulf %151, %152 : vector<8x32x4xf32>
    %154 = vector.shape_cast %153 : vector<8x32x4xf32> to vector<256x4xf32>
    %155 = arith.truncf %154 : vector<256x4xf32> to vector<256x4xbf16>
    %c0_36 = arith.constant 0 : index
    %c0_37 = arith.constant 0 : index
    %156 = vector.load %arg11[%c0_36, %c0_37] : memref<4x32xbf16, #tpu.memory_space<vmem>>, vector<4x32xbf16>
    %cst_38 = arith.constant dense<0.000000e+00> : vector<256x32xf32>
    %157 = tpu.matmul %155, %156, %cst_38 {dimension_numbers = #tpu.dot_dimension_numbers<[1], [0], [0], [1], [0, 0, 1, 1], [], []>} : vector<256x4xbf16>, vector<4x32xbf16>, vector<256x32xf32> -> vector<256x32xf32>
    %c0_39 = arith.constant 0 : index
    %c0_40 = arith.constant 0 : index
    %158 = vector.load %arg12[%c0_39, %c0_40] : memref<1x32xf32, #tpu.memory_space<vmem>>, vector<1x32xf32>
    %159 = vector.broadcast %158 : vector<1x32xf32> to vector<256x32xf32>
    %160 = arith.addf %157, %159 : vector<256x32xf32>
    %cst_41 = arith.constant 0.000000e+00 : f32
    %161 = vector.broadcast %cst_41 : f32 to vector<256x32xf32>
    %162 = arith.maximumf %160, %161 : vector<256x32xf32>
    %163 = vector.shape_cast %162 : vector<256x32xf32> to vector<8x32x32xf32>
    %164 = vector.extract_strided_slice %35 {offsets = [2, 0, 0], sizes = [8, 32, 64], strides = [1, 1, 1]} : vector<12x32x64xf32> to vector<8x32x64xf32>
    %165 = tpu.concatenate %164, %70, %137, %163 in 2 : vector<8x32x64xf32>, vector<8x32x64xf32>, vector<8x32x96xf32>, vector<8x32x32xf32> -> vector<8x32x256xf32>
    %166 = vector.extract_strided_slice %165 {offsets = [0, 8, 0], sizes = [8, 16, 256], strides = [1, 1, 1]} : vector<8x32x256xf32> to vector<8x16x256xf32>
    %c0_42 = arith.constant 0 : index
    %c0_43 = arith.constant 0 : index
    %c0_44 = arith.constant 0 : index
    %c0_45 = arith.constant 0 : index
    %167 = vector.load %arg13[%c0_42, %c0_43, %c0_44, %c0_45] : memref<1x8x16x256xf32, #tpu.memory_space<vmem>>, vector<1x8x16x256xf32>
    %168 = vector.shape_cast %167 : vector<1x8x16x256xf32> to vector<8x16x256xf32>
    %169 = vector.shape_cast %166 : vector<8x16x256xf32> to vector<1x8x16x256xf32>
    tpu.vector_store %arg13[%c0_42, %c0_43, %c0_44, %c0_45], %169 {strides = array<i32>} : memref<1x8x16x256xf32, #tpu.memory_space<vmem>>, vector<1x8x16x256xf32>,
    return
  }
  func.func @transform_0(%arg0: i32, %arg1: i32) -> (i32, i32, i32, i32) {
    %c0_i32 = arith.constant 0 : i32
    %c0_i32_0 = arith.constant 0 : i32
    %c0_i32_1 = arith.constant 0 : i32
    %c0_i32_2 = arith.constant 0 : i32
    return %arg0, %c0_i32, %c0_i32_0, %c0_i32_1 : i32, i32, i32, i32
  }
  func.func @transform_1(%arg0: i32, %arg1: i32) -> (i32, i32) {
    %c0_i32 = arith.constant 0 : i32
    %c0_i32_0 = arith.constant 0 : i32
    %c0_i32_1 = arith.constant 0 : i32
    return %c0_i32, %c0_i32_0 : i32, i32
  }
  func.func @transform_2(%arg0: i32, %arg1: i32) -> (i32, i32) {
    %c0_i32 = arith.constant 0 : i32
    %c0_i32_0 = arith.constant 0 : i32
    %c0_i32_1 = arith.constant 0 : i32
    return %c0_i32, %c0_i32_0 : i32, i32
  }
  func.func @transform_3(%arg0: i32, %arg1: i32) -> (i32, i32, i32) {
    %c0_i32 = arith.constant 0 : i32
    %c0_i32_0 = arith.constant 0 : i32
    %c0_i32_1 = arith.constant 0 : i32
    %c0_i32_2 = arith.constant 0 : i32
    return %c0_i32, %c0_i32_0, %c0_i32_1 : i32, i32, i32
  }
  func.func @transform_4(%arg0: i32, %arg1: i32) -> (i32, i32) {
    %c0_i32 = arith.constant 0 : i32
    %c0_i32_0 = arith.constant 0 : i32
    %c0_i32_1 = arith.constant 0 : i32
    return %c0_i32, %c0_i32_0 : i32, i32
  }
  func.func @transform_5(%arg0: i32, %arg1: i32) -> (i32, i32, i32) {
    %c0_i32 = arith.constant 0 : i32
    %c0_i32_0 = arith.constant 0 : i32
    %c0_i32_1 = arith.constant 0 : i32
    %c0_i32_2 = arith.constant 0 : i32
    return %c0_i32, %c0_i32_0, %c0_i32_1 : i32, i32, i32
  }
  func.func @transform_6(%arg0: i32, %arg1: i32) -> (i32, i32) {
    %c0_i32 = arith.constant 0 : i32
    %c0_i32_0 = arith.constant 0 : i32
    %c0_i32_1 = arith.constant 0 : i32
    return %c0_i32, %c0_i32_0 : i32, i32
  }
  func.func @transform_7(%arg0: i32, %arg1: i32) -> (i32, i32, i32) {
    %c0_i32 = arith.constant 0 : i32
    %c0_i32_0 = arith.constant 0 : i32
    %c0_i32_1 = arith.constant 0 : i32
    %c0_i32_2 = arith.constant 0 : i32
    return %c0_i32, %c0_i32_0, %c0_i32_1 : i32, i32, i32
  }
  func.func @transform_8(%arg0: i32, %arg1: i32) -> (i32, i32) {
    %c0_i32 = arith.constant 0 : i32
    %c0_i32_0 = arith.constant 0 : i32
    %c0_i32_1 = arith.constant 0 : i32
    return %c0_i32, %c0_i32_0 : i32, i32
  }
  func.func @transform_9(%arg0: i32, %arg1: i32) -> (i32, i32) {
    %c0_i32 = arith.constant 0 : i32
    %c0_i32_0 = arith.constant 0 : i32
    %c0_i32_1 = arith.constant 0 : i32
    return %c0_i32, %c0_i32_0 : i32, i32
  }
  func.func @transform_10(%arg0: i32, %arg1: i32) -> (i32, i32) {
    %c0_i32 = arith.constant 0 : i32
    %c0_i32_0 = arith.constant 0 : i32
    %c0_i32_1 = arith.constant 0 : i32
    return %c0_i32, %c0_i32_0 : i32, i32
  }
  func.func @transform_11(%arg0: i32, %arg1: i32) -> (i32, i32, i32, i32) {
    %c0_i32 = arith.constant 0 : i32
    %c0_i32_0 = arith.constant 0 : i32
    %c0_i32_1 = arith.constant 0 : i32
    return %arg0, %arg1, %c0_i32, %c0_i32_0 : i32, i32, i32, i32
  }
}

</mosaic_0001>

<bundles_post_ra>
// kernel: inception_forward.1
= control target key start
LH: loop header
LB: loop body
LE: loop exit
PB: predicated region body
PF: predicated region fallthrough
CT: control target
= control target key end

     0   :  { %s14885_s0 = inlined_call_operand.vmem [shape: f32[2,20,32,4], index: 0, kind: input, shape index: {}]   ;;  %s14886_s1 = inlined_call_operand.vmem [shape: bf16[4,192], index: 1, kind: input, shape index: {}]   ;;  %s14887_s2 = inlined_call_operand.vmem [shape: f32[1,192], index: 2, kind: input, shape index: {}]   ;;  %s14888_s3 = inlined_call_operand.vmem [shape: bf16[3,192,64], index: 3, kind: input, shape index: {}]   ;;  %s14889_s4 = inlined_call_operand.vmem [shape: f32[1,64], index: 4, kind: input, shape index: {}]   ;;  %s14890_s5 = inlined_call_operand.vmem [shape: bf16[3,192,96], index: 5, kind: input, shape index: {}]   ;;  %s14891_s6 = inlined_call_operand.vmem [shape: f32[1,96], index: 6, kind: input, shape index: {}]   ;;  %s14892_s7 = inlined_call_operand.vmem [shape: bf16[3,288,96], index: 7, kind: input, shape index: {}]   ;;  %s14893_s8 = inlined_call_operand.vmem [shape: f32[1,96], index: 8, kind: input, shape index: {}]   ;;  %s14894_s9 = inlined_call_operand.vmem [shape: bf16[4,32], index: 9, kind: input, shape index: {}]   ;;  %s14895_s10 = inlined_call_operand.vmem [shape: f32[1,32], index: 10, kind: input, shape index: {}]   ;;  %s14896_s11 = inlined_call_operand.hbm [shape: f32[2,16,16,256], index: 11, kind: output, shape index: {}]  }
   0x1   :  { %15206 = sst [smem:[#allocation170_spill]] %s14885_s0 }
   0x2   :  { %15207 = sst [smem:[#allocation171_spill]] %s14886_s1 }
   0x3   :  { %15208 = sst [smem:[#allocation172_spill]] %s14887_s2 }
   0x4   :  { %16 = vsyncpa [#allocation3], 0 }
   0x5   :  { %18 = vsyncpa [#allocation3 + $0x1], 0  ;;  %s9634_s17 = smov 0   ;;  %s9636_s18 = smov 0  }
   0x6   :  { %s9638_s19 = smov 0   ;;  %s9640_s20 = smov 0  }
   0x7   :  { %s9642_s21 = smov 0   ;;  %s9644_s22 = smov 0  }
   0x8   :  { %s9646_s23 = smov 0   ;;  %s9648_s24 = smov 0  }
   0x9 LB: > { %s7711_s25 = sadd.s32 4294967295, %s9565_s24   ;;  %s7712_s26 = sadd.s32 4294967294, %s9565_s24   ;;  %s9565_s24 = sphi %s9648_s24, %s24_s24   ;;  %s9561_s23 = sphi %s9646_s23, %s16046_s23   ;;  %s9557_s22 = sphi %s9644_s22, %s16045_s22   ;;  %s9553_s21 = sphi %s9642_s21, %s16044_s21   ;;  %s9549_s20 = sphi %s9640_s20, %s16043_s20   ;;  %s9545_s19 = sphi %s9638_s19, %s16042_s19   ;;  %s9541_s18 = sphi %s9636_s18, %s16041_s18   ;;  %s9537_s17 = sphi %s9634_s17, %s16040_s17  }
   0xa   : > { %s33_s27 = sadd.s32 1, %s9557_s22  ;;  %s36_s28 = sadd.s32 1, %s9561_s23 }
   0xb   : > { %p34_p0 = scmp.ge.s32.totalorder %s33_s27, 2  ;;  %p291_p1 = scmp.ne.s32.totalorder %s9545_s19, %s9541_s18 }
   0xc   : > { %p292_p2 = scmp.eq.s32.totalorder %s7711_s25, 3  ;;  %p297_p5 = scmp.ne.s32.totalorder %s9541_s18, %s9537_s17 }
   0xd   : > { %s16048_s27 = smov (%p34_p0, %s33_s27), 0  ;;  %s16050_s28 = smov (!%p34_p0, %s36_s28), %s9561_s23 }
   0xe   : > { %15209 = sst [smem:[#allocation5_spill]] %s16048_s27  ;;  %s277_s29 = ssub.s32 %s9557_s22, %s16048_s27 }
   0xf   : > { %p9685_p3 = por %p292_p2, %p291_p1  ;;  %p38_p4 = scmp.ge.s32.totalorder %s16050_s28, 2 }
  0x10   : > { %p298_p6 = scmp.eq.s32.totalorder %s7712_s26, 3  ;;  %p7715_p7 = scmp.ge.s32.totalorder %s9565_s24, 1 }
  0x11   : > { %s16052_s28 = smov (%p38_p4, %s16050_s28), 0  ;;  %p354_p9 = scmp.lt.s32.totalorder %s9565_s24, 5 }
  0x12   : > { %p9694_p8 = por %p298_p6, %p297_p5  ;;  %s276_s13 = ssub.s32 %s9561_s23, %s16052_s28 }
  0x13   : > { %s281_s14 = sadd.s32 1, %s9545_s19  ;;  %s278_s15 = sor.u32 %s277_s29, %s276_s13 }
  0x14   : > { %p355_p10 = pnand %p7715_p7, %p354_p9  ;;  %p279_p11 = scmp.eq.s32.totalorder %s278_s15, 0 }
  0x16   : > { %s9703_s16 = scalar_select %p279_p11, %s9545_s19, %s281_s14  }
  0x17   : > { %358 = sbr.rel (%p355_p10) target bundleno = 1818 (0x71a), region = 64 }
  0x1e   : > { %s15212_s1 = sld [smem:[#allocation171_spill]]  ;;  %vm834_vm0 = vcmask 1041408   ;;  %v14930_v3 = vmov 0   ;;  %p394_p12 = scmp.lt.s32.totalorder %s9553_s21, 1  ;;  %vm761_vm1 = vcmask 31744   ;;  %vm1451_vm2 = vcmask 1040384  }
  0x1f   : > { %873 = vmatprep.mubr.bf16.mxu0 %v14930_v3  ;;  %2210 = vmatprep.subr.bf16.mxu1 %v14930_v3  ;;  %s8102_s27 = sshll.u32 %s9549_s20, 8  ;;  %s15213_s0 = sld [smem:[#allocation170_spill]]  ;;  %vm1548_vm3 = vcmask 1046528  }
  0x20   : > { %s395_s26 = scalar_select %p394_p12, %s9553_s21, 1 }
  0x21   : > { %s15276_s2 = sld [smem:[#allocation172_spill]] }
  0x22   : > { %s8670_s29 = smul.u32 640, %s395_s26  ;;  %s15796_s26 = smov 64  }
  0x24   : > { %v7755_v0 = vld.sshfl [vmem:[%s15212_s1] sm:$0x33 pattern:$0x76325410] }
  0x25   : > { %v760_v1 = vcombine.high %v7755_v0, %v7755_v0  ;;  %v836_v2 = vsel %vm834_vm0, %v7755_v0, 0  ;;  %s398_s15 = scalar_lea.vmem %s15213_s0, %s8670_s29  ;;  %s9570_s0 = smov 96  }
  0x26   : > { %s9719_s25 = scalar_lea.vmem %s398_s15, %s8102_s27  ;;  %s7718_s27 = sshll.u32 %s9549_s20, 3 }
  0x27   : > { %7756 = vmatprep.subr.msk.bf16.mxu0 %vm834_vm0, %v760_v1  ;;  %v404_v4 = vld [vmem:[%s9719_s25] sm:$0xff]  ;;  %v405_v5 = vld [vmem:[%s9719_s25 + $0x8] sm:$0xff]  ;;  %v9731_v10 = vld [vmem:[%s9719_s25 + $0x38] sm:$0xff]  ;;  %s15165_s15 = smov 64   ;;  %s8103_s29 = sshll.u32 %s9549_s20, 5 }
  0x28   : > { %842 = vmatpush1.bf16.msra.mxu0 %v836_v2  ;;  %v715_v6 = vpack.c.bf16 %v405_v5, %v404_v4  ;;  %v9724_v7 = vld [vmem:[%s9719_s25 + $0x28] sm:$0xff]  ;;  %v9727_v8 = vld [vmem:[%s9719_s25 + $0x20] sm:$0xff]  ;;  %15216 = vst [vmem:[#allocation8_spill] sm:$0xff] %v9731_v10  ;;  %v9736_v12 = vld [vmem:[%s9719_s25 + $0x30] sm:$0xff]  ;;  %v14921_v13 = vrot.slane %v9731_v10, 7  ;;  %v6927_v18 = vrot.slane %v9731_v10, 1 }
  0x29   : > { %2457 = vmatprep.subr.bf16.mxu0 %v14930_v3  ;;  %15214 = vst [vmem:[#allocation6_spill] sm:$0xff] %v9724_v7  ;;  %15215 = vst [vmem:[#allocation7_spill] sm:$0xff] %v9727_v8  ;;  %v14925_v9 = vrot.slane %v9724_v7, 7  ;;  %v14918_v11 = vrot.slane %v9727_v8, 1  ;;  %v406_v14 = vld [vmem:[%s9719_s25 + $0x10] sm:$0xff]  ;;  %v407_v15 = vld [vmem:[%s9719_s25 + $0x18] sm:$0xff]  ;;  %v717_v55 = vpack.c.bf16 %v9724_v7, %v9727_v8 }
  0x2a   : > { %15217 = vst [vmem:[#allocation9_spill] sm:$0xff] %v9736_v12  ;;  %v6775_v16 = vrot.slane %v9736_v12, 7  ;;  %v14917_v17 = vrot.slane %v9736_v12, 1  ;;  %v9758_v23 = vld [vmem:[%s9719_s25 + $0x48] sm:$0xff]  ;;  %v716_v24 = vpack.c.bf16 %v407_v15, %v406_v14  ;;  %v9763_v27 = vld [vmem:[%s9719_s25 + $0x40] sm:$0xff]  ;;  %v9767_v29 = vld [vmem:[%s9719_s25 + $0x58] sm:$0xff] }
  0x2b   : > { %7757 = vmatmul.mubr.msk.bf16.vlgmr.msra.gmra.mrb[0].mxu0 %vm761_vm1, %v715_v6  ;;  %v7042_v22 = vsel %vm1548_vm3, %v6927_v18, %v14918_v11  ;;  %15218 = vst [vmem:[#allocation10_spill] sm:$0xff] %v9758_v23  ;;  %15219 = vst [vmem:[#allocation11_spill] sm:$0xff] %v9763_v27  ;;  %v14924_v28 = vrot.slane %v9758_v23, 7  ;;  %v14912_v30 = vrot.slane %v9763_v27, 1  ;;  %v9771_v31 = vld [vmem:[%s9719_s25 + $0x50] sm:$0xff]  ;;  %v14920_v32 = vrot.slane %v9767_v29, 7 }
  0x2c   : > { %883 = vmatprep.mubr.bf16.mxu0 %v14930_v3  ;;  %v6776_v19 = vsel %vm1451_vm2, %v14925_v9, %v6775_v16  ;;  %v6777_v20 = vsel %vm1451_vm2, %v6775_v16, %v14921_v13  ;;  %v6928_v21 = vsel %vm1548_vm3, %v14917_v17, %v6927_v18  ;;  %15220 = vst [vmem:[#allocation12_spill] sm:$0xff] %v9767_v29  ;;  %15221 = vst [vmem:[#allocation13_spill] sm:$0xff] %v9771_v31  ;;  %v9778_v38 = vld [vmem:[%s9719_s25 + $0x60] sm:$0xff]  ;;  %v9781_v39 = vld [vmem:[%s9719_s25 + $0x68] sm:$0xff] }
  0x2d   : > { %v6884_v25 = vadd.f32 %v6776_v19, %v9736_v12  ;;  %v6885_v26 = vadd.f32 %v6777_v20, %v9731_v10  ;;  %v6781_v35 = vrot.slane %v9771_v31, 7  ;;  %v14911_v36 = vrot.slane %v9771_v31, 1  ;;  %15222 = vst [vmem:[#allocation14_spill] sm:$0xff] %v9778_v38  ;;  %15223 = vst [vmem:[#allocation15_spill] sm:$0xff] %v9781_v39  ;;  %v9802_v48 = vld [vmem:[%s9719_s25 + $0x70] sm:$0xff]  ;;  %v9805_v49 = vld [vmem:[%s9719_s25 + $0x78] sm:$0xff] }
  0x2e   : > { %v6934_v37 = vrot.slane %v9767_v29, 1  ;;  %v14923_v42 = vrot.slane %v9781_v39, 7  ;;  %v14910_v43 = vrot.slane %v9778_v38, 1  ;;  %15224 = vst [vmem:[#allocation16_spill] sm:$0xff] %v9802_v48  ;;  %15225 = vst [vmem:[#allocation17_spill] sm:$0xff] %v9805_v49  ;;  %v14919_v50 = vrot.slane %v9805_v49, 7 }
  0x2f   : > { %v7054_v33 = vadd.f32 %v6928_v21, %v6884_v25  ;;  %v7055_v34 = vadd.f32 %v7042_v22, %v6885_v26  ;;  %v6782_v40 = vsel %vm1451_vm2, %v14924_v28, %v6781_v35  ;;  %v6783_v41 = vsel %vm1451_vm2, %v6781_v35, %v14920_v32  ;;  %v9820_v59 = vld [vmem:[%s9719_s25 + $0x88] sm:$0xff]  ;;  %v9832_v4 = vld [vmem:[%s9719_s25 + $0x90] sm:$0xff]  ;;  %v9835_v14 = vld [vmem:[%s9719_s25 + $0x98] sm:$0xff] }
  0x30   : > { %v6888_v44 = vadd.f32 %v6782_v40, %v9771_v31  ;;  %v6889_v45 = vadd.f32 %v6783_v41, %v9767_v29  ;;  %v6935_v46 = vsel %vm1548_vm3, %v14911_v36, %v6934_v37  ;;  %v7043_v47 = vsel %vm1548_vm3, %v6934_v37, %v14912_v30  ;;  %15226 = vst [vmem:[#allocation18_spill] sm:$0xff] %v9820_v59  ;;  %v9842_v22 = vld [vmem:[%s9719_s25 + $0x80] sm:$0xff] }
  0x31   : > { %v6787_v51 = vrot.slane %v9802_v48, 7  ;;  %v14909_v54 = vrot.slane %v9802_v48, 1  ;;  %v6941_v58 = vrot.slane %v9805_v49, 1  ;;  %v14922_v2 = vrot.slane %v9820_v59, 7  ;;  %15227 = vst [vmem:[#allocation19_spill] sm:$0xff] %v9832_v4  ;;  %15228 = vst [vmem:[#allocation20_spill] sm:$0xff] %v9835_v14 }
  0x32   : > { %v7058_v52 = vadd.f32 %v6935_v46, %v6888_v44  ;;  %v7059_v53 = vadd.f32 %v7043_v47, %v6889_v45  ;;  %v14903_v15 = vrot.slane %v9835_v14, 7  ;;  %v6793_v16 = vrot.slane %v9832_v4, 7  ;;  %15229 = vst [vmem:[#allocation21_spill] sm:$0xff] %v9842_v22  ;;  %v9859_v41 = vld [vmem:[%s9719_s25 + $0xa0] sm:$0xff]  ;;  %v9865_v46 = vld [vmem:[%s9719_s25 + $0xa8] sm:$0xff]  ;;  %v9868_v47 = vld [vmem:[%s9719_s25 + $0xb0] sm:$0xff] }
  0x33   : > { %7758 = vmatmul.mubr.msk.bf16.gmra.mrb[4].mxu0 %vm761_vm1, %v716_v24  ;;  %v6788_v56 = vsel %vm1451_vm2, %v14923_v42, %v6787_v51  ;;  %v6789_v57 = vsel %vm1451_vm2, %v6787_v51, %v14919_v50  ;;  %v6942_v0 = vsel %vm1548_vm3, %v14909_v54, %v6941_v58  ;;  %v7044_v1 = vsel %vm1548_vm3, %v6941_v58, %v14910_v43  ;;  %v9976_v30 = vld [vmem:[%s9719_s25 + $0x100] sm:$0xff] }
  0x34   : > { %893 = vmatprep.mubr.bf16.mxu0 %v14930_v3  ;;  %v7094_v60 = vadd.f32 %v7058_v52, %v7054_v33  ;;  %v7095_v61 = vadd.f32 %v7059_v53, %v7055_v34  ;;  %v6892_v62 = vadd.f32 %v6788_v56, %v9802_v48  ;;  %v6893_v63 = vadd.f32 %v6789_v57, %v9805_v49  ;;  %v10021_v9 = vld [vmem:[%s9719_s25 + $0x120] sm:$0xff] }
  0x35   : > { %v14902_v24 = vrot.slane %v9842_v22, 1  ;;  %v6794_v25 = vsel %vm1451_vm2, %v14922_v2, %v6793_v16  ;;  %v6795_v26 = vsel %vm1451_vm2, %v6793_v16, %v14903_v15  ;;  %v14901_v33 = vrot.slane %v9832_v4, 1  ;;  %15232 = vst [vmem:[#allocation24_spill] sm:$0xff] %v9859_v41  ;;  %15233 = vst [vmem:[#allocation25_spill] sm:$0xff] %v9865_v46 }
  0x36   : > { %v7062_v5 = vadd.f32 %v6942_v0, %v6892_v62  ;;  %v7063_v6 = vadd.f32 %v7044_v1, %v6893_v63  ;;  %v6896_v37 = vadd.f32 %v6794_v25, %v9832_v4  ;;  %v6897_v40 = vadd.f32 %v6795_v26, %v9835_v14  ;;  %15234 = vst [vmem:[#allocation26_spill] sm:$0xff] %v9868_v47  ;;  %v9890_v25 = vld [vmem:[%s9719_s25 + $0xc8] sm:$0xff] }
  0x37   : > { %v718_v44 = vpack.c.bf16 %v9731_v10, %v9736_v12  ;;  %v6948_v45 = vrot.slane %v9835_v14, 1  ;;  %v14899_v57 = vrot.slane %v9859_v41, 1  ;;  %v6799_v62 = vrot.slane %v9868_v47, 7  ;;  %15236 = vst [vmem:[#allocation28_spill] sm:$0xff] %v9890_v25  ;;  %15250 = vst [vmem:[#allocation42_spill] sm:$0xff] %v9976_v30 }
  0x38   : > { %v7098_v18 = vadd.f32 %v7062_v5, %v7058_v52  ;;  %v7099_v19 = vadd.f32 %v7063_v6, %v7059_v53  ;;  %v7126_v20 = vadd.f32 %v7094_v60, %v7062_v5  ;;  %v7127_v21 = vadd.f32 %v7095_v61, %v7063_v6  ;;  %v9874_v53 = vld [vmem:[%s9719_s25 + $0xb8] sm:$0xff]  ;;  %15254 = vst [vmem:[#allocation46_spill] sm:$0xff] %v10021_v9 }
  0x39   : > { %v14907_v52 = vrot.slane %v9865_v46, 7  ;;  %15235 = vst [vmem:[#allocation27_spill] sm:$0xff] %v9874_v53  ;;  %v7045_v56 = vsel %vm1548_vm3, %v6948_v45, %v14902_v24  ;;  %v14900_v58 = vrot.slane %v9874_v53, 7  ;;  %v14898_v63 = vrot.slane %v9868_v47, 1 }
  0x3a   : > { %v9852_v34 = vmul.f32 0.11111111, %v7126_v20  ;;  %v9854_v35 = vmul.f32 0.11111111, %v7127_v21  ;;  %v7067_v61 = vadd.f32 %v7045_v56, %v6897_v40  ;;  %v6955_v0 = vrot.slane %v9874_v53, 1 }
  0x3b   : > { %7759 = vmatmul.mubr.msk.bf16.gmra.mrb[8].mxu0 %vm761_vm1, %v717_v55  ;;  %v6949_v55 = vsel %vm1548_vm3, %v14901_v33, %v6948_v45  ;;  %v6800_v26 = vsel %vm1451_vm2, %v14907_v52, %v6799_v62  ;;  %v719_v45 = vpack.c.bf16 %v9758_v23, %v9763_v27  ;;  %v14906_v56 = vrot.slane %v9890_v25, 7 }
  0x3c   : > { %903 = vmatprep.mubr.bf16.mxu0 %v14930_v3  ;;  %15230 = vst [vmem:[#allocation22_spill] sm:$0xff] %v9852_v34  ;;  %15231 = vst [vmem:[#allocation23_spill] sm:$0xff] %v9854_v35  ;;  %v7066_v60 = vadd.f32 %v6949_v55, %v6896_v37  ;;  %v7103_v16 = vadd.f32 %v7067_v61, %v7063_v6  ;;  %v7131_v21 = vadd.f32 %v7099_v19, %v7067_v61  ;;  %v9913_v55 = vld [vmem:[%s9719_s25 + $0xc0] sm:$0xff] }
  0x3d   : > { %v6801_v37 = vsel %vm1451_vm2, %v6799_v62, %v14900_v58  ;;  %v6956_v40 = vsel %vm1548_vm3, %v14898_v63, %v6955_v0  ;;  %v6900_v19 = vadd.f32 %v6800_v26, %v9868_v47  ;;  %15239 = vst [vmem:[#allocation31_spill] sm:$0xff] %v9913_v55  ;;  %v9917_v62 = vld [vmem:[%s9719_s25 + $0xd8] sm:$0xff]  ;;  %v721_v50 = vpack.c.bf16 %v9781_v39, %v9778_v38 }
  0x3e   : > { %v7102_v1 = vadd.f32 %v7066_v60, %v7062_v5  ;;  %v7130_v20 = vadd.f32 %v7098_v18, %v7066_v60  ;;  %v7046_v5 = vsel %vm1548_vm3, %v6955_v0, %v14899_v57  ;;  %v9906_v18 = vmul.f32 0.11111111, %v7131_v21  ;;  %15240 = vst [vmem:[#allocation32_spill] sm:$0xff] %v9917_v62  ;;  %v9922_v21 = vld [vmem:[%s9719_s25 + $0xd0] sm:$0xff] }
  0x3f   : > { %15241 = vst [vmem:[#allocation33_spill] sm:$0xff] %v9922_v21  ;;  %v14905_v26 = vrot.slane %v9917_v62, 7  ;;  %v6805_v63 = vrot.slane %v9922_v21, 7  ;;  %v14904_v57 = vrot.slane %v9922_v21, 1  ;;  %v6962_v58 = vrot.slane %v9917_v62, 1 }
  0x40   : > { %v9904_v6 = vmul.f32 0.11111111, %v7130_v20  ;;  %15238 = vst [vmem:[#allocation30_spill] sm:$0xff] %v9906_v18  ;;  %v7070_v20 = vadd.f32 %v6956_v40, %v6900_v19 }
  0x41   : > { %v6806_v40 = vsel %vm1451_vm2, %v14906_v56, %v6805_v63  ;;  %v6963_v19 = vsel %vm1548_vm3, %v14904_v57, %v6962_v58  ;;  %v9959_v56 = vld [vmem:[%s9719_s25 + $0xf0] sm:$0xff] }
  0x42   : > { %15237 = vst [vmem:[#allocation29_spill] sm:$0xff] %v9904_v6  ;;  %v7106_v33 = vadd.f32 %v7070_v20, %v7066_v60  ;;  %v7134_v15 = vadd.f32 %v7102_v1, %v7070_v20  ;;  %v6904_v1 = vadd.f32 %v6806_v40, %v9922_v21  ;;  %15246 = vst [vmem:[#allocation38_spill] sm:$0xff] %v9959_v56  ;;  %v9962_v40 = vld [vmem:[%s9719_s25 + $0xf8] sm:$0xff] }
  0x43   : > { %7760 = vmatmul.mubr.msk.bf16.gmra.mrb[12].mxu0 %vm761_vm1, %v718_v44  ;;  %v6901_v44 = vadd.f32 %v6801_v37, %v9874_v53  ;;  %v14908_v37 = vrot.slane %v9913_v55, 1  ;;  %15247 = vst [vmem:[#allocation39_spill] sm:$0xff] %v9962_v40 }
  0x44   : > { %913 = vmatprep.mubr.bf16.mxu0 %v14930_v3  ;;  %v9940_v60 = vmul.f32 0.11111111, %v7134_v15 }
  0x45   : > { %v7071_v51 = vadd.f32 %v7046_v5, %v6901_v44  ;;  %v6807_v5 = vsel %vm1451_vm2, %v6805_v63, %v14905_v26  ;;  %v9947_v44 = vld [vmem:[%s9719_s25 + $0xe0] sm:$0xff]  ;;  %v7047_v63 = vsel %vm1548_vm3, %v6962_v58, %v14908_v37  ;;  %v7074_v26 = vadd.f32 %v6963_v19, %v6904_v1 }
  0x46   : > { %15242 = vst [vmem:[#allocation34_spill] sm:$0xff] %v9940_v60  ;;  %15244 = vst [vmem:[#allocation36_spill] sm:$0xff] %v9947_v44  ;;  %v14916_v52 = vrot.slane %v9947_v44, 1  ;;  %v14913_v58 = vrot.slane %v9962_v40, 7  ;;  %v6811_v1 = vrot.slane %v9959_v56, 7  ;;  %v10064_v60 = vld [vmem:[%s9719_s25 + $0x148] sm:$0xff] }
  0x47   : > { %v7107_v24 = vadd.f32 %v7071_v51, %v7067_v61  ;;  %v7135_v0 = vadd.f32 %v7103_v16, %v7071_v51  ;;  %v6905_v16 = vadd.f32 %v6807_v5, %v9917_v62  ;;  %v720_v5 = vpack.c.bf16 %v9767_v29, %v9771_v31  ;;  %15260 = vst [vmem:[#allocation52_spill] sm:$0xff] %v10064_v60 }
  0x48   : > { %v7110_v37 = vadd.f32 %v7074_v26, %v7070_v20  ;;  %v7138_v57 = vadd.f32 %v7106_v33, %v7074_v26  ;;  %v6813_v33 = vsel %vm1451_vm2, %v6811_v1, %v14913_v58  ;;  %v9992_v20 = vld [vmem:[%s9719_s25 + $0x108] sm:$0xff] }
  0x49   : > { %v9942_v61 = vmul.f32 0.11111111, %v7135_v0  ;;  %v7075_v15 = vadd.f32 %v7047_v63, %v6905_v16  ;;  %v14914_v16 = vrot.slane %v9959_v56, 1  ;;  %v6969_v63 = vrot.slane %v9962_v40, 1  ;;  %15251 = vst [vmem:[#allocation43_spill] sm:$0xff] %v9992_v20 }
  0x4a   : > { %v9971_v43 = vmul.f32 0.11111111, %v7138_v57  ;;  %v6909_v58 = vadd.f32 %v6813_v33, %v9962_v40 }
  0x4b   : > { %7761 = vmatmul.mubr.msk.bf16.gmra.mrb[16].mxu0 %vm761_vm1, %v719_v45  ;;  %15243 = vst [vmem:[#allocation35_spill] sm:$0xff] %v9942_v61  ;;  %v9953_v45 = vld [vmem:[%s9719_s25 + $0xe8] sm:$0xff]  ;;  %v7111_v54 = vadd.f32 %v7075_v15, %v7071_v51  ;;  %v7139_v19 = vadd.f32 %v7107_v24, %v7075_v15  ;;  %v6970_v51 = vsel %vm1548_vm3, %v14914_v16, %v6969_v63  ;;  %v10003_v16 = vld [vmem:[%s9719_s25 + $0x110] sm:$0xff] }
  0x4c   : > { %923 = vmatprep.mubr.bf16.mxu0 %v14930_v3  ;;  %15245 = vst [vmem:[#allocation37_spill] sm:$0xff] %v9953_v45  ;;  %v14915_v0 = vrot.slane %v9953_v45, 7  ;;  %15248 = vst [vmem:[#allocation40_spill] sm:$0xff] %v9971_v43  ;;  %v7048_v57 = vsel %vm1548_vm3, %v6969_v63, %v14916_v52  ;;  %v14926_v63 = vrot.slane %v9992_v20, 7  ;;  %v14929_v52 = vrot.slane %v9976_v30, 1 }
  0x4d   : > { %v9973_v36 = vmul.f32 0.11111111, %v7139_v19  ;;  %15252 = vst [vmem:[#allocation44_spill] sm:$0xff] %v10003_v16  ;;  %v9309_v19 = vld [vmem:[%s14888_s3 + $0x8] sm:$0xff]   ;;  %v7079_v11 = vadd.f32 %v7048_v57, %v6909_v58  ;;  %v6817_v33 = vrot.slane %v10003_v16, 7  ;;  %v14927_v32 = vrot.slane %v10003_v16, 1 }
  0x4e   : > { %v6812_v24 = vsel %vm1451_vm2, %v14915_v0, %v6811_v1  ;;  %v10006_v0 = vld [vmem:[%s9719_s25 + $0x118] sm:$0xff]  ;;  %v10024_v58 = vld [vmem:[%s9719_s25 + $0x128] sm:$0xff] }
  0x4f   : > { %15249 = vst [vmem:[#allocation41_spill] sm:$0xff] %v9973_v36  ;;  %v6908_v1 = vadd.f32 %v6812_v24, %v9959_v56  ;;  %15253 = vst [vmem:[#allocation45_spill] sm:$0xff] %v10006_v0  ;;  %v14928_v17 = vrot.slane %v10006_v0, 7  ;;  %v6976_v13 = vrot.slane %v10006_v0, 1  ;;  %v7115_v42 = vadd.f32 %v7079_v11, %v7075_v15 }
  0x50   : > { %v7143_v28 = vadd.f32 %v7111_v54, %v7079_v11  ;;  %15255 = vst [vmem:[#allocation47_spill] sm:$0xff] %v10024_v58 }
  0x51   : > { %v7078_v24 = vadd.f32 %v6970_v51, %v6908_v1  ;;  %v6818_v51 = vsel %vm1451_vm2, %v14926_v63, %v6817_v33  ;;  %v6819_v57 = vsel %vm1451_vm2, %v6817_v33, %v14928_v17  ;;  %v7049_v54 = vsel %vm1548_vm3, %v6976_v13, %v14929_v52  ;;  %v10049_v17 = vld [vmem:[%s9719_s25 + $0x130] sm:$0xff] }
  0x52   : > { %v10040_v15 = vmul.f32 0.11111111, %v7143_v28  ;;  %v6912_v1 = vadd.f32 %v6818_v51, %v10003_v16  ;;  %v6913_v63 = vadd.f32 %v6819_v57, %v10006_v0  ;;  %15258 = vst [vmem:[#allocation50_spill] sm:$0xff] %v10049_v17  ;;  %v722_v28 = vpack.c.bf16 %v9805_v49, %v9802_v48 }
  0x53   : > { %7762 = vmatmul.mubr.msk.bf16.gmra.mrb[20].mxu0 %vm761_vm1, %v720_v5  ;;  %v9308_v5 = vld [vmem:[%s14888_s3] sm:$0xff]   ;;  %v7114_v2 = vadd.f32 %v7078_v24, %v7074_v26  ;;  %v6977_v26 = vsel %vm1548_vm3, %v14927_v32, %v6976_v13  ;;  %v10052_v13 = vld [vmem:[%s9719_s25 + $0x138] sm:$0xff]  ;;  %v6823_v57 = vrot.slane %v10049_v17, 7  ;;  %v14937_v52 = vrot.slane %v10049_v17, 1 }
  0x54   : > { %933 = vmatprep.mubr.bf16.mxu0 %v14930_v3  ;;  %2458 = vmatpush1.bf16.msra.mxu0 %v9308_v5  ;;  %v7142_v5 = vadd.f32 %v7110_v37, %v7078_v24  ;;  %15257 = vst [vmem:[#allocation49_spill] sm:$0xff] %v10040_v15  ;;  %15259 = vst [vmem:[#allocation51_spill] sm:$0xff] %v10052_v13  ;;  %v7083_v51 = vadd.f32 %v7049_v54, %v6913_v63  ;;  %v6983_v32 = vrot.slane %v10052_v13, 1 }
  0x55   : > { %2459 = vmatprep.subr.bf16.mxu0 %v14930_v3 }
  0x56   : > { %v10038_v37 = vmul.f32 0.11111111, %v7142_v5  ;;  %v7082_v5 = vadd.f32 %v6977_v26, %v6912_v1  ;;  %v7119_v36 = vadd.f32 %v7083_v51, %v7079_v11  ;;  %v15261_v26 = vrot.slane %v10024_v58, 7 }
  0x57   : > { %v6984_v1 = vsel %vm1548_vm3, %v14937_v52, %v6983_v32 }
  0x58   : > { %2460 = vmatpush1.bf16.msra.mxu0 %v9309_v19  ;;  %15256 = vst [vmem:[#allocation48_spill] sm:$0xff] %v10038_v37  ;;  %v7146_v33 = vadd.f32 %v7114_v2, %v7082_v5  ;;  %v7118_v43 = vadd.f32 %v7082_v5, %v7078_v24  ;;  %v6824_v63 = vsel %vm1451_vm2, %v15261_v26, %v6823_v57  ;;  %v15262_v2 = vrot.slane %v10021_v9, 1  ;;  %v10085_v37 = vld [vmem:[%s9719_s25 + $0x140] sm:$0xff] }
  0x59   : > { %2461 = vmatprep.subr.bf16.mxu0 %v14930_v3  ;;  %v6916_v19 = vadd.f32 %v6824_v63, %v10049_v17  ;;  %15265 = vst [vmem:[#allocation55_spill] sm:$0xff] %v10085_v37 }
  0x5a   : > { %v10078_v11 = vmul.f32 0.11111111, %v7146_v33 }
  0x5b   : > { %7763 = vmatmul.mubr.msk.bf16.gmra.mrb[24].mxu0 %vm761_vm1, %v721_v50  ;;  %v14936_v50 = vrot.slane %v10052_v13, 7  ;;  %v7086_v15 = vadd.f32 %v6984_v1, %v6916_v19  ;;  %v15269_v19 = vrot.slane %v10064_v60, 7 }
  0x5c   : > { %943 = vmatprep.mubr.bf16.mxu0 %v14930_v3  ;;  %v7147_v3 = vadd.f32 %v7115_v42, %v7083_v51  ;;  %v7050_v42 = vsel %vm1548_vm3, %v6983_v32, %v15262_v2  ;;  %15263 = vst [vmem:[#allocation53_spill] sm:$0xff] %v10078_v11  ;;  %v10094_v32 = vld [vmem:[%s9719_s25 + $0x158] sm:$0xff]  ;;  %v15268_v2 = vmov 0  }
  0x5d   : > { %v6825_v54 = vsel %vm1451_vm2, %v6823_v57, %v14936_v50  ;;  %v10089_v50 = vld [vmem:[%s9719_s25 + $0x150] sm:$0xff]  ;;  %15267 = vst [vmem:[#allocation57_spill] sm:$0xff] %v10094_v32  ;;  %v14942_v33 = vrot.slane %v10094_v32, 7  ;;  %v7122_v57 = vadd.f32 %v7086_v15, %v7082_v5  ;;  %v7150_v18 = vadd.f32 %v7118_v43, %v7086_v15 }
  0x5e   : > { %v10080_v24 = vmul.f32 0.11111111, %v7147_v3  ;;  %v6917_v26 = vadd.f32 %v6825_v54, %v10052_v13  ;;  %15266 = vst [vmem:[#allocation56_spill] sm:$0xff] %v10089_v50  ;;  %v6829_v63 = vrot.slane %v10089_v50, 7  ;;  %v15272_v43 = vrot.slane %v10089_v50, 1 }
  0x5f   : > { %v15273_v15 = vrot.slane %v10085_v37, 1 }
  0x60   : > { %15264 = vst [vmem:[#allocation54_spill] sm:$0xff] %v10080_v24  ;;  %v7087_v61 = vadd.f32 %v7050_v42, %v6917_v26  ;;  %v6830_v1 = vsel %vm1451_vm2, %v15269_v19, %v6829_v63  ;;  %v6990_v42 = vrot.slane %v10094_v32, 1  ;;  %v10109_v26 = vmul.f32 0.11111111, %v7150_v18 }
  0x61   : > { %v6920_v54 = vadd.f32 %v6830_v1, %v10089_v50 }
  0x62   : > { %v7123_v6 = vadd.f32 %v7087_v61, %v7083_v51  ;;  %v7151_v52 = vadd.f32 %v7119_v36, %v7087_v61  ;;  %15270 = vst [vmem:[#allocation58_spill] sm:$0xff] %v10109_v26  ;;  %v723_v36 = vpack.c.bf16 %v9820_v59, %v9842_v22  ;;  %v6991_v61 = vsel %vm1548_vm3, %v15272_v43, %v6990_v42 }
  0x63   : > { %7764 = vmatmul.mubr.msk.bf16.gmra.mrb[28].mxu0 %vm761_vm1, %v722_v28  ;;  %v6831_v28 = vsel %vm1451_vm2, %v6829_v63, %v14942_v33  ;;  %v7051_v51 = vsel %vm1548_vm3, %v6990_v42, %v15273_v15  ;;  %v742_v63 = vlaneseq  ;;  %v7090_v18 = vadd.f32 %v6991_v61, %v6920_v54  ;;  %v9310_v61 = vld [vmem:[%s14888_s3 + $0x10] sm:$0xff]  }
  0x64   : > { %953 = vmatprep.mubr.bf16.mxu0 %v15268_v2  ;;  %v10111_v3 = vmul.f32 0.11111111, %v7151_v52  ;;  %v6921_v5 = vadd.f32 %v6831_v28, %v10094_v32  ;;  %v724_v15 = vpack.c.bf16 %v9835_v14, %v9832_v4  ;;  %2462 = vmatpush1.bf16.msra.mxu0 %v9310_v61  ;;  %v735_v61 = vpack.c.bf16 %v10064_v60, %v10085_v37 }
  0x65   : > { %v7154_v1 = vadd.f32 %v7122_v57, %v7090_v18  ;;  %v10126_v28 = vshrl.u32 %v742_v63, 7  ;;  %v10144_v57 = vld [vmem:[%s15276_s2] sm:$0x3]  ;;  %2463 = vmatprep.subr.bf16.mxu0 %v15268_v2  ;;  %v729_v63 = vpack.c.bf16 %v9953_v45, %v9947_v44  ;;  %v9311_v18 = vld [vmem:[%s14888_s3 + $0x18] sm:$0xff]  }
  0x66   : > { %15271 = vst [vmem:[#allocation59_spill] sm:$0xff] %v10111_v3  ;;  %v7091_v19 = vadd.f32 %v7051_v51, %v6921_v5  ;;  %v726_v5 = vpack.c.bf16 %v9874_v53, %v9868_v47  ;;  %v728_v51 = vpack.c.bf16 %v9917_v62, %v9922_v21 }
  0x67   : > { %v10129_v11 = vmul.f32 0.11111111, %v7154_v1  ;;  %v731_v1 = vpack.c.bf16 %v9992_v20, %v9976_v30 }
  0x68   : > { %v7155_v33 = vadd.f32 %v7123_v6, %v7091_v19  ;;  %v725_v6 = vpack.c.bf16 %v9865_v46, %v9859_v41  ;;  %2464 = vmatpush1.bf16.msra.mxu0 %v9311_v18  ;;  %v730_v19 = vpack.c.bf16 %v9962_v40, %v9959_v56  ;;  %v448_v18 = vld [vmem:[%s9719_s25 + $0x160] sm:$0xff] }
  0x69   : > { %15274 = vst [vmem:[#allocation60_spill] sm:$0xff] %v10129_v11  ;;  %2465 = vmatprep.subr.bf16.mxu0 %v15268_v2 }
  0x6a   : > { %v10131_v43 = vmul.f32 0.11111111, %v7155_v33  ;;  %v748_v33 = vsub.s32 1, %v10126_v28 }
  0x6b   : > { %7765 = vmatmul.mubr.msk.bf16.gmra.mrb[32].mxu0 %vm761_vm1, %v723_v36  ;;  %v727_v36 = vpack.c.bf16 %v9890_v25, %v9913_v55 }
  0x6c   : > { %963 = vmatprep.mubr.bf16.mxu0 %v15268_v2  ;;  %15275 = vst [vmem:[#allocation61_spill] sm:$0xff] %v10131_v43  ;;  %v10150_v54 = vrot.slane %v10144_v57, %v748_v33  ;;  %v733_v33 = vpack.c.bf16 %v10024_v58, %v10021_v9  ;;  %v14948_v43 = vmov 0.0   ;;  %v15290_v9 = vmov 0.0  }
  0x73   : > { %7766 = vmatmul.mubr.msk.bf16.gmra.mrb[36].mxu0 %vm761_vm1, %v724_v15  ;;  %v9312_v15 = vld [vmem:[%s14888_s3 + $0x20] sm:$0xff]  }
  0x74   : > { %973 = vmatprep.mubr.bf16.mxu0 %v15268_v2  ;;  %2466 = vmatpush1.bf16.msra.mxu0 %v9312_v15  ;;  %v9315_v15 = vld [vmem:[%s14888_s3 + $0x38] sm:$0xff]  }
  0x75   : > { %2467 = vmatprep.subr.bf16.mxu0 %v15268_v2 }
  0x7b   : > { %7767 = vmatmul.mubr.msk.bf16.gmra.mrb[40].mxu0 %vm761_vm1, %v725_v6  ;;  %v732_v6 = vpack.c.bf16 %v10006_v0, %v10003_v16 }
  0x7c   : > { %983 = vmatprep.mubr.bf16.mxu0 %v15268_v2 }
  0x83   : > { %7768 = vmatmul.mubr.msk.bf16.gmra.mrb[44].mxu0 %vm761_vm1, %v726_v5  ;;  %v9313_v5 = vld [vmem:[%s14888_s3 + $0x28] sm:$0xff]  }
  0x84   : > { %993 = vmatprep.mubr.bf16.mxu0 %v15268_v2  ;;  %2468 = vmatpush1.bf16.msra.mxu0 %v9313_v5 }
  0x85   : > { %2469 = vmatprep.subr.bf16.mxu0 %v15268_v2 }
  0x8b   : > { %7769 = vmatmul.mubr.msk.bf16.gmra.mrb[48].mxu0 %vm761_vm1, %v727_v36  ;;  %v734_v36 = vpack.c.bf16 %v10052_v13, %v10049_v17 }
  0x8c   : > { %1003 = vmatprep.mubr.bf16.mxu0 %v15268_v2 }
  0x93   : > { %7770 = vmatmul.mubr.msk.bf16.gmra.mrb[52].mxu0 %vm761_vm1, %v728_v51  ;;  %v9314_v51 = vld [vmem:[%s14888_s3 + $0x30] sm:$0xff]  }
  0x94   : > { %1013 = vmatprep.mubr.bf16.mxu0 %v15268_v2  ;;  %2470 = vmatpush1.bf16.msra.mxu0 %v9314_v51  ;;  %v10235_v51 = vstv %s7718_s27  ;;  %s15200_s27 = sand.u32 1, %s9541_s18  }
  0x95   : > { %2471 = vmatprep.subr.bf16.mxu0 %v15268_v2  ;;  %v457_v3 = vadd.s32 6, %v10235_v51  ;;  %vm481_vm9 = vcmp.ge.s32.totalorder %v10235_v51, 0  ;;  %vm493_vm10 = vcmp.lt.s32.totalorder %v10235_v51, 16  ;;  %s7716_s13 = sshll.u32 %s15200_s27, 8  ;;  %s8098_s27 = sshll.u32 %s9553_s21, 6 }
  0x96   : > { %vm10327_vm14 = vmand %vm481_vm9, %vm493_vm10  ;;  %s13888_s14 = scalar_lea.vmem [#allocation2], %s7716_s13  ;;  %s7630_s13 = sadd.s32 %s8103_s29, %s8098_s27 }
  0x97   : > { %v10280_v34 = vadd.s32 4294967294, %v457_v3  ;;  %s9571_s27 = smov [#allocation2]  }
  0x98   : > { %2472 = vmatpush1.bf16.msra.mxu0 %v9315_v15  ;;  %v9320_v15 = vld [vmem:[%s14888_s3 + $0x70] sm:$0xff]  }
  0x99   : > { %2473 = vmatprep.subr.bf16.mxu0 %v15268_v2  ;;  %vm497_vm9 = vcmp.lt.s32.totalorder %v10280_v34, 16 }
  0x9b   : > { %7771 = vmatmul.mubr.msk.bf16.gmra.mrb[56].mxu0 %vm761_vm1, %v729_v63  ;;  %v736_v63 = vpack.c.bf16 %v10094_v32, %v10089_v50 }
  0x9c   : > { %1023 = vmatprep.mubr.bf16.mxu0 %v15268_v2 }
  0xa3   : > { %7772 = vmatmul.mubr.msk.bf16.gmra.mrb[60].mxu0 %vm761_vm1, %v730_v19  ;;  %v449_v19 = vld [vmem:[%s9719_s25 + $0x168] sm:$0xff] }
  0xa4   : > { %1033 = vmatprep.mubr.bf16.mxu0 %v15268_v2 }
  0xab   : > { %7773 = vmatmul.mubr.msk.bf16.gmra.mrb[64].mxu0 %vm761_vm1, %v731_v1  ;;  %v737_v1 = vpack.c.bf16 %v449_v19, %v448_v18  ;;  %v744_v18 = vsub.s32 0, %v10126_v28  ;;  %v9318_v19 = vld [vmem:[%s14888_s3 + $0x48] sm:$0xff]   ;;  %v453_v28 = vadd.s32 1, %v10235_v51 }
  0xac   : > { %1043 = vmatprep.mubr.bf16.mxu0 %v15268_v2 }
  0xb3   : > { %7774 = vmatmul.mubr.msk.bf16.gmra.mrb[68].mxu0 %vm761_vm1, %v732_v6  ;;  %v450_v6 = vld [vmem:[%s9719_s25 + $0x170] sm:$0xff] }
  0xb4   : > { %1053 = vmatprep.mubr.bf16.mxu0 %v15268_v2 }
  0xbb   : > { %7775 = vmatmul.mubr.msk.bf16.gmra.mrb[72].mxu0 %vm761_vm1, %v733_v33  ;;  %v451_v33 = vld [vmem:[%s9719_s25 + $0x178] sm:$0xff] }
  0xbc   : > { %1063 = vmatprep.mubr.bf16.mxu0 %v15268_v2  ;;  %v738_v5 = vpack.c.bf16 %v451_v33, %v450_v6  ;;  %v10252_v6 = vrot.slane %v10144_v57, %v744_v18 }
  0xc3   : > { %7776 = vmatmul.mubr.msk.bf16.gmra.mrb[76].mxu0 %vm761_vm1, %v734_v36  ;;  %v9316_v36 = vld [vmem:[%s14888_s3 + $0x40] sm:$0xff]  }
  0xc4   : > { %1073 = vmatprep.mubr.bf16.mxu0 %v15268_v2  ;;  %2474 = vmatpush1.bf16.msra.mxu0 %v9316_v36 }
  0xc5   : > { %2475 = vmatprep.subr.bf16.mxu0 %v15268_v2 }
  0xc8   : > { %2476 = vmatpush1.bf16.msra.mxu0 %v9318_v19  ;;  %v7721_v19 = vadd.s32 4294967294, %v453_v28  ;;  %v9322_v28 = vld [vmem:[%s14888_s3 + $0x80] sm:$0xff]  }
  0xc9   : > { %2477 = vmatprep.subr.bf16.mxu0 %v15268_v2 }
  0xca   : > { %vm480_vm7 = vcmp.ge.s32.totalorder %v7721_v19, 0  ;;  %vm492_vm8 = vcmp.lt.s32.totalorder %v7721_v19, 16 }
  0xcb   : > { %7777 = vmatmul.mubr.msk.bf16.gmra.mrb[80].mxu0 %vm761_vm1, %v735_v61  ;;  %v9317_v61 = vld [vmem:[%s14888_s3 + $0x60] sm:$0xff]   ;;  %vm10306_vm13 = vmand %vm480_vm7, %vm492_vm8  ;;  %vm485_vm8 = vcmp.ge.s32.totalorder %v10280_v34, 0 }
  0xcc   : > { %1083 = vmatprep.mubr.bf16.mxu0 %v15268_v2  ;;  %2211 = vmatpush1.bf16.msra.mxu1 %v9317_v61  ;;  %v9321_v61 = vld [vmem:[%s14888_s3 + $0x78] sm:$0xff]   ;;  %v10363_v13 = vsel %vm10306_vm13, 1.0, %v15290_v9  ;;  %v9328_v34 = vld [vmem:[%s14888_s3 + $0xa0] sm:$0xff]  }
  0xcd   : > { %2212 = vmatprep.subr.bf16.mxu1 %v15268_v2  ;;  %15291 = vst [vmem:[#allocation67_spill] sm:$0xff] %v10363_v13 }
  0xd3   : > { %7778 = vmatmul.mubr.msk.bf16.gmra.mrb[84].mxu0 %vm761_vm1, %v736_v63  ;;  %v9319_v63 = vld [vmem:[%s14888_s3 + $0x68] sm:$0xff]  }
  0xd4   : > { %1093 = vmatprep.mubr.bf16.mxu0 %v15268_v2  ;;  %2213 = vmatpush1.bf16.msra.mxu1 %v9319_v63 }
  0xd5   : > { %2214 = vmatprep.subr.bf16.mxu1 %v15268_v2 }
  0xd8   : > { %2215 = vmatpush1.bf16.msra.mxu1 %v9320_v15 }
  0xd9   : > { %2216 = vmatprep.subr.bf16.mxu1 %v15268_v2 }
  0xdb   : > { %7779 = vmatmul.mubr.msk.bf16.gmra.mrb[88].mxu0 %vm761_vm1, %v737_v1  ;;  %v7720_v1 = vadd.s32 4294967294, %v10235_v51 }
  0xdc   : > { %1103 = vmatprep.mubr.bf16.mxu0 %v15268_v2  ;;  %2217 = vmatpush1.bf16.msra.mxu1 %v9321_v61 }
  0xdd   : > { %vm479_vm4 = vcmp.ge.s32.totalorder %v7720_v1, 0  ;;  %vm491_vm5 = vcmp.lt.s32.totalorder %v7720_v1, 16  ;;  %2218 = vmatprep.subr.bf16.mxu1 %v15268_v2 }
  0xde   : > { %vm503_vm6 = vmand %vm479_vm4, %vm491_vm5 }
  0xdf   : > { %v7731_v26 = vsel %vm503_vm6, 1.0, %v14948_v43 }
  0xe0   : > { %2219 = vmatpush1.bf16.msra.mxu1 %v9322_v28 }
  0xe1   : > { %2220 = vmatprep.subr.bf16.mxu1 %v15268_v2 }
  0xe3   : > { %7780 = vmatmul.mubr.msk.bf16.gmra.mrb[92].mxu0 %vm761_vm1, %v738_v5  ;;  %v454_v5 = vadd.s32 3, %v10235_v51 }
  0xe5   : > { %v7722_v11 = vadd.s32 4294967294, %v454_v5 }
  0xe7   : > { %vm482_vm11 = vcmp.ge.s32.totalorder %v7722_v11, 0  ;;  %vm494_vm12 = vcmp.lt.s32.totalorder %v7722_v11, 16  ;;  %v10368_v11 = vsel %vm10327_vm14, 1.0, %v15290_v9 }
  0xe8   : > { %vm10343_vm4 = vmand %vm482_vm11, %vm494_vm12  ;;  %15292 = vst [vmem:[#allocation68_spill] sm:$0xff] %v10368_v11 }
  0xe9   : > { %v10373_v58 = vsel %vm10343_vm4, 1.0, %v15290_v9  ;;  %vm10401_vm12 = vmand %vm485_vm8, %vm497_vm9 }
  0xea   : > { %15293 = vst [vmem:[#allocation69_spill] sm:$0xff] %v10373_v58 }
  0xfe   : > { %v875_v33 = vpop.f32.mrb[0].mxu0 }
  0xff   : > { %v877_v36 = vpop.f32.mrb[1].mxu0  ;;  %v876_v63 = vadd.f32 %v875_v33, %v10252_v6  ;;  %v455_v33 = vadd.s32 4, %v10235_v51 }
 0x100   : > { %v878_v57 = vadd.f32 %v877_v36, %v10150_v54  ;;  %v879_v18 = vpop.f32.mrb[2].mxu0  ;;  %v456_v36 = vadd.s32 5, %v10235_v51 }
 0x101   : > { %v880_v1 = vadd.f32 %v879_v18, %v10252_v6  ;;  %v881_v15 = vpop.f32.mrb[3].mxu0  ;;  %v1114_v61 = vmax.f32 %v876_v63, 0.0  ;;  %v7723_v24 = vadd.s32 4294967294, %v455_v33 }
 0x102   : > { %v1115_v42 = vmax.f32 %v878_v57, 0.0  ;;  %v882_v52 = vadd.f32 %v881_v15, %v10150_v54 }
 0x103   : > { %v1116_v5 = vmax.f32 %v880_v1, 0.0  ;;  %v9324_v1 = vld [vmem:[%s14888_s3 + $0x88] sm:$0xff]   ;;  %v10285_v28 = vmul.f32 0.0, %v1114_v61  ;;  %vm483_vm15 = vcmp.ge.s32.totalorder %v7723_v24, 0  ;;  %vm495_vm5 = vcmp.lt.s32.totalorder %v7723_v24, 16 }
 0x104   : > { %v1117_v57 = vmax.f32 %v882_v52, 0.0  ;;  %v10272_v18 = vmul.f32 0.0, %v1115_v42  ;;  %v7724_v42 = vadd.s32 4294967294, %v456_v36  ;;  %2221 = vmatpush1.bf16.msra.mxu1 %v9324_v1  ;;  %vm10377_vm10 = vmand %vm483_vm15, %vm495_vm5 }
 0x105   : > { %v10294_v33 = vmul.f32 %v7731_v26, %v1116_v5  ;;  %2222 = vmatprep.subr.bf16.mxu1 %v15268_v2 }
 0x106   : > { %15277 = vst [vmem:[#allocation62_spill] sm:$0xff] %v10272_v18  ;;  %v10275_v15 = vmul.f32 %v7731_v26, %v1117_v57  ;;  %v885_v43 = vpop.f32.mrb[4].mxu0  ;;  %v14959_v3 = vrot.slane %v10272_v18, 7  ;;  %v14958_v57 = vrot.slane %v10272_v18, 1  ;;  %vm484_vm6 = vcmp.ge.s32.totalorder %v7724_v42, 0 }
 0x107   : > { %v886_v63 = vadd.f32 %v885_v43, %v10252_v6  ;;  %v887_v52 = vpop.f32.mrb[5].mxu0  ;;  %v9323_v43 = vld [vmem:[%s14888_s3 + $0x50] sm:$0xff]   ;;  %vm496_vm7 = vcmp.lt.s32.totalorder %v7724_v42, 16  ;;  %v15296_v30 = vrot.slane %v10294_v33, 7  ;;  %v1549_v42 = vrot.slane %v10285_v28, 1 }
 0x108   : > { %15278 = vst [vmem:[#allocation63_spill] sm:$0xff] %v10275_v15  ;;  %v888_v50 = vadd.f32 %v887_v52, %v10150_v54  ;;  %v889_v37 = vpop.f32.mrb[6].mxu0  ;;  %2478 = vmatpush1.bf16.msra.mxu0 %v9323_v43  ;;  %v15286_v43 = vrot.slane %v10275_v15, 1  ;;  %v1452_v52 = vrot.slane %v10285_v28, 7  ;;  %vm10391_vm11 = vmand %vm484_vm6, %vm496_vm7  ;;  %vm1981_vm7 = vcmask 523264  }
 0x109   : > { %v1118_v36 = vmax.f32 %v886_v63, 0.0  ;;  %v890_v32 = vadd.f32 %v889_v37, %v10252_v6  ;;  %v891_v61 = vpop.f32.mrb[7].mxu0  ;;  %2479 = vmatprep.subr.bf16.mxu0 %v15268_v2  ;;  %v15281_v63 = vrot.slane %v10275_v15, 7 }
 0x10a   : > { %v1119_v60 = vmax.f32 %v888_v50, 0.0  ;;  %v892_v35 = vadd.f32 %v891_v61, %v10150_v54  ;;  %v9325_v50 = vld [vmem:[%s14888_s3 + $0x90] sm:$0xff]   ;;  %v1454_v19 = vsel %vm1451_vm2, %v1452_v52, %v15296_v30 }
 0x10b   : > { %v10302_v17 = vmul.f32 %v7731_v26, %v1118_v36  ;;  %v1120_v5 = vmax.f32 %v890_v32, 0.0  ;;  %v10319_v1 = vsel %vm1451_vm2, %v14959_v3, %v15281_v63  ;;  %v10336_v36 = vsel %vm1548_vm3, %v14958_v57, %v15286_v43  ;;  %2223 = vmatpush1.bf16.msra.mxu1 %v9325_v50  ;;  %v9326_v50 = vld [vmem:[%s14888_s3 + $0x98] sm:$0xff]  }
 0x10c   : > { %15282 = vst [vmem:[#allocation64_spill] sm:$0xff] %v10319_v1  ;;  %v10321_v32 = vmul.f32 %v7731_v26, %v1119_v60  ;;  %15287 = vst [vmem:[#allocation66_spill] sm:$0xff] %v10336_v36  ;;  %2224 = vmatprep.subr.bf16.mxu1 %v15268_v2  ;;  %v9327_v3 = vld [vmem:[%s14888_s3 + $0x58] sm:$0xff]   ;;  %v1550_v26 = vrot.slane %v10294_v33, 1 }
 0x10d   : > { %v10338_v61 = vmul.f32 0.0, %v1120_v5  ;;  %v1121_v5 = vmax.f32 %v892_v35, 0.0  ;;  %v1552_v57 = vrot.slane %v10302_v17, 1  ;;  %2480 = vmatpush1.bf16.msra.mxu0 %v9327_v3 }
 0x10e   : > { %15283 = vst [vmem:[#allocation65_spill] sm:$0xff] %v10321_v32  ;;  %v895_v63 = vpop.f32.mrb[8].mxu0  ;;  %3732 = vmatprep.subr.bf16.mxu0 %v15268_v2 }
 0x10f   : > { %v897_v43 = vpop.f32.mrb[9].mxu0  ;;  %v15297_v0 = vrot.slane %v10338_v61, 7  ;;  %2225 = vmatpush1.bf16.msra.mxu1 %v9326_v50  ;;  %v1554_v3 = vrot.slane %v10338_v61, 1 }
 0x110   : > { %v898_v60 = vadd.f32 %v897_v43, %v10150_v54  ;;  %v899_v35 = vpop.f32.mrb[10].mxu0  ;;  %2226 = vmatprep.subr.bf16.mxu1 %v15268_v2 }
 0x111   : > { %v900_v37 = vadd.f32 %v899_v35, %v10252_v6  ;;  %v901_v16 = vpop.f32.mrb[11].mxu0  ;;  %v1536_v20 = vsel %vm1451_vm2, %v15297_v0, %v1452_v52  ;;  %v896_v35 = vadd.f32 %v895_v63, %v10252_v6  ;;  %v10409_v52 = vmul.f32 0.0, %v1121_v5 }
 0x112   : > { %v1123_v56 = vmax.f32 %v898_v60, 0.0  ;;  %v902_v44 = vadd.f32 %v901_v16, %v10150_v54  ;;  %v8758_v30 = vpack.i.bf16 %v1454_v19, %v1536_v20  ;;  %v1553_v16 = vsel %vm1548_vm3, %v1550_v26, %v1552_v57 }
 0x113   : > { %15302 = vst [vmem:[#allocation70_spill] sm:$0xff] %v10409_v52  ;;  %v1124_v20 = vmax.f32 %v900_v37, 0.0  ;;  %v10419_v63 = vsel %vm10377_vm10, 1.0, %v15290_v9  ;;  %v10424_v5 = vsel %vm10391_vm11, 1.0, %v15290_v9  ;;  %v1551_v19 = vsel %vm1548_vm3, %v1549_v42, %v1550_v26  ;;  %2227 = vmatpush1.bf16.msra.mxu1 %v9328_v34  ;;  %v9329_v34 = vld [vmem:[%s14888_s3 + $0xa8] sm:$0xff]  }
 0x114   : > { %v1125_v60 = vmax.f32 %v902_v44, 0.0  ;;  %8759 = vrot.lane.b32.xlu1 %v8758_v30, %s15165_s15  ;;  %15303 = vst [vmem:[#allocation71_spill] sm:$0xff] %v10419_v63  ;;  %15304 = vst [vmem:[#allocation72_spill] sm:$0xff] %v10424_v5  ;;  %v10426_v50 = vmul.f32 0.0, %v1123_v56  ;;  %v10432_v44 = vsel %vm10401_vm12, 1.0, %v15290_v9  ;;  %v10435_v37 = vadd.s32 7, %v10235_v51  ;;  %2228 = vmatprep.subr.bf16.mxu1 %v15268_v2 }
 0x115   : > { %15305 = vst [vmem:[#allocation73_spill] sm:$0xff] %v10432_v44  ;;  %v1122_v30 = vmax.f32 %v896_v35, 0.0  ;;  %v8763_v56 = vpack.i.bf16 %v1553_v16, %v1551_v19  ;;  %v10445_v21 = vsel %vm1548_vm3, %v1552_v57, %v1554_v3  ;;  %v10466_v19 = vsel %vm1548_vm3, %v1554_v3, %v1549_v42 }
 0x116   : > { %v10439_v24 = vmul.f32 %v10363_v13, %v1125_v60  ;;  %v905_v40 = vpop.f32.mrb[12].mxu0  ;;  %v10453_v60 = vmul.f32 %v10363_v13, %v1124_v20  ;;  %v14975_v57 = vrot.slane %v10426_v50, 7  ;;  %v14977_v26 = vrot.slane %v10426_v50, 1 }
 0x117   : > { %v906_v0 = vadd.f32 %v905_v40, %v10252_v6  ;;  %v907_v45 = vpop.f32.mrb[13].mxu0  ;;  %2229 = vmatpush1.bf16.msra.mxu1 %v9329_v34  ;;  %v10462_v20 = vmul.f32 0.0, %v1122_v30  ;;  %v15310_v25 = vrot.slane %v10409_v52, 7 }
 0x118   : > { %v908_v40 = vadd.f32 %v907_v45, %v10150_v54  ;;  %v909_v43 = vpop.f32.mrb[14].mxu0  ;;  %8764 = vrot.lane.b32.xlu1 %v8763_v56, %s15165_s15  ;;  %2230 = vmatprep.subr.bf16.mxu1 %v15268_v2  ;;  %v15306_v30 = vrot.slane %v10439_v24, 7  ;;  %v15308_v3 = vrot.slane %v10439_v24, 1  ;;  %v15309_v45 = vrot.slane %v10272_v18, 7 }
 0x119   : > { %v1126_v55 = vmax.f32 %v906_v0, 0.0  ;;  %v910_v62 = vadd.f32 %v909_v43, %v10252_v6  ;;  %v911_v35 = vpop.f32.mrb[15].mxu0  ;;  %v9330_v43 = vld [vmem:[%s14888_s3 + $0xb0] sm:$0xff]   ;;  %v1556_v41 = vrot.slane %v10462_v20, 1 }
 0x11a   : > { %v912_v16 = vadd.f32 %v911_v35, %v10150_v54  ;;  %v10482_v42 = vsel %vm1451_vm2, %v14975_v57, %v15306_v30  ;;  %v10489_v34 = vsel %vm1548_vm3, %v14977_v26, %v15308_v3  ;;  %v10493_v35 = vadd.s32 8, %v10235_v51 }
 0x11b   : > { %v10472_v56 = vmul.f32 %v10363_v13, %v1126_v55  ;;  %v1128_v0 = vmax.f32 %v910_v62, 0.0  ;;  %15307 = vst [vmem:[#allocation74_spill] sm:$0xff] %v10482_v42  ;;  %v1127_v55 = vmax.f32 %v908_v40, 0.0  ;;  %v10500_v30 = vsel %vm1451_vm2, %v15310_v25, %v15309_v45  ;;  %2231 = vmatpush1.bf16.msra.mxu1 %v9330_v43 }
 0x11c   : > { %15311 = vst [vmem:[#allocation75_spill] sm:$0xff] %v10500_v30  ;;  %v1455_v3 = vrot.slane %v10302_v17, 7  ;;  %v15312_v40 = vrot.slane %v10321_v32, 1  ;;  %v15313_v26 = vrot.slane %v10275_v15, 1  ;;  %v1129_v53 = vmax.f32 %v912_v16, 0.0  ;;  %2232 = vmatprep.subr.bf16.mxu1 %v15268_v2  ;;  %v9331_v16 = vld [vmem:[%s14888_s3 + $0xb8] sm:$0xff]  }
 0x11d   : > { %v10502_v57 = vmul.f32 0.0, %v1128_v0  ;;  %v1458_v45 = vrot.slane %v10462_v20, 7  ;;  %v15315_v0 = vrot.slane %v10453_v60, 7 }
 0x11e   : > { %v10512_v62 = vsel %vm1548_vm3, %v15313_v26, %v15312_v40  ;;  %v915_v25 = vpop.f32.mrb[16].mxu0  ;;  %v1559_v26 = vrot.slane %v10472_v56, 1  ;;  %v10527_v40 = vmul.f32 %v10363_v13, %v1127_v55 }
 0x11f   : > { %15314 = vst [vmem:[#allocation76_spill] sm:$0xff] %v10512_v62  ;;  %v1561_v43 = vrot.slane %v10502_v57, 1  ;;  %v916_v47 = vadd.f32 %v915_v25, %v10252_v6  ;;  %v917_v4 = vpop.f32.mrb[17].mxu0  ;;  %v1392_v22 = vrot.slane %v10502_v57, 7  ;;  %v1460_v48 = vsel %vm1451_vm2, %v1458_v45, %v15315_v0  ;;  %2233 = vmatpush1.bf16.msra.mxu1 %v9331_v16 }
 0x120   : > { %v918_v14 = vadd.f32 %v917_v4, %v10150_v54  ;;  %v919_v46 = vpop.f32.mrb[18].mxu0  ;;  %v1557_v25 = vrot.slane %v10453_v60, 1  ;;  %2704 = vmatprep.subr.bf16.mxu1 %v15268_v2  ;;  %v10540_v0 = vmul.f32 0.0, %v1129_v53 }
 0x121   : > { %v1130_v38 = vmax.f32 %v916_v47, 0.0  ;;  %v920_v31 = vadd.f32 %v919_v46, %v10252_v6  ;;  %v921_v27 = vpop.f32.mrb[19].mxu0  ;;  %v1537_v12 = vsel %vm1451_vm2, %v1392_v22, %v1458_v45  ;;  %v1562_v8 = vsel %vm1548_vm3, %v1559_v26, %v1561_v43 }
 0x122   : > { %v1131_v55 = vmax.f32 %v918_v14, 0.0  ;;  %v922_v49 = vadd.f32 %v921_v27, %v10150_v54  ;;  %v8748_v4 = vpack.i.bf16 %v1460_v48, %v1537_v12  ;;  %v1658_v29 = vsel %vm1548_vm3, %v1561_v43, %v1556_v41 }
 0x123   : > { %v1132_v10 = vmax.f32 %v920_v31, 0.0  ;;  %v8778_v47 = vpack.i.bf16 %v1658_v29, %v1562_v8  ;;  %v1560_v46 = vsel %vm1548_vm3, %v1557_v25, %v1559_v26  ;;  %v10543_v59 = vmul.f32 0.0, %v1130_v38 }
 0x124   : > { %v1133_v45 = vmax.f32 %v922_v49, 0.0  ;;  %8749 = vrot.lane.b32.xlu0 %v8748_v4, %s15165_s15  ;;  %v1461_v14 = vrot.slane %v10472_v56, 7  ;;  %v15316_v27 = vrot.slane %v10294_v33, 7  ;;  %v3214_v48 = vrot.slane %v10527_v40, 1 }
 0x125   : > { %v10552_v53 = vmul.f32 %v10368_v11, %v1132_v10  ;;  %8779 = vrot.lane.b32.xlu1 %v8778_v47, %s15165_s15  ;;  %v1558_v8 = vsel %vm1548_vm3, %v1556_v41, %v1557_v25  ;;  %v15318_v29 = vrot.slane %v10338_v61, 7  ;;  %v10559_v38 = vmul.f32 0.0, %v1131_v55 }
 0x126   : > { %v1456_v12 = vsel %vm1451_vm2, %v15316_v27, %v1455_v3  ;;  %v10562_v49 = vmul.f32 %v10368_v11, %v1133_v45  ;;  %v925_v43 = vpop.f32.mrb[20].mxu0  ;;  %v8753_v26 = vpack.i.bf16 %v1560_v46, %v1558_v8  ;;  %v1463_v16 = vsel %vm1451_vm2, %v1461_v14, %v1392_v22 }
 0x127   : > { %15317 = vst [vmem:[#allocation77_spill] sm:$0xff] %v10552_v53  ;;  %v1457_v31 = vsel %vm1451_vm2, %v1455_v3, %v15318_v29  ;;  %15319 = vst [vmem:[#allocation78_spill] sm:$0xff] %v10559_v38  ;;  %v3216_v4 = vrot.slane %v10540_v0, 1  ;;  %v926_v47 = vadd.f32 %v925_v43, %v10252_v6  ;;  %v927_v41 = vpop.f32.mrb[21].mxu0  ;;  %v1464_v3 = vrot.slane %v10543_v59, 7 }
 0x128   : > { %15320 = vst [vmem:[#allocation79_spill] sm:$0xff] %v10562_v49  ;;  %v1563_v55 = vrot.slane %v10543_v59, 1  ;;  %v928_v45 = vadd.f32 %v927_v41, %v10150_v54  ;;  %v929_v27 = vpop.f32.mrb[22].mxu0  ;;  %8754 = vrot.lane.b32.xlu0 %v8753_v26, %s15165_s15  ;;  %v15321_v22 = vrot.slane %v10453_v60, 7  ;;  %v15322_v43 = vpack.i.bf16 %v10466_v19, %v10445_v21 }
 0x129   : > { %v1134_v8 = vmax.f32 %v926_v47, 0.0  ;;  %v930_v29 = vadd.f32 %v929_v27, %v10252_v6  ;;  %v931_v25 = vpop.f32.mrb[23].mxu0  ;;  %v1564_v39 = vrot.slane %v10552_v53, 1  ;;  %v1465_v26 = vrot.slane %v10552_v53, 7 }
 0x12a   : > { %v1462_v46 = vsel %vm1451_vm2, %v15321_v22, %v1461_v14  ;;  %8784 = vrot.lane.b32.xlu1 %v15322_v43, %s15165_s15  ;;  %v1135_v41 = vmax.f32 %v928_v45, 0.0  ;;  %v932_v23 = vadd.f32 %v931_v25, %v10150_v54  ;;  %v15324_v22 = vrot.slane %v10426_v50, 7 }
 0x12b   : > { %v8768_v10 = vpack.i.bf16 %v1463_v16, %v1462_v46  ;;  %v10588_v47 = vmul.f32 %v10368_v11, %v1134_v8  ;;  %v1136_v27 = vmax.f32 %v930_v29, 0.0  ;;  %v15325_v21 = vrot.slane %v10540_v0, 7 }
 0x12c   : > { %v15327_v16 = vrot.slane %v10439_v24, 1  ;;  %v1137_v46 = vmax.f32 %v932_v23, 0.0  ;;  %v8773_v43 = vpack.i.bf16 %v1457_v31, %v1456_v12  ;;  %v10611_v7 = vmul.f32 %v10368_v11, %v1135_v41 }
 0x12d   : > { %15323 = vst [vmem:[#allocation80_spill] sm:$0xff] %v10588_v47  ;;  %v10595_v19 = vsel %vm1451_vm2, %v15325_v21, %v15324_v22  ;;  %8769 = vrot.lane.b32.xlu0 %v8768_v10, %s15165_s15  ;;  %v10606_v14 = vmul.f32 0.0, %v1136_v27  ;;  %v1566_v22 = vrot.slane %v10588_v47, 1  ;;  %v3217_v21 = vsel %vm1548_vm3, %v3214_v48, %v3216_v4 }
 0x12e   : > { %15326 = vst [vmem:[#allocation81_spill] sm:$0xff] %v10595_v19  ;;  %v3215_v25 = vsel %vm1548_vm3, %v15327_v16, %v3214_v48  ;;  %15329 = vst [vmem:[#allocation83_spill] sm:$0xff] %v10611_v7  ;;  %v935_v16 = vpop.f32.mrb[24].mxu0  ;;  %v1565_v23 = vsel %vm1548_vm3, %v1563_v55, %v1564_v39  ;;  %v1466_v10 = vsel %vm1451_vm2, %v1464_v3, %v1465_v26  ;;  %v15330_v12 = vrot.slane %v10426_v50, 1 }
 0x12f   : > { %v10603_v8 = vpack.c.bf16 %v3215_v25, %v10489_v34  ;;  %v1393_v31 = vrot.slane %v10606_v14, 7  ;;  %v1568_v27 = vrot.slane %v10606_v14, 1  ;;  %v936_v25 = vadd.f32 %v935_v16, %v10252_v6  ;;  %v937_v29 = vpop.f32.mrb[25].mxu0 }
 0x130   : > { %v3349_v34 = vsel %vm1548_vm3, %v3216_v4, %v15330_v12  ;;  %v1567_v48 = vsel %vm1548_vm3, %v1564_v39, %v1566_v22  ;;  %v10622_v41 = vmul.f32 0.0, %v1137_v46  ;;  %v938_v45 = vadd.f32 %v937_v29, %v10150_v54  ;;  %v939_v11 = vpop.f32.mrb[26].mxu0 }
 0x131   : > { %15328 = vst [vmem:[#allocation82_spill] sm:$0xff] %v10603_v8  ;;  %8774 = vrot.lane.b32.xlu0 %v8773_v43, %s15165_s15  ;;  %v8793_v13 = vpack.i.bf16 %v1567_v48, %v1565_v23  ;;  %v1467_v36 = vrot.slane %v10588_v47, 7  ;;  %v1138_v4 = vmax.f32 %v936_v25, 0.0  ;;  %v940_v12 = vadd.f32 %v939_v11, %v10252_v6  ;;  %v941_v62 = vpop.f32.mrb[27].mxu0 }
 0x132   : > { %v1538_v1 = vsel %vm1451_vm2, %v1393_v31, %v1464_v3  ;;  %v1569_v16 = vsel %vm1548_vm3, %v1566_v22, %v1568_v27  ;;  %v1139_v30 = vmax.f32 %v938_v45, 0.0  ;;  %v942_v39 = vadd.f32 %v941_v62, %v10150_v54 }
 0x133   : > { %8794 = vrot.lane.b32.xlu1 %v8793_v13, %s15165_s15  ;;  %v8788_v46 = vpack.i.bf16 %v1466_v10, %v1538_v1  ;;  %v1659_v43 = vsel %vm1548_vm3, %v1568_v27, %v1563_v55  ;;  %v3218_v29 = vrot.slane %v10559_v38, 1  ;;  %v10634_v23 = vmul.f32 0.0, %v1138_v4 }
 0x134   : > { %v1140_v25 = vmax.f32 %v940_v12, 0.0  ;;  %v8803_v48 = vpack.i.bf16 %v1659_v43, %v1569_v16  ;;  %v10636_v11 = vmul.f32 0.0, %v1139_v30  ;;  %v1141_v8 = vmax.f32 %v942_v39, 0.0 }
 0x135   : > { %8789 = vrot.lane.b32.xlu0 %v8788_v46, %s15165_s15  ;;  %v1469_v3 = vsel %vm1451_vm2, %v1467_v36, %v1393_v31  ;;  %v3219_v1 = vrot.slane %v10562_v49, 1  ;;  %v1468_v45 = vsel %vm1451_vm2, %v1465_v26, %v1467_v36  ;;  %v3221_v30 = vrot.slane %v10611_v7, 1 }
 0x136   : > { %15331 = vst [vmem:[#allocation84_spill] sm:$0xff] %v10636_v11  ;;  %v10645_v55 = vmul.f32 %v10373_v58, %v1140_v25  ;;  %v10650_v22 = vmul.f32 %v10373_v58, %v1141_v8  ;;  %v945_v10 = vpop.f32.mrb[28].mxu0  ;;  %v8798_v31 = vpack.i.bf16 %v1469_v3, %v1468_v45  ;;  %v10653_v27 = vpack.c.bf16 %v3349_v34, %v3217_v21 }
 0x137   : > { %8804 = vrot.lane.b32.xlu1 %v8803_v48, %s15165_s15  ;;  %v3223_v12 = vrot.slane %v10622_v41, 1  ;;  %v946_v16 = vadd.f32 %v945_v10, %v10252_v6  ;;  %v947_v39 = vpop.f32.mrb[29].mxu0  ;;  %v15335_v36 = vrot.slane %v10527_v40, 7  ;;  %v15336_v26 = vrot.slane %v10439_v24, 7 }
 0x138   : > { %15332 = vst [vmem:[#allocation85_spill] sm:$0xff] %v10645_v55  ;;  %15333 = vst [vmem:[#allocation86_spill] sm:$0xff] %v10650_v22  ;;  %v1470_v46 = vrot.slane %v10634_v23, 7  ;;  %v1570_v43 = vrot.slane %v10634_v23, 1  ;;  %v948_v21 = vadd.f32 %v947_v39, %v10150_v54  ;;  %v949_v34 = vpop.f32.mrb[30].mxu0  ;;  %v1571_v10 = vrot.slane %v10645_v55, 1 }
 0x139   : > { %15334 = vst [vmem:[#allocation87_spill] sm:$0xff] %v10653_v27  ;;  %v10663_v8 = vsel %vm1451_vm2, %v15336_v26, %v15335_v36  ;;  %8799 = vrot.lane.b32.xlu0 %v8798_v31, %s15165_s15  ;;  %v1142_v48 = vmax.f32 %v946_v16, 0.0  ;;  %v950_v3 = vadd.f32 %v949_v34, %v10252_v6  ;;  %v951_v45 = vpop.f32.mrb[31].mxu0  ;;  %v1471_v36 = vrot.slane %v10645_v55, 7 }
 0x13a   : > { %15337 = vst [vmem:[#allocation88_spill] sm:$0xff] %v10663_v8  ;;  %v1143_v26 = vmax.f32 %v948_v21, 0.0  ;;  %v952_v62 = vadd.f32 %v951_v45, %v10150_v54  ;;  %v15338_v4 = vrot.slane %v10540_v0, 7  ;;  %v15339_v39 = vrot.slane %v10527_v40, 7 }
 0x13b   : > { %v3220_v25 = vsel %vm1548_vm3, %v3218_v29, %v3219_v1  ;;  %v10684_v16 = vmul.f32 %v10373_v58, %v1142_v48  ;;  %v1144_v34 = vmax.f32 %v950_v3, 0.0  ;;  %v3222_v13 = vsel %vm1548_vm3, %v3219_v1, %v3221_v30 }
 0x13c   : > { %v10680_v31 = vsel %vm1451_vm2, %v15339_v39, %v15338_v4  ;;  %v15342_v27 = vrot.slane %v10562_v49, 7  ;;  %v15343_v21 = vrot.slane %v10559_v38, 7  ;;  %v1145_v42 = vmax.f32 %v952_v62, 0.0 }
 0x13d   : > { %15340 = vst [vmem:[#allocation89_spill] sm:$0xff] %v10680_v31  ;;  %15341 = vst [vmem:[#allocation90_spill] sm:$0xff] %v10684_v16  ;;  %v10695_v4 = vpack.c.bf16 %v3222_v13, %v3220_v25  ;;  %v15347_v48 = vrot.slane %v10622_v41, 7  ;;  %v10705_v31 = vmul.f32 0.0, %v1144_v34  ;;  %v1573_v8 = vrot.slane %v10684_v16, 1 }
 0x13e   : > { %v10692_v45 = vsel %vm1451_vm2, %v15343_v21, %v15342_v27  ;;  %v15346_v39 = vmov %v15343_v21  ;;  %v3224_v27 = vsel %vm1548_vm3, %v3221_v30, %v3223_v12  ;;  %v10710_v21 = vmul.f32 %v10373_v58, %v1143_v26  ;;  %v955_v62 = vpop.f32.mrb[32].mxu0 }
 0x13f   : > { %15344 = vst [vmem:[#allocation91_spill] sm:$0xff] %v10692_v45  ;;  %15345 = vst [vmem:[#allocation92_spill] sm:$0xff] %v10695_v4  ;;  %v10702_v3 = vsel %vm1451_vm2, %v15347_v48, %v15346_v39  ;;  %v1572_v13 = vsel %vm1548_vm3, %v1570_v43, %v1571_v10  ;;  %v1472_v25 = vsel %vm1451_vm2, %v1470_v46, %v1471_v36  ;;  %v1394_v39 = vrot.slane %v10705_v31, 7  ;;  %v957_v1 = vpop.f32.mrb[33].mxu0 }
 0x140   : > { %15348 = vst [vmem:[#allocation93_spill] sm:$0xff] %v10702_v3  ;;  %15349 = vst [vmem:[#allocation94_spill] sm:$0xff] %v10705_v31  ;;  %v3350_v19 = vsel %vm1548_vm3, %v3223_v12, %v3218_v29  ;;  %v1575_v48 = vrot.slane %v10705_v31, 1  ;;  %v956_v34 = vadd.f32 %v955_v62, %v10252_v6  ;;  %v1574_v4 = vsel %vm1548_vm3, %v1571_v10, %v1573_v8  ;;  %v959_v58 = vpop.f32.mrb[34].mxu0 }
 0x141   : > { %15350 = vst [vmem:[#allocation95_spill] sm:$0xff] %v10710_v21  ;;  %v10719_v30 = vmul.f32 0.0, %v1145_v42  ;;  %v958_v26 = vadd.f32 %v957_v1, %v10150_v54  ;;  %v8813_v45 = vpack.i.bf16 %v1574_v4, %v1572_v13  ;;  %v1473_v3 = vrot.slane %v10684_v16, 7  ;;  %v961_v12 = vpop.f32.mrb[35].mxu0 }
 0x142   : > { %v1146_v15 = vmax.f32 %v956_v34, 0.0  ;;  %v960_v29 = vadd.f32 %v959_v58, %v10252_v6  ;;  %v1539_v18 = vsel %vm1451_vm2, %v1394_v39, %v1470_v46  ;;  %v1576_v52 = vsel %vm1548_vm3, %v1573_v8, %v1575_v48 }
 0x143   : > { %15351 = vst [vmem:[#allocation96_spill] sm:$0xff] %v10719_v30  ;;  %v1147_v62 = vmax.f32 %v958_v26, 0.0  ;;  %v962_v31 = vadd.f32 %v961_v12, %v10150_v54  ;;  %8814 = vrot.lane.b32.xlu1 %v8813_v45, %s15165_s15  ;;  %v8808_v42 = vpack.i.bf16 %v1472_v25, %v1539_v18  ;;  %v1660_v10 = vsel %vm1548_vm3, %v1575_v48, %v1570_v43 }
 0x144   : > { %v3225_v4 = vrot.slane %v10636_v11, 1  ;;  %v10730_v1 = vmul.f32 0.0, %v1146_v15  ;;  %v1148_v13 = vmax.f32 %v960_v29, 0.0  ;;  %v8823_v34 = vpack.i.bf16 %v1660_v10, %v1576_v52 }
 0x145   : > { %v10732_v58 = vmul.f32 0.0, %v1147_v62  ;;  %v1149_v16 = vmax.f32 %v962_v31, 0.0  ;;  %8809 = vrot.lane.b32.xlu0 %v8808_v42, %s15165_s15  ;;  %v1475_v8 = vsel %vm1451_vm2, %v1473_v3, %v1394_v39  ;;  %v3226_v43 = vrot.slane %v10650_v22, 1 }
 0x146   : > { %15352 = vst [vmem:[#allocation97_spill] sm:$0xff] %v10730_v1  ;;  %v10741_v45 = vmul.f32 %v10419_v63, %v1148_v13  ;;  %v1474_v15 = vsel %vm1451_vm2, %v1471_v36, %v1473_v3  ;;  %v3228_v52 = vrot.slane %v10710_v21, 1  ;;  %v965_v25 = vpop.f32.mrb[36].mxu0  ;;  %v10749_v48 = vpack.c.bf16 %v3350_v19, %v3224_v27 }
 0x147   : > { %15353 = vst [vmem:[#allocation98_spill] sm:$0xff] %v10732_v58  ;;  %v10746_v31 = vmul.f32 %v10419_v63, %v1149_v16  ;;  %8824 = vrot.lane.b32.xlu1 %v8823_v34, %s15165_s15  ;;  %v8818_v39 = vpack.i.bf16 %v1475_v8, %v1474_v15  ;;  %v3230_v29 = vrot.slane %v10719_v30, 1  ;;  %v966_v12 = vadd.f32 %v965_v25, %v10252_v6  ;;  %v967_v62 = vpop.f32.mrb[37].mxu0 }
 0x148   : > { %15354 = vst [vmem:[#allocation99_spill] sm:$0xff] %v10741_v45  ;;  %15356 = vst [vmem:[#allocation101_spill] sm:$0xff] %v10749_v48  ;;  %v15357_v36 = vrot.slane %v10611_v7, 7  ;;  %v15358_v3 = vrot.slane %v10562_v49, 7  ;;  %v1476_v42 = vrot.slane %v10730_v1, 7  ;;  %v1577_v10 = vrot.slane %v10730_v1, 1 }
 0x149   : > { %15355 = vst [vmem:[#allocation100_spill] sm:$0xff] %v10746_v31  ;;  %v968_v19 = vadd.f32 %v967_v62, %v10150_v54  ;;  %v969_v27 = vpop.f32.mrb[38].mxu0  ;;  %8819 = vrot.lane.b32.xlu0 %v8818_v39, %s15165_s15  ;;  %v1150_v34 = vmax.f32 %v966_v12, 0.0  ;;  %v1578_v25 = vrot.slane %v10741_v45, 1  ;;  %v15360_v26 = vrot.slane %v10622_v41, 7 }
 0x14a   : > { %v10759_v16 = vsel %vm1451_vm2, %v15358_v3, %v15357_v36  ;;  %v970_v8 = vadd.f32 %v969_v27, %v10252_v6  ;;  %v971_v15 = vpop.f32.mrb[39].mxu0  ;;  %v1477_v36 = vrot.slane %v10741_v45, 7  ;;  %v15361_v62 = vrot.slane %v10611_v7, 7 }
 0x14b   : > { %15359 = vst [vmem:[#allocation102_spill] sm:$0xff] %v10759_v16  ;;  %v1151_v3 = vmax.f32 %v968_v19, 0.0  ;;  %v972_v46 = vadd.f32 %v971_v15, %v10150_v54  ;;  %v3227_v13 = vsel %vm1548_vm3, %v3225_v4, %v3226_v43  ;;  %v10780_v12 = vmul.f32 %v10419_v63, %v1150_v34 }
 0x14c   : > { %v10776_v39 = vsel %vm1451_vm2, %v15361_v62, %v15360_v26  ;;  %v1152_v27 = vmax.f32 %v970_v8, 0.0  ;;  %v3229_v18 = vsel %vm1548_vm3, %v3226_v43, %v3228_v52  ;;  %v15364_v48 = vrot.slane %v10650_v22, 7 }
 0x14d   : > { %15362 = vst [vmem:[#allocation103_spill] sm:$0xff] %v10776_v39  ;;  %15363 = vst [vmem:[#allocation104_spill] sm:$0xff] %v10780_v12  ;;  %v15365_v19 = vrot.slane %v10636_v11, 7  ;;  %v1153_v16 = vmax.f32 %v972_v46, 0.0  ;;  %v7726_v45 = vadd.s32 4294967294, %v10435_v37  ;;  %v10791_v26 = vpack.c.bf16 %v3229_v18, %v3227_v13 }
 0x14e   : > { %v15369_v34 = vrot.slane %v10719_v30, 7  ;;  %v10800_v43 = vmul.f32 0.0, %v1152_v27  ;;  %v1580_v39 = vrot.slane %v10780_v12, 1  ;;  %v10804_v1 = vadd.s32 4294967294, %v10493_v35  ;;  %v975_v18 = vpop.f32.mrb[40].mxu0 }
 0x14f   : > { %v10788_v15 = vsel %vm1451_vm2, %v15365_v19, %v15364_v48  ;;  %15367 = vst [vmem:[#allocation106_spill] sm:$0xff] %v10791_v26  ;;  %v15368_v62 = vmov %v15365_v19  ;;  %v3231_v46 = vsel %vm1548_vm3, %v3228_v52, %v3230_v29  ;;  %v10808_v37 = vmul.f32 %v10419_v63, %v1151_v3  ;;  %v977_v35 = vpop.f32.mrb[41].mxu0 }
 0x150   : > { %15366 = vst [vmem:[#allocation105_spill] sm:$0xff] %v10788_v15  ;;  %v10798_v8 = vsel %vm1451_vm2, %v15369_v34, %v15368_v62  ;;  %15371 = vst [vmem:[#allocation108_spill] sm:$0xff] %v10800_v43  ;;  %v1579_v48 = vsel %vm1548_vm3, %v1577_v10, %v1578_v25  ;;  %v1478_v13 = vsel %vm1451_vm2, %v1476_v42, %v1477_v36  ;;  %v1395_v27 = vrot.slane %v10800_v43, 7  ;;  %v979_v63 = vpop.f32.mrb[42].mxu0 }
 0x151   : > { %15370 = vst [vmem:[#allocation107_spill] sm:$0xff] %v10798_v8  ;;  %15372 = vst [vmem:[#allocation109_spill] sm:$0xff] %v10808_v37  ;;  %v3351_v19 = vsel %vm1548_vm3, %v3230_v29, %v3225_v4  ;;  %v1582_v62 = vrot.slane %v10800_v43, 1  ;;  %v976_v34 = vadd.f32 %v975_v18, %v10252_v6  ;;  %v1581_v26 = vsel %vm1548_vm3, %v1578_v25, %v1580_v39  ;;  %v981_v29 = vpop.f32.mrb[43].mxu0 }
 0x152   : > { %v10817_v52 = vmul.f32 0.0, %v1153_v16  ;;  %v978_v3 = vadd.f32 %v977_v35, %v10150_v54  ;;  %v8833_v15 = vpack.i.bf16 %v1581_v26, %v1579_v48  ;;  %v1479_v8 = vrot.slane %v10780_v12, 7 }
 0x153   : > { %v1154_v11 = vmax.f32 %v976_v34, 0.0  ;;  %v980_v4 = vadd.f32 %v979_v63, %v10252_v6  ;;  %v1540_v38 = vsel %vm1451_vm2, %v1395_v27, %v1476_v42  ;;  %v1583_v43 = vsel %vm1548_vm3, %v1580_v39, %v1582_v62 }
 0x154   : > { %v1155_v18 = vmax.f32 %v978_v3, 0.0  ;;  %v982_v49 = vadd.f32 %v981_v29, %v10150_v54  ;;  %8834 = vrot.lane.b32.xlu1 %v8833_v15, %s15165_s15  ;;  %v8828_v16 = vpack.i.bf16 %v1478_v13, %v1540_v38  ;;  %v1661_v25 = vsel %vm1548_vm3, %v1582_v62, %v1577_v10 }
 0x155   : > { %v10827_v35 = vmul.f32 0.0, %v1154_v11  ;;  %v1156_v26 = vmax.f32 %v980_v4, 0.0  ;;  %v8843_v48 = vpack.i.bf16 %v1661_v25, %v1583_v43  ;;  %vm486_vm13 = vcmp.ge.s32.totalorder %v7726_v45, 0 }
 0x156   : > { %v10829_v34 = vmul.f32 0.0, %v1155_v18  ;;  %v1157_v63 = vmax.f32 %v982_v49, 0.0  ;;  %8829 = vrot.lane.b32.xlu0 %v8828_v16, %s15165_s15  ;;  %v1481_v42 = vsel %vm1451_vm2, %v1479_v8, %v1395_v27  ;;  %v1480_v38 = vsel %vm1451_vm2, %v1477_v36, %v1479_v8  ;;  %v985_v49 = vpop.f32.mrb[44].mxu0 }
 0x157   : > { %15373 = vst [vmem:[#allocation110_spill] sm:$0xff] %v10827_v35  ;;  %v10836_v15 = vmul.f32 %v10424_v5, %v1156_v26  ;;  %vm498_vm14 = vcmp.lt.s32.totalorder %v7726_v45, 16  ;;  %vm487_vm15 = vcmp.ge.s32.totalorder %v10804_v1, 0  ;;  %v3093_v11 = vrot.slane %v10710_v21, 7  ;;  %v987_v8 = vpop.f32.mrb[45].mxu0 }
 0x158   : > { %15374 = vst [vmem:[#allocation111_spill] sm:$0xff] %v10829_v34  ;;  %v10842_v10 = vmul.f32 %v10424_v5, %v1157_v63  ;;  %8844 = vrot.lane.b32.xlu1 %v8843_v48, %s15165_s15  ;;  %v8838_v43 = vpack.i.bf16 %v1481_v42, %v1480_v38  ;;  %vm499_vm4 = vcmp.lt.s32.totalorder %v10804_v1, 16  ;;  %v15028_v13 = vrot.slane %v10732_v58, 1  ;;  %v989_v18 = vpop.f32.mrb[46].mxu0  ;;  %vm10857_vm5 = vmand %vm486_vm13, %vm498_vm14 }
 0x159   : > { %15375 = vst [vmem:[#allocation112_spill] sm:$0xff] %v10836_v15  ;;  %v3233_v27 = vrot.slane %v10746_v31, 1  ;;  %v986_v36 = vadd.f32 %v985_v49, %v10252_v6  ;;  %v10849_v62 = vpack.c.bf16 %v3351_v19, %v3231_v46  ;;  %v15033_v3 = vrot.slane %v10808_v37, 1  ;;  %v991_v48 = vpop.f32.mrb[47].mxu0  ;;  %vm511_vm6 = vmand %vm487_vm15, %vm499_vm4 }
 0x15a   : > { %15376 = vst [vmem:[#allocation113_spill] sm:$0xff] %v10842_v10  ;;  %v1482_v4 = vrot.slane %v10827_v35, 7  ;;  %v988_v29 = vadd.f32 %v987_v8, %v10150_v54  ;;  %8839 = vrot.lane.b32.xlu0 %v8838_v43, %s15165_s15  ;;  %v1584_v46 = vrot.slane %v10827_v35, 1  ;;  %v990_v26 = vadd.f32 %v989_v18, %v10252_v6 }
 0x15b   : > { %15377 = vst [vmem:[#allocation114_spill] sm:$0xff] %v10849_v62  ;;  %v1158_v19 = vmax.f32 %v986_v36, 0.0  ;;  %v1585_v63 = vrot.slane %v10836_v15, 1  ;;  %v992_v42 = vadd.f32 %v991_v48, %v10150_v54  ;;  %v1483_v38 = vrot.slane %v10836_v15, 7 }
 0x15c   : > { %v1159_v45 = vmax.f32 %v988_v29, 0.0  ;;  %v15380_v49 = vrot.slane %v10650_v22, 7  ;;  %v1160_v8 = vmax.f32 %v990_v26, 0.0  ;;  %v15383_v18 = vrot.slane %v10719_v30, 7 }
 0x15d   : > { %v10878_v36 = vmul.f32 %v10424_v5, %v1158_v19  ;;  %v3234_v1 = vsel %vm1548_vm3, %v15028_v13, %v3233_v27  ;;  %v1161_v29 = vmax.f32 %v992_v42, 0.0  ;;  %v10891_v48 = vsel %vm10857_vm5, 1.0, %v15290_v9 }
 0x15e   : > { %v10875_v43 = vsel %vm1451_vm2, %v15380_v49, %v3093_v11  ;;  %v10883_v25 = vsel %vm1451_vm2, %v3093_v11, %v15383_v18  ;;  %15385 = vst [vmem:[#allocation118_spill] sm:$0xff] %v10891_v48  ;;  %v10894_v49 = vsel %vm511_vm6, 1.0, %v15290_v9  ;;  %v10897_v19 = vadd.s32 9, %v10235_v51  ;;  %v995_v13 = vpop.f32.mrb[48].mxu0 }
 0x15f   : > { %15381 = vst [vmem:[#allocation115_spill] sm:$0xff] %v10875_v43  ;;  %15382 = vst [vmem:[#allocation116_spill] sm:$0xff] %v10878_v36  ;;  %v10900_v11 = vmul.f32 0.0, %v1160_v8  ;;  %v1587_v18 = vrot.slane %v10878_v36, 1  ;;  %v3236_v42 = vsel %vm1548_vm3, %v3233_v27, %v15033_v3  ;;  %v10908_v39 = vmul.f32 %v10424_v5, %v1159_v45  ;;  %v997_v15 = vpop.f32.mrb[49].mxu0 }
 0x160   : > { %15384 = vst [vmem:[#allocation117_spill] sm:$0xff] %v10883_v25  ;;  %15386 = vst [vmem:[#allocation119_spill] sm:$0xff] %v10894_v49  ;;  %v1586_v62 = vsel %vm1548_vm3, %v1584_v46, %v1585_v63  ;;  %v1484_v25 = vsel %vm1451_vm2, %v1482_v4, %v1483_v38  ;;  %v996_v43 = vadd.f32 %v995_v13, %v10252_v6  ;;  %v10916_v27 = vmul.f32 0.0, %v1161_v29  ;;  %v999_v45 = vpop.f32.mrb[50].mxu0 }
 0x161   : > { %15387 = vst [vmem:[#allocation120_spill] sm:$0xff] %v10900_v11  ;;  %15388 = vst [vmem:[#allocation121_spill] sm:$0xff] %v10908_v39  ;;  %v1396_v26 = vrot.slane %v10900_v11, 7  ;;  %v1589_v8 = vrot.slane %v10900_v11, 1  ;;  %v1588_v35 = vsel %vm1548_vm3, %v1585_v63, %v1587_v18  ;;  %v998_v3 = vadd.f32 %v997_v15, %v10150_v54  ;;  %v1001_v21 = vpop.f32.mrb[51].mxu0 }
 0x162   : > { %15389 = vst [vmem:[#allocation122_spill] sm:$0xff] %v10916_v27  ;;  %v8853_v16 = vpack.i.bf16 %v1588_v35, %v1586_v62  ;;  %v1485_v5 = vrot.slane %v10878_v36, 7  ;;  %v1162_v12 = vmax.f32 %v996_v43, 0.0  ;;  %v1000_v22 = vadd.f32 %v999_v45, %v10252_v6 }
 0x163   : > { %v1541_v30 = vsel %vm1451_vm2, %v1396_v26, %v1482_v4  ;;  %v1590_v11 = vsel %vm1548_vm3, %v1587_v18, %v1589_v8  ;;  %v1163_v13 = vmax.f32 %v998_v3, 0.0  ;;  %v1002_v7 = vadd.f32 %v1001_v21, %v10150_v54 }
 0x164   : > { %8854 = vrot.lane.b32.xlu1 %v8853_v16, %s15165_s15  ;;  %v8848_v63 = vpack.i.bf16 %v1484_v25, %v1541_v30  ;;  %v1662_v15 = vsel %vm1548_vm3, %v1589_v8, %v1584_v46  ;;  %v3099_v35 = vrot.slane %v10808_v37, 7  ;;  %v10927_v62 = vmul.f32 0.0, %v1162_v12 }
 0x165   : > { %v1164_v43 = vmax.f32 %v1000_v22, 0.0  ;;  %v8863_v29 = vpack.i.bf16 %v1662_v15, %v1590_v11  ;;  %v10929_v45 = vmul.f32 0.0, %v1163_v13  ;;  %v1165_v36 = vmax.f32 %v1002_v7, 0.0 }
 0x166   : > { %15390 = vst [vmem:[#allocation123_spill] sm:$0xff] %v10927_v62  ;;  %8849 = vrot.lane.b32.xlu0 %v8848_v63, %s15165_s15  ;;  %v1487_v3 = vsel %vm1451_vm2, %v1485_v5, %v1396_v26  ;;  %v3016_v30 = vrot.slane %v10817_v52, 7  ;;  %v3237_v4 = vrot.slane %v10817_v52, 1  ;;  %v1486_v22 = vsel %vm1451_vm2, %v1483_v38, %v1485_v5  ;;  %v1005_v46 = vpop.f32.mrb[52].mxu0 }
 0x167   : > { %v10938_v25 = vmul.f32 %v10432_v44, %v1164_v43  ;;  %v10943_v7 = vmul.f32 %v10432_v44, %v1165_v36  ;;  %v8858_v26 = vpack.i.bf16 %v1487_v3, %v1486_v22  ;;  %v10946_v11 = vpack.c.bf16 %v3236_v42, %v3234_v1  ;;  %v1007_v13 = vpop.f32.mrb[53].mxu0 }
 0x168   : > { %8864 = vrot.lane.b32.xlu1 %v8863_v29, %s15165_s15  ;;  %v3240_v18 = vrot.slane %v10842_v10, 1  ;;  %v1006_v8 = vadd.f32 %v1005_v46, %v10252_v6  ;;  %v15394_v5 = vrot.slane %v10746_v31, 7  ;;  %v15395_v38 = vrot.slane %v10732_v58, 7  ;;  %v1009_v42 = vpop.f32.mrb[54].mxu0 }
 0x169   : > { %15391 = vst [vmem:[#allocation124_spill] sm:$0xff] %v10938_v25  ;;  %15392 = vst [vmem:[#allocation125_spill] sm:$0xff] %v10943_v7  ;;  %v1488_v63 = vrot.slane %v10927_v62, 7  ;;  %v1591_v15 = vrot.slane %v10927_v62, 1  ;;  %v1008_v1 = vadd.f32 %v1007_v13, %v10150_v54  ;;  %v1010_v3 = vadd.f32 %v1009_v42, %v10252_v6  ;;  %v1011_v22 = vpop.f32.mrb[55].mxu0 }
 0x16a   : > { %15393 = vst [vmem:[#allocation126_spill] sm:$0xff] %v10946_v11  ;;  %v10956_v36 = vsel %vm1451_vm2, %v15395_v38, %v15394_v5  ;;  %8859 = vrot.lane.b32.xlu0 %v8858_v26, %s15165_s15  ;;  %v1166_v29 = vmax.f32 %v1006_v8, 0.0  ;;  %v1592_v46 = vrot.slane %v10938_v25, 1  ;;  %v1489_v5 = vrot.slane %v10938_v25, 7 }
 0x16b   : > { %15396 = vst [vmem:[#allocation127_spill] sm:$0xff] %v10956_v36  ;;  %v1167_v38 = vmax.f32 %v1008_v1, 0.0  ;;  %v1012_v21 = vadd.f32 %v1011_v22, %v10150_v54  ;;  %v15397_v16 = vrot.slane %v10732_v58, 7  ;;  %v15399_v26 = vrot.slane %v10808_v37, 1 }
 0x16c   : > { %v10977_v8 = vmul.f32 %v10432_v44, %v1166_v29  ;;  %v1168_v42 = vmax.f32 %v1010_v3, 0.0  ;;  %v15401_v12 = vrot.slane %v10732_v58, 1  ;;  %v15402_v1 = vrot.slane %v10746_v31, 7 }
 0x16d   : > { %v10971_v13 = vsel %vm1451_vm2, %v3016_v30, %v15397_v16  ;;  %v3238_v43 = vsel %vm1548_vm3, %v15399_v26, %v3237_v4  ;;  %v1169_v36 = vmax.f32 %v1012_v21, 0.0  ;;  %v10988_v16 = vadd.s32 4294967294, %v10897_v19 }
 0x16e   : > { %15398 = vst [vmem:[#allocation128_spill] sm:$0xff] %v10971_v13  ;;  %15400 = vst [vmem:[#allocation129_spill] sm:$0xff] %v10977_v8  ;;  %v3352_v11 = vsel %vm1548_vm3, %v3237_v4, %v15401_v12  ;;  %v10985_v22 = vsel %vm1451_vm2, %v15402_v1, %v3099_v35  ;;  %v10993_v26 = vsel %vm1451_vm2, %v3099_v35, %v3016_v30  ;;  %v10996_v3 = vmul.f32 0.0, %v1168_v42  ;;  %v1015_v19 = vpop.f32.mrb[56].mxu0 }
 0x16f   : > { %15403 = vst [vmem:[#allocation130_spill] sm:$0xff] %v10985_v22  ;;  %v10990_v13 = vpack.c.bf16 %v3352_v11, %v3238_v43  ;;  %15405 = vst [vmem:[#allocation132_spill] sm:$0xff] %v10993_v26  ;;  %v1594_v4 = vrot.slane %v10977_v8, 1  ;;  %v15407_v12 = vrot.slane %v10829_v34, 1  ;;  %v11003_v21 = vmul.f32 %v10432_v44, %v1167_v38  ;;  %v1017_v26 = vpop.f32.mrb[57].mxu0 }
 0x170   : > { %15406 = vst [vmem:[#allocation133_spill] sm:$0xff] %v10996_v3  ;;  %v1593_v11 = vsel %vm1548_vm3, %v1591_v15, %v1592_v46  ;;  %v1490_v43 = vsel %vm1451_vm2, %v1488_v63, %v1489_v5  ;;  %v15408_v35 = vrot.slane %v10908_v39, 1  ;;  %v1397_v42 = vrot.slane %v10996_v3, 7  ;;  %v1019_v22 = vpop.f32.mrb[58].mxu0 }
 0x171   : > { %15404 = vst [vmem:[#allocation131_spill] sm:$0xff] %v10990_v13  ;;  %v3241_v1 = vsel %vm1548_vm3, %v15407_v12, %v3240_v18  ;;  %v1596_v29 = vrot.slane %v10996_v3, 1  ;;  %v1016_v13 = vadd.f32 %v1015_v19, %v10252_v6  ;;  %v1595_v12 = vsel %vm1548_vm3, %v1592_v46, %v1594_v4 }
 0x172   : > { %v3243_v30 = vsel %vm1548_vm3, %v3240_v18, %v15408_v35  ;;  %v11014_v38 = vmul.f32 0.0, %v1169_v36  ;;  %v1018_v44 = vadd.f32 %v1017_v26, %v10150_v54  ;;  %v8873_v25 = vpack.i.bf16 %v1595_v12, %v1593_v11  ;;  %v1021_v35 = vpop.f32.mrb[59].mxu0 }
 0x173   : > { %v1491_v62 = vrot.slane %v10977_v8, 7  ;;  %v1170_v58 = vmax.f32 %v1016_v13, 0.0  ;;  %v1020_v18 = vadd.f32 %v1019_v22, %v10252_v6  ;;  %v1542_v31 = vsel %vm1451_vm2, %v1397_v42, %v1488_v63 }
 0x174   : > { %v1597_v3 = vsel %vm1548_vm3, %v1594_v4, %v1596_v29  ;;  %v1171_v19 = vmax.f32 %v1018_v44, 0.0  ;;  %v1022_v37 = vadd.f32 %v1021_v35, %v10150_v54  ;;  %8874 = vrot.lane.b32.xlu1 %v8873_v25, %s15165_s15  ;;  %v8868_v36 = vpack.i.bf16 %v1490_v43, %v1542_v31 }
 0x175   : > { %v1663_v46 = vsel %vm1548_vm3, %v1596_v29, %v1591_v15  ;;  %v3103_v26 = vrot.slane %v10842_v10, 7  ;;  %v11025_v11 = vmul.f32 0.0, %v1170_v58  ;;  %v1172_v13 = vmax.f32 %v1020_v18, 0.0 }
 0x176   : > { %v8883_v12 = vpack.i.bf16 %v1663_v46, %v1597_v3  ;;  %v11027_v22 = vmul.f32 0.0, %v1171_v19  ;;  %v1173_v8 = vmax.f32 %v1022_v37, 0.0  ;;  %8869 = vrot.lane.b32.xlu0 %v8868_v36, %s15165_s15  ;;  %v1493_v44 = vsel %vm1451_vm2, %v1491_v62, %v1397_v42  ;;  %v1025_v3 = vpop.f32.mrb[60].mxu0 }
 0x177   : > { %15409 = vst [vmem:[#allocation134_spill] sm:$0xff] %v11025_v11  ;;  %v3105_v31 = vrot.slane %v10908_v39, 7  ;;  %v3017_v25 = vrot.slane %v10916_v27, 7  ;;  %v11036_v15 = vmul.f32 %v10891_v48, %v1172_v13  ;;  %v1492_v58 = vsel %vm1451_vm2, %v1489_v5, %v1491_v62  ;;  %v1027_v19 = vpop.f32.mrb[61].mxu0 }
 0x178   : > { %15410 = vst [vmem:[#allocation135_spill] sm:$0xff] %v11027_v22  ;;  %v3244_v29 = vrot.slane %v10916_v27, 1  ;;  %v11041_v37 = vmul.f32 %v10891_v48, %v1173_v8  ;;  %8884 = vrot.lane.b32.xlu1 %v8883_v12, %s15165_s15  ;;  %v8878_v4 = vpack.i.bf16 %v1493_v44, %v1492_v58  ;;  %v11044_v43 = vpack.c.bf16 %v3243_v30, %v3241_v1  ;;  %v1029_v1 = vpop.f32.mrb[62].mxu0 }
 0x179   : > { %15411 = vst [vmem:[#allocation136_spill] sm:$0xff] %v11036_v15  ;;  %v3247_v18 = vrot.slane %v10943_v7, 1  ;;  %v1026_v35 = vadd.f32 %v1025_v3, %v10252_v6  ;;  %v15414_v62 = vrot.slane %v10829_v34, 7  ;;  %v1494_v36 = vrot.slane %v11025_v11, 7  ;;  %v1031_v58 = vpop.f32.mrb[63].mxu0 }
 0x17a   : > { %15412 = vst [vmem:[#allocation137_spill] sm:$0xff] %v11041_v37  ;;  %15413 = vst [vmem:[#allocation138_spill] sm:$0xff] %v11044_v43  ;;  %v1028_v46 = vadd.f32 %v1027_v19, %v10150_v54  ;;  %8879 = vrot.lane.b32.xlu0 %v8878_v4, %s15165_s15  ;;  %v1598_v13 = vrot.slane %v11025_v11, 1  ;;  %v1030_v44 = vadd.f32 %v1029_v1, %v10252_v6  ;;  %v1599_v3 = vrot.slane %v11036_v15, 1 }
 0x17b   : > { %v11052_v5 = vsel %vm1451_vm2, %v15414_v62, %v3103_v26  ;;  %v1174_v12 = vmax.f32 %v1026_v35, 0.0  ;;  %v1032_v62 = vadd.f32 %v1031_v58, %v10150_v54  ;;  %v1495_v63 = vrot.slane %v11036_v15, 7 }
 0x17c   : > { %15415 = vst [vmem:[#allocation139_spill] sm:$0xff] %v11052_v5  ;;  %v15416_v19 = vrot.slane %v10829_v34, 7  ;;  %v15418_v4 = vrot.slane %v10908_v39, 1  ;;  %v1176_v1 = vmax.f32 %v1030_v44, 0.0  ;;  %v15420_v42 = vrot.slane %v10829_v34, 1 }
 0x17d   : > { %v11074_v35 = vmul.f32 %v10891_v48, %v1174_v12  ;;  %v11080_v58 = vsel %vm1451_vm2, %v3103_v26, %v3105_v31  ;;  %v1177_v5 = vmax.f32 %v1032_v62, 0.0  ;;  %v461_v15 = vadd.s32 10, %v10235_v51 }
 0x17e   : > { %v11068_v8 = vsel %vm1451_vm2, %v3017_v25, %v15416_v19  ;;  %v3245_v30 = vsel %vm1548_vm3, %v15418_v4, %v3244_v29  ;;  %v3353_v43 = vsel %vm1548_vm3, %v3244_v29, %v15420_v42  ;;  %15421 = vst [vmem:[#allocation142_spill] sm:$0xff] %v11080_v58  ;;  %v11088_v4 = vmul.f32 0.0, %v1176_v1  ;;  %v1035_v42 = vpop.f32.mrb[64].mxu0 }
 0x17f   : > { %15417 = vst [vmem:[#allocation140_spill] sm:$0xff] %v11068_v8  ;;  %15419 = vst [vmem:[#allocation141_spill] sm:$0xff] %v11074_v35  ;;  %v11083_v19 = vpack.c.bf16 %v3353_v43, %v3245_v30  ;;  %v11086_v8 = vsel %vm1451_vm2, %v3105_v31, %v3017_v25  ;;  %v1601_v12 = vrot.slane %v11074_v35, 1  ;;  %v462_v44 = vadd.s32 11, %v10235_v51 }
 0x180   : > { %15423 = vst [vmem:[#allocation144_spill] sm:$0xff] %v11086_v8  ;;  %15424 = vst [vmem:[#allocation145_spill] sm:$0xff] %v11088_v4  ;;  %v15425_v11 = vrot.slane %v10929_v45, 1  ;;  %v1175_v26 = vmax.f32 %v1028_v46, 0.0  ;;  %v1600_v62 = vsel %vm1548_vm3, %v1598_v13, %v1599_v3  ;;  %v1496_v43 = vsel %vm1451_vm2, %v1494_v36, %v1495_v63 }
 0x181   : > { %15422 = vst [vmem:[#allocation143_spill] sm:$0xff] %v11083_v19  ;;  %v15426_v30 = vrot.slane %v11003_v21, 1  ;;  %v1398_v25 = vrot.slane %v11088_v4, 7  ;;  %v1603_v1 = vrot.slane %v11088_v4, 1  ;;  %v1036_v51 = vadd.f32 %v1035_v42, %v10252_v6  ;;  %v1037_v19 = vpop.f32.mrb[65].mxu0 }
 0x182   : > { %v3248_v29 = vsel %vm1548_vm3, %v15425_v11, %v3247_v18  ;;  %v1602_v8 = vsel %vm1548_vm3, %v1599_v3, %v1601_v12  ;;  %v11104_v11 = vmul.f32 0.0, %v1177_v5  ;;  %v1038_v46 = vadd.f32 %v1037_v19, %v10150_v54  ;;  %v1039_v58 = vpop.f32.mrb[66].mxu0 }
 0x183   : > { %v3250_v31 = vsel %vm1548_vm3, %v3247_v18, %v15426_v30  ;;  %v8893_v34 = vpack.i.bf16 %v1602_v8, %v1600_v62  ;;  %v1497_v10 = vrot.slane %v11074_v35, 7  ;;  %v1178_v39 = vmax.f32 %v1036_v51, 0.0  ;;  %v1041_v30 = vpop.f32.mrb[67].mxu0 }
 0x184   : > { %15427 = vst [vmem:[#allocation146_spill] sm:$0xff] %v11104_v11  ;;  %v1040_v18 = vadd.f32 %v1039_v58, %v10252_v6  ;;  %v1543_v27 = vsel %vm1451_vm2, %v1398_v25, %v1494_v36  ;;  %v1604_v4 = vsel %vm1548_vm3, %v1601_v12, %v1603_v1  ;;  %v11112_v42 = vmul.f32 %v10891_v48, %v1175_v26 }
 0x185   : > { %v1042_v5 = vadd.f32 %v1041_v30, %v10150_v54  ;;  %8894 = vrot.lane.b32.xlu1 %v8893_v34, %s15165_s15  ;;  %v8888_v3 = vpack.i.bf16 %v1496_v43, %v1543_v27  ;;  %v1664_v8 = vsel %vm1548_vm3, %v1603_v1, %v1598_v13  ;;  %v11117_v19 = vmul.f32 0.0, %v1178_v39 }
 0x186   : > { %15428 = vst [vmem:[#allocation147_spill] sm:$0xff] %v11112_v42  ;;  %v1179_v62 = vmax.f32 %v1038_v46, 0.0  ;;  %v1180_v51 = vmax.f32 %v1040_v18, 0.0  ;;  %v11119_v58 = vadd.s32 4294967294, %v461_v15  ;;  %v8903_v36 = vpack.i.bf16 %v1664_v8, %v1604_v4  ;;  %v1045_v43 = vpop.f32.mrb[68].mxu0  ;;  %v8760_v4 = vpop.permute.xlu1 %8759 }
 0x187   : > { %15429 = vst [vmem:[#allocation148_spill] sm:$0xff] %v11117_v19  ;;  %v1181_v35 = vmax.f32 %v1042_v5, 0.0  ;;  %8889 = vrot.lane.b32.xlu0 %v8888_v3, %s15165_s15  ;;  %v1499_v12 = vsel %vm1451_vm2, %v1497_v10, %v1398_v25  ;;  %v1498_v39 = vsel %vm1451_vm2, %v1495_v63, %v1497_v10  ;;  %v11129_v27 = vadd.s32 4294967294, %v462_v44  ;;  %v1047_v10 = vpop.f32.mrb[69].mxu0 }
 0x188   : > { %v11126_v34 = vmul.f32 %v10894_v49, %v1180_v51  ;;  %v15074_v13 = vrot.slane %v10943_v7, 7  ;;  %v8898_v25 = vpack.i.bf16 %v1499_v12, %v1498_v39  ;;  %v11134_v1 = vpack.c.bf16 %v3250_v31, %v3248_v29  ;;  %v1049_v31 = vpop.f32.mrb[70].mxu0 }
 0x189   : > { %8904 = vrot.lane.b32.xlu1 %v8903_v36, %s15165_s15  ;;  %v11136_v46 = vmul.f32 0.0, %v1179_v62  ;;  %v1046_v18 = vadd.f32 %v1045_v43, %v10252_v6  ;;  %v8762_v30 = vunpack.i.h.bf16 %v8760_v4  ;;  %v8761_v5 = vunpack.i.l.bf16 %v8760_v4  ;;  %v1051_v51 = vpop.f32.mrb[71].mxu0 }
 0x18a   : > { %15430 = vst [vmem:[#allocation149_spill] sm:$0xff] %v11126_v34  ;;  %15431 = vst [vmem:[#allocation150_spill] sm:$0xff] %v11134_v1  ;;  %vm488_vm8 = vcmp.ge.s32.totalorder %v10988_v16, 0  ;;  %vm500_vm9 = vcmp.lt.s32.totalorder %v10988_v16, 16  ;;  %v1500_v63 = vrot.slane %v11117_v19, 7  ;;  %v1605_v44 = vrot.slane %v11117_v19, 1 }
 0x18b   : > { %15432 = vst [vmem:[#allocation151_spill] sm:$0xff] %v11136_v46  ;;  %v11144_v3 = vmul.f32 %v10894_v49, %v1181_v35  ;;  %v1048_v29 = vadd.f32 %v1047_v10, %v10150_v54  ;;  %8899 = vrot.lane.b32.xlu0 %v8898_v25, %s15165_s15  ;;  %vm489_vm10 = vcmp.ge.s32.totalorder %v11119_v58, 0  ;;  %v1182_v8 = vmax.f32 %v1046_v18, 0.0  ;;  %v8765_v25 = vpop.permute.xlu1 %8764  ;;  %vm11205_vm14 = vmand %vm488_vm8, %vm500_vm9 }
 0x18c   : > { %v1050_v62 = vadd.f32 %v1049_v31, %v10252_v6  ;;  %v1606_v36 = vrot.slane %v11126_v34, 1  ;;  %v1501_v12 = vrot.slane %v11126_v34, 7  ;;  %v1983_v39 = vsel %vm1981_vm7, %v8762_v30, %v10294_v33 }
 0x18d   : > { %15433 = vst [vmem:[#allocation152_spill] sm:$0xff] %v11144_v3  ;;  %v1982_v35 = vsel %vm1981_vm7, %v8761_v5, %v10285_v28  ;;  %v1183_v43 = vmax.f32 %v1048_v29, 0.0  ;;  %v1052_v4 = vadd.f32 %v1051_v51, %v10150_v54  ;;  %v11158_v10 = vmul.f32 %v10894_v49, %v1182_v8  ;;  %v9333_v29 = vld [vmem:[%s14890_s5 + $0x60] sm:$0xff]  }
 0x18e   : > { %v1184_v18 = vmax.f32 %v1050_v62, 0.0  ;;  %v8767_v31 = vunpack.i.h.bf16 %v8765_v25  ;;  %v8766_v26 = vunpack.i.l.bf16 %v8765_v25  ;;  %vm501_vm11 = vcmp.lt.s32.totalorder %v11119_v58, 16  ;;  %v1055_v51 = vpop.f32.mrb[72].mxu0 }
 0x18f   : > { %15434 = vst [vmem:[#allocation153_spill] sm:$0xff] %v11158_v10  ;;  %v1185_v15 = vmax.f32 %v1052_v4, 0.0  ;;  %vm490_vm12 = vcmp.ge.s32.totalorder %v11129_v27, 0  ;;  %v1608_v5 = vrot.slane %v11158_v10, 1  ;;  %vm502_vm13 = vcmp.lt.s32.totalorder %v11129_v27, 16  ;;  %vm11219_vm15 = vmand %vm489_vm10, %vm501_vm11 }
 0x190   : > { %v11164_v30 = vmul.f32 0.0, %v1184_v18  ;;  %v2031_v28 = vpack.c.bf16 %v8767_v31, %v8766_v26  ;;  %v2030_v8 = vpack.c.bf16 %v1983_v39, %v1982_v35  ;;  %v11172_v62 = vmul.f32 %v10894_v49, %v1183_v43  ;;  %v1057_v39 = vpop.f32.mrb[73].mxu0  ;;  %vm11229_vm4 = vmand %vm490_vm12, %vm502_vm13 }
 0x191   : > { %v1607_v4 = vsel %vm1548_vm3, %v1605_v44, %v1606_v36  ;;  %v15437_v25 = vrot.slane %v10929_v45, 7  ;;  %v1609_v35 = vsel %vm1548_vm3, %v1606_v36, %v1608_v5  ;;  %v1502_v43 = vsel %vm1451_vm2, %v1500_v63, %v1501_v12 }
 0x192   : > { %15435 = vst [vmem:[#allocation154_spill] sm:$0xff] %v11164_v30  ;;  %15436 = vst [vmem:[#allocation155_spill] sm:$0xff] %v11172_v62  ;;  %v1399_v18 = vrot.slane %v11164_v30, 7  ;;  %v1610_v31 = vrot.slane %v11164_v30, 1  ;;  %7825 = vmatprep.mubr.msk.bf16.mxu0 %vm1981_vm7, %v2031_v28  ;;  %v11187_v33 = vmul.f32 0.0, %v1185_v15  ;;  %v1056_v49 = vadd.f32 %v1055_v51, %v10252_v6  ;;  %v9335_v15 = vld [vmem:[%s14890_s5 + $0x68] sm:$0xff]  }
 0x193   : > { %v11180_v26 = vsel %vm1451_vm2, %v15437_v25, %v15074_v13  ;;  %v11191_v48 = vadd.f32 %v1057_v39, %v10150_v54  ;;  %2490 = vmatmul.mubr.bf16.vlgmr.msra.gmra.mrb[96].mxu0 %v2030_v8  ;;  %v1059_v25 = vpop.f32.mrb[74].mxu0  ;;  %v8913_v13 = vpack.i.bf16 %v1609_v35, %v1607_v4  ;;  %v1503_v36 = vrot.slane %v11158_v10, 7 }
 0x194   : > { %15438 = vst [vmem:[#allocation156_spill] sm:$0xff] %v11180_v26  ;;  %v1060_v1 = vadd.f32 %v1059_v25, %v10252_v6  ;;  %v1061_v26 = vpop.f32.mrb[75].mxu0  ;;  %v1544_v28 = vsel %vm1451_vm2, %v1399_v18, %v1500_v63  ;;  %v1611_v30 = vsel %vm1548_vm3, %v1608_v5, %v1610_v31  ;;  %3733 = vmatpush1.bf16.msra.mxu0 %v9333_v29  ;;  %v15077_v51 = vrot.slane %v11014_v38, 7 }
 0x195   : > { %v11210_v63 = vadd.f32 %v1061_v26, %v10150_v54  ;;  %8914 = vrot.lane.b32.xlu1 %v8913_v13, %s15165_s15  ;;  %v8908_v5 = vpack.i.bf16 %v1502_v43, %v1544_v28  ;;  %v1665_v29 = vsel %vm1548_vm3, %v1610_v31, %v1605_v44  ;;  %3734 = vmatprep.subr.bf16.mxu0 %v15268_v2  ;;  %v1186_v4 = vmax.f32 %v1056_v49, 0.0  ;;  %v9337_v49 = vld [vmem:[%s14890_s5 + $0x70] sm:$0xff]  }
 0x196   : > { %v8923_v26 = vpack.i.bf16 %v1665_v29, %v1611_v30  ;;  %v1505_v39 = vsel %vm1451_vm2, %v1503_v36, %v1399_v18  ;;  %v1188_v44 = vmax.f32 %v1060_v1, 0.0  ;;  %v1504_v31 = vsel %vm1451_vm2, %v1501_v12, %v1503_v36  ;;  %v1065_v18 = vpop.f32.mrb[76].mxu0  ;;  %v8750_v35 = vpop.permute.xlu0 %8749 }
 0x197   : > { %8909 = vrot.lane.b32.xlu0 %v8908_v5, %s15165_s15  ;;  %v11243_v27 = vsel %vm11205_vm14, 1.0, %v15290_v9  ;;  %v8918_v43 = vpack.i.bf16 %v1505_v39, %v1504_v31  ;;  %v15446_v1 = vrot.slane %v10929_v45, 7  ;;  %v1066_v25 = vadd.f32 %v1065_v18, %v10252_v6  ;;  %v8780_v36 = vpop.permute.xlu1 %8779 }
 0x198   : > { %3735 = vmatpush1.bf16.msra.mxu0 %v9335_v15  ;;  %15445 = vst [vmem:[#allocation157_spill] sm:$0xff] %v11243_v27  ;;  %v8751_v28 = vunpack.i.l.bf16 %v8750_v35  ;;  %v1067_v15 = vpop.f32.mrb[77].mxu0  ;;  %v11258_v8 = vsel %vm11219_vm15, 1.0, %v15290_v9  ;;  %v11263_v5 = vsel %vm11229_vm4, 1.0, %v15290_v9  ;;  %v11267_v39 = vmul.f32 0.0, %v1186_v4  ;;  %v9339_v4 = vld [vmem:[%s14890_s5 + $0x78] sm:$0xff]  }
 0x199   : > { %8924 = vrot.lane.b32.xlu1 %v8923_v26, %s15165_s15  ;;  %3736 = vmatprep.subr.bf16.mxu0 %v15268_v2  ;;  %v11252_v12 = vsel %vm1451_vm2, %v15077_v51, %v15446_v1  ;;  %15448 = vst [vmem:[#allocation159_spill] sm:$0xff] %v11258_v8  ;;  %v8752_v31 = vunpack.i.h.bf16 %v8750_v35  ;;  %v1069_v18 = vpop.f32.mrb[78].mxu0  ;;  %v11271_v1 = vmul.f32 %v11243_v27, %v1188_v44  ;;  %v1190_v16 = vmax.f32 %v1066_v25, 0.0 }
 0x19a   : > { %15447 = vst [vmem:[#allocation158_spill] sm:$0xff] %v11252_v12  ;;  %15449 = vst [vmem:[#allocation160_spill] sm:$0xff] %v11267_v39  ;;  %v11274_v30 = vadd.f32 %v1067_v15, %v10150_v54  ;;  %v1070_v9 = vadd.f32 %v1069_v18, %v10252_v6  ;;  %v1071_v13 = vpop.f32.mrb[79].mxu0  ;;  %v8782_v58 = vunpack.i.h.bf16 %v8780_v36  ;;  %v8781_v51 = vunpack.i.l.bf16 %v8780_v36  ;;  %v8755_v44 = vpop.permute.xlu0 %8754 }
 0x19b   : > { %8919 = vrot.lane.b32.xlu0 %v8918_v43, %s15165_s15  ;;  %15450 = vst [vmem:[#allocation161_spill] sm:$0xff] %v11271_v1  ;;  %v11282_v43 = vadd.f32 %v1071_v13, %v10150_v54  ;;  %v11286_v25 = vmul.f32 %v11243_v27, %v1190_v16  ;;  %v1986_v29 = vsel %vm1981_vm7, %v8751_v28, %v10462_v20  ;;  %v8756_v35 = vunpack.i.l.bf16 %v8755_v44 }
 0x19c   : > { %3737 = vmatpush1.bf16.msra.mxu0 %v9337_v49  ;;  %v1192_v15 = vmax.f32 %v1070_v9, 0.0  ;;  %v8785_v18 = vpop.permute.xlu1 %8784  ;;  %v8757_v49 = vunpack.i.h.bf16 %v8755_v44  ;;  %v1987_v36 = vsel %vm1981_vm7, %v8752_v31, %v10453_v60  ;;  %v1612_v13 = vrot.slane %v11267_v39, 1  ;;  %v9332_v60 = vld [vmem:[%s14888_s3 + $0xc0] sm:$0xff]  }
 0x19d   : > { %3738 = vmatprep.subr.bf16.mxu0 %v15268_v2  ;;  %15451 = vst [vmem:[#allocation162_spill] sm:$0xff] %v11286_v25  ;;  %v8787_v26 = vunpack.i.h.bf16 %v8785_v18  ;;  %v8786_v12 = vunpack.i.l.bf16 %v8785_v18  ;;  %v1613_v34 = vrot.slane %v11271_v1, 1  ;;  %v1615_v16 = vrot.slane %v11286_v25, 1 }
 0x19e   : > { %v11293_v10 = vmul.f32 0.0, %v1192_v15  ;;  %v1075_v44 = vpop.f32.mrb[80].mxu0  ;;  %v11301_v18 = vpack.c.bf16 %v8757_v49, %v8756_v35  ;;  %v11310_v19 = vpack.c.bf16 %v1987_v36, %v1986_v29  ;;  %v11316_v35 = vpack.c.bf16 %v8782_v58, %v8781_v51  ;;  %v9334_v29 = vld [vmem:[%s14888_s3 + $0xc8] sm:$0xff]  }
 0x19f   : > { %v2033_v20 = vpack.c.bf16 %v8787_v26, %v8786_v12  ;;  %v11299_v28 = vpop.permute.xlu0 %8769  ;;  %v1077_v9 = vpop.f32.mrb[81].mxu0  ;;  %v9341_v12 = vld [vmem:[%s14890_s5 + $0x80] sm:$0xff]   ;;  %v1506_v26 = vrot.slane %v11267_v39, 7  ;;  %v1614_v51 = vsel %vm1548_vm3, %v1612_v13, %v1613_v34  ;;  %v1616_v58 = vsel %vm1548_vm3, %v1613_v34, %v1615_v16 }
 0x1a0   : > { %3739 = vmatpush1.bf16.msra.mxu0 %v9339_v4  ;;  %7793 = vmatprep.mubr.msk.bf16.mxu1 %vm1981_vm7, %v11301_v18  ;;  %v1079_v4 = vpop.f32.mrb[82].mxu0  ;;  %v11325_v36 = vadd.f32 %v1077_v9, %v10150_v54  ;;  %v1617_v39 = vrot.slane %v11293_v10, 1  ;;  %v8933_v9 = vpack.i.bf16 %v1616_v58, %v1614_v51  ;;  %v1187_v34 = vmax.f32 %v11191_v48, 0.0 }
 0x1a1   : > { %3740 = vmatprep.subr.bf16.mxu0 %v15268_v2  ;;  %7826 = vmatprep.mubr.msk.bf16.mxu0 %vm1981_vm7, %v2033_v20  ;;  %v1081_v31 = vpop.f32.mrb[83].mxu0  ;;  %v1076_v49 = vadd.f32 %v1075_v44, %v10252_v6  ;;  %v1080_v32 = vadd.f32 %v1079_v4, %v10252_v6  ;;  %v15452_v58 = vrot.slane %v11271_v1, 7  ;;  %v15453_v48 = vrot.slane %v11293_v10, 7  ;;  %v9343_v4 = vld [vmem:[%s14890_s5 + $0x88] sm:$0xff]  }
 0x1a2   : > { %2243 = vmatmul.mubr.bf16.vlgmr.msra.gmra.mrb[0].mxu1 %v11310_v19  ;;  %v11335_v20 = vadd.f32 %v1081_v31, %v10150_v54  ;;  %8934 = vrot.lane.b32.xlu1 %v8933_v9, %s15165_s15  ;;  %v1618_v42 = vsel %vm1548_vm3, %v1615_v16, %v1617_v39  ;;  %v11370_v3 = vmul.f32 0.0, %v1187_v34  ;;  %v8772_v31 = vunpack.i.h.bf16 %v11299_v28  ;;  %v9345_v34 = vld [vmem:[%s14890_s5 + $0x90] sm:$0xff]  }
 0x1a3   : > { %2705 = vmatpush1.bf16.msra.mxu1 %v9332_v60  ;;  %7794 = vmatprep.mubr.msk.bf16.mxu1 %vm1981_vm7, %v11316_v35  ;;  %v11347_v51 = vpop.permute.xlu0 %8774  ;;  %v1508_v15 = vsel %vm1451_vm2, %v1506_v26, %v15452_v58  ;;  %v1545_v44 = vsel %vm1451_vm2, %v15453_v48, %v1506_v26  ;;  %v1666_v26 = vsel %vm1548_vm3, %v1617_v39, %v1612_v13  ;;  %v1509_v48 = vrot.slane %v11286_v25, 7 }
 0x1a4   : > { %2706 = vmatprep.subr.bf16.mxu1 %v15268_v2  ;;  %3741 = vmatpush1.bf16.msra.mxu0 %v9341_v12  ;;  %v8928_v60 = vpack.i.bf16 %v1508_v15, %v1545_v44  ;;  %v9336_v12 = vld [vmem:[%s14888_s3 + $0xd0] sm:$0xff]   ;;  %v1194_v15 = vmax.f32 %v1076_v49, 0.0  ;;  %v1196_v44 = vmax.f32 %v1080_v32, 0.0  ;;  %v8771_v39 = vunpack.i.l.bf16 %v11299_v28 }
 0x1a5   : > { %3742 = vmatprep.subr.bf16.mxu0 %v15268_v2  ;;  %v8795_v46 = vpop.permute.xlu1 %8794  ;;  %v8777_v49 = vunpack.i.h.bf16 %v11347_v51  ;;  %v8776_v32 = vunpack.i.l.bf16 %v11347_v51  ;;  %v15455_v37 = vrot.slane %v11293_v10, 7  ;;  %v1189_v51 = vmax.f32 %v11210_v63, 0.0  ;;  %v9347_v63 = vld [vmem:[%s14890_s5 + $0x98] sm:$0xff]  }
 0x1a6   : > { %v1085_v11 = vpop.f32.mrb[84].mxu0  ;;  %8929 = vrot.lane.b32.xlu0 %v8928_v60, %s15165_s15  ;;  %v8797_v13 = vunpack.i.h.bf16 %v8795_v46  ;;  %v8796_v16 = vunpack.i.l.bf16 %v8795_v46  ;;  %v8943_v60 = vpack.i.bf16 %v1666_v26, %v1618_v42  ;;  %v9338_v42 = vld [vmem:[%s14888_s3 + $0xd8] sm:$0xff]   ;;  %v11400_v26 = vmul.f32 %v11258_v8, %v1196_v44 }
 0x1a7   : > { %2707 = vmatpush1.bf16.msra.mxu1 %v9334_v29  ;;  %v1087_v58 = vpop.f32.mrb[85].mxu0  ;;  %v1086_v29 = vadd.f32 %v1085_v11, %v10252_v6  ;;  %v8790_v28 = vpop.permute.xlu0 %8789  ;;  %v1511_v7 = vsel %vm1451_vm2, %v1509_v48, %v15455_v37  ;;  %v1984_v44 = vsel %vm1981_vm7, %v8776_v32, %v10302_v17  ;;  %vm5262_vm5 = vcmask 785408  }
 0x1a8   : > { %2708 = vmatprep.subr.bf16.mxu1 %v15268_v2  ;;  %v1089_v9 = vpop.f32.mrb[86].mxu0  ;;  %3743 = vmatpush1.bf16.msra.mxu0 %v9343_v4  ;;  %v11383_v25 = vadd.f32 %v1087_v58, %v10150_v54  ;;  %v15454_v4 = vrot.slane %v11271_v1, 7  ;;  %v11397_v58 = vmul.f32 0.0, %v1194_v15  ;;  %15457 = vst [vmem:[#allocation164_spill] sm:$0xff] %v11400_v26  ;;  %vm5511_vm6 = vcmask 261120  }
 0x1a9   : > { %v1091_v62 = vpop.f32.mrb[87].mxu0  ;;  %3744 = vmatprep.subr.bf16.mxu0 %v15268_v2  ;;  %v1198_v46 = vmax.f32 %v1086_v29, 0.0  ;;  %v1090_v11 = vadd.f32 %v1089_v9, %v10252_v6  ;;  %8944 = vrot.lane.b32.xlu1 %v8943_v60, %s15165_s15  ;;  %v11404_v29 = vpack.c.bf16 %v8797_v13, %v8796_v16 }
 0x1aa   : > { %v1510_v22 = vsel %vm1451_vm2, %v15454_v4, %v1509_v48  ;;  %15456 = vst [vmem:[#allocation163_spill] sm:$0xff] %v11397_v58  ;;  %v1989_v48 = vsel %vm1981_vm7, %v8772_v31, %v10502_v57  ;;  %v8805_v57 = vpop.permute.xlu1 %8804  ;;  %v1985_v31 = vsel %vm1981_vm7, %v8777_v49, %v10338_v61  ;;  %v11426_v13 = vadd.f32 %v1091_v62, %v10150_v54 }
 0x1ab   : > { %2709 = vmatpush1.bf16.msra.mxu1 %v9336_v12  ;;  %v8938_v9 = vpack.i.bf16 %v1511_v7, %v1510_v22  ;;  %v1200_v37 = vmax.f32 %v1090_v11, 0.0  ;;  %v1988_v12 = vsel %vm1981_vm7, %v8771_v39, %v10472_v56  ;;  %v11414_v15 = vmul.f32 %v11258_v8, %v1198_v46  ;;  %v8800_v17 = vpop.permute.xlu0 %8799 }
 0x1ac   : > { %2710 = vmatprep.subr.bf16.mxu1 %v15268_v2  ;;  %3745 = vmatpush1.bf16.msra.mxu0 %v9345_v34  ;;  %v8792_v7 = vunpack.i.h.bf16 %v8790_v28  ;;  %v11417_v22 = vpack.c.bf16 %v1989_v48, %v1988_v12  ;;  %v8791_v56 = vunpack.i.l.bf16 %v8790_v28  ;;  %v9340_v34 = vld [vmem:[%s14888_s3 + $0xe0] sm:$0xff]   ;;  %v1512_v32 = vrot.slane %v11397_v58, 7 }
 0x1ad   : > { %8939 = vrot.lane.b32.xlu0 %v8938_v9, %s15165_s15  ;;  %v11421_v39 = vmul.f32 0.0, %v1200_v37  ;;  %3746 = vmatprep.subr.bf16.mxu0 %v15268_v2  ;;  %v1619_v60 = vrot.slane %v11397_v58, 1  ;;  %v2032_v61 = vpack.c.bf16 %v1985_v31, %v1984_v44  ;;  %v11441_v46 = vmul.f32 %v11243_v27, %v1189_v51 }
 0x1ae   : > { %v11428_v16 = vpop.f32.mrb[88].mxu0  ;;  %2249 = vmatmul.mubr.bf16.gmra.mrb[4].mxu1 %v11417_v22  ;;  %v8807_v9 = vunpack.i.h.bf16 %v8805_v57  ;;  %v1620_v37 = vrot.slane %v11400_v26, 1  ;;  %v1622_v51 = vrot.slane %v11414_v15, 1  ;;  %v1513_v12 = vrot.slane %v11400_v26, 7 }
 0x1af   : > { %15458 = vst [vmem:[#allocation165_spill] sm:$0xff] %v11421_v39  ;;  %2711 = vmatpush1.bf16.msra.mxu1 %v9338_v42  ;;  %v1097_v62 = vpop.f32.mrb[89].mxu0  ;;  %v1401_v28 = vrot.slane %v11421_v39, 7  ;;  %v1624_v11 = vrot.slane %v11421_v39, 1  ;;  %7795 = vmatprep.mubr.msk.bf16.mxu1 %vm1981_vm7, %v11404_v29  ;;  %v9349_v42 = vld [vmem:[%s14890_s5 + $0xa0] sm:$0xff]   ;;  %v8806_v44 = vunpack.i.l.bf16 %v8805_v57  ;;  %v1991_v31 = vsel %vm1981_vm7, %v8792_v7, %v10552_v53 }
 0x1b0   : > { %2712 = vmatprep.subr.bf16.mxu1 %v15268_v2  ;;  %v11447_v4 = vpop.f32.mrb[90].mxu0  ;;  %3747 = vmatpush1.bf16.msra.mxu0 %v9347_v63  ;;  %v1990_v63 = vsel %vm1981_vm7, %v8791_v56, %v10543_v59  ;;  %v1191_v49 = vmax.f32 %v11274_v30, 0.0  ;;  %v1621_v39 = vsel %vm1548_vm3, %v1619_v60, %v1620_v37  ;;  %v1623_v26 = vsel %vm1548_vm3, %v1620_v37, %v1622_v51  ;;  %v9342_v30 = vld [vmem:[%s14888_s3 + $0xe8] sm:$0xff]  }
 0x1b1   : > { %2496 = vmatmul.mubr.bf16.gmra.mrb[100].mxu0 %v2032_v61  ;;  %v11455_v48 = vpop.f32.mrb[91].mxu0  ;;  %3748 = vmatprep.subr.bf16.mxu0 %v15268_v2  ;;  %v1546_v61 = vsel %vm1451_vm2, %v1401_v28, %v1512_v32  ;;  %v1514_v57 = vsel %vm1451_vm2, %v1512_v32, %v1513_v12  ;;  %v1625_v56 = vsel %vm1548_vm3, %v1622_v51, %v1624_v11  ;;  %v1193_v37 = vmax.f32 %v11282_v43, 0.0 }
 0x1b2   : > { %7827 = vmatprep.mubr.msk.bf16.mxu0 %vm1981_vm7, %v11301_v18  ;;  %v8953_v18 = vpack.i.bf16 %v1623_v26, %v1621_v39  ;;  %v8948_v58 = vpack.i.bf16 %v1514_v57, %v1546_v61  ;;  %v1667_v7 = vsel %vm1548_vm3, %v1624_v11, %v1619_v60  ;;  %v11477_v53 = vpack.c.bf16 %v1991_v31, %v1990_v63  ;;  %v9344_v57 = vld [vmem:[%s14888_s3 + $0xf0] sm:$0xff]   ;;  %v15514_v26 = vld [vmem:[#allocation147_spill] sm:$0xff] }
 0x1b3   : > { %2713 = vmatpush1.bf16.msra.mxu1 %v9340_v34  ;;  %v1515_v32 = vrot.slane %v11414_v15, 7  ;;  %v11482_v39 = vpack.c.bf16 %v8807_v9, %v8806_v44  ;;  %v8802_v60 = vunpack.i.h.bf16 %v8800_v17  ;;  %v8801_v11 = vunpack.i.l.bf16 %v8800_v17  ;;  %v9351_v9 = vld [vmem:[%s14890_s5 + $0xa8] sm:$0xff]   ;;  %v15489_v34 = vld [vmem:[#allocation100_spill] sm:$0xff] }
 0x1b4   : > { %2714 = vmatprep.subr.bf16.mxu1 %v15268_v2  ;;  %3749 = vmatpush1.bf16.msra.mxu0 %v9349_v42  ;;  %v11487_v51 = vmul.f32 %v11243_v27, %v1191_v49  ;;  %v1195_v43 = vmax.f32 %v11325_v36, 0.0  ;;  %v8963_v31 = vpack.i.bf16 %v1667_v7, %v1625_v56  ;;  %v11499_v44 = vadd.f32 %v1097_v62, %v10150_v54 }
 0x1b5   : > { %v8815_v59 = vpop.permute.xlu1 %8814  ;;  %3750 = vmatprep.subr.bf16.mxu0 %v15268_v2  ;;  %8954 = vrot.lane.b32.xlu1 %v8953_v18, %s15165_s15  ;;  %v1517_v49 = vsel %vm1451_vm2, %v1515_v32, %v1401_v28  ;;  %v11507_v56 = vmul.f32 0.0, %v1193_v37  ;;  %v1096_v28 = vadd.f32 %v11428_v16, %v10252_v6  ;;  %v1197_v7 = vmax.f32 %v11335_v20, 0.0  ;;  %v15490_v18 = vld [vmem:[#allocation98_spill] sm:$0xff] }
 0x1b6   : > { %8949 = vrot.lane.b32.xlu0 %v8948_v58, %s15165_s15  ;;  %v1105_v42 = vpop.f32.mrb[92].mxu0  ;;  %2255 = vmatmul.mubr.bf16.gmra.mrb[8].mxu1 %v11477_v53  ;;  %v8817_v63 = vunpack.i.h.bf16 %v8815_v59  ;;  %v8816_v17 = vunpack.i.l.bf16 %v8815_v59  ;;  %v1516_v58 = vsel %vm1451_vm2, %v1513_v12, %v1515_v32  ;;  %v1100_v16 = vadd.f32 %v11447_v4, %v10252_v6  ;;  %v9346_v4 = vld [vmem:[%s14888_s3 + $0xf8] sm:$0xff]  }
 0x1b7   : > { %v1107_v61 = vpop.f32.mrb[93].mxu0  ;;  %7796 = vmatprep.mubr.msk.bf16.mxu1 %vm1981_vm7, %v11482_v39  ;;  %2715 = vmatpush1.bf16.msra.mxu1 %v9342_v30  ;;  %v8810_v59 = vpop.permute.xlu0 %8809  ;;  %v8958_v12 = vpack.i.bf16 %v1517_v49, %v1516_v58  ;;  %v1992_v30 = vsel %vm1981_vm7, %v8801_v11, %v10588_v47  ;;  %v11526_v32 = vmul.f32 0.0, %v1195_v43  ;;  %v1199_v20 = vmax.f32 %v11383_v25, 0.0 }
 0x1b8   : > { %v11501_v36 = vpop.f32.mrb[94].mxu0  ;;  %2716 = vmatprep.subr.bf16.mxu1 %v15268_v2  ;;  %v1201_v58 = vmax.f32 %v11426_v13, 0.0  ;;  %3751 = vmatpush1.bf16.msra.mxu0 %v9351_v9  ;;  %v11532_v11 = vpack.c.bf16 %v8817_v63, %v8816_v17  ;;  %v1202_v13 = vmax.f32 %v1096_v28, 0.0  ;;  %v11542_v43 = vadd.f32 %v11455_v48, %v10150_v54  ;;  %v15486_v17 = vld [vmem:[#allocation97_spill] sm:$0xff]  ;;  %v15487_v9 = vld [vmem:[#allocation99_spill] sm:$0xff] }
 0x1b9   : > { %2502 = vmatmul.mubr.bf16.gmra.mrb[104].mxu0 %v11310_v19  ;;  %v11512_v62 = vpop.f32.mrb[95].mxu0  ;;  %8964 = vrot.lane.b32.xlu1 %v8963_v31, %s15165_s15  ;;  %v1993_v19 = vsel %vm1981_vm7, %v8802_v60, %v10606_v14  ;;  %v8812_v31 = vunpack.i.h.bf16 %v8810_v59  ;;  %v8811_v14 = vunpack.i.l.bf16 %v8810_v59  ;;  %v8825_v60 = vpop.permute.xlu1 %8824  ;;  %v1106_v63 = vadd.f32 %v1105_v42, %v10252_v6 }
 0x1ba   : > { %7828 = vmatprep.mubr.msk.bf16.mxu0 %vm1981_vm7, %v11316_v35  ;;  %8959 = vrot.lane.b32.xlu0 %v8958_v12, %s15165_s15  ;;  %15459 = vst [vmem:[#allocation166_spill] sm:$0xff] %v11532_v11  ;;  %v11538_v25 = vpack.c.bf16 %v1993_v19, %v1992_v30  ;;  %v11549_v49 = vmul.f32 %v11258_v8, %v1197_v7  ;;  %v1204_v59 = vmax.f32 %v1100_v16, 0.0  ;;  %v11559_v42 = vmul.f32 0.0, %v1201_v58 }
 0x1bb   : > { %2717 = vmatpush1.bf16.msra.mxu1 %v9344_v57  ;;  %3752 = vmatprep.subr.bf16.mxu0 %v15268_v2  ;;  %v15461_v57 = vpack.i.bf16 %v10540_v0, %v10527_v40  ;;  %v11557_v12 = vmul.f32 %v11258_v8, %v1199_v20  ;;  %v8820_v28 = vpop.permute.xlu0 %8819  ;;  %v15462_v7 = vpack.i.bf16 %v10439_v24, %v10426_v50  ;;  %v9353_v40 = vld [vmem:[%s14890_s5 + $0xb0] sm:$0xff]   ;;  %v8827_v0 = vunpack.i.h.bf16 %v8825_v60  ;;  %v9348_v50 = vld [vmem:[%s14888_s3 + $0x100] sm:$0xff]   ;;  %v15535_v8 = vld [vmem:[#allocation151_spill] sm:$0xff] }
 0x1bc   : > { %15460 = vst [vmem:[#allocation167_spill] sm:$0xff] %v11538_v25  ;;  %2718 = vmatprep.subr.bf16.mxu1 %v15268_v2  ;;  %v1108_v30 = vadd.f32 %v1107_v61, %v10150_v54  ;;  %v8826_v19 = vunpack.i.l.bf16 %v8825_v60  ;;  %v1994_v24 = vsel %vm1981_vm7, %v8811_v14, %v10634_v23  ;;  %v1995_v61 = vsel %vm1981_vm7, %v8812_v31, %v10645_v55  ;;  %v15468_v20 = vld [vmem:[#allocation78_spill] sm:$0xff] }
 0x1bd   : > { %8974 = vrot.lane.b32.xlu1 %v15461_v57, %s15165_s15  ;;  %v11584_v58 = vmul.f32 0.0, %v1202_v13  ;;  %v1206_v60 = vmax.f32 %v1106_v63, 0.0  ;;  %v8821_v57 = vunpack.i.l.bf16 %v8820_v28  ;;  %v11594_v23 = vmul.f32 %v11263_v5, %v1204_v59  ;;  %v15467_v63 = vld [vmem:[#allocation79_spill] sm:$0xff]  ;;  %3753 = vmatpush1.bf16.msra.mxu0 %v9353_v40 }
 0x1be   : > { %2262 = vmatmul.mubr.bf16.gmra.mrb[12].mxu1 %v11538_v25  ;;  %8969 = vrot.lane.b32.xlu0 %v15462_v7, %s15165_s15  ;;  %v15464_v7 = vld [vmem:[#allocation83_spill] sm:$0xff]  ;;  %v15469_v16 = vpack.i.bf16 %v15467_v63, %v15468_v20  ;;  %v11607_v59 = vpack.c.bf16 %v8827_v0, %v8826_v19  ;;  %v1112_v31 = vadd.f32 %v11512_v62, %v10150_v54  ;;  %v15473_v54 = vld [vmem:[#allocation96_spill] sm:$0xff]  ;;  %v15476_v19 = vld [vmem:[#allocation90_spill] sm:$0xff]  ;;  %v15536_v27 = vrot.slane %v15535_v8, 1 }
 0x1bf   : > { %7797 = vmatprep.mubr.msk.bf16.mxu1 %vm1981_vm7, %v11532_v11  ;;  %2719 = vmatpush1.bf16.msra.mxu1 %v9346_v4  ;;  %15463 = vst [vmem:[#allocation168_spill] sm:$0xff] %v11584_v58  ;;  %v8822_v4 = vunpack.i.h.bf16 %v8820_v28  ;;  %15466 = vst [vmem:[#allocation83_spill] sm:$0xff] %v11594_v23  ;;  %v1203_v28 = vmax.f32 %v11499_v44, 0.0  ;;  %v11617_v44 = vpack.c.bf16 %v1995_v61, %v1994_v24  ;;  %v15474_v62 = vld [vmem:[#allocation95_spill] sm:$0xff]  ;;  %v15108_v61 = vrot.slane %v11584_v58, 1  ;;  %v15479_v63 = vld [vmem:[#allocation84_spill] sm:$0xff] }
 0x1c0   : > { %2720 = vmatprep.subr.bf16.mxu1 %v15268_v2  ;;  %15470 = vst [vmem:[#allocation79_spill] sm:$0xff] %v11607_v59  ;;  %3754 = vmatprep.subr.bf16.mxu0 %v15268_v2  ;;  %v15475_v40 = vpack.i.bf16 %v15473_v54, %v15474_v62  ;;  %v1996_v20 = vsel %vm1981_vm7, %v8821_v57, %v15476_v19  ;;  %v15109_v13 = vrot.slane %v11594_v23, 7 }
 0x1c1   : > { %2509 = vmatmul.mubr.bf16.gmra.mrb[108].mxu0 %v11417_v22  ;;  %v15465_v22 = vpack.i.bf16 %v10622_v41, %v15464_v7  ;;  %v1110_v41 = vadd.f32 %v11501_v36, %v10252_v6  ;;  %15471 = vst [vmem:[#allocation78_spill] sm:$0xff] %v11617_v44  ;;  %v15110_v6 = vrot.slane %v11584_v58, 7  ;;  %v1205_v36 = vmax.f32 %v11542_v43, 0.0 }
 0x1c2   : > { %7829 = vmatprep.mubr.msk.bf16.mxu0 %vm1981_vm7, %v11404_v29  ;;  %8979 = vrot.lane.b32.xlu0 %v15469_v16, %s15165_s15  ;;  %v9350_v16 = vld [vmem:[%s14888_s3 + $0x108] sm:$0xff]   ;;  %v1627_v43 = vrot.slane %v11594_v23, 1 }
 0x1c3   : > { %8984 = vrot.lane.b32.xlu1 %v15465_v22, %s15165_s15  ;;  %v1207_v22 = vmax.f32 %v1108_v30, 0.0  ;;  %2721 = vmatpush1.bf16.msra.mxu1 %v9348_v50  ;;  %v11622_v30 = vmul.f32 %v11263_v5, %v1206_v60  ;;  %v15477_v50 = vld [vmem:[#allocation94_spill] sm:$0xff] }
 0x1c4   : > { %2722 = vmatprep.subr.bf16.mxu1 %v15268_v2  ;;  %v1997_v24 = vsel %vm1981_vm7, %v8822_v4, %v15477_v50  ;;  %v15478_v60 = vld [vmem:[#allocation86_spill] sm:$0xff]  ;;  %v9355_v4 = vld [vmem:[%s14890_s5 + $0xb8] sm:$0xff]  }
 0x1c5   : > { %15472 = vst [vmem:[#allocation169_spill] sm:$0xff] %v11622_v30  ;;  %v15480_v48 = vpack.i.bf16 %v15478_v60, %v15479_v63  ;;  %v11647_v37 = vmul.f32 %v11263_v5, %v1207_v22  ;;  %v1209_v60 = vmax.f32 %v1112_v31, 0.0  ;;  %v11656_v63 = vmul.f32 %v11263_v5, %v1205_v36  ;;  %v15484_v31 = vld [vmem:[#allocation109_spill] sm:$0xff]  ;;  %3755 = vmatpush1.bf16.msra.mxu0 %v9355_v4 }
 0x1c6   : > { %v8835_v7 = vpop.permute.xlu1 %8834  ;;  %2269 = vmatmul.mubr.bf16.gmra.mrb[16].mxu1 %v11617_v44  ;;  %v15485_v22 = vpack.i.bf16 %v10817_v52, %v15484_v31  ;;  %v11678_v52 = vpack.c.bf16 %v1997_v24, %v1996_v20  ;;  %4274 = vmatprep.subr.bf16.mxu0 %v15268_v2  ;;  %v15493_v24 = vrot.slane %v11622_v30, 1  ;;  %v15497_v31 = vld [vmem:[#allocation121_spill] sm:$0xff] }
 0x1c7   : > { %8994 = vrot.lane.b32.xlu1 %v15475_v40, %s15165_s15  ;;  %8989 = vrot.lane.b32.xlu0 %v15480_v48, %s15165_s15  ;;  %v1208_v40 = vmax.f32 %v1110_v41, 0.0  ;;  %v8837_v57 = vunpack.i.h.bf16 %v8835_v7  ;;  %v8836_v50 = vunpack.i.l.bf16 %v8835_v7  ;;  %15481 = vst [vmem:[#allocation96_spill] sm:$0xff] %v11647_v37  ;;  %v9352_v48 = vld [vmem:[%s14888_s3 + $0x110] sm:$0xff]   ;;  %15483 = vst [vmem:[#allocation94_spill] sm:$0xff] %v11656_v63  ;;  %v11670_v36 = vmul.f32 0.0, %v1209_v60  ;;  %v15502_v4 = vld [vmem:[#allocation125_spill] sm:$0xff] }
 0x1c8   : > { %v8830_v0 = vpop.permute.xlu0 %8829  ;;  %7798 = vmatprep.mubr.msk.bf16.mxu1 %vm1981_vm7, %v11607_v59  ;;  %2723 = vmatpush1.bf16.msra.mxu1 %v9350_v16  ;;  %v15491_v7 = vpack.i.bf16 %v15489_v34, %v15490_v18  ;;  %v9354_v18 = vld [vmem:[%s14888_s3 + $0x118] sm:$0xff]   ;;  %v15503_v34 = vrot.slane %v15502_v4, 7 }
 0x1c9   : > { %v8832_v54 = vunpack.i.h.bf16 %v8830_v0  ;;  %v8831_v62 = vunpack.i.l.bf16 %v8830_v0  ;;  %2516 = vmatmul.mubr.bf16.gmra.mrb[112].mxu0 %v11477_v53  ;;  %v11653_v0 = vmul.f32 0.0, %v1203_v28  ;;  %2724 = vmatprep.subr.bf16.mxu1 %v15268_v2  ;;  %15488 = vst [vmem:[#allocation86_spill] sm:$0xff] %v11670_v36 }
 0x1ca   : > { %v8845_v14 = vpop.permute.xlu1 %8844  ;;  %7830 = vmatprep.mubr.msk.bf16.mxu0 %vm1981_vm7, %v11482_v39 }
 0x1cb   : > { %v8847_v41 = vunpack.i.h.bf16 %v8845_v14  ;;  %15482 = vst [vmem:[#allocation95_spill] sm:$0xff] %v11653_v0  ;;  %9004 = vrot.lane.b32.xlu1 %v15485_v22, %s15165_s15  ;;  %v8846_v16 = vunpack.i.l.bf16 %v8845_v14  ;;  %v1998_v28 = vsel %vm1981_vm7, %v8831_v62, %v15486_v17  ;;  %v1999_v5 = vsel %vm1981_vm7, %v8832_v54, %v15487_v9  ;;  %8999 = vrot.lane.b32.xlu0 %v15491_v7, %s15165_s15  ;;  %v15496_v7 = vld [vmem:[#allocation122_spill] sm:$0xff] }
 0x1cc   : > { %v11683_v17 = vsel %vm1548_vm3, %v15108_v61, %v1627_v43  ;;  %v11685_v14 = vpack.c.bf16 %v8837_v57, %v8836_v50  ;;  %v11687_v54 = vmul.f32 0.0, %v1208_v40  ;;  %v11694_v62 = vsel %vm1451_vm2, %v15110_v6, %v15109_v13  ;;  %2725 = vmatpush1.bf16.msra.mxu1 %v9352_v48  ;;  %v8840_v19 = vpop.permute.xlu0 %8839 }
 0x1cd   : > { %v11702_v20 = vpack.c.bf16 %v1999_v5, %v1998_v28  ;;  %v11707_v40 = vsel %vm1548_vm3, %v1627_v43, %v15493_v24  ;;  %2726 = vmatprep.subr.bf16.mxu1 %v15268_v2  ;;  %v15494_v57 = vrot.slane %v11014_v38, 1  ;;  %v15495_v50 = vrot.slane %v11003_v21, 1 }
 0x1ce   : > { %15492 = vst [vmem:[#allocation84_spill] sm:$0xff] %v11687_v54  ;;  %v11717_v48 = vpack.c.bf16 %v8847_v41, %v8846_v16  ;;  %v15498_v22 = vpack.i.bf16 %v15496_v7, %v15497_v31  ;;  %v15499_v43 = vrot.slane %v10929_v45, 1  ;;  %v15501_v24 = vrot.slane %v11003_v21, 7  ;;  %2276 = vmatmul.mubr.bf16.gmra.mrb[20].mxu1 %v11678_v52  ;;  %v15506_v7 = vld [vmem:[#allocation113_spill] sm:$0xff]  ;;  %v15507_v31 = vld [vmem:[#allocation111_spill] sm:$0xff] }
 0x1cf   : > { %v3252_v60 = vsel %vm1548_vm3, %v15495_v50, %v15494_v57  ;;  %v15500_v28 = vmov %v15494_v57  ;;  %v15504_v41 = vrot.slane %v11014_v38, 7  ;;  %7799 = vmatprep.mubr.msk.bf16.mxu1 %vm1981_vm7, %v11685_v14 }
 0x1d0   : > { %9014 = vrot.lane.b32.xlu1 %v15498_v22, %s15165_s15  ;;  %v3354_v5 = vsel %vm1548_vm3, %v15500_v28, %v15499_v43  ;;  %v11733_v61 = vsel %vm1451_vm2, %v15503_v34, %v15501_v24  ;;  %v15505_v16 = vmov %v15501_v24  ;;  %v15508_v22 = vpack.i.bf16 %v15506_v7, %v15507_v31  ;;  %v15510_v34 = vld [vmem:[#allocation137_spill] sm:$0xff]  ;;  %v15512_v24 = vld [vmem:[#allocation135_spill] sm:$0xff]  ;;  %2727 = vmatpush1.bf16.msra.mxu1 %v9354_v18 }
 0x1d1   : > { %v11740_v57 = vsel %vm1451_vm2, %v15505_v16, %v15504_v41  ;;  %v11748_v43 = vpack.c.bf16 %v3354_v5, %v3252_v60  ;;  %v15511_v28 = vrot.slane %v15510_v34, 1  ;;  %v15513_v35 = vrot.slane %v15512_v24, 1  ;;  %2523 = vmatmul.mubr.bf16.gmra.mrb[116].mxu0 %v11538_v25  ;;  %4003 = vmatprep.subr.bf16.mxu1 %v15268_v2 }
 0x1d2   : > { %9009 = vrot.lane.b32.xlu0 %v15508_v22, %s15165_s15  ;;  %v15515_v41 = vrot.slane %v15514_v26, 1  ;;  %v15518_v5 = vrot.slane %v15510_v34, 7  ;;  %v15519_v7 = vrot.slane %v15512_v24, 7  ;;  %v15521_v22 = vld [vmem:[#allocation146_spill] sm:$0xff]  ;;  %v1521_v18 = vrot.slane %v11622_v30, 7  ;;  %7831 = vmatprep.mubr.msk.bf16.mxu0 %vm1981_vm7, %v11532_v11 }
 0x1d3   : > { %15509 = vst [vmem:[#allocation109_spill] sm:$0xff] %v11748_v43  ;;  %v3255_v13 = vsel %vm1548_vm3, %v15513_v35, %v15511_v28  ;;  %v15516_v16 = vmov %v15511_v28  ;;  %v15522_v28 = vrot.slane %v15521_v22, 7  ;;  %v15550_v11 = vrot.slane %v15535_v8, 1 }
 0x1d4   : > { %v3257_v50 = vsel %vm1548_vm3, %v15516_v16, %v15515_v41  ;;  %v11770_v35 = vsel %vm1451_vm2, %v15519_v7, %v15518_v5  ;;  %v15520_v31 = vmov %v15519_v7  ;;  %v15525_v5 = vrot.slane %v15512_v24, 1 }
 0x1d5   : > { %v11763_v60 = vpack.c.bf16 %v3257_v50, %v3255_v13  ;;  %v11777_v41 = vsel %vm1451_vm2, %v15522_v28, %v15520_v31  ;;  %v15523_v13 = vrot.slane %v15521_v22, 1  ;;  %v15524_v50 = vrot.slane %v15514_v26, 1 }
 0x1d6   : > { %v15527_v31 = vrot.slane %v15514_v26, 7  ;;  %v15528_v28 = vrot.slane %v15510_v34, 7  ;;  %2283 = vmatmul.mubr.bf16.gmra.mrb[24].mxu1 %v11702_v20 }
 0x1d7   : > { %15517 = vst [vmem:[#allocation97_spill] sm:$0xff] %v11763_v60  ;;  %v3259_v16 = vsel %vm1548_vm3, %v15524_v50, %v15523_v13  ;;  %v15526_v7 = vmov %v15523_v13  ;;  %v15529_v13 = vpack.i.bf16 %v11014_v38, %v11003_v21  ;;  %v1402_v50 = vrot.slane %v11687_v54, 7  ;;  %v15538_v38 = vld [vmem:[#allocation155_spill] sm:$0xff]  ;;  %7800 = vmatprep.mubr.msk.bf16.mxu1 %vm1981_vm7, %v11717_v48 }
 0x1d8   : > { %v3355_v6 = vsel %vm1548_vm3, %v15526_v7, %v15525_v5  ;;  %v11797_v9 = vsel %vm1451_vm2, %v15528_v28, %v15527_v31  ;;  %v15531_v5 = vrot.slane %v15521_v22, 7  ;;  %v15532_v7 = vmov %v15527_v31  ;;  %v15533_v28 = vld [vmem:[#allocation152_spill] sm:$0xff] }
 0x1d9   : > { %9024 = vrot.lane.b32.xlu1 %v15529_v13, %s15165_s15  ;;  %v11806_v55 = vpack.c.bf16 %v3355_v6, %v3259_v16  ;;  %v15534_v47 = vrot.slane %v15533_v28, 1  ;;  %v15537_v21 = vpack.i.bf16 %v15502_v4, %v10929_v45  ;;  %v15539_v6 = vrot.slane %v15538_v38, 1  ;;  %2530 = vmatmul.mubr.bf16.gmra.mrb[120].mxu0 %v11617_v44  ;;  %v15587_v44 = vld [vmem:[#allocation108_spill] sm:$0xff] }
 0x1da   : > { %v11813_v31 = vsel %vm1451_vm2, %v15532_v7, %v15531_v5  ;;  %v15541_v5 = vrot.slane %v15533_v28, 7  ;;  %v15542_v7 = vrot.slane %v15535_v8, 7  ;;  %v15547_v4 = vrot.slane %v11187_v33, 1  ;;  %7832 = vmatprep.mubr.msk.bf16.mxu0 %vm1981_vm7, %v11607_v59 }
 0x1db   : > { %15530 = vst [vmem:[#allocation100_spill] sm:$0xff] %v11806_v55  ;;  %v3262_v60 = vsel %vm1548_vm3, %v15536_v27, %v15534_v47  ;;  %9019 = vrot.lane.b32.xlu0 %v15537_v21, %s15165_s15  ;;  %v15540_v16 = vmov %v15534_v47  ;;  %v15545_v27 = vrot.slane %v11187_v33, 7  ;;  %v15548_v21 = vmov %v15539_v6 }
 0x1dc   : > { %v3264_v13 = vsel %vm1548_vm3, %v15540_v16, %v15539_v6  ;;  %v11834_v55 = vsel %vm1451_vm2, %v15542_v7, %v15541_v5  ;;  %v15544_v47 = vmov %v15542_v7  ;;  %v3266_v6 = vsel %vm1548_vm3, %v15548_v21, %v15547_v4  ;;  %v8855_v16 = vpop.permute.xlu1 %8854 }
 0x1dd   : > { %15543 = vst [vmem:[#allocation98_spill] sm:$0xff] %v11834_v55  ;;  %v11841_v45 = vsel %vm1451_vm2, %v15545_v27, %v15544_v47  ;;  %v11848_v43 = vpack.c.bf16 %v3264_v13, %v3262_v60  ;;  %v15551_v5 = vmov %v15547_v4  ;;  %v15552_v55 = vrot.slane %v15538_v38, 7 }
 0x1de   : > { %15546 = vst [vmem:[#allocation122_spill] sm:$0xff] %v11841_v45  ;;  %v3356_v7 = vsel %vm1548_vm3, %v15551_v5, %v15550_v11  ;;  %v15553_v47 = vrot.slane %v15533_v28, 7  ;;  %v15554_v45 = vrot.slane %v11187_v33, 7  ;;  %v8842_v13 = vunpack.i.h.bf16 %v8840_v19 }
 0x1df   : > { %15549 = vst [vmem:[#allocation121_spill] sm:$0xff] %v11848_v43  ;;  %v15555_v4 = vmov %v15552_v55  ;;  %v8841_v21 = vunpack.i.l.bf16 %v8840_v19  ;;  %v11869_v43 = vpack.c.bf16 %v3356_v7, %v3266_v6  ;;  %v15557_v11 = vrot.slane %v11441_v46, 1 }
 0x1e0   : > { %v11860_v27 = vsel %vm1451_vm2, %v15553_v47, %v15552_v55  ;;  %v11867_v60 = vsel %vm1451_vm2, %v15555_v4, %v15554_v45  ;;  %v15558_v5 = vrot.slane %v11370_v3, 1  ;;  %v15559_v55 = vpack.i.bf16 %v15521_v22, %v15514_v26 }
 0x1e1   : > { %15556 = vst [vmem:[#allocation125_spill] sm:$0xff] %v11869_v43  ;;  %v15560_v47 = vrot.slane %v11487_v51, 1  ;;  %v15561_v45 = vmov %v15557_v11  ;;  %v15562_v19 = vrot.slane %v11441_v46, 7  ;;  %v15563_v6 = vrot.slane %v11370_v3, 7  ;;  %2537 = vmatmul.mubr.bf16.gmra.mrb[124].mxu0 %v11678_v52 }
 0x1e2   : > { %v3269_v25 = vsel %vm1548_vm3, %v15558_v5, %v15557_v11  ;;  %9034 = vrot.lane.b32.xlu1 %v15559_v55, %s15165_s15  ;;  %v15566_v5 = vrot.slane %v11507_v56, 7  ;;  %v15568_v22 = vrot.slane %v11507_v56, 1  ;;  %v15571_v43 = vrot.slane %v11584_v58, 7  ;;  %7833 = vmatprep.mubr.msk.bf16.mxu0 %vm1981_vm7, %v11685_v14 }
 0x1e3   : > { %v3271_v4 = vsel %vm1548_vm3, %v15561_v45, %v15560_v47  ;;  %v11890_v7 = vsel %vm1451_vm2, %v15563_v6, %v15562_v19  ;;  %v15565_v11 = vmov %v15563_v6  ;;  %v15569_v55 = vmov %v15560_v47 }
 0x1e4   : > { %15564 = vst [vmem:[#allocation113_spill] sm:$0xff] %v11890_v7  ;;  %v11897_v26 = vsel %vm1451_vm2, %v15566_v5, %v15565_v11  ;;  %v3273_v47 = vsel %vm1548_vm3, %v15569_v55, %v15568_v22  ;;  %v15570_v45 = vpack.i.bf16 %v15510_v34, %v15512_v24  ;;  %v8857_v19 = vunpack.i.h.bf16 %v8855_v16 }
 0x1e5   : > { %15567 = vst [vmem:[#allocation111_spill] sm:$0xff] %v11897_v26  ;;  %v8856_v6 = vunpack.i.l.bf16 %v8855_v16  ;;  %v1547_v11 = vsel %vm1451_vm2, %v1402_v50, %v15571_v43  ;;  %v11912_v5 = vpack.c.bf16 %v3271_v4, %v3269_v25  ;;  %v15573_v22 = vrot.slane %v11370_v3, 1  ;;  %v15583_v26 = vld [vmem:[#allocation104_spill] sm:$0xff] }
 0x1e6   : > { %9029 = vrot.lane.b32.xlu0 %v15570_v45, %s15165_s15  ;;  %v15574_v55 = vrot.slane %v11507_v56, 1  ;;  %v15575_v34 = vrot.slane %v11487_v51, 7  ;;  %v15576_v24 = vrot.slane %v11441_v46, 7  ;;  %v15578_v43 = vrot.slane %v11507_v56, 7 }
 0x1e7   : > { %15572 = vst [vmem:[#allocation137_spill] sm:$0xff] %v11912_v5  ;;  %v15581_v45 = vrot.slane %v11549_v49, 1  ;;  %v15582_v5 = vrot.slane %v11526_v32, 1  ;;  %v15591_v59 = vpack.i.bf16 %v15533_v28, %v15535_v8 }
 0x1e8   : > { %v3357_v7 = vsel %vm1548_vm3, %v15574_v55, %v15573_v22  ;;  %v11926_v16 = vsel %vm1451_vm2, %v15576_v24, %v15575_v34  ;;  %v15579_v25 = vmov %v15575_v34  ;;  %v3135_v55 = vrot.slane %v11557_v12, 7 }
 0x1e9   : > { %15577 = vst [vmem:[#allocation135_spill] sm:$0xff] %v11926_v16  ;;  %v11933_v4 = vsel %vm1451_vm2, %v15579_v25, %v15578_v43  ;;  %v3276_v22 = vsel %vm1548_vm3, %v15582_v5, %v15581_v45  ;;  %v2000_v34 = vsel %vm1981_vm7, %v8841_v21, %v15583_v26  ;;  %v9058_v24 = vpack.i.bf16 %v11707_v40, %v11683_v17  ;;  %v15585_v25 = vld [vmem:[#allocation70_spill] sm:$0xff]  ;;  %v8850_v5 = vpop.permute.xlu0 %8849 }
 0x1ea   : > { %15580 = vst [vmem:[#allocation147_spill] sm:$0xff] %v11933_v4  ;;  %v15584_v16 = vrot.slane %v11594_v23, 7  ;;  %v3209_v4 = vrot.slane %v15585_v25, 1  ;;  %v15586_v45 = vpack.i.bf16 %v11187_v33, %v15538_v38  ;;  %v2001_v21 = vsel %vm1981_vm7, %v8842_v13, %v15587_v44  ;;  %9039 = vrot.lane.b32.xlu0 %v15591_v59, %s15165_s15  ;;  %2544 = vmatmul.mubr.bf16.gmra.mrb[128].mxu0 %v11702_v20 }
 0x1eb   : > { %v11958_v26 = vpack.c.bf16 %v3357_v7, %v3273_v47  ;;  %v15589_v17 = vrot.slane %v11557_v12, 1  ;;  %v15590_v40 = vrot.slane %v11549_v49, 1  ;;  %v11965_v23 = vpack.c.bf16 %v8857_v19, %v8856_v6  ;;  %7834 = vmatprep.mubr.msk.bf16.mxu0 %vm1981_vm7, %v11717_v48 }
 0x1ec   : > { %v1522_v43 = vsel %vm1451_vm2, %v15584_v16, %v1521_v18  ;;  %9044 = vrot.lane.b32.xlu1 %v15586_v45, %s15165_s15  ;;  %v9063_v33 = vpack.i.bf16 %v11694_v62, %v1547_v11  ;;  %v1523_v38 = vsel %vm1451_vm2, %v1521_v18, %v1402_v50  ;;  %v15593_v13 = vrot.slane %v11549_v49, 7 }
 0x1ed   : > { %15588 = vst [vmem:[#allocation146_spill] sm:$0xff] %v11958_v26  ;;  %v3278_v16 = vsel %vm1548_vm3, %v15590_v40, %v15589_v17  ;;  %v15594_v7 = vrot.slane %v11526_v32, 7  ;;  %v15596_v6 = vrot.slane %v11559_v42, 7  ;;  %v15597_v59 = vrot.slane %v11559_v42, 1 }
 0x1ee   : > { %v11973_v44 = vpack.c.bf16 %v3278_v16, %v3276_v22  ;;  %v15598_v62 = vmov %v15589_v17  ;;  %v15599_v50 = vrot.slane %v11526_v32, 1  ;;  %v8852_v22 = vunpack.i.h.bf16 %v8850_v5 }
 0x1ef   : > { %v11980_v47 = vsel %vm1451_vm2, %v15594_v7, %v15593_v13  ;;  %v15595_v19 = vmov %v15594_v7  ;;  %v3280_v18 = vsel %vm1548_vm3, %v15598_v62, %v15597_v59  ;;  %v15600_v28 = vmov %v15597_v59  ;;  %v15608_v62 = vld [vmem:[#allocation62_spill] sm:$0xff] }
 0x1f0   : > { %15592 = vst [vmem:[#allocation152_spill] sm:$0xff] %v11973_v44  ;;  %v11987_v8 = vsel %vm1451_vm2, %v15596_v6, %v15595_v19  ;;  %v3358_v11 = vsel %vm1548_vm3, %v15600_v28, %v15599_v50  ;;  %v11999_v45 = vpack.c.bf16 %v2001_v21, %v2000_v34  ;;  %v15602_v40 = vmov %v15593_v13  ;;  %v15605_v34 = vld [vmem:[#allocation65_spill] sm:$0xff]  ;;  %v15613_v28 = vld [vmem:[#allocation63_spill] sm:$0xff] }
 0x1f1   : > { %v12001_v17 = vpack.c.bf16 %v3358_v11, %v3280_v18  ;;  %v12006_v16 = vsel %vm1451_vm2, %v15602_v40, %v3135_v55  ;;  %v8851_v13 = vunpack.i.l.bf16 %v8850_v5  ;;  %v15603_v7 = vpack.i.bf16 %v11507_v56, %v11487_v51  ;;  %v8865_v5 = vpop.permute.xlu1 %8864  ;;  %v15618_v56 = vld [vmem:[#allocation112_spill] sm:$0xff] }
 0x1f2   : > { %v15604_v19 = vmov %v15596_v6  ;;  %v15606_v21 = vrot.slane %v15605_v34, 1  ;;  %v15609_v18 = vrot.slane %v15608_v62, 1  ;;  %2290 = vmatmul.mubr.bf16.gmra.mrb[28].mxu1 %v11999_v45  ;;  %v15611_v51 = vpack.i.bf16 %v11441_v46, %v11370_v3  ;;  %2551 = vmatmul.mubr.bf16.gmra.mrb[132].mxu0 %v11999_v45 }
 0x1f3   : > { %15601 = vst [vmem:[#allocation151_spill] sm:$0xff] %v12001_v17  ;;  %9054 = vrot.lane.b32.xlu1 %v15603_v7, %s15165_s15  ;;  %v12015_v6 = vsel %vm1451_vm2, %v3135_v55, %v15604_v19  ;;  %v15612_v55 = vrot.slane %v15605_v34, 7  ;;  %v15614_v11 = vrot.slane %v15613_v28, 7  ;;  %v1631_v3 = vrot.slane %v11687_v54, 1  ;;  %7801 = vmatprep.mubr.msk.bf16.mxu1 %vm1981_vm7, %v11965_v23 }
 0x1f4   : > { %v12020_v59 = vsel %vm1548_vm3, %v15606_v21, %v3209_v4  ;;  %v12025_v50 = vsel %vm1548_vm3, %v3209_v4, %v15609_v18  ;;  %9049 = vrot.lane.b32.xlu0 %v15611_v51, %s15165_s15  ;;  %v15615_v4 = vrot.slane %v15585_v25, 7  ;;  %v3139_v46 = vrot.slane %v11656_v63, 7  ;;  %7835 = vmatprep.mubr.msk.bf16.mxu0 %vm1981_vm7, %v11965_v23 }
 0x1f5   : > { %15607 = vst [vmem:[#allocation155_spill] sm:$0xff] %v12020_v59  ;;  %15610 = vst [vmem:[#allocation70_spill] sm:$0xff] %v12025_v50  ;;  %v12039_v40 = vsel %vm1451_vm2, %v15614_v11, %v15612_v55  ;;  %v15616_v7 = vmov %v15612_v55  ;;  %v3141_v21 = vrot.slane %v11647_v37, 7  ;;  %v9073_v18 = vpack.i.bf16 %v1523_v38, %v1522_v43  ;;  %v8860_v11 = vpop.permute.xlu0 %8859  ;;  %v8875_v44 = vpop.permute.xlu1 %8874 }
 0x1f6   : > { %v12046_v19 = vsel %vm1451_vm2, %v15616_v7, %v15615_v4  ;;  %v8867_v51 = vunpack.i.h.bf16 %v8865_v5  ;;  %v8866_v55 = vunpack.i.l.bf16 %v8865_v5  ;;  %v15617_v4 = vld [vmem:[#allocation110_spill] sm:$0xff]  ;;  %v2003_v59 = vsel %vm1981_vm7, %v8852_v22, %v15618_v56 }
 0x1f7   : > { %9059 = vrot.lane.b32.xlu1 %v9058_v24, %s15165_s15  ;;  %v2002_v7 = vsel %vm1981_vm7, %v8851_v13, %v15617_v4  ;;  %v3023_v50 = vrot.slane %v11670_v36, 7  ;;  %v15619_v43 = vrot.slane %v11622_v30, 1  ;;  %v15620_v5 = vrot.slane %v11584_v58, 1 }
 0x1f8   : > { %9064 = vrot.lane.b32.xlu0 %v9063_v33, %s15165_s15  ;;  %v8861_v17 = vunpack.i.l.bf16 %v8860_v11  ;;  %v12069_v24 = vpack.c.bf16 %v2003_v59, %v2002_v7  ;;  %v12072_v13 = vsel %vm1451_vm2, %v3139_v46, %v3141_v21  ;;  %v3138_v33 = vrot.slane %v11653_v0, 7 }
 0x1f9   : > { %v1632_v38 = vsel %vm1548_vm3, %v15619_v43, %v1631_v3  ;;  %v1668_v54 = vsel %vm1548_vm3, %v1631_v3, %v15620_v5  ;;  %v12075_v22 = vsel %vm1451_vm2, %v3141_v21, %v3023_v50  ;;  %v12078_v4 = vpack.c.bf16 %v8867_v51, %v8866_v55  ;;  %v15622_v51 = vld [vmem:[#allocation116_spill] sm:$0xff] }
 0x1fa   : > { %v8862_v56 = vunpack.i.h.bf16 %v8860_v11  ;;  %2297 = vmatmul.mubr.bf16.gmra.mrb[32].mxu1 %v12069_v24  ;;  %v15621_v59 = vpack.i.bf16 %v11549_v49, %v11526_v32  ;;  %v9078_v3 = vpack.i.bf16 %v1668_v54, %v1632_v38  ;;  %v8877_v21 = vunpack.i.h.bf16 %v8875_v44  ;;  %v15624_v32 = vld [vmem:[#allocation120_spill] sm:$0xff]  ;;  %v8870_v11 = vpop.permute.xlu0 %8869  ;;  %2558 = vmatmul.mubr.bf16.gmra.mrb[136].mxu0 %v12069_v24 }
 0x1fb   : > { %9074 = vrot.lane.b32.xlu1 %v9073_v18, %s15165_s15  ;;  %7802 = vmatprep.mubr.msk.bf16.mxu1 %vm1981_vm7, %v12078_v4  ;;  %v8876_v7 = vunpack.i.l.bf16 %v8875_v44  ;;  %v2004_v55 = vsel %vm1981_vm7, %v8861_v17, %v15622_v51  ;;  %v15623_v18 = vpack.i.bf16 %v11559_v42, %v11557_v12  ;;  %v12100_v54 = vsel %vm1451_vm2, %v3138_v33, %v3139_v46  ;;  %v8885_v42 = vpop.permute.xlu1 %8884 }
 0x1fc   : > { %9069 = vrot.lane.b32.xlu0 %v15621_v59, %s15165_s15  ;;  %v2005_v49 = vsel %vm1981_vm7, %v8862_v56, %v15624_v32  ;;  %v12103_v44 = vsel %vm1451_vm2, %v3023_v50, %v3138_v33  ;;  %v8872_v38 = vunpack.i.h.bf16 %v8870_v11  ;;  %v8871_v5 = vunpack.i.l.bf16 %v8870_v11  ;;  %7836 = vmatprep.mubr.msk.bf16.mxu0 %vm1981_vm7, %v12078_v4 }
 0x1fd   : > { %v12106_v17 = vpack.c.bf16 %v8877_v21, %v8876_v7  ;;  %v12108_v43 = vpack.c.bf16 %v2005_v49, %v2004_v55  ;;  %v15625_v12 = vpack.i.bf16 %v15585_v25, %v15605_v34  ;;  %v15626_v50 = vpack.i.bf16 %v15613_v28, %v15608_v62  ;;  %v15628_v34 = vld [vmem:[#allocation123_spill] sm:$0xff]  ;;  %v15629_v62 = vld [vmem:[#allocation124_spill] sm:$0xff] }
 0x1fe   : > { %v8887_v56 = vunpack.i.h.bf16 %v8885_v42  ;;  %v8886_v46 = vunpack.i.l.bf16 %v8885_v42  ;;  %v15627_v25 = vpack.i.bf16 %v11670_v36, %v11647_v37  ;;  %v2006_v33 = vsel %vm1981_vm7, %v8871_v5, %v15628_v34  ;;  %v8880_v59 = vpop.permute.xlu0 %8879  ;;  %v15657_v36 = vld [vmem:[#allocation74_spill] sm:$0xff] }
 0x1ff   : > { %9084 = vrot.lane.b32.xlu1 %v15623_v18, %s15165_s15  ;;  %v2007_v28 = vsel %vm1981_vm7, %v8872_v38, %v15629_v62  ;;  %v8895_v7 = vpop.permute.xlu1 %8894  ;;  %v8882_v18 = vunpack.i.h.bf16 %v8880_v59  ;;  %v8881_v32 = vunpack.i.l.bf16 %v8880_v59  ;;  %v15631_v38 = vld [vmem:[#allocation129_spill] sm:$0xff] }
 0x200   : > { %9079 = vrot.lane.b32.xlu0 %v9078_v3, %s15165_s15  ;;  %v15630_v3 = vpack.i.bf16 %v11656_v63, %v11653_v0  ;;  %v12136_v21 = vpack.c.bf16 %v2007_v28, %v2006_v33  ;;  %v12138_v55 = vpack.c.bf16 %v8887_v56, %v8886_v46  ;;  %v8897_v49 = vunpack.i.h.bf16 %v8895_v7 }
 0x201   : > { %v8896_v11 = vunpack.i.l.bf16 %v8895_v7  ;;  %v2008_v5 = vsel %vm1981_vm7, %v8881_v32, %v15631_v38 }
 0x202   : > { %2304 = vmatmul.mubr.bf16.gmra.mrb[36].mxu1 %v12108_v43  ;;  %2565 = vmatmul.mubr.bf16.gmra.mrb[140].mxu0 %v12108_v43 }
 0x203   : > { %9094 = vrot.lane.b32.xlu1 %v15625_v12, %s15165_s15  ;;  %7803 = vmatprep.mubr.msk.bf16.mxu1 %vm1981_vm7, %v12106_v17  ;;  %v15632_v12 = vld [vmem:[#allocation133_spill] sm:$0xff]  ;;  %v12150_v56 = vpack.c.bf16 %v8897_v49, %v8896_v11  ;;  %v8905_v33 = vpop.permute.xlu1 %8904 }
 0x204   : > { %9089 = vrot.lane.b32.xlu0 %v15626_v50, %s15165_s15  ;;  %v2009_v42 = vsel %vm1981_vm7, %v8882_v18, %v15632_v12  ;;  %v8890_v50 = vpop.permute.xlu0 %8889  ;;  %v8907_v28 = vunpack.i.h.bf16 %v8905_v33  ;;  %v8906_v59 = vunpack.i.l.bf16 %v8905_v33  ;;  %7837 = vmatprep.mubr.msk.bf16.mxu0 %vm1981_vm7, %v12106_v17  ;;  %v15635_v18 = vld [vmem:[#allocation136_spill] sm:$0xff] }
 0x205   : > { %15633 = vst [vmem:[#allocation108_spill] sm:$0xff] %v12150_v56  ;;  %v12152_v46 = vpack.c.bf16 %v2009_v42, %v2008_v5  ;;  %v8891_v34 = vunpack.i.l.bf16 %v8890_v50 }
 0x206   : > { %v12166_v12 = vpack.c.bf16 %v8907_v28, %v8906_v59 }
 0x207   : > { %9104 = vrot.lane.b32.xlu1 %v15627_v25, %s15165_s15  ;;  %v8892_v25 = vunpack.i.h.bf16 %v8890_v50  ;;  %v8915_v5 = vpop.permute.xlu1 %8914 }
 0x208   : > { %9099 = vrot.lane.b32.xlu0 %v15630_v3, %s15165_s15  ;;  %v15634_v3 = vld [vmem:[#allocation134_spill] sm:$0xff]  ;;  %v8900_v49 = vpop.permute.xlu0 %8899  ;;  %15637 = vst [vmem:[#allocation62_spill] sm:$0xff] %v12166_v12  ;;  %v8917_v33 = vunpack.i.h.bf16 %v8915_v5  ;;  %v8916_v38 = vunpack.i.l.bf16 %v8915_v5 }
 0x209   : > { %v2010_v7 = vsel %vm1981_vm7, %v8891_v34, %v15634_v3  ;;  %v2011_v32 = vsel %vm1981_vm7, %v8892_v25, %v15635_v18  ;;  %v8902_v42 = vunpack.i.h.bf16 %v8900_v49  ;;  %v8901_v50 = vunpack.i.l.bf16 %v8900_v49  ;;  %v15638_v25 = vld [vmem:[#allocation141_spill] sm:$0xff] }
 0x20a   : > { %2311 = vmatmul.mubr.bf16.gmra.mrb[40].mxu1 %v12136_v21  ;;  %v12164_v11 = vpack.c.bf16 %v2011_v32, %v2010_v7  ;;  %2572 = vmatmul.mubr.bf16.gmra.mrb[144].mxu0 %v12136_v21  ;;  %v15639_v3 = vld [vmem:[#allocation145_spill] sm:$0xff]  ;;  %v12178_v7 = vpack.c.bf16 %v8917_v33, %v8916_v38 }
 0x20b   : > { %7804 = vmatprep.mubr.msk.bf16.mxu1 %vm1981_vm7, %v12138_v55  ;;  %7838 = vmatprep.mubr.msk.bf16.mxu0 %vm1981_vm7, %v12138_v55  ;;  %v2012_v34 = vsel %vm1981_vm7, %v8901_v50, %v15638_v25  ;;  %v2013_v28 = vsel %vm1981_vm7, %v8902_v42, %v15639_v3  ;;  %v8925_v62 = vpop.permute.xlu1 %8924  ;;  %v15642_v42 = vld [vmem:[#allocation148_spill] sm:$0xff]  ;;  %v15643_v33 = vld [vmem:[#allocation149_spill] sm:$0xff] }
 0x20c   : > { %15636 = vst [vmem:[#allocation65_spill] sm:$0xff] %v12164_v11  ;;  %v8910_v59 = vpop.permute.xlu0 %8909  ;;  %15640 = vst [vmem:[#allocation63_spill] sm:$0xff] %v12178_v7  ;;  %v12180_v32 = vpack.c.bf16 %v2013_v28, %v2012_v34  ;;  %v8927_v5 = vunpack.i.h.bf16 %v8925_v62  ;;  %v8926_v50 = vunpack.i.l.bf16 %v8925_v62 }
 0x20d   : > { %v8912_v49 = vunpack.i.h.bf16 %v8910_v59  ;;  %v8911_v18 = vunpack.i.l.bf16 %v8910_v59 }
 0x20e   : > { %15641 = vst [vmem:[#allocation110_spill] sm:$0xff] %v12180_v32  ;;  %v12194_v59 = vpack.c.bf16 %v8927_v5, %v8926_v50  ;;  %v15647_v5 = vld [vmem:[#allocation154_spill] sm:$0xff] }
 0x20f   : > { %v2014_v38 = vsel %vm1981_vm7, %v8911_v18, %v15642_v42  ;;  %v2015_v34 = vsel %vm1981_vm7, %v8912_v49, %v15643_v33  ;;  %v15646_v18 = vld [vmem:[#allocation153_spill] sm:$0xff] }
 0x210   : > { %v8920_v3 = vpop.permute.xlu0 %8919  ;;  %v12192_v28 = vpack.c.bf16 %v2015_v34, %v2014_v38  ;;  %15645 = vst [vmem:[#allocation123_spill] sm:$0xff] %v12194_v59 }
 0x211   : > { %v8922_v25 = vunpack.i.h.bf16 %v8920_v3  ;;  %v8921_v51 = vunpack.i.l.bf16 %v8920_v3 }
 0x212   : > { %2318 = vmatmul.mubr.bf16.gmra.mrb[44].mxu1 %v12152_v46  ;;  %2579 = vmatmul.mubr.bf16.gmra.mrb[148].mxu0 %v12152_v46  ;;  %15644 = vst [vmem:[#allocation120_spill] sm:$0xff] %v12192_v28 }
 0x213   : > { %7805 = vmatprep.mubr.msk.bf16.mxu1 %vm1981_vm7, %v12150_v56  ;;  %7839 = vmatprep.mubr.msk.bf16.mxu0 %vm1981_vm7, %v12150_v56  ;;  %v2016_v49 = vsel %vm1981_vm7, %v8921_v51, %v15646_v18  ;;  %v2017_v50 = vsel %vm1981_vm7, %v8922_v25, %v15647_v5  ;;  %v15650_v25 = vld [vmem:[#allocation160_spill] sm:$0xff] }
 0x214   : > { %v8935_v30 = vpop.permute.xlu1 %8934  ;;  %v12208_v34 = vpack.c.bf16 %v2017_v50, %v2016_v49 }
 0x215   : > { %v8937_v62 = vunpack.i.h.bf16 %v8935_v30  ;;  %v8936_v58 = vunpack.i.l.bf16 %v8935_v30 }
 0x216   : > { %15649 = vst [vmem:[#allocation134_spill] sm:$0xff] %v12208_v34 }
 0x217   : > { %v12206_v38 = vpack.c.bf16 %v8937_v62, %v8936_v58 }
 0x218   : > { %v8930_v42 = vpop.permute.xlu0 %8929 }
 0x219   : > { %15648 = vst [vmem:[#allocation133_spill] sm:$0xff] %v12206_v38  ;;  %v8932_v3 = vunpack.i.h.bf16 %v8930_v42  ;;  %v8931_v33 = vunpack.i.l.bf16 %v8930_v42 }
 0x21a   : > { %2325 = vmatmul.mubr.bf16.gmra.mrb[48].mxu1 %v12164_v11  ;;  %2586 = vmatmul.mubr.bf16.gmra.mrb[152].mxu0 %v12164_v11 }
 0x21b   : > { %7806 = vmatprep.mubr.msk.bf16.mxu1 %vm1981_vm7, %v12166_v12  ;;  %7840 = vmatprep.mubr.msk.bf16.mxu0 %vm1981_vm7, %v12166_v12  ;;  %v8945_v26 = vpop.permute.xlu1 %8944  ;;  %v2018_v58 = vsel %vm1981_vm7, %v8931_v33, %v15650_v25  ;;  %v2019_v62 = vsel %vm1981_vm7, %v8932_v3, %v11271_v1  ;;  %v15651_v3 = vld [vmem:[#allocation162_spill] sm:$0xff] }
 0x21c   : > { %v8947_v30 = vunpack.i.h.bf16 %v8945_v26  ;;  %v8946_v51 = vunpack.i.l.bf16 %v8945_v26  ;;  %v12220_v5 = vpack.c.bf16 %v2019_v62, %v2018_v58 }
 0x21e   : > { %v12222_v50 = vpack.c.bf16 %v8947_v30, %v8946_v51 }
 0x21f   : > { %v8940_v49 = vpop.permute.xlu0 %8939 }
 0x220   : > { %v8942_v42 = vunpack.i.h.bf16 %v8940_v49  ;;  %v8941_v18 = vunpack.i.l.bf16 %v8940_v49 }
 0x222   : > { %2332 = vmatmul.mubr.bf16.gmra.mrb[52].mxu1 %v12180_v32  ;;  %2593 = vmatmul.mubr.bf16.gmra.mrb[156].mxu0 %v12180_v32  ;;  %v2020_v30 = vsel %vm1981_vm7, %v8941_v18, %v15651_v3  ;;  %v2021_v51 = vsel %vm1981_vm7, %v8942_v42, %v11293_v10  ;;  %v15653_v10 = vld [vmem:[#allocation163_spill] sm:$0xff] }
 0x223   : > { %7807 = vmatprep.mubr.msk.bf16.mxu1 %vm1981_vm7, %v12178_v7  ;;  %7841 = vmatprep.mubr.msk.bf16.mxu0 %vm1981_vm7, %v12178_v7  ;;  %v12236_v32 = vpack.c.bf16 %v2021_v51, %v2020_v30 }
 0x227   : > { %v8955_v26 = vpop.permute.xlu1 %8954 }
 0x228   : > { %v8950_v7 = vpop.permute.xlu0 %8949  ;;  %v8957_v33 = vunpack.i.h.bf16 %v8955_v26  ;;  %v8956_v25 = vunpack.i.l.bf16 %v8955_v26 }
 0x229   : > { %v8952_v49 = vunpack.i.h.bf16 %v8950_v7  ;;  %v8951_v1 = vunpack.i.l.bf16 %v8950_v7 }
 0x22a   : > { %2339 = vmatmul.mubr.bf16.gmra.mrb[56].mxu1 %v12192_v28  ;;  %2600 = vmatmul.mubr.bf16.gmra.mrb[160].mxu0 %v12192_v28  ;;  %v12234_v58 = vpack.c.bf16 %v8957_v33, %v8956_v25  ;;  %v15654_v33 = vld [vmem:[#allocation164_spill] sm:$0xff] }
 0x22b   : > { %7808 = vmatprep.mubr.msk.bf16.mxu1 %vm1981_vm7, %v12194_v59  ;;  %7842 = vmatprep.mubr.msk.bf16.mxu0 %vm1981_vm7, %v12194_v59  ;;  %v8965_v62 = vpop.permute.xlu1 %8964  ;;  %v2022_v42 = vsel %vm1981_vm7, %v8951_v1, %v15653_v10  ;;  %v2023_v7 = vsel %vm1981_vm7, %v8952_v49, %v15654_v33  ;;  %v15658_v1 = vld [vmem:[#allocation81_spill] sm:$0xff] }
 0x22c   : > { %15652 = vst [vmem:[#allocation145_spill] sm:$0xff] %v12234_v58  ;;  %v8960_v12 = vpop.permute.xlu0 %8959  ;;  %v8967_v25 = vunpack.i.h.bf16 %v8965_v62  ;;  %v8966_v30 = vunpack.i.l.bf16 %v8965_v62  ;;  %v12256_v33 = vpack.c.bf16 %v2023_v7, %v2022_v42  ;;  %v15663_v42 = vld [vmem:[#allocation103_spill] sm:$0xff]  ;;  %v15664_v7 = vld [vmem:[#allocation93_spill] sm:$0xff] }
 0x22f   : > { %v8975_v26 = vpop.permute.xlu1 %8974 }
 0x230   : > { %v8977_v18 = vunpack.i.h.bf16 %v8975_v26  ;;  %v8976_v3 = vunpack.i.l.bf16 %v8975_v26  ;;  %v8970_v59 = vpop.permute.xlu0 %8969 }
 0x231   : > { %v8972_v51 = vunpack.i.h.bf16 %v8970_v59  ;;  %v8971_v28 = vunpack.i.l.bf16 %v8970_v59 }
 0x232   : > { %2346 = vmatmul.mubr.bf16.gmra.mrb[60].mxu1 %v12208_v34  ;;  %2607 = vmatmul.mubr.bf16.gmra.mrb[164].mxu0 %v12208_v34  ;;  %v15656_v34 = vld [vmem:[#allocation89_spill] sm:$0xff] }
 0x233   : > { %7809 = vmatprep.mubr.msk.bf16.mxu1 %vm1981_vm7, %v12206_v38  ;;  %7843 = vmatprep.mubr.msk.bf16.mxu0 %vm1981_vm7, %v12206_v38  ;;  %v3511_v26 = vsel %vm1981_vm7, %v15656_v34, %v8977_v18  ;;  %v3509_v37 = vsel %vm1981_vm7, %v15657_v36, %v8972_v51  ;;  %v3508_v10 = vsel %vm1981_vm7, %v15658_v1, %v8971_v28  ;;  %v8962_v38 = vunpack.i.h.bf16 %v8960_v12  ;;  %v15662_v36 = vld [vmem:[#allocation102_spill] sm:$0xff] }
 0x234   : > { %v12260_v63 = vpack.c.bf16 %v3509_v37, %v3508_v10  ;;  %v8961_v34 = vunpack.i.l.bf16 %v8960_v12 }
 0x235   : > { %v8985_v49 = vpop.permute.xlu1 %8984 }
 0x236   : > { %15660 = vst [vmem:[#allocation154_spill] sm:$0xff] %v12260_v63  ;;  %v8987_v59 = vunpack.i.h.bf16 %v8985_v49  ;;  %v8986_v0 = vunpack.i.l.bf16 %v8985_v49 }
 0x238   : > { %v3514_v28 = vsel %vm1981_vm7, %v15662_v36, %v8986_v0  ;;  %v15667_v36 = vld [vmem:[#allocation115_spill] sm:$0xff] }
 0x239   : > { %v8995_v37 = vpop.permute.xlu1 %8994 }
 0x23a   : > { %2353 = vmatmul.mubr.bf16.gmra.mrb[64].mxu1 %v12220_v5  ;;  %2614 = vmatmul.mubr.bf16.gmra.mrb[168].mxu0 %v12220_v5  ;;  %v8996_v1 = vunpack.i.l.bf16 %v8995_v37 }
 0x23b   : > { %7810 = vmatprep.mubr.msk.bf16.mxu1 %vm1981_vm7, %v12222_v50  ;;  %7844 = vmatprep.mubr.msk.bf16.mxu0 %vm1981_vm7, %v12222_v50 }
 0x242   : > { %2360 = vmatmul.mubr.bf16.gmra.mrb[68].mxu1 %v12236_v32  ;;  %2620 = vmatmul.mubr.bf16.gmra.mrb[172].mxu0 %v12236_v32 }
 0x243   : > { %7811 = vmatprep.mubr.msk.bf16.mxu1 %vm1981_vm7, %v12234_v58  ;;  %v15655_v58 = vld [vmem:[#allocation88_spill] sm:$0xff] }
 0x244   : > { %v3510_v11 = vsel %vm1981_vm7, %v15655_v58, %v8976_v3  ;;  %v8980_v3 = vpop.permute.xlu0 %8979  ;;  %v12262_v58 = vpack.c.bf16 %v8967_v25, %v8966_v30  ;;  %v15665_v25 = vld [vmem:[#allocation91_spill] sm:$0xff] }
 0x245   : > { %v12258_v62 = vpack.c.bf16 %v3511_v26, %v3510_v11  ;;  %v8982_v18 = vunpack.i.h.bf16 %v8980_v3  ;;  %v8981_v56 = vunpack.i.l.bf16 %v8980_v3  ;;  %v3515_v11 = vsel %vm1981_vm7, %v15663_v42, %v8987_v59  ;;  %v15666_v3 = vld [vmem:[#allocation165_spill] sm:$0xff] }
 0x246   : > { %15661 = vst [vmem:[#allocation160_spill] sm:$0xff] %v12262_v58  ;;  %v12275_v30 = vpack.c.bf16 %v3515_v11, %v3514_v28  ;;  %v8997_v26 = vunpack.i.h.bf16 %v8995_v37  ;;  %v3518_v28 = vsel %vm1981_vm7, %v15667_v36, %v8996_v1  ;;  %v15668_v42 = vld [vmem:[#allocation117_spill] sm:$0xff]  ;;  %v9005_v37 = vpop.permute.xlu1 %9004 }
 0x247   : > { %15659 = vst [vmem:[#allocation148_spill] sm:$0xff] %v12258_v62  ;;  %v3512_v51 = vsel %vm1981_vm7, %v15664_v7, %v8981_v56  ;;  %v3513_v12 = vsel %vm1981_vm7, %v15665_v25, %v8982_v18  ;;  %v2024_v56 = vsel %vm1981_vm7, %v8961_v34, %v11414_v15  ;;  %v2025_v18 = vsel %vm1981_vm7, %v8962_v38, %v15666_v3  ;;  %v15669_v7 = vld [vmem:[#allocation107_spill] sm:$0xff]  ;;  %v15670_v25 = vld [vmem:[#allocation105_spill] sm:$0xff] }
 0x248   : > { %v8990_v0 = vpop.permute.xlu0 %8989  ;;  %v12278_v10 = vpack.c.bf16 %v3513_v12, %v3512_v51  ;;  %v3519_v11 = vsel %vm1981_vm7, %v15668_v42, %v8997_v26  ;;  %v9006_v15 = vunpack.i.l.bf16 %v9005_v37  ;;  %v12296_v34 = vpack.c.bf16 %v2025_v18, %v2024_v56  ;;  %v15672_v26 = vld [vmem:[#allocation130_spill] sm:$0xff]  ;;  %v15675_v18 = vld [vmem:[#allocation127_spill] sm:$0xff] }
 0x249   : > { %v8992_v49 = vunpack.i.h.bf16 %v8990_v0  ;;  %v8991_v59 = vunpack.i.l.bf16 %v8990_v0  ;;  %v12294_v0 = vpack.c.bf16 %v3519_v11, %v3518_v28  ;;  %v15674_v28 = vld [vmem:[#allocation128_spill] sm:$0xff] }
 0x24a   : > { %2367 = vmatmul.mubr.bf16.gmra.mrb[72].mxu1 %v12256_v33  ;;  %15671 = vst [vmem:[#allocation163_spill] sm:$0xff] %v12296_v34  ;;  %v3522_v42 = vsel %vm1981_vm7, %v15672_v26, %v9006_v15  ;;  %v15677_v26 = vld [vmem:[#allocation142_spill] sm:$0xff] }
 0x24b   : > { %7812 = vmatprep.mubr.msk.bf16.mxu1 %vm1981_vm7, %v12262_v58  ;;  %v3516_v51 = vsel %vm1981_vm7, %v15669_v7, %v8991_v59  ;;  %v3517_v12 = vsel %vm1981_vm7, %v15670_v25, %v8992_v49  ;;  %v9007_v58 = vunpack.i.h.bf16 %v9005_v37  ;;  %v15673_v59 = vld [vmem:[#allocation132_spill] sm:$0xff]  ;;  %v9015_v49 = vpop.permute.xlu1 %9014 }
 0x24c   : > { %v9000_v38 = vpop.permute.xlu0 %8999  ;;  %v12298_v3 = vpack.c.bf16 %v3517_v12, %v3516_v51  ;;  %v9017_v51 = vunpack.i.h.bf16 %v9015_v49  ;;  %v9016_v25 = vunpack.i.l.bf16 %v9015_v49  ;;  %v15679_v49 = vld [vmem:[#allocation140_spill] sm:$0xff] }
 0x24d   : > { %v9002_v1 = vunpack.i.h.bf16 %v9000_v38  ;;  %v9001_v36 = vunpack.i.l.bf16 %v9000_v38  ;;  %v3523_v7 = vsel %vm1981_vm7, %v15673_v59, %v9007_v58  ;;  %v15676_v58 = vld [vmem:[#allocation82_spill] sm:$0xff]  ;;  %v15678_v59 = vld [vmem:[#allocation144_spill] sm:$0xff] }
 0x24e   : > { %v12311_v37 = vpack.c.bf16 %v3523_v7, %v3522_v42  ;;  %7890 = vmatprep.mubr.msk.bf16.mxu0 %vm1981_vm7, %v15676_v58  ;;  %v9356_v7 = vld [vmem:[%s14890_s5] sm:$0xff]  }
 0x24f   : > { %v3520_v56 = vsel %vm1981_vm7, %v15674_v28, %v9001_v36  ;;  %v3521_v11 = vsel %vm1981_vm7, %v15675_v18, %v9002_v1  ;;  %v3526_v36 = vsel %vm1981_vm7, %v15677_v26, %v9016_v25  ;;  %v3527_v1 = vsel %vm1981_vm7, %v15678_v59, %v9017_v51  ;;  %v9025_v42 = vpop.permute.xlu1 %9024  ;;  %v9357_v59 = vld [vmem:[%s14890_s5 + $0xc0] sm:$0xff]   ;;  %3765 = vmatmul.mubr.bf16.vlgmr.msra.gmra.mrb[176].mxu0 %v12260_v63 }
 0x250   : > { %v9010_v12 = vpop.permute.xlu0 %9009  ;;  %v12314_v15 = vpack.c.bf16 %v3521_v11, %v3520_v56  ;;  %v15680_v56 = vld [vmem:[#allocation139_spill] sm:$0xff]  ;;  %v12329_v11 = vpack.c.bf16 %v3527_v1, %v3526_v36  ;;  %v9026_v58 = vunpack.i.l.bf16 %v9025_v42  ;;  %v15681_v1 = vld [vmem:[#allocation158_spill] sm:$0xff]  ;;  %4275 = vmatpush1.bf16.msra.mxu0 %v9357_v59  ;;  %v9360_v59 = vld [vmem:[%s14890_s5 + $0x10] sm:$0xff]  }
 0x251   : > { %v9011_v38 = vunpack.i.l.bf16 %v9010_v12  ;;  %4276 = vmatprep.subr.bf16.mxu0 %v15268_v2 }
 0x252   : > { %2373 = vmatmul.mubr.bf16.gmra.mrb[76].mxu1 %v12296_v34 }
 0x253   : > { %7857 = vmatprep.mubr.msk.bf16.mxu1 %vm1981_vm7, %v11404_v29  ;;  %v9012_v29 = vunpack.i.h.bf16 %v9010_v12  ;;  %v3524_v28 = vsel %vm1981_vm7, %v15679_v49, %v9011_v38  ;;  %v9027_v12 = vunpack.i.h.bf16 %v9025_v42  ;;  %v3530_v38 = vsel %vm1981_vm7, %v11733_v61, %v9026_v58  ;;  %v15682_v49 = vld [vmem:[#allocation156_spill] sm:$0xff] }
 0x254   : > { %v9020_v34 = vpop.permute.xlu0 %9019  ;;  %v9035_v36 = vpop.permute.xlu1 %9034 }
 0x255   : > { %v3525_v18 = vsel %vm1981_vm7, %v15680_v56, %v9012_v29  ;;  %v9022_v26 = vunpack.i.h.bf16 %v9020_v34  ;;  %v9021_v51 = vunpack.i.l.bf16 %v9020_v34  ;;  %v3531_v29 = vsel %vm1981_vm7, %v11740_v57, %v9027_v12  ;;  %v9358_v34 = vld [vmem:[%s14890_s5 + $0x8] sm:$0xff]  }
 0x256   : > { %v12331_v25 = vpack.c.bf16 %v3525_v18, %v3524_v28  ;;  %v12350_v28 = vpack.c.bf16 %v3531_v29, %v3530_v38  ;;  %v9037_v61 = vunpack.i.h.bf16 %v9035_v36  ;;  %v9036_v57 = vunpack.i.l.bf16 %v9035_v36  ;;  %v9359_v12 = vld [vmem:[%s14890_s5 + $0xc8] sm:$0xff]  }
 0x257   : > { %v3528_v42 = vsel %vm1981_vm7, %v15681_v1, %v9021_v51  ;;  %4277 = vmatpush1.bf16.msra.mxu0 %v9359_v12  ;;  %v15686_v12 = vld [vmem:[#allocation122_spill] sm:$0xff] }
 0x258   : > { %v9030_v58 = vpop.permute.xlu0 %9029  ;;  %v3535_v51 = vsel %vm1981_vm7, %v11813_v31, %v9037_v61  ;;  %v9361_v61 = vld [vmem:[%s14890_s5 + $0xd0] sm:$0xff]   ;;  %4278 = vmatprep.subr.bf16.mxu0 %v15268_v2 }
 0x259   : > { %v9032_v56 = vunpack.i.h.bf16 %v9030_v58  ;;  %v9031_v18 = vunpack.i.l.bf16 %v9030_v58  ;;  %v15685_v58 = vld [vmem:[#allocation166_spill] sm:$0xff] }
 0x25a   : > { %2737 = vmatmul.mubr.bf16.vlgmr.msra.gmra.mrb[80].mxu1 %v11477_v53  ;;  %v3529_v53 = vsel %vm1981_vm7, %v15682_v49, %v9022_v26  ;;  %v3534_v26 = vsel %vm1981_vm7, %v11797_v9, %v9036_v57 }
 0x25b   : > { %4004 = vmatpush1.bf16.msra.mxu1 %v9356_v7  ;;  %7858 = vmatprep.mubr.msk.bf16.mxu1 %vm1981_vm7, %v11482_v39  ;;  %v12354_v39 = vpack.c.bf16 %v3529_v53, %v3528_v42  ;;  %v15683_v7 = vld [vmem:[#allocation87_spill] sm:$0xff]  ;;  %v3532_v29 = vsel %vm1981_vm7, %v11777_v41, %v9031_v18  ;;  %v3533_v36 = vsel %vm1981_vm7, %v11770_v35, %v9032_v56  ;;  %v9362_v18 = vld [vmem:[%s14890_s5 + $0x18] sm:$0xff]  }
 0x25c   : > { %4005 = vmatprep.subr.bf16.mxu1 %v15268_v2  ;;  %7891 = vmatprep.mubr.msk.bf16.mxu0 %vm1981_vm7, %v15683_v7  ;;  %v12373_v1 = vpack.c.bf16 %v3535_v51, %v3534_v26  ;;  %v9040_v9 = vpop.permute.xlu0 %9039  ;;  %v12376_v31 = vpack.c.bf16 %v3533_v36, %v3532_v29  ;;  %v15684_v41 = vld [vmem:[#allocation167_spill] sm:$0xff]  ;;  %v15687_v51 = vld [vmem:[#allocation98_spill] sm:$0xff] }
 0x25d   : > { %v9041_v53 = vunpack.i.l.bf16 %v9040_v9  ;;  %3773 = vmatmul.mubr.bf16.gmra.mrb[180].mxu0 %v12258_v62 }
 0x25e   : > { %v9045_v38 = vpop.permute.xlu1 %9044  ;;  %4279 = vmatpush1.bf16.msra.mxu0 %v9361_v61  ;;  %v15691_v61 = vld [vmem:[#allocation111_spill] sm:$0xff] }
 0x25f   : > { %4006 = vmatpush1.bf16.msra.mxu1 %v9358_v34  ;;  %v9047_v42 = vunpack.i.h.bf16 %v9045_v38  ;;  %v9046_v49 = vunpack.i.l.bf16 %v9045_v38  ;;  %v9042_v34 = vunpack.i.h.bf16 %v9040_v9  ;;  %v3536_v26 = vsel %vm1981_vm7, %v15686_v12, %v9041_v53  ;;  %4280 = vmatprep.subr.bf16.mxu0 %v15268_v2  ;;  %v15689_v53 = vld [vmem:[#allocation135_spill] sm:$0xff] }
 0x260   : > { %4007 = vmatprep.subr.bf16.mxu1 %v15268_v2 }
 0x261   : > { %v3538_v35 = vsel %vm1981_vm7, %v11860_v27, %v9046_v49  ;;  %v3539_v57 = vsel %vm1981_vm7, %v11867_v60, %v9047_v42  ;;  %v3537_v38 = vsel %vm1981_vm7, %v15687_v51, %v9042_v34  ;;  %v15688_v42 = vld [vmem:[#allocation92_spill] sm:$0xff]  ;;  %v9363_v34 = vld [vmem:[%s14890_s5 + $0xd8] sm:$0xff]  }
 0x262   : > { %2743 = vmatmul.mubr.bf16.gmra.mrb[84].mxu1 %v15684_v41  ;;  %v12396_v29 = vpack.c.bf16 %v3539_v57, %v3538_v35  ;;  %7892 = vmatprep.mubr.msk.bf16.mxu0 %vm1981_vm7, %v15688_v42  ;;  %v15690_v35 = vld [vmem:[#allocation147_spill] sm:$0xff] }
 0x263   : > { %7859 = vmatprep.mubr.msk.bf16.mxu1 %vm1981_vm7, %v15685_v58  ;;  %4008 = vmatpush1.bf16.msra.mxu1 %v9360_v59  ;;  %v12400_v59 = vpack.c.bf16 %v3537_v38, %v3536_v26  ;;  %v15692_v26 = vld [vmem:[#allocation113_spill] sm:$0xff] }
 0x264   : > { %4009 = vmatprep.subr.bf16.mxu1 %v15268_v2  ;;  %4281 = vmatpush1.bf16.msra.mxu0 %v9363_v34 }
 0x265   : > { %v9055_v56 = vpop.permute.xlu1 %9054  ;;  %4282 = vmatprep.subr.bf16.mxu0 %v15268_v2  ;;  %3781 = vmatmul.mubr.bf16.gmra.mrb[184].mxu0 %v12278_v10 }
 0x266   : > { %v9057_v27 = vunpack.i.h.bf16 %v9055_v56  ;;  %v9056_v60 = vunpack.i.l.bf16 %v9055_v56  ;;  %v9050_v36 = vpop.permute.xlu0 %9049  ;;  %v9364_v56 = vld [vmem:[%s14890_s5 + $0x20] sm:$0xff]  }
 0x267   : > { %v9052_v49 = vunpack.i.h.bf16 %v9050_v36  ;;  %v9051_v9 = vunpack.i.l.bf16 %v9050_v36  ;;  %4010 = vmatpush1.bf16.msra.mxu1 %v9362_v18  ;;  %v9365_v18 = vld [vmem:[%s14890_s5 + $0xe0] sm:$0xff]  }
 0x268   : > { %v3542_v41 = vsel %vm1981_vm7, %v15689_v53, %v9056_v60  ;;  %v3543_v57 = vsel %vm1981_vm7, %v15690_v35, %v9057_v27  ;;  %4011 = vmatprep.subr.bf16.mxu1 %v15268_v2  ;;  %v15694_v60 = vld [vmem:[#allocation78_spill] sm:$0xff]  ;;  %v9366_v53 = vld [vmem:[%s14890_s5 + $0x28] sm:$0xff]   ;;  %4283 = vmatpush1.bf16.msra.mxu0 %v9365_v18 }
 0x269   : > { %v12412_v58 = vpop.permute.xlu1 %9059  ;;  %v3540_v12 = vsel %vm1981_vm7, %v15691_v61, %v9051_v9  ;;  %v3541_v51 = vsel %vm1981_vm7, %v15692_v26, %v9052_v49  ;;  %v12421_v38 = vpack.c.bf16 %v3543_v57, %v3542_v41  ;;  %v15695_v9 = vld [vmem:[#allocation79_spill] sm:$0xff]  ;;  %v15696_v41 = vld [vmem:[#allocation101_spill] sm:$0xff]  ;;  %4284 = vmatprep.subr.bf16.mxu0 %v15268_v2 }
 0x26a   : > { %v12423_v36 = vpop.permute.xlu0 %9064  ;;  %v12426_v27 = vpack.c.bf16 %v3541_v51, %v3540_v12  ;;  %2749 = vmatmul.mubr.bf16.gmra.mrb[88].mxu1 %v15694_v60  ;;  %7893 = vmatprep.mubr.msk.bf16.mxu0 %vm1981_vm7, %v15696_v41  ;;  %v9367_v61 = vld [vmem:[%s14890_s5 + $0xe8] sm:$0xff]   ;;  %v9368_v12 = vld [vmem:[%s14890_s5 + $0x30] sm:$0xff]  }
 0x26b   : > { %15693 = vst [vmem:[#allocation164_spill] sm:$0xff] %v12421_v38  ;;  %7860 = vmatprep.mubr.msk.bf16.mxu1 %vm1981_vm7, %v15695_v9  ;;  %4012 = vmatpush1.bf16.msra.mxu1 %v9364_v56 }
 0x26c   : > { %4013 = vmatprep.subr.bf16.mxu1 %v15268_v2  ;;  %4285 = vmatpush1.bf16.msra.mxu0 %v9367_v61 }
 0x26d   : > { %v12435_v49 = vpop.permute.xlu1 %9074  ;;  %4286 = vmatprep.subr.bf16.mxu0 %v15268_v2  ;;  %3789 = vmatmul.mubr.bf16.gmra.mrb[188].mxu0 %v12275_v30 }
 0x26e   : > { %v9070_v34 = vpop.permute.xlu0 %9069 }
 0x26f   : > { %v9072_v35 = vunpack.i.h.bf16 %v9070_v34  ;;  %v9071_v57 = vunpack.i.l.bf16 %v9070_v34  ;;  %4014 = vmatpush1.bf16.msra.mxu1 %v9366_v53  ;;  %v9369_v53 = vld [vmem:[%s14890_s5 + $0xf0] sm:$0xff]  }
 0x270   : > { %4015 = vmatprep.subr.bf16.mxu1 %v15268_v2  ;;  %4287 = vmatpush1.bf16.msra.mxu0 %v9369_v53  ;;  %v9372_v53 = vld [vmem:[%s14890_s5 + $0x40] sm:$0xff]  }
 0x271   : > { %v9085_v56 = vpop.permute.xlu1 %9084  ;;  %v3544_v26 = vsel %vm1981_vm7, %v11987_v8, %v9071_v57  ;;  %v3545_v51 = vsel %vm1981_vm7, %v11980_v47, %v9072_v35  ;;  %v9370_v57 = vld [vmem:[%s14890_s5 + $0x38] sm:$0xff]   ;;  %4288 = vmatprep.subr.bf16.mxu0 %v15268_v2 }
 0x272   : > { %v9087_v60 = vunpack.i.h.bf16 %v9085_v56  ;;  %v9086_v18 = vunpack.i.l.bf16 %v9085_v56  ;;  %v12455_v9 = vpop.permute.xlu0 %9079  ;;  %v12458_v34 = vpack.c.bf16 %v3545_v51, %v3544_v26  ;;  %2756 = vmatmul.mubr.bf16.gmra.mrb[92].mxu1 %v11678_v52  ;;  %v15698_v26 = vld [vmem:[#allocation75_spill] sm:$0xff] }
 0x273   : > { %7861 = vmatprep.mubr.msk.bf16.mxu1 %vm1981_vm7, %v11685_v14  ;;  %4016 = vmatpush1.bf16.msra.mxu1 %v9368_v12  ;;  %v9371_v14 = vld [vmem:[%s14890_s5 + $0xf8] sm:$0xff]   ;;  %v2491_v12 = vpop.f32.mrb[96].mxu0 }
 0x274   : > { %v3546_v47 = vsel %vm1981_vm7, %v12006_v16, %v9086_v18  ;;  %v3547_v8 = vsel %vm1981_vm7, %v12015_v6, %v9087_v60  ;;  %4017 = vmatprep.subr.bf16.mxu1 %v15268_v2  ;;  %v15697_v16 = vld [vmem:[#allocation106_spill] sm:$0xff]  ;;  %v15699_v60 = vld [vmem:[#allocation64_spill] sm:$0xff]  ;;  %4289 = vmatpush1.bf16.msra.mxu0 %v9371_v14 }
 0x275   : > { %v9095_v35 = vpop.permute.xlu1 %9094  ;;  %v12474_v61 = vpack.c.bf16 %v3547_v8, %v3546_v47  ;;  %7894 = vmatprep.mubr.msk.bf16.mxu0 %vm1981_vm7, %v15697_v16  ;;  %v2492_v8 = vpop.f32.mrb[97].mxu0  ;;  %4290 = vmatprep.subr.bf16.mxu0 %v15268_v2  ;;  %v9376_v14 = vld [vmem:[%s14890_s5 + $0x50] sm:$0xff]  }
 0x276   : > { %v9090_v52 = vpop.permute.xlu0 %9089  ;;  %v2493_v63 = vpop.f32.mrb[98].mxu0  ;;  %3797 = vmatmul.mubr.bf16.gmra.mrb[192].mxu0 %v12298_v3 }
 0x277   : > { %v9092_v6 = vunpack.i.h.bf16 %v9090_v52  ;;  %v9091_v56 = vunpack.i.l.bf16 %v9090_v52  ;;  %4018 = vmatpush1.bf16.msra.mxu1 %v9370_v57  ;;  %v9373_v57 = vld [vmem:[%s14890_s5 + $0x100] sm:$0xff]   ;;  %v15725_v52 = vld [vmem:[#allocation120_spill] sm:$0xff] }
 0x278   : > { %4019 = vmatprep.subr.bf16.mxu1 %v15268_v2  ;;  %4291 = vmatpush1.bf16.msra.mxu0 %v9373_v57  ;;  %v15706_v57 = vld [vmem:[#allocation131_spill] sm:$0xff] }
 0x279   : > { %v12486_v51 = vsel %vm1981_vm7, %v15698_v26, %v9091_v56  ;;  %v12490_v18 = vsel %vm1981_vm7, %v15699_v60, %v9092_v6  ;;  %v9105_v47 = vpop.permute.xlu1 %9104  ;;  %v2494_v6 = vpop.f32.mrb[99].mxu0  ;;  %4292 = vmatprep.subr.bf16.mxu0 %v15268_v2 }
 0x27a   : > { %v9107_v12 = vunpack.i.h.bf16 %v9105_v47  ;;  %v9106_v62 = vunpack.i.l.bf16 %v9105_v47  ;;  %v9100_v7 = vpop.permute.xlu0 %9099  ;;  %2763 = vmatmul.mubr.bf16.gmra.mrb[96].mxu1 %v11702_v20  ;;  %v9374_v20 = vld [vmem:[%s14890_s5 + $0x48] sm:$0xff]   ;;  %v9377_v47 = vld [vmem:[%s14890_s5 + $0x110] sm:$0xff]  }
 0x27b   : > { %v9102_v56 = vunpack.i.h.bf16 %v9100_v7  ;;  %v9101_v26 = vunpack.i.l.bf16 %v9100_v7  ;;  %7862 = vmatprep.mubr.msk.bf16.mxu1 %vm1981_vm7, %v11717_v48  ;;  %4020 = vmatpush1.bf16.msra.mxu1 %v9372_v53  ;;  %v15704_v48 = vld [vmem:[#allocation114_spill] sm:$0xff] }
 0x27c   : > { %v12503_v60 = vsel %vm1981_vm7, %v12075_v22, %v9107_v12  ;;  %v12507_v8 = vsel %vm1981_vm7, %v12072_v13, %v9106_v62  ;;  %4021 = vmatprep.subr.bf16.mxu1 %v15268_v2  ;;  %7895 = vmatprep.mubr.msk.bf16.mxu0 %vm1981_vm7, %v15704_v48  ;;  %v9096_v62 = vunpack.i.l.bf16 %v9095_v35  ;;  %v9378_v12 = vld [vmem:[%s14890_s5 + $0x58] sm:$0xff]  }
 0x27d   : > { %15700 = vst [vmem:[#allocation88_spill] sm:$0xff] %v12503_v60  ;;  %15701 = vst [vmem:[#allocation89_spill] sm:$0xff] %v12507_v8  ;;  %v12517_v7 = vsel %vm1981_vm7, %v12100_v54, %v9102_v56  ;;  %v12521_v22 = vsel %vm1981_vm7, %v12103_v44, %v9101_v26  ;;  %v9375_v54 = vld [vmem:[%s14890_s5 + $0x108] sm:$0xff]   ;;  %v9097_v44 = vunpack.i.h.bf16 %v9095_v35  ;;  %v15715_v13 = vld [vmem:[#allocation65_spill] sm:$0xff] }
 0x27e   : > { %15702 = vst [vmem:[#allocation74_spill] sm:$0xff] %v12517_v7  ;;  %15703 = vst [vmem:[#allocation81_spill] sm:$0xff] %v12521_v22  ;;  %4293 = vmatpush1.bf16.msra.mxu0 %v9375_v54  ;;  %v12547_v35 = vsel %vm1981_vm7, %v12039_v40, %v9096_v62  ;;  %v15705_v40 = vld [vmem:[#allocation126_spill] sm:$0xff]  ;;  %v9061_v22 = vunpack.i.l.bf16 %v12412_v58 }
 0x27f   : > { %4022 = vmatpush1.bf16.msra.mxu1 %v9374_v20  ;;  %4294 = vmatprep.subr.bf16.mxu0 %v15268_v2  ;;  %v12551_v53 = vsel %vm1981_vm7, %v12046_v19, %v9097_v44  ;;  %v2244_v19 = vpop.f32.mrb[0].mxu1 }
 0x280   : > { %4023 = vmatprep.subr.bf16.mxu1 %v15268_v2  ;;  %3805 = vmatmul.mubr.bf16.gmra.mrb[196].mxu0 %v12294_v0  ;;  %v2245_v56 = vpop.f32.mrb[1].mxu1 }
 0x281   : > { %7896 = vmatprep.mubr.msk.bf16.mxu0 %vm1981_vm7, %v15705_v40  ;;  %v2246_v26 = vpop.f32.mrb[2].mxu1 }
 0x282   : > { %2770 = vmatmul.mubr.bf16.gmra.mrb[100].mxu1 %v11999_v45  ;;  %4295 = vmatpush1.bf16.msra.mxu0 %v9377_v47  ;;  %v2247_v6 = vpop.f32.mrb[3].mxu1  ;;  %v15716_v45 = vld [vmem:[#allocation62_spill] sm:$0xff] }
 0x283   : > { %7863 = vmatprep.mubr.msk.bf16.mxu1 %vm1981_vm7, %v11965_v23  ;;  %4024 = vmatpush1.bf16.msra.mxu1 %v9376_v14  ;;  %v9379_v23 = vld [vmem:[%s14890_s5 + $0x118] sm:$0xff]  }
 0x284   : > { %4025 = vmatprep.subr.bf16.mxu1 %v15268_v2  ;;  %4296 = vmatprep.subr.bf16.mxu0 %v15268_v2  ;;  %v15707_v2 = vld [vmem:[#allocation138_spill] sm:$0xff]  ;;  %v2497_v54 = vpop.f32.mrb[100].mxu0 }
 0x286   : > { %4297 = vmatpush1.bf16.msra.mxu0 %v9379_v23 }
 0x287   : > { %4026 = vmatpush1.bf16.msra.mxu1 %v9378_v12 }
 0x288   : > { %3813 = vmatmul.mubr.bf16.gmra.mrb[200].mxu0 %v12314_v15 }
 0x289   : > { %7897 = vmatprep.mubr.msk.bf16.mxu0 %vm1981_vm7, %v15706_v57 }
 0x28a   : > { %2777 = vmatmul.mubr.bf16.gmra.mrb[104].mxu1 %v12069_v24  ;;  %v2250_v24 = vpop.f32.mrb[4].mxu1 }
 0x28b   : > { %7864 = vmatprep.mubr.msk.bf16.mxu1 %vm1981_vm7, %v12078_v4  ;;  %v2251_v20 = vpop.f32.mrb[5].mxu1  ;;  %v2498_v4 = vpop.f32.mrb[101].mxu0 }
 0x28c   : > { %v2252_v44 = vpop.f32.mrb[6].mxu1  ;;  %v2499_v14 = vpop.f32.mrb[102].mxu0  ;;  %v15711_v4 = vld [vmem:[#allocation95_spill] sm:$0xff] }
 0x28d   : > { %v2253_v62 = vpop.f32.mrb[7].mxu1  ;;  %v2500_v47 = vpop.f32.mrb[103].mxu0  ;;  %v15712_v14 = vld [vmem:[#allocation94_spill] sm:$0xff] }
 0x28e   : > { %v2503_v23 = vpop.f32.mrb[104].mxu0  ;;  %v3281_v62 = vrot.slane %v15711_v4, 1  ;;  %v3282_v47 = vrot.slane %v15712_v14, 1 }
 0x28f   : > { %v2504_v56 = vpop.f32.mrb[105].mxu0  ;;  %v15714_v23 = vld [vmem:[#allocation86_spill] sm:$0xff] }
 0x290   : > { %3821 = vmatmul.mubr.bf16.gmra.mrb[204].mxu0 %v12311_v37  ;;  %v2505_v6 = vpop.f32.mrb[106].mxu0 }
 0x291   : > { %7898 = vmatprep.mubr.msk.bf16.mxu0 %vm1981_vm7, %v15707_v2  ;;  %v2507_v20 = vpop.f32.mrb[107].mxu0 }
 0x292   : > { %2784 = vmatmul.mubr.bf16.gmra.mrb[108].mxu1 %v12108_v43  ;;  %v2256_v43 = vpop.f32.mrb[8].mxu1 }
 0x293   : > { %7865 = vmatprep.mubr.msk.bf16.mxu1 %vm1981_vm7, %v12106_v17  ;;  %v15708_v17 = vld [vmem:[#allocation143_spill] sm:$0xff]  ;;  %v2257_v12 = vpop.f32.mrb[9].mxu1  ;;  %v15713_v43 = vld [vmem:[#allocation96_spill] sm:$0xff] }
 0x294   : > { %v2258_v19 = vpop.f32.mrb[10].mxu1  ;;  %v3284_v12 = vrot.slane %v15713_v43, 1  ;;  %v2510_v56 = vpop.f32.mrb[108].mxu0 }
 0x295   : > { %v2260_v26 = vpop.f32.mrb[11].mxu1  ;;  %v12586_v24 = vadd.f32 %v2505_v6, %v2258_v19  ;;  %v3286_v19 = vrot.slane %v15714_v23, 1  ;;  %v2512_v6 = vpop.f32.mrb[109].mxu0 }
 0x296   : > { %v2263_v54 = vpop.f32.mrb[12].mxu1  ;;  %v12607_v4 = vsel %vm1548_vm3, %v3282_v47, %v3284_v12 }
 0x297   : > { %v2265_v44 = vpop.f32.mrb[13].mxu1  ;;  %v12598_v26 = vadd.f32 %v2510_v56, %v2263_v54  ;;  %15718 = vst [vmem:[#allocation103_spill] sm:$0xff] %v12607_v4  ;;  %v12610_v14 = vsel %vm1548_vm3, %v3284_v12, %v3286_v19  ;;  %v12613_v54 = vsel %vm1548_vm3, %v3286_v19, %v3281_v62 }
 0x298   : > { %3829 = vmatmul.mubr.bf16.gmra.mrb[208].mxu0 %v12331_v25  ;;  %v12604_v44 = vsel %vm1548_vm3, %v3281_v62, %v3282_v47  ;;  %15719 = vst [vmem:[#allocation93_spill] sm:$0xff] %v12610_v14  ;;  %15720 = vst [vmem:[#allocation91_spill] sm:$0xff] %v12613_v54 }
 0x299   : > { %7899 = vmatprep.mubr.msk.bf16.mxu0 %vm1981_vm7, %v15708_v17  ;;  %15717 = vst [vmem:[#allocation102_spill] sm:$0xff] %v12604_v44 }
 0x29a   : > { %2791 = vmatmul.mubr.bf16.gmra.mrb[112].mxu1 %v12136_v21  ;;  %v15709_v21 = vld [vmem:[#allocation108_spill] sm:$0xff] }
 0x29b   : > { %7866 = vmatprep.mubr.msk.bf16.mxu1 %vm1981_vm7, %v12138_v55  ;;  %v15710_v55 = vld [vmem:[#allocation150_spill] sm:$0xff] }
 0x2a0   : > { %3837 = vmatmul.mubr.bf16.gmra.mrb[212].mxu0 %v12329_v11 }
 0x2a1   : > { %7900 = vmatprep.mubr.msk.bf16.mxu0 %vm1981_vm7, %v15710_v55 }
 0x2a2   : > { %2798 = vmatmul.mubr.bf16.gmra.mrb[116].mxu1 %v12152_v46  ;;  %v2266_v46 = vpop.f32.mrb[14].mxu1 }
 0x2a3   : > { %7867 = vmatprep.mubr.msk.bf16.mxu1 %vm1981_vm7, %v15709_v21  ;;  %v2267_v20 = vpop.f32.mrb[15].mxu1  ;;  %v2513_v21 = vpop.f32.mrb[110].mxu0 }
 0x2a4   : > { %v2514_v63 = vpop.f32.mrb[111].mxu0  ;;  %v2270_v43 = vpop.f32.mrb[16].mxu1  ;;  %v15722_v20 = vld [vmem:[#allocation110_spill] sm:$0xff]  ;;  %v15723_v21 = vld [vmem:[#allocation63_spill] sm:$0xff] }
 0x2a5   : > { %v2271_v47 = vpop.f32.mrb[17].mxu1  ;;  %v2517_v23 = vpop.f32.mrb[112].mxu0 }
 0x2a6   : > { %v2272_v56 = vpop.f32.mrb[18].mxu1  ;;  %v2518_v12 = vpop.f32.mrb[113].mxu0 }
 0x2a7   : > { %v2274_v46 = vpop.f32.mrb[19].mxu1  ;;  %v2519_v6 = vpop.f32.mrb[114].mxu0 }
 0x2a8   : > { %3845 = vmatmul.mubr.bf16.gmra.mrb[216].mxu0 %v12354_v39  ;;  %v12622_v62 = vadd.f32 %v2519_v6, %v2272_v56  ;;  %v2521_v19 = vpop.f32.mrb[115].mxu0  ;;  %v2277_v43 = vpop.f32.mrb[20].mxu1 }
 0x2a9   : > { %v2279_v47 = vpop.f32.mrb[21].mxu1  ;;  %v2524_v23 = vpop.f32.mrb[116].mxu0 }
 0x2aa   : > { %2805 = vmatmul.mubr.bf16.gmra.mrb[120].mxu1 %v15715_v13  ;;  %v15724_v13 = vld [vmem:[#allocation97_spill] sm:$0xff]  ;;  %v2280_v63 = vpop.f32.mrb[22].mxu1  ;;  %v12630_v12 = vadd.f32 %v2524_v23, %v2277_v43  ;;  %v2526_v46 = vpop.f32.mrb[117].mxu0 }
 0x2ab   : > { %7868 = vmatprep.mubr.msk.bf16.mxu1 %vm1981_vm7, %v15716_v45  ;;  %v15721_v45 = vld [vmem:[#allocation109_spill] sm:$0xff]  ;;  %v2281_v56 = vpop.f32.mrb[23].mxu1  ;;  %v2527_v6 = vpop.f32.mrb[118].mxu0 }
 0x2ac   : > { %7901 = vmatprep.mubr.msk.bf16.mxu0 %vm1981_vm7, %v15721_v45  ;;  %v2528_v19 = vpop.f32.mrb[119].mxu0  ;;  %v2284_v8 = vpop.f32.mrb[24].mxu1 }
 0x2ad   : > { %v2285_v47 = vpop.f32.mrb[25].mxu1  ;;  %v2531_v60 = vpop.f32.mrb[120].mxu0  ;;  %v15728_v19 = vld [vmem:[#allocation134_spill] sm:$0xff] }
 0x2ae   : > { %v2286_v63 = vpop.f32.mrb[26].mxu1  ;;  %v2532_v43 = vpop.f32.mrb[121].mxu0 }
 0x2af   : > { %v2288_v23 = vpop.f32.mrb[27].mxu1  ;;  %v2533_v46 = vpop.f32.mrb[122].mxu0 }
 0x2b0   : > { %3853 = vmatmul.mubr.bf16.gmra.mrb[220].mxu0 %v12350_v28  ;;  %v12638_v56 = vadd.f32 %v2533_v46, %v2286_v63  ;;  %v2535_v6 = vpop.f32.mrb[123].mxu0 }
 0x2b1   : > { %7902 = vmatprep.mubr.msk.bf16.mxu0 %vm1981_vm7, %v15724_v13 }
 0x2b2   : > { %2812 = vmatmul.mubr.bf16.gmra.mrb[124].mxu1 %v15722_v20  ;;  %v15726_v20 = vld [vmem:[#allocation123_spill] sm:$0xff] }
 0x2b3   : > { %7869 = vmatprep.mubr.msk.bf16.mxu1 %vm1981_vm7, %v15723_v21  ;;  %v15727_v21 = vld [vmem:[#allocation100_spill] sm:$0xff] }
 0x2b4   : > { %v2538_v60 = vpop.f32.mrb[124].mxu0 }
 0x2b5   : > { %v2540_v23 = vpop.f32.mrb[125].mxu0 }
 0x2b6   : > { %v2541_v46 = vpop.f32.mrb[126].mxu0 }
 0x2b7   : > { %v2542_v6 = vpop.f32.mrb[127].mxu0 }
 0x2b8   : > { %3861 = vmatmul.mubr.bf16.gmra.mrb[224].mxu0 %v12376_v31 }
 0x2b9   : > { %7903 = vmatprep.mubr.msk.bf16.mxu0 %vm1981_vm7, %v15727_v21 }
 0x2ba   : > { %2819 = vmatmul.mubr.bf16.gmra.mrb[128].mxu1 %v15725_v52  ;;  %v15729_v52 = vld [vmem:[#allocation133_spill] sm:$0xff] }
 0x2bb   : > { %7870 = vmatprep.mubr.msk.bf16.mxu1 %vm1981_vm7, %v15726_v20  ;;  %v15730_v20 = vld [vmem:[#allocation121_spill] sm:$0xff] }
 0x2bd   : > { %v2545_v54 = vpop.f32.mrb[128].mxu0 }
 0x2c0   : > { %3869 = vmatmul.mubr.bf16.gmra.mrb[228].mxu0 %v12373_v1 }
 0x2c1   : > { %7904 = vmatprep.mubr.msk.bf16.mxu0 %vm1981_vm7, %v15730_v20 }
 0x2c2   : > { %2826 = vmatmul.mubr.bf16.gmra.mrb[132].mxu1 %v15728_v19  ;;  %v15731_v19 = vld [vmem:[#allocation125_spill] sm:$0xff] }
 0x2c3   : > { %7871 = vmatprep.mubr.msk.bf16.mxu1 %vm1981_vm7, %v15729_v52 }
 0x2c5   : > { %v2291_v8 = vpop.f32.mrb[28].mxu1 }
 0x2c6   : > { %v2293_v47 = vpop.f32.mrb[29].mxu1  ;;  %v12646_v43 = vadd.f32 %v2538_v60, %v2291_v8  ;;  %v2546_v8 = vpop.f32.mrb[129].mxu0 }
 0x2c7   : > { %v2294_v14 = vpop.f32.mrb[30].mxu1  ;;  %v2547_v23 = vpop.f32.mrb[130].mxu0 }
 0x2c8   : > { %v2295_v63 = vpop.f32.mrb[31].mxu1  ;;  %3877 = vmatmul.mubr.bf16.gmra.mrb[232].mxu0 %v12400_v59  ;;  %v2549_v46 = vpop.f32.mrb[131].mxu0 }
 0x2c9   : > { %7905 = vmatprep.mubr.msk.bf16.mxu0 %vm1981_vm7, %v15731_v19  ;;  %v2552_v54 = vpop.f32.mrb[132].mxu0 }
 0x2ca   : > { %2833 = vmatmul.mubr.bf16.gmra.mrb[136].mxu1 %v12220_v5  ;;  %v15733_v5 = vld [vmem:[#allocation145_spill] sm:$0xff] }
 0x2cb   : > { %7872 = vmatprep.mubr.msk.bf16.mxu1 %vm1981_vm7, %v12222_v50  ;;  %v15734_v50 = vld [vmem:[#allocation137_spill] sm:$0xff] }
 0x2cd   : > { %v2298_v52 = vpop.f32.mrb[32].mxu1 }
 0x2ce   : > { %v2299_v47 = vpop.f32.mrb[33].mxu1 }
 0x2cf   : > { %v2300_v14 = vpop.f32.mrb[34].mxu1 }
 0x2d0   : > { %v2302_v60 = vpop.f32.mrb[35].mxu1  ;;  %v12654_v63 = vadd.f32 %v2547_v23, %v2300_v14  ;;  %3885 = vmatmul.mubr.bf16.gmra.mrb[236].mxu0 %v12396_v29 }
 0x2d1   : > { %7906 = vmatprep.mubr.msk.bf16.mxu0 %vm1981_vm7, %v15734_v50  ;;  %v2554_v60 = vpop.f32.mrb[133].mxu0 }
 0x2d2   : > { %15732 = vst [vmem:[#allocation165_spill] sm:$0xff] %v12654_v63  ;;  %2840 = vmatmul.mubr.bf16.gmra.mrb[140].mxu1 %v12236_v32  ;;  %v2555_v23 = vpop.f32.mrb[134].mxu0  ;;  %v15736_v32 = vld [vmem:[#allocation160_spill] sm:$0xff] }
 0x2d3   : > { %7873 = vmatprep.mubr.msk.bf16.mxu1 %vm1981_vm7, %v15733_v5  ;;  %v2556_v46 = vpop.f32.mrb[135].mxu0  ;;  %v9062_v5 = vunpack.i.h.bf16 %v12412_v58  ;;  %v9082_v58 = vunpack.i.h.bf16 %v12455_v9 }
 0x2d5   : > { %v2305_v6 = vpop.f32.mrb[36].mxu1  ;;  %v2075_v46 = vpack.c.bf16 %v9062_v5, %v9061_v22  ;;  %v15741_v5 = vld [vmem:[#allocation168_spill] sm:$0xff] }
 0x2d6   : > { %v2307_v52 = vpop.f32.mrb[37].mxu1  ;;  %v12662_v8 = vadd.f32 %v2552_v54, %v2305_v6 }
 0x2d7   : > { %v2308_v47 = vpop.f32.mrb[38].mxu1  ;;  %v15737_v52 = vld [vmem:[#allocation146_spill] sm:$0xff] }
 0x2d8   : > { %15735 = vst [vmem:[#allocation115_spill] sm:$0xff] %v12662_v8  ;;  %v2309_v14 = vpop.f32.mrb[39].mxu1  ;;  %3893 = vmatmul.mubr.bf16.gmra.mrb[240].mxu0 %v12426_v27  ;;  %v2559_v47 = vpop.f32.mrb[136].mxu0  ;;  %v15739_v8 = vld [vmem:[#allocation163_spill] sm:$0xff] }
 0x2d9   : > { %7907 = vmatprep.mubr.msk.bf16.mxu0 %vm1981_vm7, %v15737_v52  ;;  %v2560_v14 = vpop.f32.mrb[137].mxu0 }
 0x2da   : > { %2847 = vmatmul.mubr.bf16.gmra.mrb[144].mxu1 %v12256_v33  ;;  %v9067_v33 = vunpack.i.h.bf16 %v12423_v36  ;;  %v2561_v7 = vpop.f32.mrb[138].mxu0 }
 0x2db   : > { %7874 = vmatprep.mubr.msk.bf16.mxu1 %vm1981_vm7, %v15736_v32  ;;  %v9066_v32 = vunpack.i.l.bf16 %v12423_v36  ;;  %v2563_v4 = vpop.f32.mrb[139].mxu0 }
 0x2dd   : > { %v2312_v6 = vpop.f32.mrb[40].mxu1  ;;  %v2026_v36 = vsel %vm1981_vm7, %v9066_v32, %v15741_v5 }
 0x2de   : > { %v2313_v54 = vpop.f32.mrb[41].mxu1  ;;  %v9081_v6 = vunpack.i.l.bf16 %v12455_v9  ;;  %v9077_v9 = vunpack.i.h.bf16 %v12435_v49 }
 0x2df   : > { %v2314_v60 = vpop.f32.mrb[42].mxu1  ;;  %v15740_v54 = vld [vmem:[#allocation152_spill] sm:$0xff] }
 0x2e0   : > { %v2316_v23 = vpop.f32.mrb[43].mxu1  ;;  %v12674_v44 = vadd.f32 %v2561_v7, %v2314_v60  ;;  %3901 = vmatmul.mubr.bf16.gmra.mrb[244].mxu0 %v12421_v38  ;;  %v15742_v7 = vld [vmem:[#allocation83_spill] sm:$0xff]  ;;  %v9076_v38 = vunpack.i.l.bf16 %v12435_v49 }
 0x2e1   : > { %7908 = vmatprep.mubr.msk.bf16.mxu0 %vm1981_vm7, %v15740_v54  ;;  %v2027_v4 = vsel %vm1981_vm7, %v9067_v33, %v15742_v7  ;;  %v2077_v54 = vpack.c.bf16 %v9082_v58, %v9081_v6  ;;  %v15743_v33 = vld [vmem:[#allocation151_spill] sm:$0xff] }
 0x2e2   : > { %15738 = vst [vmem:[#allocation117_spill] sm:$0xff] %v12674_v44  ;;  %2854 = vmatmul.mubr.bf16.gmra.mrb[148].mxu1 %v15739_v8  ;;  %v2566_v8 = vpop.f32.mrb[140].mxu0  ;;  %v2074_v44 = vpack.c.bf16 %v2027_v4, %v2026_v36  ;;  %v15745_v36 = vld [vmem:[#allocation84_spill] sm:$0xff] }
 0x2e3   : > { %7875 = vmatprep.mubr.msk.bf16.mxu1 %vm1981_vm7, %v2075_v46  ;;  %v2568_v23 = vpop.f32.mrb[141].mxu0  ;;  %v2029_v7 = vsel %vm1981_vm7, %v9077_v9, %v15745_v36 }
 0x2e4   : > { %v2569_v63 = vpop.f32.mrb[142].mxu0 }
 0x2e5   : > { %v2319_v22 = vpop.f32.mrb[44].mxu1  ;;  %v2570_v52 = vpop.f32.mrb[143].mxu0 }
 0x2e6   : > { %v2321_v47 = vpop.f32.mrb[45].mxu1  ;;  %v12687_v14 = vadd.f32 %v2566_v8, %v2319_v22  ;;  %v15744_v22 = vld [vmem:[#allocation169_spill] sm:$0xff]  ;;  %v2573_v49 = vpop.f32.mrb[144].mxu0  ;;  %v15746_v8 = vld [vmem:[#allocation76_spill] sm:$0xff] }
 0x2e7   : > { %v2322_v60 = vpop.f32.mrb[46].mxu1  ;;  %v2028_v5 = vsel %vm1981_vm7, %v9076_v38, %v15744_v22  ;;  %v2574_v63 = vpop.f32.mrb[145].mxu0  ;;  %v15749_v49 = vpack.c.bf16 %v12490_v18, %v12486_v51  ;;  %v15753_v18 = vpack.c.bf16 %v12551_v53, %v12547_v35  ;;  %v15755_v35 = vld [vmem:[#allocation154_spill] sm:$0xff]  ;;  %v15756_v53 = vld [vmem:[#allocation87_spill] sm:$0xff] }
 0x2e8   : > { %v2323_v46 = vpop.f32.mrb[47].mxu1  ;;  %3909 = vmatmul.mubr.bf16.gmra.mrb[248].mxu0 %v12458_v34  ;;  %v2575_v6 = vpop.f32.mrb[146].mxu0  ;;  %v15747_v60 = vld [vmem:[#allocation66_spill] sm:$0xff]  ;;  %v15751_v63 = vld [vmem:[#allocation155_spill] sm:$0xff] }
 0x2e9   : > { %7909 = vmatprep.mubr.msk.bf16.mxu0 %vm1981_vm7, %v15743_v33  ;;  %v2577_v47 = vpop.f32.mrb[147].mxu0  ;;  %v15748_v23 = vpack.c.bf16 %v15746_v8, %v15747_v60 }
 0x2ea   : > { %2861 = vmatmul.mubr.bf16.gmra.mrb[152].mxu1 %v2074_v44  ;;  %v2076_v44 = vpack.c.bf16 %v2029_v7, %v2028_v5  ;;  %v2580_v9 = vpop.f32.mrb[148].mxu0 }
 0x2eb   : > { %7876 = vmatprep.mubr.msk.bf16.mxu1 %vm1981_vm7, %v2077_v54  ;;  %v2582_v5 = vpop.f32.mrb[149].mxu0 }
 0x2ec   : > { %v2583_v7 = vpop.f32.mrb[150].mxu0 }
 0x2ed   : > { %v2326_v32 = vpop.f32.mrb[48].mxu1 }
 0x2ee   : > { %v2327_v4 = vpop.f32.mrb[49].mxu1 }
 0x2ef   : > { %v2328_v58 = vpop.f32.mrb[50].mxu1  ;;  %v2584_v4 = vpop.f32.mrb[151].mxu0 }
 0x2f0   : > { %v2330_v52 = vpop.f32.mrb[51].mxu1  ;;  %v12699_v54 = vadd.f32 %v2575_v6, %v2328_v58  ;;  %3917 = vmatmul.mubr.bf16.gmra.mrb[252].mxu0 %v12474_v61  ;;  %v15750_v58 = vld [vmem:[#allocation70_spill] sm:$0xff]  ;;  %v2587_v47 = vpop.f32.mrb[152].mxu0 }
 0x2f1   : > { %7954 = vmatprep.mubr.msk.bf16.mxu0 %vm1981_vm7, %v15688_v42  ;;  %v15752_v52 = vpack.c.bf16 %v15750_v58, %v15751_v63  ;;  %v2588_v60 = vpop.f32.mrb[153].mxu0 }
 0x2f2   : > { %2867 = vmatmul.mubr.bf16.gmra.mrb[156].mxu1 %v2076_v44 }
 0x2f3   : > { %7922 = vmatprep.mubr.msk.bf16.mxu1 %vm1981_vm7, %v15748_v23 }
 0x2f5   : > { %v2333_v38 = vpop.f32.mrb[52].mxu1 }
 0x2f6   : > { %v2335_v46 = vpop.f32.mrb[53].mxu1  ;;  %v12708_v22 = vadd.f32 %v2580_v9, %v2333_v38  ;;  %v2589_v38 = vpop.f32.mrb[154].mxu0  ;;  %v15754_v9 = vld [vmem:[#allocation82_spill] sm:$0xff] }
 0x2f7   : > { %v2336_v32 = vpop.f32.mrb[54].mxu1  ;;  %v2591_v51 = vpop.f32.mrb[155].mxu0 }
 0x2f8   : > { %v2337_v36 = vpop.f32.mrb[55].mxu1  ;;  %4307 = vmatmul.mubr.bf16.vlgmr.msra.gmra.mrb[0].mxu0 %v12278_v10 }
 0x2f9   : > { %7955 = vmatprep.mubr.msk.bf16.mxu0 %vm1981_vm7, %v15696_v41  ;;  %v2594_v36 = vpop.f32.mrb[156].mxu0 }
 0x2fa   : > { %4036 = vmatmul.mubr.bf16.vlgmr.msra.gmra.mrb[160].mxu1 %v15749_v49  ;;  %v2596_v49 = vpop.f32.mrb[157].mxu0 }
 0x2fb   : > { %7923 = vmatprep.mubr.msk.bf16.mxu1 %vm1981_vm7, %v15752_v52  ;;  %v2597_v63 = vpop.f32.mrb[158].mxu0 }
 0x2fc   : > { %v2598_v52 = vpop.f32.mrb[159].mxu0 }
 0x2fd   : > { %v2340_v44 = vpop.f32.mrb[56].mxu1  ;;  %v2601_v47 = vpop.f32.mrb[160].mxu0 }
 0x2fe   : > { %v2341_v6 = vpop.f32.mrb[57].mxu1  ;;  %v2602_v60 = vpop.f32.mrb[161].mxu0 }
 0x2ff   : > { %v2342_v8 = vpop.f32.mrb[58].mxu1 }
 0x300   : > { %v2344_v23 = vpop.f32.mrb[59].mxu1  ;;  %v12720_v46 = vadd.f32 %v2589_v38, %v2342_v8  ;;  %4315 = vmatmul.mubr.bf16.gmra.mrb[4].mxu0 %v12275_v30  ;;  %v2603_v38 = vpop.f32.mrb[162].mxu0 }
 0x301   : > { %7956 = vmatprep.mubr.msk.bf16.mxu0 %vm1981_vm7, %v15697_v16 }
 0x302   : > { %4044 = vmatmul.mubr.bf16.gmra.mrb[164].mxu1 %v15753_v18  ;;  %v2605_v18 = vpop.f32.mrb[163].mxu0 }
 0x303   : > { %7924 = vmatprep.mubr.msk.bf16.mxu1 %vm1981_vm7, %v15754_v9  ;;  %v15757_v9 = vld [vmem:[#allocation148_spill] sm:$0xff] }
 0x305   : > { %v2347_v32 = vpop.f32.mrb[60].mxu1 }
 0x306   : > { %v2349_v5 = vpop.f32.mrb[61].mxu1  ;;  %v12730_v4 = vadd.f32 %v2594_v36, %v2347_v32  ;;  %v2608_v36 = vpop.f32.mrb[164].mxu0 }
 0x307   : > { %v2350_v7 = vpop.f32.mrb[62].mxu1 }
 0x308   : > { %v2351_v58 = vpop.f32.mrb[63].mxu1  ;;  %4323 = vmatmul.mubr.bf16.gmra.mrb[8].mxu0 %v12298_v3 }
 0x309   : > { %7957 = vmatprep.mubr.msk.bf16.mxu0 %vm1981_vm7, %v15704_v48  ;;  %v2610_v58 = vpop.f32.mrb[165].mxu0 }
 0x30a   : > { %4052 = vmatmul.mubr.bf16.gmra.mrb[168].mxu1 %v15755_v35  ;;  %v2611_v52 = vpop.f32.mrb[166].mxu0 }
 0x30b   : > { %7925 = vmatprep.mubr.msk.bf16.mxu1 %vm1981_vm7, %v15756_v53  ;;  %v2612_v35 = vpop.f32.mrb[167].mxu0 }
 0x30d   : > { %v2354_v44 = vpop.f32.mrb[64].mxu1 }
 0x30e   : > { %v2355_v6 = vpop.f32.mrb[65].mxu1  ;;  %v2615_v44 = vpop.f32.mrb[168].mxu0 }
 0x30f   : > { %v2356_v8 = vpop.f32.mrb[66].mxu1  ;;  %v2616_v47 = vpop.f32.mrb[169].mxu0 }
 0x310   : > { %v2358_v23 = vpop.f32.mrb[67].mxu1  ;;  %v12738_v51 = vadd.f32 %v2603_v38, %v2356_v8  ;;  %4331 = vmatmul.mubr.bf16.gmra.mrb[12].mxu0 %v12294_v0  ;;  %v2617_v60 = vpop.f32.mrb[170].mxu0 }
 0x311   : > { %7958 = vmatprep.mubr.msk.bf16.mxu0 %vm1981_vm7, %v15705_v40  ;;  %v2618_v23 = vpop.f32.mrb[171].mxu0 }
 0x312   : > { %4060 = vmatmul.mubr.bf16.gmra.mrb[172].mxu1 %v15757_v9 }
 0x313   : > { %7926 = vmatprep.mubr.msk.bf16.mxu1 %vm1981_vm7, %v15688_v42 }
 0x315   : > { %v2361_v32 = vpop.f32.mrb[68].mxu1  ;;  %v2621_v38 = vpop.f32.mrb[172].mxu0 }
 0x316   : > { %v2363_v5 = vpop.f32.mrb[69].mxu1  ;;  %v12746_v49 = vadd.f32 %v2608_v36, %v2361_v32  ;;  %v2622_v9 = vpop.f32.mrb[173].mxu0 }
 0x317   : > { %v2364_v7 = vpop.f32.mrb[70].mxu1  ;;  %v2623_v5 = vpop.f32.mrb[174].mxu0 }
 0x318   : > { %v2365_v63 = vpop.f32.mrb[71].mxu1  ;;  %4339 = vmatmul.mubr.bf16.gmra.mrb[16].mxu0 %v12314_v15  ;;  %v2624_v36 = vpop.f32.mrb[175].mxu0 }
 0x319   : > { %7959 = vmatprep.mubr.msk.bf16.mxu0 %vm1981_vm7, %v15706_v57 }
 0x31a   : > { %4068 = vmatmul.mubr.bf16.gmra.mrb[176].mxu1 %v12278_v10 }
 0x31b   : > { %7927 = vmatprep.mubr.msk.bf16.mxu1 %vm1981_vm7, %v15696_v41 }
 0x31d   : > { %v2368_v42 = vpop.f32.mrb[72].mxu1 }
 0x31e   : > { %v2369_v53 = vpop.f32.mrb[73].mxu1 }
 0x31f   : > { %v2370_v6 = vpop.f32.mrb[74].mxu1 }
 0x320   : > { %v2371_v8 = vpop.f32.mrb[75].mxu1  ;;  %4347 = vmatmul.mubr.bf16.gmra.mrb[20].mxu0 %v12311_v37 }
 0x321   : > { %7960 = vmatprep.mubr.msk.bf16.mxu0 %vm1981_vm7, %v15707_v2 }
 0x322   : > { %4076 = vmatmul.mubr.bf16.gmra.mrb[180].mxu1 %v12275_v30  ;;  %v12766_v7 = vpop.f32.mrb[176].mxu0 }
 0x323   : > { %7928 = vmatprep.mubr.msk.bf16.mxu1 %vm1981_vm7, %v15697_v16  ;;  %v3768_v63 = vpop.f32.mrb[177].mxu0 }
 0x324   : > { %v12768_v35 = vpop.f32.mrb[178].mxu0 }
 0x325   : > { %v2374_v10 = vpop.f32.mrb[76].mxu1  ;;  %v3771_v42 = vpop.f32.mrb[179].mxu0 }
 0x326   : > { %v2375_v41 = vpop.f32.mrb[77].mxu1 }
 0x327   : > { %v2376_v18 = vpop.f32.mrb[78].mxu1 }
 0x328   : > { %v2377_v32 = vpop.f32.mrb[79].mxu1  ;;  %4355 = vmatmul.mubr.bf16.gmra.mrb[24].mxu0 %v12331_v25 }
 0x329   : > { %7961 = vmatprep.mubr.msk.bf16.mxu0 %vm1981_vm7, %v15708_v17 }
 0x32a   : > { %4084 = vmatmul.mubr.bf16.gmra.mrb[184].mxu1 %v12298_v3 }
 0x32b   : > { %7929 = vmatprep.mubr.msk.bf16.mxu1 %vm1981_vm7, %v15704_v48 }
 0x32d   : > { %v2738_v30 = vpop.f32.mrb[80].mxu1 }
 0x32e   : > { %v2739_v16 = vpop.f32.mrb[81].mxu1 }
 0x32f   : > { %v2740_v58 = vpop.f32.mrb[82].mxu1 }
 0x330   : > { %v2741_v52 = vpop.f32.mrb[83].mxu1  ;;  %4363 = vmatmul.mubr.bf16.gmra.mrb[28].mxu0 %v12329_v11  ;;  %v12776_v53 = vpop.f32.mrb[180].mxu0 }
 0x331   : > { %7962 = vmatprep.mubr.msk.bf16.mxu0 %vm1981_vm7, %v15710_v55  ;;  %v3776_v6 = vpop.f32.mrb[181].mxu0 }
 0x332   : > { %4092 = vmatmul.mubr.bf16.gmra.mrb[188].mxu1 %v12294_v0  ;;  %v12778_v8 = vpop.f32.mrb[182].mxu0 }
 0x333   : > { %7930 = vmatprep.mubr.msk.bf16.mxu1 %vm1981_vm7, %v15705_v40  ;;  %v3779_v60 = vpop.f32.mrb[183].mxu0 }
 0x335   : > { %v2744_v3 = vpop.f32.mrb[84].mxu1 }
 0x336   : > { %v2745_v48 = vpop.f32.mrb[85].mxu1 }
 0x337   : > { %v2746_v44 = vpop.f32.mrb[86].mxu1 }
 0x338   : > { %v2747_v47 = vpop.f32.mrb[87].mxu1  ;;  %4371 = vmatmul.mubr.bf16.gmra.mrb[32].mxu0 %v12354_v39  ;;  %v12786_v23 = vpop.f32.mrb[184].mxu0 }
 0x339   : > { %7963 = vmatprep.mubr.msk.bf16.mxu0 %vm1981_vm7, %v15721_v45  ;;  %v3784_v41 = vpop.f32.mrb[185].mxu0 }
 0x33a   : > { %4100 = vmatmul.mubr.bf16.gmra.mrb[192].mxu1 %v12314_v15  ;;  %v12791_v9 = vpop.f32.mrb[186].mxu0 }
 0x33b   : > { %7931 = vmatprep.mubr.msk.bf16.mxu1 %vm1981_vm7, %v15706_v57  ;;  %v3787_v15 = vpop.f32.mrb[187].mxu0 }
 0x33d   : > { %v2750_v0 = vpop.f32.mrb[88].mxu1 }
 0x33e   : > { %v2751_v40 = vpop.f32.mrb[89].mxu1 }
 0x33f   : > { %v2752_v10 = vpop.f32.mrb[90].mxu1 }
 0x340   : > { %v12789_v38 = vadd.f32 %v2752_v10, %v12586_v24  ;;  %v2754_v18 = vpop.f32.mrb[91].mxu1  ;;  %4379 = vmatmul.mubr.bf16.gmra.mrb[36].mxu0 %v12350_v28  ;;  %v12802_v5 = vpop.f32.mrb[188].mxu0 }
 0x341   : > { %7964 = vmatprep.mubr.msk.bf16.mxu0 %vm1981_vm7, %v15724_v13  ;;  %v3792_v30 = vpop.f32.mrb[189].mxu0 }
 0x342   : > { %15758 = vst [vmem:[#allocation107_spill] sm:$0xff] %v12789_v38  ;;  %4108 = vmatmul.mubr.bf16.gmra.mrb[196].mxu1 %v12311_v37  ;;  %v12804_v58 = vpop.f32.mrb[190].mxu0 }
 0x343   : > { %7932 = vmatprep.mubr.msk.bf16.mxu1 %vm1981_vm7, %v15707_v2  ;;  %v3795_v37 = vpop.f32.mrb[191].mxu0 }
 0x345   : > { %v2757_v57 = vpop.f32.mrb[92].mxu1 }
 0x346   : > { %v12800_v32 = vadd.f32 %v2757_v57, %v12598_v26  ;;  %v2759_v24 = vpop.f32.mrb[93].mxu1 }
 0x347   : > { %v2760_v36 = vpop.f32.mrb[94].mxu1 }
 0x348   : > { %15759 = vst [vmem:[#allocation105_spill] sm:$0xff] %v12800_v32  ;;  %v2761_v16 = vpop.f32.mrb[95].mxu1  ;;  %4387 = vmatmul.mubr.bf16.gmra.mrb[40].mxu0 %v12376_v31 }
 0x349   : > { %7965 = vmatprep.mubr.msk.bf16.mxu0 %vm1981_vm7, %v15727_v21  ;;  %v12812_v63 = vpop.f32.mrb[192].mxu0 }
 0x34a   : > { %4116 = vmatmul.mubr.bf16.gmra.mrb[200].mxu1 %v12331_v25  ;;  %v3800_v42 = vpop.f32.mrb[193].mxu0 }
 0x34b   : > { %7933 = vmatprep.mubr.msk.bf16.mxu1 %vm1981_vm7, %v15708_v17  ;;  %v12817_v44 = vpop.f32.mrb[194].mxu0 }
 0x34c   : > { %v3803_v25 = vpop.f32.mrb[195].mxu0 }
 0x34d   : > { %v2764_v2 = vpop.f32.mrb[96].mxu1 }
 0x34e   : > { %v2765_v26 = vpop.f32.mrb[97].mxu1 }
 0x34f   : > { %v2766_v52 = vpop.f32.mrb[98].mxu1 }
 0x350   : > { %v12815_v3 = vadd.f32 %v2766_v52, %v12622_v62  ;;  %v2768_v48 = vpop.f32.mrb[99].mxu1  ;;  %4395 = vmatmul.mubr.bf16.gmra.mrb[44].mxu0 %v12373_v1 }
 0x351   : > { %7966 = vmatprep.mubr.msk.bf16.mxu0 %vm1981_vm7, %v15730_v20 }
 0x352   : > { %15760 = vst [vmem:[#allocation130_spill] sm:$0xff] %v12815_v3  ;;  %4124 = vmatmul.mubr.bf16.gmra.mrb[204].mxu1 %v12329_v11 }
 0x353   : > { %7934 = vmatprep.mubr.msk.bf16.mxu1 %vm1981_vm7, %v15710_v55  ;;  %v12828_v47 = vpop.f32.mrb[196].mxu0 }
 0x354   : > { %v3808_v0 = vpop.f32.mrb[197].mxu0 }
 0x355   : > { %v2771_v17 = vpop.f32.mrb[100].mxu1  ;;  %v12830_v10 = vpop.f32.mrb[198].mxu0 }
 0x356   : > { %v12826_v6 = vadd.f32 %v2771_v17, %v12630_v12  ;;  %v2773_v62 = vpop.f32.mrb[101].mxu1  ;;  %v3811_v11 = vpop.f32.mrb[199].mxu0 }
 0x357   : > { %v2774_v60 = vpop.f32.mrb[102].mxu1  ;;  %v15765_v62 = vld [vmem:[#allocation165_spill] sm:$0xff]  ;;  %v15768_v11 = vld [vmem:[#allocation152_spill] sm:$0xff] }
 0x358   : > { %15761 = vst [vmem:[#allocation132_spill] sm:$0xff] %v12826_v6  ;;  %v2775_v40 = vpop.f32.mrb[103].mxu1  ;;  %4403 = vmatmul.mubr.bf16.gmra.mrb[48].mxu0 %v12400_v59 }
 0x359   : > { %7967 = vmatprep.mubr.msk.bf16.mxu0 %vm1981_vm7, %v15731_v19 }
 0x35a   : > { %4132 = vmatmul.mubr.bf16.gmra.mrb[208].mxu1 %v12354_v39 }
 0x35b   : > { %7935 = vmatprep.mubr.msk.bf16.mxu1 %vm1981_vm7, %v15721_v45  ;;  %v12838_v41 = vpop.f32.mrb[200].mxu0 }
 0x35c   : > { %v3816_v15 = vpop.f32.mrb[201].mxu0 }
 0x35d   : > { %v2778_v55 = vpop.f32.mrb[104].mxu1  ;;  %v12843_v36 = vpop.f32.mrb[202].mxu0 }
 0x35e   : > { %v2779_v12 = vpop.f32.mrb[105].mxu1  ;;  %v3819_v39 = vpop.f32.mrb[203].mxu0 }
 0x35f   : > { %v2780_v18 = vpop.f32.mrb[106].mxu1  ;;  %v15769_v12 = vld [vmem:[#allocation115_spill] sm:$0xff] }
 0x360   : > { %v12841_v57 = vadd.f32 %v2780_v18, %v12638_v56  ;;  %v2782_v24 = vpop.f32.mrb[107].mxu1  ;;  %4411 = vmatmul.mubr.bf16.gmra.mrb[52].mxu0 %v12396_v29 }
 0x361   : > { %7968 = vmatprep.mubr.msk.bf16.mxu0 %vm1981_vm7, %v15734_v50 }
 0x362   : > { %15762 = vst [vmem:[#allocation128_spill] sm:$0xff] %v12841_v57  ;;  %4140 = vmatmul.mubr.bf16.gmra.mrb[212].mxu1 %v12350_v28 }
 0x363   : > { %7936 = vmatprep.mubr.msk.bf16.mxu1 %vm1981_vm7, %v15724_v13  ;;  %v12854_v16 = vpop.f32.mrb[204].mxu0  ;;  %v15764_v13 = vld [vmem:[#allocation146_spill] sm:$0xff] }
 0x364   : > { %v3824_v2 = vpop.f32.mrb[205].mxu0 }
 0x365   : > { %v2785_v45 = vpop.f32.mrb[108].mxu1  ;;  %v12856_v52 = vpop.f32.mrb[206].mxu0 }
 0x366   : > { %v12852_v30 = vadd.f32 %v2785_v45, %v12646_v43  ;;  %v2787_v56 = vpop.f32.mrb[109].mxu1  ;;  %v3827_v28 = vpop.f32.mrb[207].mxu0 }
 0x367   : > { %v2788_v37 = vpop.f32.mrb[110].mxu1 }
 0x368   : > { %15763 = vst [vmem:[#allocation127_spill] sm:$0xff] %v12852_v30  ;;  %v2789_v26 = vpop.f32.mrb[111].mxu1  ;;  %4419 = vmatmul.mubr.bf16.gmra.mrb[56].mxu0 %v12426_v27 }
 0x369   : > { %7969 = vmatprep.mubr.msk.bf16.mxu0 %vm1981_vm7, %v15764_v13 }
 0x36a   : > { %4148 = vmatmul.mubr.bf16.gmra.mrb[216].mxu1 %v12376_v31 }
 0x36b   : > { %7937 = vmatprep.mubr.msk.bf16.mxu1 %vm1981_vm7, %v15727_v21  ;;  %v12864_v48 = vpop.f32.mrb[208].mxu0  ;;  %v15767_v21 = vld [vmem:[#allocation164_spill] sm:$0xff] }
 0x36c   : > { %v3832_v17 = vpop.f32.mrb[209].mxu0 }
 0x36d   : > { %v2792_v43 = vpop.f32.mrb[112].mxu1  ;;  %v12869_v40 = vpop.f32.mrb[210].mxu0 }
 0x36e   : > { %v2793_v42 = vpop.f32.mrb[113].mxu1  ;;  %v3835_v31 = vpop.f32.mrb[211].mxu0 }
 0x36f   : > { %v2794_v25 = vpop.f32.mrb[114].mxu1  ;;  %v15771_v42 = vld [vmem:[#allocation117_spill] sm:$0xff] }
 0x370   : > { %v12867_v60 = vadd.f32 %v2794_v25, %v15765_v62  ;;  %v2796_v0 = vpop.f32.mrb[115].mxu1  ;;  %4427 = vmatmul.mubr.bf16.gmra.mrb[60].mxu0 %v15767_v21 }
 0x371   : > { %7970 = vmatprep.mubr.msk.bf16.mxu0 %vm1981_vm7, %v15768_v11 }
 0x372   : > { %15766 = vst [vmem:[#allocation142_spill] sm:$0xff] %v12867_v60  ;;  %4156 = vmatmul.mubr.bf16.gmra.mrb[220].mxu1 %v12373_v1 }
 0x373   : > { %7938 = vmatprep.mubr.msk.bf16.mxu1 %vm1981_vm7, %v15730_v20  ;;  %v12880_v24 = vpop.f32.mrb[212].mxu0 }
 0x374   : > { %v3840_v45 = vpop.f32.mrb[213].mxu0 }
 0x375   : > { %v2799_v55 = vpop.f32.mrb[116].mxu1  ;;  %v12882_v37 = vpop.f32.mrb[214].mxu0  ;;  %v15778_v45 = vld [vmem:[#allocation81_spill] sm:$0xff] }
 0x376   : > { %v12878_v18 = vadd.f32 %v2799_v55, %v15769_v12  ;;  %v2801_v15 = vpop.f32.mrb[117].mxu1  ;;  %v3843_v1 = vpop.f32.mrb[215].mxu0 }
 0x377   : > { %v2802_v39 = vpop.f32.mrb[118].mxu1  ;;  %v15781_v1 = vld [vmem:[#allocation93_spill] sm:$0xff] }
 0x378   : > { %15770 = vst [vmem:[#allocation144_spill] sm:$0xff] %v12878_v18  ;;  %v2803_v56 = vpop.f32.mrb[119].mxu1  ;;  %4435 = vmatmul.mubr.bf16.gmra.mrb[64].mxu0 %v12458_v34  ;;  %v15773_v34 = vld [vmem:[#allocation103_spill] sm:$0xff] }
 0x379   : > { %7971 = vmatprep.mubr.msk.bf16.mxu0 %vm1981_vm7, %v15743_v33 }
 0x37a   : > { %4164 = vmatmul.mubr.bf16.gmra.mrb[224].mxu1 %v12400_v59 }
 0x37b   : > { %7939 = vmatprep.mubr.msk.bf16.mxu1 %vm1981_vm7, %v15731_v19  ;;  %v12890_v26 = vpop.f32.mrb[216].mxu0  ;;  %v15774_v19 = vld [vmem:[#allocation102_spill] sm:$0xff] }
 0x37c   : > { %v3848_v43 = vpop.f32.mrb[217].mxu0  ;;  %v15775_v33 = vpack.c.bf16 %v15773_v34, %v15774_v19  ;;  %v9380_v19 = vld [vmem:[%s14892_s7 + $0xd0] sm:$0xff]  }
 0x37d   : > { %v2806_v20 = vpop.f32.mrb[120].mxu1  ;;  %v12895_v62 = vpop.f32.mrb[218].mxu0  ;;  %8104 = vmatprep.subr.bf16.mxu1 %v9380_v19  ;;  %v9382_v19 = vld [vmem:[%s14892_s7 + $0xd8] sm:$0xff]  }
 0x37e   : > { %v2807_v2 = vpop.f32.mrb[121].mxu1  ;;  %v3851_v59 = vpop.f32.mrb[219].mxu0 }
 0x37f   : > { %v2808_v28 = vpop.f32.mrb[122].mxu1 }
 0x380   : > { %v12893_v25 = vadd.f32 %v2808_v28, %v15771_v42  ;;  %v2810_v17 = vpop.f32.mrb[123].mxu1  ;;  %4443 = vmatmul.mubr.bf16.gmra.mrb[68].mxu0 %v12474_v61  ;;  %v15777_v61 = vld [vmem:[#allocation74_spill] sm:$0xff] }
 0x381   : > { %7972 = vmatprep.mubr.msk.bf16.mxu0 %vm1981_vm7, %v15775_v33  ;;  %v15779_v56 = vpack.c.bf16 %v15777_v61, %v15778_v45  ;;  %v9381_v33 = vld [vmem:[%s14892_s7 + $0x90] sm:$0xff]  }
 0x382   : > { %15772 = vst [vmem:[#allocation140_spill] sm:$0xff] %v12893_v25  ;;  %4172 = vmatmul.mubr.bf16.gmra.mrb[228].mxu1 %v12396_v29 }
 0x383   : > { %7940 = vmatprep.mubr.msk.bf16.mxu1 %vm1981_vm7, %v15734_v50  ;;  %v12908_v55 = vpop.f32.mrb[220].mxu0  ;;  %8105 = vmatpush3.bf16.msra.mxu1 %v9381_v33 }
 0x384   : > { %v3856_v15 = vpop.f32.mrb[221].mxu0  ;;  %8106 = vmatprep.subr.bf16.mxu1 %v9382_v19 }
 0x385   : > { %v2813_v0 = vpop.f32.mrb[124].mxu1  ;;  %v12910_v39 = vpop.f32.mrb[222].mxu0 }
 0x386   : > { %v12906_v31 = vadd.f32 %v2813_v0, %v12687_v14  ;;  %v2815_v11 = vpop.f32.mrb[125].mxu1  ;;  %v3859_v50 = vpop.f32.mrb[223].mxu0  ;;  %v15780_v14 = vld [vmem:[#allocation91_spill] sm:$0xff]  ;;  %v15784_v0 = vld [vmem:[#allocation88_spill] sm:$0xff] }
 0x387   : > { %v2816_v12 = vpop.f32.mrb[126].mxu1  ;;  %v15782_v20 = vpack.c.bf16 %v15780_v14, %v15781_v1  ;;  %v15785_v11 = vld [vmem:[#allocation89_spill] sm:$0xff] }
 0x388   : > { %15776 = vst [vmem:[#allocation139_spill] sm:$0xff] %v12906_v31  ;;  %v2817_v29 = vpop.f32.mrb[127].mxu1  ;;  %4451 = vmatmul.mubr.bf16.gmra.mrb[72].mxu0 %v15779_v56  ;;  %v15786_v12 = vpack.c.bf16 %v15784_v0, %v15785_v11 }
 0x389   : > { %7973 = vmatprep.mubr.msk.bf16.mxu0 %vm1981_vm7, %v15782_v20 }
 0x38a   : > { %4180 = vmatmul.mubr.bf16.gmra.mrb[232].mxu1 %v12426_v27 }
 0x38b   : > { %7941 = vmatprep.mubr.msk.bf16.mxu1 %vm1981_vm7, %v15764_v13  ;;  %v12922_v43 = vpop.f32.mrb[224].mxu0 }
 0x38c   : > { %v3864_v17 = vpop.f32.mrb[225].mxu0 }
 0x38d   : > { %v2820_v2 = vpop.f32.mrb[128].mxu1  ;;  %v12927_v13 = vpop.f32.mrb[226].mxu0 }
 0x38e   : > { %v2821_v28 = vpop.f32.mrb[129].mxu1  ;;  %v3867_v34 = vpop.f32.mrb[227].mxu0 }
 0x38f   : > { %v2822_v42 = vpop.f32.mrb[130].mxu1 }
 0x390   : > { %v12925_v27 = vadd.f32 %v2822_v42, %v12699_v54  ;;  %v2824_v59 = vpop.f32.mrb[131].mxu1  ;;  %4459 = vmatmul.mubr.bf16.gmra.mrb[76].mxu0 %v15786_v12 }
 0x392   : > { %15783 = vst [vmem:[#allocation158_spill] sm:$0xff] %v12925_v27  ;;  %4188 = vmatmul.mubr.bf16.gmra.mrb[236].mxu1 %v15767_v21 }
 0x393   : > { %v12942_v21 = vpop.f32.mrb[228].mxu0 }
 0x394   : > { %v3872_v61 = vpop.f32.mrb[229].mxu0 }
 0x395   : > { %v2827_v54 = vpop.f32.mrb[132].mxu1  ;;  %v12944_v56 = vpop.f32.mrb[230].mxu0 }
 0x396   : > { %v12940_v15 = vadd.f32 %v2827_v54, %v12708_v22  ;;  %v2829_v29 = vpop.f32.mrb[133].mxu1  ;;  %v3875_v14 = vpop.f32.mrb[231].mxu0 }
 0x397   : > { %v2830_v50 = vpop.f32.mrb[134].mxu1 }
 0x398   : > { %15787 = vst [vmem:[#allocation156_spill] sm:$0xff] %v12940_v15  ;;  %v2831_v45 = vpop.f32.mrb[135].mxu1  ;;  %v9383_v50 = vld [vmem:[%s14892_s7 + $0x98] sm:$0xff]  }
 0x399   : > { %8107 = vmatpush3.bf16.msra.mxu1 %v9383_v50 }
 0x39b   : > { %v12946_v2 = vpop.f32.mrb[232].mxu0 }
 0x39c   : > { %v3880_v42 = vpop.f32.mrb[233].mxu0 }
 0x39d   : > { %v2834_v1 = vpop.f32.mrb[136].mxu1  ;;  %v12951_v59 = vpop.f32.mrb[234].mxu0 }
 0x39e   : > { %v2835_v20 = vpop.f32.mrb[137].mxu1  ;;  %v3883_v34 = vpop.f32.mrb[235].mxu0 }
 0x39f   : > { %v2836_v28 = vpop.f32.mrb[138].mxu1 }
 0x3a0   : > { %v12949_v17 = vadd.f32 %v2836_v28, %v12720_v46  ;;  %v2838_v22 = vpop.f32.mrb[139].mxu1 }
 0x3a2   : > { %15788 = vst [vmem:[#allocation167_spill] sm:$0xff] %v12949_v17 }
 0x3a3   : > { %v12959_v12 = vpop.f32.mrb[236].mxu0 }
 0x3a4   : > { %v3888_v29 = vpop.f32.mrb[237].mxu0 }
 0x3a5   : > { %v2841_v33 = vpop.f32.mrb[140].mxu1  ;;  %v12964_v61 = vpop.f32.mrb[238].mxu0 }
 0x3a6   : > { %v12957_v0 = vadd.f32 %v2841_v33, %v12730_v4  ;;  %v2843_v11 = vpop.f32.mrb[141].mxu1  ;;  %v3891_v45 = vpop.f32.mrb[239].mxu0  ;;  %v9384_v33 = vld [vmem:[%s14892_s7 + $0x40] sm:$0xff]  }
 0x3a7   : > { %v2844_v54 = vpop.f32.mrb[142].mxu1  ;;  %v9385_v11 = vld [vmem:[%s14892_s7] sm:$0xff]   ;;  %8234 = vmatprep.subr.bf16.mxu0 %v9384_v33 }
 0x3a8   : > { %15789 = vst [vmem:[#allocation166_spill] sm:$0xff] %v12957_v0  ;;  %v2845_v46 = vpop.f32.mrb[143].mxu1  ;;  %8235 = vmatpush3.bf16.msra.mxu0 %v9385_v11 }
 0x3ab   : > { %v12966_v20 = vpop.f32.mrb[240].mxu0 }
 0x3ac   : > { %v3896_v28 = vpop.f32.mrb[241].mxu0 }
 0x3ad   : > { %v2848_v14 = vpop.f32.mrb[144].mxu1  ;;  %v12971_v34 = vpop.f32.mrb[242].mxu0  ;;  %v9386_v28 = vld [vmem:[%s14892_s7 + $0xe0] sm:$0xff]  }
 0x3ae   : > { %v2849_v1 = vpop.f32.mrb[145].mxu1  ;;  %v3899_v19 = vpop.f32.mrb[243].mxu0  ;;  %8108 = vmatprep.subr.bf16.mxu1 %v9386_v28  ;;  %v9388_v28 = vld [vmem:[%s14892_s7 + $0x48] sm:$0xff]  }
 0x3af   : > { %v2850_v4 = vpop.f32.mrb[146].mxu1  ;;  %8236 = vmatprep.subr.bf16.mxu0 %v9388_v28 }
 0x3b0   : > { %v12969_v42 = vadd.f32 %v2850_v4, %v12738_v51  ;;  %v2852_v22 = vpop.f32.mrb[147].mxu1 }
 0x3b1   : > { %v9387_v22 = vld [vmem:[%s14892_s7 + $0xa0] sm:$0xff]  }
 0x3b2   : > { %15790 = vst [vmem:[#allocation122_spill] sm:$0xff] %v12969_v42  ;;  %8109 = vmatpush3.bf16.msra.mxu1 %v9387_v22  ;;  %v9389_v22 = vld [vmem:[%s14892_s7 + $0x8] sm:$0xff]  }
 0x3b3   : > { %v12982_v51 = vpop.f32.mrb[244].mxu0  ;;  %8237 = vmatpush3.bf16.msra.mxu0 %v9389_v22 }
 0x3b4   : > { %v3904_v45 = vpop.f32.mrb[245].mxu0 }
 0x3b5   : > { %v2855_v54 = vpop.f32.mrb[148].mxu1  ;;  %v12984_v1 = vpop.f32.mrb[246].mxu0 }
 0x3b6   : > { %v12980_v29 = vadd.f32 %v2855_v54, %v12746_v49  ;;  %v2857_v46 = vpop.f32.mrb[149].mxu1  ;;  %v3907_v4 = vpop.f32.mrb[247].mxu0 }
 0x3b7   : > { %v2858_v50 = vpop.f32.mrb[150].mxu1 }
 0x3b8   : > { %15791 = vst [vmem:[#allocation98_spill] sm:$0xff] %v12980_v29  ;;  %v2859_v14 = vpop.f32.mrb[151].mxu1 }
 0x3bb   : > { %v12992_v33 = vpop.f32.mrb[248].mxu0 }
 0x3bc   : > { %v3912_v54 = vpop.f32.mrb[249].mxu0 }
 0x3bd   : > { %v2862_v49 = vpop.f32.mrb[152].mxu1  ;;  %v12994_v50 = vpop.f32.mrb[250].mxu0 }
 0x3be   : > { %v2863_v19 = vpop.f32.mrb[153].mxu1  ;;  %v3915_v45 = vpop.f32.mrb[251].mxu0 }
 0x3bf   : > { %v2864_v11 = vpop.f32.mrb[154].mxu1 }
 0x3c0   : > { %v2865_v46 = vpop.f32.mrb[155].mxu1  ;;  %v9390_v11 = vld [vmem:[%s14892_s7 + $0xe8] sm:$0xff]  }
 0x3c1   : > { %8110 = vmatprep.subr.bf16.mxu1 %v9390_v11  ;;  %v13016_v46 = vld [vmem:[%s14891_s6] ss:$0 sm:$0xff] }
 0x3c3   : > { %v12996_v29 = vpop.f32.mrb[252].mxu0 }
 0x3c4   : > { %15792 = vst [vmem:[#allocation92_spill] sm:$0xff] %v12996_v29  ;;  %v3920_v0 = vpop.f32.mrb[253].mxu0 }
 0x3c5   : > { %v2868_v14 = vpop.f32.mrb[156].mxu1  ;;  %v13004_v49 = vpop.f32.mrb[254].mxu0 }
 0x3c6   : > { %v2869_v4 = vpop.f32.mrb[157].mxu1  ;;  %15793 = vst [vmem:[#allocation135_spill] sm:$0xff] %v13004_v49  ;;  %v3923_v19 = vpop.f32.mrb[255].mxu0 }
 0x3c7   : > { %v2870_v42 = vpop.f32.mrb[158].mxu1 }
 0x3c8   : > { %v2871_v17 = vpop.f32.mrb[159].mxu1 }
 0x3c9   : > { %v9391_v17 = vld [vmem:[%s14892_s7 + $0xa8] sm:$0xff]  }
 0x3ca   : > { %8111 = vmatpush3.bf16.msra.mxu1 %v9391_v17 }
 0x3cb   : > { %v4308_v45 = vpop.f32.mrb[0].mxu0 }
 0x3cc   : > { %v4310_v28 = vpop.f32.mrb[1].mxu0 }
 0x3cd   : > { %v4037_v0 = vpop.f32.mrb[160].mxu1  ;;  %v4311_v27 = vpop.f32.mrb[2].mxu0  ;;  %v15794_v28 = vld [vmem:[#allocation67_spill] sm:$0xff] }
 0x3ce   : > { %v4038_v42 = vadd.f32 %v4037_v0, %v12766_v7  ;;  %v4039_v54 = vpop.f32.mrb[161].mxu1  ;;  %v4313_v17 = vpop.f32.mrb[3].mxu0 }
 0x3cf   : > { %v4040_v14 = vpop.f32.mrb[162].mxu1 }
 0x3d0   : > { %v4467_v4 = vadd.f32 %v4308_v45, %v4038_v42  ;;  %v4041_v19 = vadd.f32 %v4040_v14, %v12768_v35  ;;  %v4042_v15 = vpop.f32.mrb[163].mxu1 }
 0x3d2   : > { %v4513_v22 = vadd.f32 %v13016_v46, %v4467_v4  ;;  %v4468_v11 = vadd.f32 %v4311_v27, %v4041_v19 }
 0x3d3   : > { %v4316_v42 = vpop.f32.mrb[4].mxu0 }
 0x3d4   : > { %v4553_v31 = vmax.f32 %v4513_v22, 0.0  ;;  %v4514_v7 = vadd.f32 %v13016_v46, %v4468_v11  ;;  %v4318_v14 = vpop.f32.mrb[5].mxu0 }
 0x3d5   : > { %v4045_v0 = vpop.f32.mrb[164].mxu1  ;;  %v4319_v19 = vpop.f32.mrb[6].mxu0 }
 0x3d6   : > { %v13021_v54 = vmul.f32 0.0, %v4553_v31  ;;  %v4554_v25 = vmax.f32 %v4514_v7, 0.0  ;;  %v4046_v18 = vadd.f32 %v4045_v0, %v12776_v53  ;;  %v4047_v60 = vpop.f32.mrb[165].mxu1  ;;  %v4321_v11 = vpop.f32.mrb[7].mxu0 }
 0x3d7   : > { %v4048_v45 = vpop.f32.mrb[166].mxu1 }
 0x3d8   : > { %v13025_v35 = vmul.f32 %v15794_v28, %v4554_v25  ;;  %v4469_v15 = vadd.f32 %v4316_v42, %v4046_v18  ;;  %v4050_v4 = vpop.f32.mrb[167].mxu1  ;;  %v4049_v27 = vadd.f32 %v4048_v45, %v12778_v8  ;;  %v4912_v22 = vrot.slane %v13021_v54, 1  ;;  %v9392_v25 = vld [vmem:[%s14892_s7 + $0x50] sm:$0xff]  }
 0x3d9   : > { %v9393_v18 = vld [vmem:[%s14892_s7 + $0x10] sm:$0xff]   ;;  %8238 = vmatprep.subr.bf16.mxu0 %v9392_v25 }
 0x3da   : > { %v4515_v31 = vadd.f32 %v13016_v46, %v4469_v15  ;;  %v4913_v60 = vrot.slane %v13025_v35, 1  ;;  %v4470_v8 = vadd.f32 %v4319_v19, %v4049_v27  ;;  %8239 = vmatpush3.bf16.msra.mxu0 %v9393_v18 }
 0x3db   : > { %v4324_v11 = vpop.f32.mrb[8].mxu0 }
 0x3dc   : > { %v4555_v17 = vmax.f32 %v4515_v31, 0.0  ;;  %v13040_v7 = vsel %vm1548_vm3, %v4912_v22, %v4913_v60  ;;  %v4516_v0 = vadd.f32 %v13016_v46, %v4470_v8  ;;  %v4326_v27 = vpop.f32.mrb[9].mxu0 }
 0x3dd   : > { %v4053_v42 = vpop.f32.mrb[168].mxu1  ;;  %v4327_v8 = vpop.f32.mrb[10].mxu0 }
 0x3de   : > { %v13044_v45 = vmul.f32 %v15794_v28, %v4555_v17  ;;  %v4054_v15 = vadd.f32 %v4053_v42, %v12786_v23  ;;  %v4055_v14 = vpop.f32.mrb[169].mxu1  ;;  %v4556_v4 = vmax.f32 %v4516_v0, 0.0  ;;  %v4329_v17 = vpop.f32.mrb[11].mxu0 }
 0x3df   : > { %v4056_v53 = vpop.f32.mrb[170].mxu1 }
 0x3e0   : > { %v4471_v30 = vadd.f32 %v4324_v11, %v4054_v15  ;;  %v4057_v19 = vadd.f32 %v4056_v53, %v12791_v9  ;;  %v4058_v31 = vpop.f32.mrb[171].mxu1  ;;  %v4915_v25 = vrot.slane %v13044_v45, 1  ;;  %v13049_v57 = vmul.f32 0.0, %v4556_v4  ;;  %v9394_v53 = vld [vmem:[%s14892_s7 + $0xf0] sm:$0xff]  }
 0x3e1   : > { %8112 = vmatprep.subr.bf16.mxu1 %v9394_v53  ;;  %v15795_v9 = vld [vmem:[#allocation68_spill] sm:$0xff] }
 0x3e2   : > { %v4517_v18 = vadd.f32 %v13016_v46, %v4471_v30  ;;  %v4472_v28 = vadd.f32 %v4327_v8, %v4057_v19  ;;  %v13053_v23 = vsel %vm1548_vm3, %v4913_v60, %v4915_v25  ;;  %v4917_v0 = vrot.slane %v13049_v57, 1  ;;  %v9395_v30 = vld [vmem:[%s14892_s7 + $0xb0] sm:$0xff]  }
 0x3e3   : > { %8113 = vmatpush3.bf16.msra.mxu1 %v9395_v30  ;;  %v4332_v17 = vpop.f32.mrb[12].mxu0 }
 0x3e4   : > { %v4557_v15 = vmax.f32 %v4517_v18, 0.0  ;;  %v4518_v60 = vadd.f32 %v13016_v46, %v4472_v28  ;;  %v13068_v4 = vsel %vm1548_vm3, %v4915_v25, %v4917_v0  ;;  %v13071_v11 = vsel %vm1548_vm3, %v4917_v0, %v4912_v22  ;;  %v4334_v42 = vpop.f32.mrb[13].mxu0 }
 0x3e5   : > { %v4061_v14 = vpop.f32.mrb[172].mxu1  ;;  %v9397_v42 = vld [vmem:[%s14892_s7 + $0xb8] sm:$0xff]  }
 0x3e6   : > { %v13073_v27 = vmul.f32 0.0, %v4557_v15  ;;  %v4558_v19 = vmax.f32 %v4518_v60, 0.0  ;;  %v4062_v31 = vadd.f32 %v4061_v14, %v12802_v5  ;;  %v4063_v8 = vpop.f32.mrb[173].mxu1  ;;  %v4335_v5 = vpop.f32.mrb[14].mxu0 }
 0x3e7   : > { %v4064_v28 = vpop.f32.mrb[174].mxu1  ;;  %v4337_v14 = vpop.f32.mrb[15].mxu0 }
 0x3e8   : > { %v13079_v53 = vmul.f32 %v15795_v9, %v4558_v19  ;;  %v4473_v25 = vadd.f32 %v4332_v17, %v4062_v31  ;;  %v4066_v6 = vpop.f32.mrb[175].mxu1  ;;  %v4808_v22 = vrot.slane %v13073_v27, 7  ;;  %v4919_v0 = vrot.slane %v13073_v27, 1 }
 0x3e9   : > { %v4065_v15 = vadd.f32 %v4064_v28, %v12804_v58  ;;  %v9396_v6 = vld [vmem:[%s14892_s7 + $0xf8] sm:$0xff]  }
 0x3ea   : > { %v15167_v30 = vrot.slane %v13079_v53, 7  ;;  %v4519_v60 = vadd.f32 %v13016_v46, %v4473_v25  ;;  %v9108_v8 = vpack.i.bf16 %v13079_v53, %v13073_v27  ;;  %v4920_v19 = vrot.slane %v13079_v53, 1  ;;  %v9398_v58 = vld [vmem:[%s14892_s7 + $0x58] sm:$0xff]   ;;  %8114 = vmatprep.subr.bf16.mxu1 %v9396_v6  ;;  %v9399_v6 = vld [vmem:[%s14892_s7 + $0x100] sm:$0xff]  }
 0x3eb   : > { %v4474_v31 = vadd.f32 %v4335_v5, %v4065_v15  ;;  %8115 = vmatpush3.bf16.msra.mxu1 %v9397_v42  ;;  %8240 = vmatprep.subr.bf16.mxu0 %v9398_v58  ;;  %v9401_v58 = vld [vmem:[%s14892_s7 + $0xc0] sm:$0xff]  }
 0x3ec   : > { %v4559_v17 = vmax.f32 %v4519_v60, 0.0  ;;  %9109 = vrot.lane.b32.xlu0 %v9108_v8, %s9570_s0  ;;  %v4921_v27 = vsel %vm1548_vm3, %v4919_v0, %v4920_v19  ;;  %v13103_v28 = vsel %vm1451_vm2, %v4808_v22, %v15167_v30  ;;  %v4340_v8 = vpop.f32.mrb[16].mxu0  ;;  %8116 = vmatprep.subr.bf16.mxu1 %v9399_v6 }
 0x3ed   : > { %v4520_v25 = vadd.f32 %v13016_v46, %v4474_v31  ;;  %v4069_v14 = vpop.f32.mrb[176].mxu1  ;;  %v4342_v38 = vpop.f32.mrb[17].mxu0 }
 0x3ee   : > { %v4599_v18 = vmul.f32 %v15795_v9, %v4559_v17  ;;  %v4070_v15 = vadd.f32 %v4069_v14, %v12812_v63  ;;  %v4071_v5 = vpop.f32.mrb[177].mxu1  ;;  %v9400_v9 = vld [vmem:[%s14892_s7 + $0x18] sm:$0xff]   ;;  %v4343_v63 = vpop.f32.mrb[18].mxu0 }
 0x3ef   : > { %v4560_v60 = vmax.f32 %v4520_v25, 0.0  ;;  %v4072_v3 = vpop.f32.mrb[178].mxu1  ;;  %8241 = vmatpush3.bf16.msra.mxu0 %v9400_v9  ;;  %8117 = vmatpush3.bf16.msra.mxu1 %v9401_v58  ;;  %v9402_v5 = vld [vmem:[%s14892_s7 + $0x108] sm:$0xff]  }
 0x3f0   : > { %v4475_v32 = vadd.f32 %v4340_v8, %v4070_v15  ;;  %v4073_v49 = vadd.f32 %v4072_v3, %v12817_v44  ;;  %v4074_v30 = vpop.f32.mrb[179].mxu1  ;;  %v4922_v29 = vrot.slane %v4599_v18, 1  ;;  %v4811_v31 = vrot.slane %v4599_v18, 7  ;;  %v4345_v44 = vpop.f32.mrb[19].mxu0  ;;  %8118 = vmatprep.subr.bf16.mxu1 %v9402_v5 }
 0x3f1   : > { %v4600_v42 = vmul.f32 0.0, %v4560_v60  ;;  %v9403_v60 = vld [vmem:[%s14892_s7 + $0xc8] sm:$0xff]   ;;  %v15797_v44 = vrot.slane %v13079_v53, 7 }
 0x3f2   : > { %v4521_v38 = vadd.f32 %v13016_v46, %v4475_v32  ;;  %v4476_v3 = vadd.f32 %v4343_v63, %v4073_v49  ;;  %v4923_v30 = vsel %vm1548_vm3, %v4920_v19, %v4922_v29 }
 0x3f3   : > { %v4753_v17 = vrot.slane %v4600_v42, 7  ;;  %v4924_v25 = vrot.slane %v4600_v42, 1  ;;  %v9118_v14 = vpack.i.bf16 %v4600_v42, %v4599_v18  ;;  %v9113_v15 = vpack.i.bf16 %v4923_v30, %v4921_v27  ;;  %8119 = vmatpush3.bf16.msra.mxu1 %v9403_v60 }
 0x3f4   : > { %v4561_v32 = vmax.f32 %v4521_v38, 0.0  ;;  %v4522_v49 = vadd.f32 %v13016_v46, %v4476_v3  ;;  %v4348_v38 = vpop.f32.mrb[20].mxu0 }
 0x3f5   : > { %9119 = vrot.lane.b32.xlu0 %v9118_v14, %s9570_s0  ;;  %v4077_v19 = vpop.f32.mrb[180].mxu1  ;;  %9114 = vrot.lane.b32.xlu1 %v9113_v15, %s15796_s26  ;;  %v4925_v18 = vsel %vm1548_vm3, %v4922_v29, %v4924_v25  ;;  %v5003_v27 = vsel %vm1548_vm3, %v4924_v25, %v4919_v0  ;;  %v13132_v8 = vsel %vm1451_vm2, %v4753_v17, %v4808_v22  ;;  %v15799_v22 = vld [vmem:[#allocation69_spill] sm:$0xff]  ;;  %v4350_v14 = vpop.f32.mrb[21].mxu0 }
 0x3f6   : > { %v13134_v6 = vmul.f32 0.0, %v4561_v32  ;;  %v4562_v9 = vmax.f32 %v4522_v49, 0.0  ;;  %v4078_v42 = vadd.f32 %v4077_v19, %v12828_v47  ;;  %v4079_v63 = vpop.f32.mrb[181].mxu1  ;;  %v9123_v58 = vpack.i.bf16 %v5003_v27, %v4925_v18  ;;  %v4351_v32 = vpop.f32.mrb[22].mxu0  ;;  %v9404_v19 = vld [vmem:[%s14892_s7 + $0x60] sm:$0xff]  }
 0x3f7   : > { %v4080_v3 = vpop.f32.mrb[182].mxu1  ;;  %v13140_v29 = vsel %vm1451_vm2, %v15797_v44, %v4811_v31  ;;  %v13143_v0 = vsel %vm1451_vm2, %v4811_v31, %v4753_v17  ;;  %v4353_v49 = vpop.f32.mrb[23].mxu0  ;;  %8242 = vmatprep.subr.bf16.mxu0 %v9404_v19 }
 0x3f8   : > { %15798 = vst [vmem:[#allocation147_spill] sm:$0xff] %v13143_v0  ;;  %v13146_v30 = vmul.f32 %v15799_v22, %v4562_v9  ;;  %v4477_v25 = vadd.f32 %v4348_v38, %v4078_v42  ;;  %v4082_v47 = vpop.f32.mrb[183].mxu1  ;;  %v4926_v15 = vrot.slane %v13134_v6, 1  ;;  %v4081_v5 = vadd.f32 %v4080_v3, %v12830_v10  ;;  %v9405_v10 = vld [vmem:[%s14892_s7 + $0x20] sm:$0xff]  }
 0x3f9   : > { %9124 = vrot.lane.b32.xlu1 %v9123_v58, %s15796_s26  ;;  %v4814_v27 = vrot.slane %v13134_v6, 7  ;;  %8243 = vmatpush3.bf16.msra.mxu0 %v9405_v10 }
 0x3fa   : > { %v4815_v53 = vrot.slane %v13146_v30, 7  ;;  %v4523_v60 = vadd.f32 %v13016_v46, %v4477_v25  ;;  %v9128_v31 = vpack.i.bf16 %v13146_v30, %v13134_v6  ;;  %v4927_v17 = vrot.slane %v13146_v30, 1 }
 0x3fb   : > { %v4478_v18 = vadd.f32 %v4351_v32, %v4081_v5  ;;  %v4356_v6 = vpop.f32.mrb[24].mxu0 }
 0x3fc   : > { %v4563_v9 = vmax.f32 %v4523_v60, 0.0  ;;  %9129 = vrot.lane.b32.xlu0 %v9128_v31, %s9570_s0  ;;  %v4928_v42 = vsel %vm1548_vm3, %v4926_v15, %v4927_v17  ;;  %v13169_v30 = vsel %vm1451_vm2, %v4814_v27, %v4815_v53  ;;  %v4358_v5 = vpop.f32.mrb[25].mxu0 }
 0x3fd   : > { %v4524_v63 = vadd.f32 %v13016_v46, %v4478_v18  ;;  %v4085_v58 = vpop.f32.mrb[184].mxu1  ;;  %15800 = vst [vmem:[#allocation111_spill] sm:$0xff] %v13169_v30  ;;  %v4359_v19 = vpop.f32.mrb[26].mxu0 }
 0x3fe   : > { %v4603_v38 = vmul.f32 %v15799_v22, %v4563_v9  ;;  %v4086_v3 = vadd.f32 %v4085_v58, %v12838_v41  ;;  %v4087_v44 = vpop.f32.mrb[185].mxu1  ;;  %v4361_v41 = vpop.f32.mrb[27].mxu0 }
 0x3ff   : > { %v4564_v25 = vmax.f32 %v4524_v63, 0.0  ;;  %v4088_v14 = vpop.f32.mrb[186].mxu1 }
 0x400   : > { %v4479_v47 = vadd.f32 %v4356_v6, %v4086_v3  ;;  %v4089_v32 = vadd.f32 %v4088_v14, %v12843_v36  ;;  %v4090_v60 = vpop.f32.mrb[187].mxu1  ;;  %v4929_v49 = vrot.slane %v4603_v38, 1  ;;  %v4817_v10 = vrot.slane %v4603_v38, 7 }
 0x401   : > { %v4604_v31 = vmul.f32 0.0, %v4564_v25 }
 0x402   : > { %v4525_v22 = vadd.f32 %v13016_v46, %v4479_v47  ;;  %v4480_v18 = vadd.f32 %v4359_v19, %v4089_v32  ;;  %v4930_v9 = vsel %vm1548_vm3, %v4927_v17, %v4929_v49 }
 0x403   : > { %v4754_v58 = vrot.slane %v4604_v31, 7  ;;  %v4931_v44 = vrot.slane %v4604_v31, 1  ;;  %v9138_v63 = vpack.i.bf16 %v4604_v31, %v4603_v38  ;;  %v9133_v30 = vpack.i.bf16 %v4930_v9, %v4928_v42  ;;  %v4364_v32 = vpop.f32.mrb[28].mxu0 }
 0x404   : > { %v4565_v0 = vmax.f32 %v4525_v22, 0.0  ;;  %v4526_v3 = vadd.f32 %v13016_v46, %v4480_v18  ;;  %v13186_v31 = vsel %vm1451_vm2, %v4815_v53, %v4817_v10 }
 0x405   : > { %9139 = vrot.lane.b32.xlu0 %v9138_v63, %s9570_s0  ;;  %v4093_v36 = vpop.f32.mrb[188].mxu1  ;;  %9134 = vrot.lane.b32.xlu1 %v9133_v30, %s15796_s26  ;;  %v4932_v25 = vsel %vm1548_vm3, %v4929_v49, %v4931_v44  ;;  %v5004_v6 = vsel %vm1548_vm3, %v4931_v44, %v4926_v15  ;;  %v13180_v14 = vsel %vm1451_vm2, %v4754_v58, %v4814_v27  ;;  %v15801_v49 = vld [vmem:[#allocation71_spill] sm:$0xff]  ;;  %v4366_v27 = vpop.f32.mrb[29].mxu0 }
 0x406   : > { %v13182_v17 = vmul.f32 0.0, %v4565_v0  ;;  %v4566_v47 = vmax.f32 %v4526_v3, 0.0  ;;  %v4094_v42 = vadd.f32 %v4093_v36, %v12854_v16  ;;  %v4095_v38 = vpop.f32.mrb[189].mxu1  ;;  %v9143_v5 = vpack.i.bf16 %v5004_v6, %v4932_v25  ;;  %v4367_v41 = vpop.f32.mrb[30].mxu0 }
 0x407   : > { %v4096_v60 = vpop.f32.mrb[190].mxu1  ;;  %v13189_v30 = vsel %vm1451_vm2, %v4817_v10, %v4754_v58  ;;  %v4369_v44 = vpop.f32.mrb[31].mxu0 }
 0x408   : > { %v4606_v15 = vmul.f32 %v15801_v49, %v4566_v47  ;;  %v4481_v19 = vadd.f32 %v4364_v32, %v4094_v42  ;;  %v4098_v22 = vpop.f32.mrb[191].mxu1  ;;  %v4820_v0 = vrot.slane %v13182_v17, 7  ;;  %v4933_v18 = vrot.slane %v13182_v17, 1 }
 0x409   : > { %v4097_v16 = vadd.f32 %v4096_v60, %v12856_v52  ;;  %9144 = vrot.lane.b32.xlu1 %v9143_v5, %s15796_s26 }
 0x40a   : > { %v4821_v9 = vrot.slane %v4606_v15, 7  ;;  %v4527_v53 = vadd.f32 %v13016_v46, %v4481_v19  ;;  %v9148_v10 = vpack.i.bf16 %v4606_v15, %v13182_v17  ;;  %v4934_v58 = vrot.slane %v4606_v15, 1  ;;  %v9406_v17 = vld [vmem:[%s14892_s7 + $0x68] sm:$0xff]  }
 0x40b   : > { %v4482_v63 = vadd.f32 %v4367_v41, %v4097_v16  ;;  %v4372_v32 = vpop.f32.mrb[32].mxu0  ;;  %8244 = vmatprep.subr.bf16.mxu0 %v9406_v17 }
 0x40c   : > { %v4567_v3 = vmax.f32 %v4527_v53, 0.0  ;;  %9149 = vrot.lane.b32.xlu0 %v9148_v10, %s9570_s0  ;;  %v4935_v36 = vsel %vm1548_vm3, %v4933_v18, %v4934_v58  ;;  %v13201_v25 = vsel %vm1451_vm2, %v4820_v0, %v4821_v9  ;;  %v4374_v27 = vpop.f32.mrb[33].mxu0 }
 0x40d   : > { %v4528_v52 = vadd.f32 %v13016_v46, %v4482_v63  ;;  %v4101_v6 = vpop.f32.mrb[192].mxu1 }
 0x40e   : > { %v4607_v47 = vmul.f32 %v15801_v49, %v4567_v3  ;;  %v4102_v42 = vadd.f32 %v4101_v6, %v12864_v48  ;;  %v4103_v38 = vpop.f32.mrb[193].mxu1  ;;  %v4375_v49 = vpop.f32.mrb[34].mxu0  ;;  %v9407_v48 = vld [vmem:[%s14892_s7 + $0x28] sm:$0xff]  }
 0x40f   : > { %v4568_v5 = vmax.f32 %v4528_v52, 0.0  ;;  %v4104_v60 = vpop.f32.mrb[194].mxu1  ;;  %v4377_v63 = vpop.f32.mrb[35].mxu0  ;;  %8245 = vmatpush3.bf16.msra.mxu0 %v9407_v48  ;;  %v15802_v48 = vld [vmem:[#allocation72_spill] sm:$0xff] }
 0x410   : > { %v4823_v15 = vrot.slane %v4607_v47, 7  ;;  %v4483_v19 = vadd.f32 %v4372_v32, %v4102_v42  ;;  %v4105_v22 = vadd.f32 %v4104_v60, %v12869_v40  ;;  %v4106_v16 = vpop.f32.mrb[195].mxu1  ;;  %v4936_v41 = vrot.slane %v4607_v47, 1 }
 0x411   : > { %v4608_v53 = vmul.f32 0.0, %v4568_v5 }
 0x412   : > { %v4529_v44 = vadd.f32 %v13016_v46, %v4483_v19  ;;  %v4484_v10 = vadd.f32 %v4375_v49, %v4105_v22  ;;  %v4937_v3 = vsel %vm1548_vm3, %v4934_v58, %v4936_v41  ;;  %v13216_v52 = vsel %vm1451_vm2, %v4821_v9, %v4823_v15 }
 0x413   : > { %v4755_v6 = vrot.slane %v4608_v53, 7  ;;  %v4938_v40 = vrot.slane %v4608_v53, 1  ;;  %v9158_v42 = vpack.i.bf16 %v4608_v53, %v4607_v47  ;;  %v9153_v38 = vpack.i.bf16 %v4937_v3, %v4935_v36  ;;  %v4380_v16 = vpop.f32.mrb[36].mxu0 }
 0x414   : > { %v4569_v17 = vmax.f32 %v4529_v44, 0.0  ;;  %v4530_v5 = vadd.f32 %v13016_v46, %v4484_v10  ;;  %v4382_v10 = vpop.f32.mrb[37].mxu0 }
 0x415   : > { %9159 = vrot.lane.b32.xlu0 %v9158_v42, %s9570_s0  ;;  %v4109_v32 = vpop.f32.mrb[196].mxu1  ;;  %9154 = vrot.lane.b32.xlu1 %v9153_v38, %s15796_s26  ;;  %v4939_v60 = vsel %vm1548_vm3, %v4936_v41, %v4938_v40  ;;  %v5005_v58 = vsel %vm1548_vm3, %v4938_v40, %v4933_v18  ;;  %v13224_v9 = vsel %vm1451_vm2, %v4755_v6, %v4820_v0  ;;  %v4383_v40 = vpop.f32.mrb[38].mxu0 }
 0x416   : > { %v13226_v19 = vmul.f32 0.0, %v4569_v17  ;;  %v4570_v47 = vmax.f32 %v4530_v5, 0.0  ;;  %v4110_v36 = vadd.f32 %v4109_v32, %v12880_v24  ;;  %v4111_v27 = vpop.f32.mrb[197].mxu1  ;;  %v9163_v22 = vpack.i.bf16 %v5005_v58, %v4939_v60  ;;  %v4385_v38 = vpop.f32.mrb[39].mxu0 }
 0x417   : > { %v4112_v53 = vpop.f32.mrb[198].mxu1  ;;  %v13230_v49 = vsel %vm1451_vm2, %v4823_v15, %v4755_v6 }
 0x418   : > { %v4610_v44 = vmul.f32 %v15802_v48, %v4570_v47  ;;  %v4485_v41 = vadd.f32 %v4380_v16, %v4110_v36  ;;  %v4114_v18 = vpop.f32.mrb[199].mxu1  ;;  %v4826_v0 = vrot.slane %v13226_v19, 7  ;;  %v4940_v63 = vrot.slane %v13226_v19, 1 }
 0x419   : > { %v4113_v3 = vadd.f32 %v4112_v53, %v12882_v37  ;;  %9164 = vrot.lane.b32.xlu1 %v9163_v22, %s15796_s26 }
 0x41a   : > { %v4827_v24 = vrot.slane %v4610_v44, 7  ;;  %v4531_v42 = vadd.f32 %v13016_v46, %v4485_v41  ;;  %v9168_v15 = vpack.i.bf16 %v4610_v44, %v13226_v19  ;;  %v4941_v6 = vrot.slane %v4610_v44, 1 }
 0x41b   : > { %v4486_v17 = vadd.f32 %v4383_v40, %v4113_v3  ;;  %v4803_v19 = vrot.slane %v13025_v35, 7  ;;  %v4388_v16 = vpop.f32.mrb[40].mxu0 }
 0x41c   : > { %v4571_v5 = vmax.f32 %v4531_v42, 0.0  ;;  %9169 = vrot.lane.b32.xlu0 %v9168_v15, %s9570_s0  ;;  %v4942_v32 = vsel %vm1548_vm3, %v4940_v63, %v4941_v6  ;;  %v13242_v60 = vsel %vm1451_vm2, %v4826_v0, %v4827_v24  ;;  %v4390_v10 = vpop.f32.mrb[41].mxu0  ;;  %v4802_v42 = vrot.slane %v13021_v54, 7 }
 0x41d   : > { %v4532_v37 = vadd.f32 %v13016_v46, %v4486_v17  ;;  %v4117_v58 = vpop.f32.mrb[200].mxu1  ;;  %v4391_v15 = vpop.f32.mrb[42].mxu0 }
 0x41e   : > { %v4611_v47 = vmul.f32 %v15802_v48, %v4571_v5  ;;  %v4118_v36 = vadd.f32 %v4117_v58, %v12890_v26  ;;  %v4119_v27 = vpop.f32.mrb[201].mxu1  ;;  %v4393_v17 = vpop.f32.mrb[43].mxu0  ;;  %v9408_v58 = vld [vmem:[%s14892_s7 + $0x70] sm:$0xff]  }
 0x41f   : > { %v4572_v22 = vmax.f32 %v4532_v37, 0.0  ;;  %v4120_v53 = vpop.f32.mrb[202].mxu1  ;;  %8246 = vmatprep.subr.bf16.mxu0 %v9408_v58 }
 0x420   : > { %v4829_v44 = vrot.slane %v4611_v47, 7  ;;  %v4487_v41 = vadd.f32 %v4388_v16, %v4118_v36  ;;  %v4121_v18 = vadd.f32 %v4120_v53, %v12895_v62  ;;  %v4122_v3 = vpop.f32.mrb[203].mxu1  ;;  %v4943_v40 = vrot.slane %v4611_v47, 1  ;;  %v9409_v62 = vld [vmem:[%s14892_s7 + $0x30] sm:$0xff]  }
 0x421   : > { %v4612_v38 = vmul.f32 0.0, %v4572_v22  ;;  %8247 = vmatpush3.bf16.msra.mxu0 %v9409_v62 }
 0x422   : > { %v4533_v48 = vadd.f32 %v13016_v46, %v4487_v41  ;;  %v4488_v26 = vadd.f32 %v4391_v15, %v4121_v18  ;;  %v4944_v5 = vsel %vm1548_vm3, %v4941_v6, %v4943_v40  ;;  %v13253_v37 = vsel %vm1451_vm2, %v4827_v24, %v4829_v44 }
 0x423   : > { %v4756_v36 = vrot.slane %v4612_v38, 7  ;;  %v4945_v27 = vrot.slane %v4612_v38, 1  ;;  %v9178_v22 = vpack.i.bf16 %v4612_v38, %v4611_v47  ;;  %v9173_v16 = vpack.i.bf16 %v4944_v5, %v4942_v32  ;;  %v4396_v17 = vpop.f32.mrb[44].mxu0 }
 0x424   : > { %v4573_v53 = vmax.f32 %v4533_v48, 0.0  ;;  %v4534_v41 = vadd.f32 %v13016_v46, %v4488_v26  ;;  %v13263_v6 = vsel %vm1451_vm2, %v4802_v42, %v4803_v19  ;;  %v4805_v26 = vrot.slane %v13044_v45, 7 }
 0x425   : > { %15803 = vst [vmem:[#allocation113_spill] sm:$0xff] %v13263_v6  ;;  %9179 = vrot.lane.b32.xlu0 %v9178_v22, %s9570_s0  ;;  %v4125_v24 = vpop.f32.mrb[204].mxu1  ;;  %9174 = vrot.lane.b32.xlu1 %v9173_v16, %s15796_s26  ;;  %v4946_v10 = vsel %vm1548_vm3, %v4943_v40, %v4945_v27  ;;  %v5006_v18 = vsel %vm1548_vm3, %v4945_v27, %v4940_v63  ;;  %v4752_v63 = vrot.slane %v13049_v57, 7  ;;  %v15804_v40 = vld [vmem:[#allocation73_spill] sm:$0xff]  ;;  %v4398_v22 = vpop.f32.mrb[45].mxu0 }
 0x426   : > { %v13270_v3 = vsel %vm1451_vm2, %v4756_v36, %v4826_v0  ;;  %v13272_v32 = vmul.f32 0.0, %v4573_v53  ;;  %v4574_v47 = vmax.f32 %v4534_v41, 0.0  ;;  %v4126_v38 = vadd.f32 %v4125_v24, %v12908_v55  ;;  %v4127_v15 = vpop.f32.mrb[205].mxu1  ;;  %v4399_v41 = vpop.f32.mrb[46].mxu0 }
 0x427   : > { %v9183_v48 = vpack.i.bf16 %v5006_v18, %v4946_v10  ;;  %v4128_v5 = vpop.f32.mrb[206].mxu1  ;;  %v13277_v58 = vsel %vm1451_vm2, %v4829_v44, %v4756_v36  ;;  %v4401_v36 = vpop.f32.mrb[47].mxu0  ;;  %v13293_v15 = vsel %vm1451_vm2, %v4803_v19, %v4805_v26 }
 0x428   : > { %v4614_v0 = vmul.f32 %v15804_v40, %v4574_v47  ;;  %v4489_v27 = vadd.f32 %v4396_v17, %v4126_v38  ;;  %v4130_v16 = vpop.f32.mrb[207].mxu1  ;;  %v4832_v53 = vrot.slane %v13272_v32, 7  ;;  %v4947_v55 = vrot.slane %v13272_v32, 1  ;;  %v13290_v38 = vld [vmem:[%s14892_s7 + $0x110] sm:$0xff]   ;;  %15805 = vst [vmem:[#allocation78_spill] sm:$0xff] %v13293_v15 }
 0x429   : > { %v4129_v62 = vadd.f32 %v4128_v5, %v12910_v39  ;;  %9184 = vrot.lane.b32.xlu1 %v9183_v48, %s15796_s26  ;;  %8511 = vmatprep.subr.bf16.mxu1 %v13290_v38 }
 0x42a   : > { %v4833_v24 = vrot.slane %v4614_v0, 7  ;;  %v4535_v44 = vadd.f32 %v13016_v46, %v4489_v27  ;;  %v9188_v10 = vpack.i.bf16 %v4614_v0, %v13272_v32  ;;  %v4948_v18 = vrot.slane %v4614_v0, 1 }
 0x42b   : > { %v4490_v47 = vadd.f32 %v4399_v41, %v4129_v62  ;;  %v13301_v32 = vsel %vm1451_vm2, %v4752_v63, %v4802_v42  ;;  %v13306_v27 = vsel %vm1451_vm2, %v4805_v26, %v4752_v63  ;;  %v4404_v41 = vpop.f32.mrb[48].mxu0 }
 0x42c   : > { %v4575_v39 = vmax.f32 %v4535_v44, 0.0  ;;  %9189 = vrot.lane.b32.xlu0 %v9188_v10, %s9570_s0  ;;  %v4949_v48 = vsel %vm1548_vm3, %v4947_v55, %v4948_v18  ;;  %v13298_v17 = vsel %vm1451_vm2, %v4832_v53, %v4833_v24  ;;  %15807 = vst [vmem:[#allocation101_spill] sm:$0xff] %v13301_v32  ;;  %15808 = vst [vmem:[#allocation106_spill] sm:$0xff] %v13306_v27  ;;  %v4406_v42 = vpop.f32.mrb[49].mxu0 }
 0x42d   : > { %15806 = vst [vmem:[#allocation79_spill] sm:$0xff] %v13298_v17  ;;  %v4536_v5 = vadd.f32 %v13016_v46, %v4490_v47  ;;  %v4133_v0 = vpop.f32.mrb[208].mxu1  ;;  %v4407_v17 = vpop.f32.mrb[50].mxu0 }
 0x42e   : > { %v4615_v19 = vmul.f32 %v15804_v40, %v4575_v39  ;;  %v4134_v22 = vadd.f32 %v4133_v0, %v12922_v43  ;;  %v4135_v16 = vpop.f32.mrb[209].mxu1  ;;  %v4409_v27 = vpop.f32.mrb[51].mxu0  ;;  %v9411_v39 = vld [vmem:[%s14892_s7 + $0x78] sm:$0xff]  }
 0x42f   : > { %v4576_v62 = vmax.f32 %v4536_v5, 0.0  ;;  %v4136_v44 = vpop.f32.mrb[210].mxu1  ;;  %8248 = vmatprep.subr.bf16.mxu0 %v9411_v39 }
 0x430   : > { %v4835_v36 = vrot.slane %v4615_v19, 7  ;;  %v4491_v10 = vadd.f32 %v4404_v41, %v4134_v22  ;;  %v4137_v15 = vadd.f32 %v4136_v44, %v12927_v13  ;;  %v4138_v47 = vpop.f32.mrb[211].mxu1  ;;  %v4950_v32 = vrot.slane %v4615_v19, 1 }
 0x431   : > { %v4616_v6 = vmul.f32 0.0, %v4576_v62  ;;  %v15809_v47 = vld [vmem:[#allocation118_spill] sm:$0xff] }
 0x432   : > { %v4537_v26 = vadd.f32 %v13016_v46, %v4491_v10  ;;  %v4492_v63 = vadd.f32 %v4407_v17, %v4137_v15  ;;  %v4951_v40 = vsel %vm1548_vm3, %v4948_v18, %v4950_v32  ;;  %v13314_v43 = vsel %vm1451_vm2, %v4833_v24, %v4835_v36 }
 0x433   : > { %v4757_v5 = vrot.slane %v4616_v6, 7  ;;  %v4952_v0 = vrot.slane %v4616_v6, 1  ;;  %v9198_v13 = vpack.i.bf16 %v4616_v6, %v4615_v19  ;;  %v9193_v22 = vpack.i.bf16 %v4951_v40, %v4949_v48  ;;  %v4412_v44 = vpop.f32.mrb[52].mxu0 }
 0x434   : > { %v4577_v16 = vmax.f32 %v4537_v26, 0.0  ;;  %v4538_v62 = vadd.f32 %v13016_v46, %v4492_v63  ;;  %v4414_v63 = vpop.f32.mrb[53].mxu0 }
 0x435   : > { %9199 = vrot.lane.b32.xlu0 %v9198_v13, %s9570_s0  ;;  %v4141_v15 = vpop.f32.mrb[212].mxu1  ;;  %9194 = vrot.lane.b32.xlu1 %v9193_v22, %s15796_s26  ;;  %v4953_v24 = vsel %vm1548_vm3, %v4950_v32, %v4952_v0  ;;  %v5007_v18 = vsel %vm1548_vm3, %v4952_v0, %v4947_v55  ;;  %v13325_v17 = vsel %vm1451_vm2, %v4757_v5, %v4832_v53  ;;  %v4415_v0 = vpop.f32.mrb[54].mxu0 }
 0x436   : > { %v13327_v27 = vmul.f32 0.0, %v4577_v16  ;;  %v4578_v6 = vmax.f32 %v4538_v62, 0.0  ;;  %v4142_v48 = vadd.f32 %v4141_v15, %v12942_v21  ;;  %v4143_v19 = vpop.f32.mrb[213].mxu1  ;;  %v9203_v41 = vpack.i.bf16 %v5007_v18, %v4953_v24  ;;  %v9412_v21 = vld [vmem:[%s14892_s7 + $0x38] sm:$0xff]   ;;  %v4417_v13 = vpop.f32.mrb[55].mxu0 }
 0x437   : > { %v4144_v10 = vpop.f32.mrb[214].mxu1  ;;  %v13331_v42 = vsel %vm1451_vm2, %v4835_v36, %v4757_v5  ;;  %8249 = vmatpush3.bf16.msra.mxu0 %v9412_v21 }
 0x438   : > { %v4618_v26 = vmul.f32 %v15809_v47, %v4578_v6  ;;  %v4493_v32 = vadd.f32 %v4412_v44, %v4142_v48  ;;  %v4146_v55 = vpop.f32.mrb[215].mxu1  ;;  %v4838_v53 = vrot.slane %v13327_v27, 7  ;;  %v4954_v40 = vrot.slane %v13327_v27, 1 }
 0x439   : > { %v4145_v39 = vadd.f32 %v4144_v10, %v12944_v56  ;;  %9204 = vrot.lane.b32.xlu1 %v9203_v41, %s15796_s26 }
 0x43a   : > { %v4839_v36 = vrot.slane %v4618_v26, 7  ;;  %v4539_v5 = vadd.f32 %v13016_v46, %v4493_v32  ;;  %v9208_v22 = vpack.i.bf16 %v4618_v26, %v13327_v27  ;;  %v4955_v16 = vrot.slane %v4618_v26, 1 }
 0x43b   : > { %v4494_v62 = vadd.f32 %v4415_v0, %v4145_v39  ;;  %v4420_v44 = vpop.f32.mrb[56].mxu0 }
 0x43c   : > { %v4579_v15 = vmax.f32 %v4539_v5, 0.0  ;;  %9209 = vrot.lane.b32.xlu0 %v9208_v22, %s9570_s0  ;;  %v4956_v56 = vsel %vm1548_vm3, %v4954_v40, %v4955_v16  ;;  %v13346_v24 = vsel %vm1451_vm2, %v4838_v53, %v4839_v36  ;;  %v4422_v63 = vpop.f32.mrb[57].mxu0 }
 0x43d   : > { %v4540_v18 = vadd.f32 %v13016_v46, %v4494_v62  ;;  %v4149_v6 = vpop.f32.mrb[216].mxu1  ;;  %v4423_v5 = vpop.f32.mrb[58].mxu0 }
 0x43e   : > { %v4619_v48 = vmul.f32 %v15809_v47, %v4579_v15  ;;  %v4150_v19 = vadd.f32 %v4149_v6, %v12946_v2  ;;  %v4151_v41 = vpop.f32.mrb[217].mxu1  ;;  %v4425_v62 = vpop.f32.mrb[59].mxu0 }
 0x43f   : > { %v4580_v27 = vmax.f32 %v4540_v18, 0.0  ;;  %v4152_v10 = vpop.f32.mrb[218].mxu1 }
 0x440   : > { %v4841_v26 = vrot.slane %v4619_v48, 7  ;;  %v4495_v32 = vadd.f32 %v4420_v44, %v4150_v19  ;;  %v4153_v55 = vadd.f32 %v4152_v10, %v12951_v59  ;;  %v4154_v39 = vpop.f32.mrb[219].mxu1  ;;  %v4957_v0 = vrot.slane %v4619_v48, 1 }
 0x441   : > { %v4620_v21 = vmul.f32 0.0, %v4580_v27 }
 0x442   : > { %v4541_v13 = vadd.f32 %v13016_v46, %v4495_v32  ;;  %v4496_v22 = vadd.f32 %v4423_v5, %v4153_v55  ;;  %v4958_v47 = vsel %vm1548_vm3, %v4955_v16, %v4957_v0  ;;  %v13355_v2 = vsel %vm1451_vm2, %v4839_v36, %v4841_v26  ;;  %v15810_v5 = vld [vmem:[#allocation119_spill] sm:$0xff] }
 0x443   : > { %v4758_v15 = vrot.slane %v4620_v21, 7  ;;  %v4959_v18 = vrot.slane %v4620_v21, 1  ;;  %v9218_v6 = vpack.i.bf16 %v4620_v21, %v4619_v48  ;;  %v9213_v19 = vpack.i.bf16 %v4958_v47, %v4956_v56  ;;  %v4428_v55 = vpop.f32.mrb[60].mxu0 }
 0x444   : > { %v4581_v41 = vmax.f32 %v4541_v13, 0.0  ;;  %v4542_v59 = vadd.f32 %v13016_v46, %v4496_v22  ;;  %v4430_v22 = vpop.f32.mrb[61].mxu0 }
 0x445   : > { %9219 = vrot.lane.b32.xlu0 %v9218_v6, %s9570_s0  ;;  %v4157_v27 = vpop.f32.mrb[220].mxu1  ;;  %9214 = vrot.lane.b32.xlu1 %v9213_v19, %s15796_s26  ;;  %v4960_v44 = vsel %vm1548_vm3, %v4957_v0, %v4959_v18  ;;  %v5008_v10 = vsel %vm1548_vm3, %v4959_v18, %v4954_v40  ;;  %v13363_v16 = vsel %vm1451_vm2, %v4758_v15, %v4838_v53  ;;  %v4431_v18 = vpop.f32.mrb[62].mxu0 }
 0x446   : > { %v13365_v36 = vmul.f32 0.0, %v4581_v41  ;;  %v4582_v32 = vmax.f32 %v4542_v59, 0.0  ;;  %v4158_v56 = vadd.f32 %v4157_v27, %v12959_v12  ;;  %v4159_v48 = vpop.f32.mrb[221].mxu1  ;;  %v9228_v63 = vpack.i.bf16 %v5008_v10, %v4960_v44  ;;  %v4433_v19 = vpop.f32.mrb[63].mxu0 }
 0x447   : > { %v4160_v39 = vpop.f32.mrb[222].mxu1  ;;  %v13369_v21 = vsel %vm1451_vm2, %v4841_v26, %v4758_v15  ;;  %v15811_v12 = vpack.i.bf16 %v13025_v35, %v13021_v54 }
 0x448   : > { %v4622_v13 = vmul.f32 %v15810_v5, %v4582_v32  ;;  %v4497_v0 = vadd.f32 %v4428_v55, %v4158_v56  ;;  %v4162_v40 = vpop.f32.mrb[223].mxu1  ;;  %v4844_v53 = vrot.slane %v13365_v36, 7  ;;  %v4961_v62 = vrot.slane %v13365_v36, 1 }
 0x449   : > { %v4161_v47 = vadd.f32 %v4160_v39, %v12964_v61  ;;  %9224 = vrot.lane.b32.xlu0 %v15811_v12, %s9570_s0  ;;  %9229 = vrot.lane.b32.xlu1 %v9228_v63, %s15796_s26  ;;  %v13385_v61 = vld [vmem:[%s14892_s7 + $0x1a0] sm:$0xff]  }
 0x44a   : > { %v4845_v26 = vrot.slane %v4622_v13, 7  ;;  %v4962_v15 = vrot.slane %v4622_v13, 1  ;;  %v4543_v6 = vadd.f32 %v13016_v46, %v4497_v0  ;;  %v9238_v41 = vpack.i.bf16 %v4622_v13, %v13365_v36  ;;  %8583 = vmatprep.subr.bf16.mxu0 %v13385_v61 }
 0x44b   : > { %v4498_v59 = vadd.f32 %v4431_v18, %v4161_v47  ;;  %v15812_v36 = vpack.i.bf16 %v13053_v23, %v13040_v7  ;;  %v4436_v55 = vpop.f32.mrb[64].mxu0  ;;  %v15813_v23 = vpack.i.bf16 %v13049_v57, %v13044_v45 }
 0x44c   : > { %v4583_v27 = vmax.f32 %v4543_v6, 0.0  ;;  %v4963_v44 = vsel %vm1548_vm3, %v4961_v62, %v4962_v15  ;;  %v13389_v54 = vsel %vm1451_vm2, %v4844_v53, %v4845_v26  ;;  %v4438_v22 = vpop.f32.mrb[65].mxu0 }
 0x44d   : > { %v4544_v35 = vadd.f32 %v13016_v46, %v4498_v59  ;;  %9239 = vrot.lane.b32.xlu0 %v9238_v41, %s9570_s0  ;;  %v4165_v10 = vpop.f32.mrb[224].mxu1  ;;  %9234 = vrot.lane.b32.xlu1 %v15812_v36, %s15796_s26  ;;  %v4439_v7 = vpop.f32.mrb[66].mxu0  ;;  %v15814_v22 = vld [vmem:[#allocation157_spill] sm:$0xff] }
 0x44e   : > { %v4623_v32 = vmul.f32 %v15810_v5, %v4583_v27  ;;  %v4166_v56 = vadd.f32 %v4165_v10, %v12966_v20  ;;  %v4167_v48 = vpop.f32.mrb[225].mxu1  ;;  %v13408_v20 = vld [vmem:[%s14891_s6] ss:$0 sm:$0xff]  ;;  %v4441_v6 = vpop.f32.mrb[67].mxu0 }
 0x44f   : > { %v4584_v63 = vmax.f32 %v4544_v35, 0.0  ;;  %v4168_v39 = vpop.f32.mrb[226].mxu1 }
 0x450   : > { %v4847_v13 = vrot.slane %v4623_v32, 7  ;;  %v4964_v46 = vrot.slane %v4623_v32, 1  ;;  %v4499_v0 = vadd.f32 %v4436_v55, %v4166_v56  ;;  %v4169_v40 = vadd.f32 %v4168_v39, %v12971_v34  ;;  %v4170_v47 = vpop.f32.mrb[227].mxu1 }
 0x451   : > { %v4624_v18 = vmul.f32 0.0, %v4584_v63  ;;  %9244 = vrot.lane.b32.xlu0 %v15813_v23, %s9570_s0 }
 0x452   : > { %v4545_v5 = vadd.f32 %v13408_v20, %v4499_v0  ;;  %v4500_v12 = vadd.f32 %v4439_v7, %v4169_v40  ;;  %v4965_v19 = vsel %vm1548_vm3, %v4962_v15, %v4964_v46  ;;  %v13413_v34 = vsel %vm1451_vm2, %v4845_v26, %v4847_v13 }
 0x453   : > { %v4759_v41 = vrot.slane %v4624_v18, 7  ;;  %v4966_v59 = vrot.slane %v4624_v18, 1  ;;  %v9258_v27 = vpack.i.bf16 %v4624_v18, %v4623_v32  ;;  %v9248_v35 = vpack.i.bf16 %v4965_v19, %v4963_v44  ;;  %v4444_v55 = vpop.f32.mrb[68].mxu0 }
 0x454   : > { %v4585_v57 = vmax.f32 %v4545_v5, 0.0  ;;  %v4546_v45 = vadd.f32 %v13408_v20, %v4500_v12  ;;  %v4446_v47 = vpop.f32.mrb[69].mxu0 }
 0x455   : > { %9259 = vrot.lane.b32.xlu0 %v9258_v27, %s9570_s0  ;;  %v4173_v10 = vpop.f32.mrb[228].mxu1  ;;  %9249 = vrot.lane.b32.xlu1 %v9248_v35, %s15796_s26  ;;  %v4967_v36 = vsel %vm1548_vm3, %v4964_v46, %v4966_v59  ;;  %v5009_v56 = vsel %vm1548_vm3, %v4966_v59, %v4961_v62  ;;  %v13421_v15 = vsel %vm1451_vm2, %v4759_v41, %v4844_v53  ;;  %v4447_v23 = vpop.f32.mrb[70].mxu0 }
 0x456   : > { %v13423_v26 = vmul.f32 0.0, %v4585_v57  ;;  %v4586_v48 = vmax.f32 %v4546_v45, 0.0  ;;  %v4174_v44 = vadd.f32 %v4173_v10, %v12982_v51  ;;  %v4175_v32 = vpop.f32.mrb[229].mxu1  ;;  %v9263_v63 = vpack.i.bf16 %v5009_v56, %v4967_v36  ;;  %v4449_v6 = vpop.f32.mrb[71].mxu0 }
 0x457   : > { %v4176_v39 = vpop.f32.mrb[230].mxu1  ;;  %v13427_v0 = vsel %vm1451_vm2, %v4847_v13, %v4759_v41  ;;  %v15815_v51 = vpack.i.bf16 %v13071_v11, %v13068_v4 }
 0x458   : > { %v4626_v40 = vmul.f32 %v15814_v22, %v4586_v48  ;;  %v4501_v46 = vadd.f32 %v4444_v55, %v4174_v44  ;;  %v4178_v62 = vpop.f32.mrb[231].mxu1  ;;  %v4850_v53 = vrot.slane %v13423_v26, 7  ;;  %v4968_v18 = vrot.slane %v13423_v26, 1 }
 0x459   : > { %v4177_v7 = vadd.f32 %v4176_v39, %v12984_v1  ;;  %9254 = vrot.lane.b32.xlu1 %v15815_v51, %s15796_s26 }
 0x45a   : > { %v4851_v5 = vrot.slane %v4626_v40, 7  ;;  %v4969_v13 = vrot.slane %v4626_v40, 1  ;;  %v4547_v12 = vadd.f32 %v13408_v20, %v4501_v46  ;;  %v9268_v19 = vpack.i.bf16 %v4626_v40, %v13423_v26 }
 0x45b   : > { %v4502_v41 = vadd.f32 %v4447_v23, %v4177_v7  ;;  %v4452_v56 = vpop.f32.mrb[72].mxu0 }
 0x45c   : > { %v4587_v59 = vmax.f32 %v4547_v12, 0.0  ;;  %9269 = vrot.lane.b32.xlu0 %v9268_v19, %s9570_s0  ;;  %v4970_v27 = vsel %vm1548_vm3, %v4968_v18, %v4969_v13  ;;  %v13442_v1 = vsel %vm1451_vm2, %v4850_v53, %v4851_v5  ;;  %v4454_v40 = vpop.f32.mrb[73].mxu0 }
 0x45d   : > { %v4548_v35 = vadd.f32 %v13408_v20, %v4502_v41  ;;  %v4181_v4 = vpop.f32.mrb[232].mxu1  ;;  %9264 = vrot.lane.b32.xlu1 %v9263_v63, %s15796_s26  ;;  %v4455_v62 = vpop.f32.mrb[74].mxu0 }
 0x45e   : > { %v4627_v11 = vmul.f32 %v15814_v22, %v4587_v59  ;;  %v4182_v57 = vadd.f32 %v4181_v4, %v12992_v33  ;;  %v4183_v45 = vpop.f32.mrb[233].mxu1  ;;  %v13448_v10 = vpop.permute.xlu0 %9109 }
 0x45f   : > { %v4588_v36 = vmax.f32 %v4548_v35, 0.0  ;;  %v9112_v26 = vunpack.i.h.bf16 %v13448_v10  ;;  %v9111_v48 = vunpack.i.l.bf16 %v13448_v10  ;;  %v4184_v44 = vpop.f32.mrb[234].mxu1  ;;  %v4457_v12 = vpop.f32.mrb[75].mxu0 }
 0x460   : > { %v4853_v32 = vrot.slane %v4627_v11, 7  ;;  %v4971_v55 = vrot.slane %v4627_v11, 1  ;;  %v4503_v39 = vadd.f32 %v4452_v56, %v4182_v57  ;;  %v4185_v63 = vadd.f32 %v4184_v44, %v12994_v50  ;;  %v4186_v22 = vpop.f32.mrb[235].mxu1 }
 0x461   : > { %v4628_v46 = vmul.f32 0.0, %v4588_v36  ;;  %v5267_v33 = vsel %vm5262_vm5, %v13132_v8, %v9111_v48  ;;  %v5268_v47 = vsel %vm5262_vm5, %v13103_v28, %v9112_v26  ;;  %v15816_v36 = vld [vmem:[#allocation92_spill] sm:$0xff] }
 0x462   : > { %v4549_v7 = vadd.f32 %v13408_v20, %v4503_v39  ;;  %v13462_v23 = vpack.c.bf16 %v5268_v47, %v5267_v33  ;;  %v4504_v51 = vadd.f32 %v4455_v62, %v4185_v63  ;;  %v4972_v50 = vsel %vm1548_vm3, %v4969_v13, %v4971_v55 }
 0x463   : > { %v4760_v6 = vrot.slane %v4628_v46, 7  ;;  %v4973_v19 = vrot.slane %v4628_v46, 1  ;;  %v9278_v41 = vpack.i.bf16 %v4628_v46, %v4627_v11  ;;  %v9273_v59 = vpack.i.bf16 %v4972_v50, %v4970_v27  ;;  %v4460_v39 = vpop.f32.mrb[76].mxu0 }
 0x464   : > { %v4589_v35 = vmax.f32 %v4549_v7, 0.0  ;;  %v4550_v8 = vadd.f32 %v13408_v20, %v4504_v51  ;;  %v13467_v4 = vsel %vm1451_vm2, %v4851_v5, %v4853_v32  ;;  %v15818_v51 = vld [vmem:[#allocation135_spill] sm:$0xff] }
 0x465   : > { %9279 = vrot.lane.b32.xlu0 %v9278_v41, %s9570_s0  ;;  %v4189_v28 = vpop.f32.mrb[236].mxu1  ;;  %9274 = vrot.lane.b32.xlu1 %v9273_v59, %s15796_s26  ;;  %v4974_v57 = vsel %vm1548_vm3, %v4971_v55, %v4973_v19  ;;  %v5010_v45 = vsel %vm1548_vm3, %v4973_v19, %v4968_v18  ;;  %v13474_v13 = vsel %vm1451_vm2, %v4760_v6, %v4850_v53  ;;  %v15817_v55 = vld [vmem:[#allocation159_spill] sm:$0xff]  ;;  %v4462_v53 = vpop.f32.mrb[77].mxu0 }
 0x466   : > { %v13476_v11 = vmul.f32 0.0, %v4589_v35  ;;  %v4590_v27 = vmax.f32 %v4550_v8, 0.0  ;;  %v4190_v56 = vadd.f32 %v4189_v28, %v15816_v36  ;;  %v4191_v44 = vpop.f32.mrb[237].mxu1  ;;  %v9283_v5 = vpack.i.bf16 %v5010_v45, %v4974_v57  ;;  %v4463_v19 = vpop.f32.mrb[78].mxu0 }
 0x467   : > { %v9120_v40 = vpop.permute.xlu0 %9119  ;;  %v13480_v63 = vsel %vm1451_vm2, %v4853_v32, %v4760_v6  ;;  %v4192_v33 = vpop.f32.mrb[238].mxu1 }
 0x468   : > { %v4856_v22 = vrot.slane %v13476_v11, 7  ;;  %v13484_v46 = vmul.f32 %v15817_v55, %v4590_v27  ;;  %v4505_v18 = vadd.f32 %v4460_v39, %v4190_v56  ;;  %v4975_v47 = vrot.slane %v13476_v11, 1  ;;  %v9115_v50 = vpop.permute.xlu1 %9114  ;;  %v4194_v35 = vpop.f32.mrb[239].mxu1  ;;  %v15819_v27 = vld [vmem:[#allocation147_spill] sm:$0xff] }
 0x469   : > { %v9122_v62 = vunpack.i.h.bf16 %v9120_v40  ;;  %v9121_v7 = vunpack.i.l.bf16 %v9120_v40  ;;  %v4193_v12 = vadd.f32 %v4192_v33, %v15818_v51  ;;  %9284 = vrot.lane.b32.xlu1 %v9283_v5, %s15796_s26  ;;  %v9117_v59 = vunpack.i.h.bf16 %v9115_v50  ;;  %v4465_v8 = vpop.f32.mrb[79].mxu0 }
 0x46a   : > { %v4857_v32 = vrot.slane %v13484_v46, 7  ;;  %v4976_v6 = vrot.slane %v13484_v46, 1  ;;  %v4551_v41 = vadd.f32 %v13408_v20, %v4505_v18  ;;  %v9116_v28 = vunpack.i.l.bf16 %v9115_v50 }
 0x46b   : > { %v4506_v57 = vadd.f32 %v4463_v19, %v4193_v12  ;;  %v5269_v45 = vsel %vm5262_vm5, %v13140_v29, %v9121_v7  ;;  %v5270_v36 = vsel %vm5262_vm5, %v15819_v27, %v9122_v62  ;;  %v5308_v44 = vsel %vm1981_vm7, %v9112_v26, %v9117_v59  ;;  %v15820_v27 = vld [vmem:[#allocation111_spill] sm:$0xff] }
 0x46c   : > { %v4591_v56 = vmax.f32 %v4551_v41, 0.0  ;;  %v4977_v5 = vsel %vm1548_vm3, %v4975_v47, %v4976_v6  ;;  %v13500_v39 = vpack.c.bf16 %v5270_v36, %v5269_v45  ;;  %v13502_v40 = vpack.c.bf16 %v9117_v59, %v9116_v28  ;;  %v9125_v53 = vpop.permute.xlu1 %9124 }
 0x46d   : > { %v4552_v18 = vadd.f32 %v13408_v20, %v4506_v57  ;;  %v5307_v29 = vsel %vm1981_vm7, %v9111_v48, %v9116_v28  ;;  %v9298_v33 = vpack.i.bf16 %v13484_v46, %v13476_v11  ;;  %v9127_v26 = vunpack.i.h.bf16 %v9125_v53  ;;  %v9414_v20 = vld [vmem:[%s14892_s7 + $0x118] sm:$0xff]  }
 0x46e   : > { %v13511_v51 = vmul.f32 %v15817_v55, %v4591_v56  ;;  %v9126_v12 = vunpack.i.l.bf16 %v9125_v53  ;;  %v13513_v50 = vpack.c.bf16 %v5308_v44, %v5307_v29  ;;  %v9130_v19 = vpop.permute.xlu0 %9129  ;;  %v13521_v10 = vsel %vm1451_vm2, %v4856_v22, %v4857_v32 }
 0x46f   : > { %v4592_v41 = vmax.f32 %v4552_v18, 0.0  ;;  %v9132_v59 = vunpack.i.h.bf16 %v9130_v19  ;;  %v9131_v35 = vunpack.i.l.bf16 %v9130_v19  ;;  %v5310_v57 = vsel %vm1981_vm7, %v9122_v62, %v9127_v26 }
 0x470   : > { %v4859_v48 = vrot.slane %v13511_v51, 7  ;;  %v4978_v55 = vrot.slane %v13511_v51, 1  ;;  %v13525_v46 = vpack.c.bf16 %v9127_v26, %v9126_v12  ;;  %5592 = vmatprep.mubr.bf16.mxu1 %v13513_v50  ;;  %v5309_v8 = vsel %vm1981_vm7, %v9121_v7, %v9126_v12  ;;  %v15821_v12 = vld [vmem:[#allocation107_spill] sm:$0xff] }
 0x471   : > { %v4632_v28 = vmul.f32 0.0, %v4592_v41  ;;  %5593 = vmatmul.mubr.bf16.vlgmr.msra.gmra.mrb[240].mxu1 %v13462_v23  ;;  %v5271_v45 = vsel %vm5262_vm5, %v13180_v14, %v9131_v35  ;;  %v5272_v36 = vsel %vm5262_vm5, %v15820_v27, %v9132_v59  ;;  %v13535_v56 = vpack.c.bf16 %v5310_v57, %v5309_v8  ;;  %v13548_v14 = vld [vmem:[%s14889_s4] ss:$0 sm:$0xff] }
 0x472   : > { %v4979_v44 = vsel %vm1548_vm3, %v4976_v6, %v4978_v55  ;;  %v13538_v18 = vpack.c.bf16 %v5272_v36, %v5271_v45  ;;  %8512 = vmatpush3.bf16.msra.mxu1 %v13290_v38  ;;  %v13542_v7 = vsel %vm1451_vm2, %v4857_v32, %v4859_v48  ;;  %v2895_v19 = vadd.f32 %v13548_v14, %v15821_v12 }
 0x473   : > { %v4761_v53 = vrot.slane %v4632_v28, 7  ;;  %v4980_v29 = vrot.slane %v4632_v28, 1  ;;  %v9288_v62 = vpack.i.bf16 %v4979_v44, %v4977_v5  ;;  %v9303_v26 = vpack.i.bf16 %v4632_v28, %v13511_v51  ;;  %8513 = vmatprep.subr.bf16.mxu1 %v9414_v20  ;;  %5599 = vmatprep.mubr.bf16.mxu1 %v13535_v56 }
 0x475   : > { %9289 = vrot.lane.b32.xlu0 %v9288_v62, %s15796_s26  ;;  %v4981_v38 = vsel %vm1548_vm3, %v4978_v55, %v4980_v29  ;;  %v5011_v32 = vsel %vm1548_vm3, %v4980_v29, %v4975_v47  ;;  %v13557_v6 = vsel %vm1451_vm2, %v4761_v53, %v4856_v22  ;;  %v13560_v5 = vsel %vm1451_vm2, %v4859_v48, %v4761_v53  ;;  %v9435_v55 = vld [vmem:[%s14892_s7 + $0x40] sm:$0xff]   ;;  %v15822_v48 = vld [vmem:[#allocation105_spill] sm:$0xff] }
 0x476   : > { %v9293_v51 = vpack.i.bf16 %v5011_v32, %v4981_v38  ;;  %8514 = vmatpush3.bf16.msra.mxu1 %v9414_v20  ;;  %v2896_v57 = vadd.f32 %v13548_v14, %v15822_v48  ;;  %v15823_v20 = vld [vmem:[#allocation130_spill] sm:$0xff]  ;;  %v2911_v29 = vmax.f32 %v2895_v19, 0.0 }
 0x477   : > { %v9140_v41 = vpop.permute.xlu0 %9139  ;;  %v9135_v8 = vpop.permute.xlu1 %9134  ;;  %8653 = vmatprep.subr.bf16.mxu1 %v9435_v55  ;;  %v2897_v45 = vadd.f32 %v13548_v14, %v15823_v20 }
 0x478   : > { %v9142_v47 = vunpack.i.h.bf16 %v9140_v41  ;;  %v9141_v11 = vunpack.i.l.bf16 %v9140_v41  ;;  %v9137_v28 = vunpack.i.h.bf16 %v9135_v8  ;;  %v9136_v22 = vunpack.i.l.bf16 %v9135_v8  ;;  %9294 = vrot.lane.b32.xlu1 %v9293_v51, %s15796_s26 }
 0x479   : > { %5600 = vmatmul.mubr.bf16.gmra.mrb[244].mxu1 %v13500_v39  ;;  %9299 = vrot.lane.b32.xlu0 %v9298_v33, %s9570_s0  ;;  %v2912_v41 = vmax.f32 %v2896_v57, 0.0 }
 0x47a   : > { %v13574_v27 = vpack.c.bf16 %v9137_v28, %v9136_v22  ;;  %v5311_v36 = vsel %vm1981_vm7, %v9131_v35, %v9136_v22  ;;  %v5312_v44 = vsel %vm1981_vm7, %v9132_v59, %v9137_v28  ;;  %v5273_v53 = vsel %vm5262_vm5, %v13186_v31, %v9141_v11  ;;  %v15825_v31 = vld [vmem:[#allocation132_spill] sm:$0xff] }
 0x47b   : > { %v9145_v62 = vpop.permute.xlu1 %9144  ;;  %v13580_v38 = vpack.c.bf16 %v5312_v44, %v5311_v36  ;;  %v5274_v32 = vsel %vm5262_vm5, %v13189_v30, %v9142_v47  ;;  %v2913_v35 = vmax.f32 %v2897_v45, 0.0  ;;  %v2898_v59 = vadd.f32 %v13548_v14, %v15825_v31  ;;  %v15826_v28 = vld [vmem:[#allocation128_spill] sm:$0xff] }
 0x47c   : > { %v9147_v51 = vunpack.i.h.bf16 %v9145_v62  ;;  %v9146_v12 = vunpack.i.l.bf16 %v9145_v62  ;;  %9304 = vrot.lane.b32.xlu1 %v9303_v26, %s9570_s0  ;;  %v13585_v33 = vpack.c.bf16 %v5274_v32, %v5273_v53  ;;  %v2899_v26 = vadd.f32 %v13548_v14, %v15826_v28 }
 0x47d   : > { %5606 = vmatprep.mubr.bf16.mxu1 %v13580_v38  ;;  %7440 = vrot.lane.b32.xlu0 %v2911_v29, %s15796_s26  ;;  %v15830_v29 = vld [vmem:[#allocation142_spill] sm:$0xff] }
 0x47e   : > { %15824 = vst [vmem:[#allocation75_spill] sm:$0xff] %v13585_v33  ;;  %v13591_v19 = vpack.c.bf16 %v9147_v51, %v9146_v12  ;;  %v9150_v8 = vpop.permute.xlu0 %9149  ;;  %v5313_v30 = vsel %vm1981_vm7, %v9141_v11, %v9146_v12  ;;  %v5314_v55 = vsel %vm1981_vm7, %v9142_v47, %v9147_v51  ;;  %v2914_v47 = vmax.f32 %v2898_v59, 0.0  ;;  %v15828_v11 = vld [vmem:[#allocation127_spill] sm:$0xff]  ;;  %v15832_v12 = vld [vmem:[#allocation140_spill] sm:$0xff] }
 0x47f   : > { %v9152_v22 = vunpack.i.h.bf16 %v9150_v8  ;;  %v9151_v48 = vunpack.i.l.bf16 %v9150_v8  ;;  %v13597_v57 = vpack.c.bf16 %v5314_v55, %v5313_v30  ;;  %v2900_v36 = vadd.f32 %v13548_v14, %v15828_v11 }
 0x480   : > { %7442 = vrot.lane.b32.xlu1 %v2912_v41, %s15796_s26  ;;  %v2915_v53 = vmax.f32 %v2899_v26, 0.0  ;;  %v2901_v62 = vadd.f32 %v13548_v14, %v15830_v29  ;;  %v2903_v41 = vadd.f32 %v13548_v14, %v15832_v12  ;;  %v15833_v26 = vld [vmem:[#allocation139_spill] sm:$0xff] }
 0x481   : > { %15827 = vst [vmem:[#allocation64_spill] sm:$0xff] %v13597_v57  ;;  %5607 = vmatmul.mubr.bf16.gmra.mrb[248].mxu1 %v13538_v18  ;;  %v5275_v20 = vsel %vm5262_vm5, %v13224_v9, %v9151_v48  ;;  %v5276_v45 = vsel %vm5262_vm5, %v13201_v25, %v9152_v22  ;;  %7444 = vrot.lane.b32.xlu0 %v2913_v35, %s15796_s26  ;;  %v15831_v9 = vld [vmem:[#allocation144_spill] sm:$0xff]  ;;  %v2916_v25 = vmax.f32 %v2900_v36, 0.0 }
 0x482   : > { %v13608_v44 = vpack.c.bf16 %v5276_v45, %v5275_v20  ;;  %5613 = vmatprep.mubr.bf16.mxu1 %v13597_v57  ;;  %v2902_v32 = vadd.f32 %v13548_v14, %v15831_v9  ;;  %v2917_v51 = vmax.f32 %v2901_v62, 0.0  ;;  %v2904_v20 = vadd.f32 %v13548_v14, %v15833_v26  ;;  %v15834_v45 = vld [vmem:[#allocation158_spill] sm:$0xff] }
 0x483   : > { %v2919_v62 = vmax.f32 %v2903_v41, 0.0 }
 0x484   : > { %15829 = vst [vmem:[#allocation114_spill] sm:$0xff] %v13608_v44  ;;  %7446 = vrot.lane.b32.xlu1 %v2914_v47, %s15796_s26  ;;  %v2918_v28 = vmax.f32 %v2902_v32, 0.0  ;;  %v2905_v47 = vadd.f32 %v13548_v14, %v15834_v45 }
 0x485   : > { %7448 = vrot.lane.b32.xlu0 %v2915_v53, %s15796_s26 }
 0x487   : > { %v9160_v35 = vpop.permute.xlu0 %9159  ;;  %v9155_v31 = vpop.permute.xlu1 %9154 }
 0x488   : > { %v9162_v59 = vunpack.i.h.bf16 %v9160_v35  ;;  %v9161_v8 = vunpack.i.l.bf16 %v9160_v35  ;;  %v9157_v30 = vunpack.i.h.bf16 %v9155_v31  ;;  %v9156_v55 = vunpack.i.l.bf16 %v9155_v31  ;;  %7450 = vrot.lane.b32.xlu1 %v2916_v25, %s15796_s26 }
 0x489   : > { %5614 = vmatmul.mubr.bf16.gmra.mrb[252].mxu1 %v13585_v33  ;;  %7452 = vrot.lane.b32.xlu0 %v2917_v51, %s15796_s26  ;;  %v2921_v31 = vmax.f32 %v2905_v47, 0.0 }
 0x48a   : > { %v5277_v11 = vsel %vm5262_vm5, %v13216_v52, %v9161_v8  ;;  %v5278_v36 = vsel %vm5262_vm5, %v13230_v49, %v9162_v59  ;;  %v13630_v53 = vpack.c.bf16 %v9157_v30, %v9156_v55  ;;  %v5315_v29 = vsel %vm1981_vm7, %v9151_v48, %v9156_v55  ;;  %v15837_v49 = vld [vmem:[#allocation156_spill] sm:$0xff]  ;;  %v15838_v55 = vld [vmem:[#allocation167_spill] sm:$0xff] }
 0x48b   : > { %v13633_v9 = vpack.c.bf16 %v5278_v36, %v5277_v11  ;;  %v9165_v32 = vpop.permute.xlu1 %9164  ;;  %v5316_v25 = vsel %vm1981_vm7, %v9152_v22, %v9157_v30  ;;  %v2920_v52 = vmax.f32 %v2904_v20, 0.0  ;;  %v2906_v26 = vadd.f32 %v13548_v14, %v15837_v49 }
 0x48c   : > { %v9167_v12 = vunpack.i.h.bf16 %v9165_v32  ;;  %v9166_v35 = vunpack.i.l.bf16 %v9165_v32  ;;  %7454 = vrot.lane.b32.xlu1 %v2918_v28, %s15796_s26  ;;  %v13637_v51 = vpack.c.bf16 %v5316_v25, %v5315_v29  ;;  %v2907_v28 = vadd.f32 %v13548_v14, %v15838_v55  ;;  %v15842_v25 = vld [vmem:[#allocation122_spill] sm:$0xff] }
 0x48d   : > { %15835 = vst [vmem:[#allocation126_spill] sm:$0xff] %v13633_v9  ;;  %7456 = vrot.lane.b32.xlu0 %v2919_v62, %s15796_s26 }
 0x48e   : > { %15836 = vst [vmem:[#allocation131_spill] sm:$0xff] %v13637_v51  ;;  %v13642_v48 = vpack.c.bf16 %v9167_v12, %v9166_v35  ;;  %5620 = vmatprep.mubr.bf16.mxu1 %v13637_v51  ;;  %v9170_v41 = vpop.permute.xlu0 %9169  ;;  %v5317_v22 = vsel %vm1981_vm7, %v9161_v8, %v9166_v35  ;;  %v5318_v30 = vsel %vm1981_vm7, %v9162_v59, %v9167_v12  ;;  %v2922_v59 = vmax.f32 %v2906_v26, 0.0  ;;  %v15840_v8 = vld [vmem:[#allocation166_spill] sm:$0xff] }
 0x48f   : > { %v9172_v45 = vunpack.i.h.bf16 %v9170_v41  ;;  %v9171_v20 = vunpack.i.l.bf16 %v9170_v41  ;;  %v13649_v47 = vpack.c.bf16 %v5318_v30, %v5317_v22  ;;  %v2908_v29 = vadd.f32 %v13548_v14, %v15840_v8 }
 0x490   : > { %7458 = vrot.lane.b32.xlu1 %v2920_v52, %s15796_s26  ;;  %v2923_v32 = vmax.f32 %v2907_v28, 0.0  ;;  %v2909_v12 = vadd.f32 %v13548_v14, %v15842_v25 }
 0x491   : > { %15839 = vst [vmem:[#allocation138_spill] sm:$0xff] %v13649_v47  ;;  %5621 = vmatmul.mubr.bf16.gmra.mrb[0].mxu1 %v13608_v44  ;;  %v5279_v11 = vsel %vm5262_vm5, %v13270_v3, %v9171_v20  ;;  %v5280_v36 = vsel %vm5262_vm5, %v13242_v60, %v9172_v45  ;;  %7460 = vrot.lane.b32.xlu0 %v2921_v31, %s15796_s26  ;;  %v15843_v3 = vld [vmem:[#allocation98_spill] sm:$0xff]  ;;  %v2924_v60 = vmax.f32 %v2908_v29, 0.0 }
 0x492   : > { %v13660_v62 = vpack.c.bf16 %v5280_v36, %v5279_v11  ;;  %5627 = vmatprep.mubr.bf16.mxu1 %v13649_v47  ;;  %v2910_v35 = vadd.f32 %v13548_v14, %v15843_v3  ;;  %v2925_v52 = vmax.f32 %v2909_v12, 0.0 }
 0x494   : > { %15841 = vst [vmem:[#allocation143_spill] sm:$0xff] %v13660_v62  ;;  %7462 = vrot.lane.b32.xlu1 %v2922_v59, %s15796_s26  ;;  %v2926_v55 = vmax.f32 %v2910_v35, 0.0 }
 0x495   : > { %7464 = vrot.lane.b32.xlu0 %v2923_v32, %s15796_s26 }
 0x497   : > { %v9180_v31 = vpop.permute.xlu0 %9179  ;;  %v9175_v49 = vpop.permute.xlu1 %9174 }
 0x498   : > { %v9182_v26 = vunpack.i.h.bf16 %v9180_v31  ;;  %v9181_v41 = vunpack.i.l.bf16 %v9180_v31  ;;  %v9177_v22 = vunpack.i.h.bf16 %v9175_v49  ;;  %v9176_v30 = vunpack.i.l.bf16 %v9175_v49  ;;  %7466 = vrot.lane.b32.xlu1 %v2924_v60, %s15796_s26  ;;  %v15847_v31 = vld [vmem:[#allocation79_spill] sm:$0xff] }
 0x499   : > { %5628 = vmatmul.mubr.bf16.gmra.mrb[4].mxu1 %v13633_v9  ;;  %7468 = vrot.lane.b32.xlu0 %v2925_v52, %s15796_s26 }
 0x49a   : > { %v5281_v14 = vsel %vm5262_vm5, %v13253_v37, %v9181_v41  ;;  %v5282_v28 = vsel %vm5262_vm5, %v13277_v58, %v9182_v26  ;;  %v13676_v11 = vpack.c.bf16 %v9177_v22, %v9176_v30  ;;  %v5319_v36 = vsel %vm1981_vm7, %v9171_v20, %v9176_v30 }
 0x49b   : > { %v13679_v59 = vpack.c.bf16 %v5282_v28, %v5281_v14  ;;  %v9185_v8 = vpop.permute.xlu1 %9184  ;;  %v5320_v29 = vsel %vm1981_vm7, %v9172_v45, %v9177_v22 }
 0x49c   : > { %v9187_v32 = vunpack.i.h.bf16 %v9185_v8  ;;  %v9186_v25 = vunpack.i.l.bf16 %v9185_v8  ;;  %7470 = vrot.lane.b32.xlu1 %v2926_v55, %s15796_s26  ;;  %v13683_v12 = vpack.c.bf16 %v5320_v29, %v5319_v36  ;;  %s8099_s26 = sshll.u32 %s7630_s13, 7  ;;  %s9475_s13 = sshll.u32 %s9571_s27, 4  ;;  %s9476_s13 = int_to_ptr.vmem [resolvable:$false] %s9475_s13 }
 0x49d   : > { %15844 = vst [vmem:[#allocation108_spill] sm:$0xff] %v13679_v59  ;;  %s14827_s1 = scalar_lea.hbm %s14896_s11, %s8099_s26  ;;  %s9477_s2 = scalar_lea.vmem %s9476_s13, 8192 }
 0x49e   : > { %15845 = vst [vmem:[#allocation150_spill] sm:$0xff] %v13683_v12  ;;  %v13685_v3 = vpack.c.bf16 %v9187_v32, %v9186_v25  ;;  %5634 = vmatprep.mubr.bf16.mxu1 %v13683_v12  ;;  %v9190_v37 = vpop.permute.xlu0 %9189  ;;  %v5321_v58 = vsel %vm1981_vm7, %v9181_v41, %v9186_v25  ;;  %v5322_v20 = vsel %vm1981_vm7, %v9182_v26, %v9187_v32 }
 0x49f   : > { %v9192_v35 = vunpack.i.h.bf16 %v9190_v37  ;;  %v9191_v60 = vunpack.i.l.bf16 %v9190_v37  ;;  %v13690_v52 = vpack.c.bf16 %v5322_v20, %v5321_v58 }
 0x4a1   : > { %15846 = vst [vmem:[#allocation95_spill] sm:$0xff] %v13690_v52  ;;  %5635 = vmatmul.mubr.bf16.gmra.mrb[8].mxu1 %v13660_v62  ;;  %v5283_v45 = vsel %vm5262_vm5, %v13325_v17, %v9191_v60  ;;  %v5284_v49 = vsel %vm5262_vm5, %v15847_v31, %v9192_v35 }
 0x4a2   : > { %v13697_v22 = vpack.c.bf16 %v5284_v49, %v5283_v45  ;;  %5641 = vmatprep.mubr.bf16.mxu1 %v13690_v52 }
 0x4a4   : > { %15848 = vst [vmem:[#allocation94_spill] sm:$0xff] %v13697_v22 }
 0x4a7   : > { %v9200_v30 = vpop.permute.xlu0 %9199  ;;  %v9195_v41 = vpop.permute.xlu1 %9194 }
 0x4a8   : > { %v9202_v55 = vunpack.i.h.bf16 %v9200_v30  ;;  %v9201_v26 = vunpack.i.l.bf16 %v9200_v30  ;;  %v9197_v14 = vunpack.i.h.bf16 %v9195_v41  ;;  %v9196_v28 = vunpack.i.l.bf16 %v9195_v41 }
 0x4a9   : > { %5642 = vmatmul.mubr.bf16.gmra.mrb[12].mxu1 %v13679_v59 }
 0x4aa   : > { %v5285_v36 = vsel %vm5262_vm5, %v13314_v43, %v9201_v26  ;;  %v5286_v17 = vsel %vm5262_vm5, %v13331_v42, %v9202_v55  ;;  %v13705_v8 = vpack.c.bf16 %v9197_v14, %v9196_v28  ;;  %v5323_v29 = vsel %vm1981_vm7, %v9191_v60, %v9196_v28 }
 0x4ab   : > { %v13708_v32 = vpack.c.bf16 %v5286_v17, %v5285_v36  ;;  %v9205_v25 = vpop.permute.xlu1 %9204  ;;  %v5324_v37 = vsel %vm1981_vm7, %v9192_v35, %v9197_v14 }
 0x4ac   : > { %v9207_v58 = vunpack.i.h.bf16 %v9205_v25  ;;  %v9206_v20 = vunpack.i.l.bf16 %v9205_v25  ;;  %v13711_v45 = vpack.c.bf16 %v5324_v37, %v5323_v29 }
 0x4ad   : > { %15849 = vst [vmem:[#allocation96_spill] sm:$0xff] %v13708_v32 }
 0x4ae   : > { %15850 = vst [vmem:[#allocation86_spill] sm:$0xff] %v13711_v45  ;;  %v13713_v31 = vpack.c.bf16 %v9207_v58, %v9206_v20  ;;  %5648 = vmatprep.mubr.bf16.mxu1 %v13711_v45  ;;  %v9210_v43 = vpop.permute.xlu0 %9209  ;;  %v5325_v42 = vsel %vm1981_vm7, %v9201_v26, %v9206_v20  ;;  %v5326_v49 = vsel %vm1981_vm7, %v9202_v55, %v9207_v58 }
 0x4af   : > { %v9212_v30 = vunpack.i.h.bf16 %v9210_v43  ;;  %v9211_v60 = vunpack.i.l.bf16 %v9210_v43  ;;  %v13718_v41 = vpack.c.bf16 %v5326_v49, %v5325_v42 }
 0x4b1   : > { %15851 = vst [vmem:[#allocation65_spill] sm:$0xff] %v13718_v41  ;;  %5649 = vmatmul.mubr.bf16.gmra.mrb[16].mxu1 %v13697_v22  ;;  %v5287_v35 = vsel %vm5262_vm5, %v13363_v16, %v9211_v60  ;;  %v5288_v14 = vsel %vm5262_vm5, %v13346_v24, %v9212_v30 }
 0x4b2   : > { %v13725_v28 = vpack.c.bf16 %v5288_v14, %v5287_v35  ;;  %5655 = vmatprep.mubr.bf16.mxu1 %v13718_v41 }
 0x4b7   : > { %v9220_v36 = vpop.permute.xlu0 %9219  ;;  %v9215_v26 = vpop.permute.xlu1 %9214 }
 0x4b8   : > { %v9222_v17 = vunpack.i.h.bf16 %v9220_v36  ;;  %v9221_v55 = vunpack.i.l.bf16 %v9220_v36  ;;  %v9217_v29 = vunpack.i.h.bf16 %v9215_v26  ;;  %v9216_v25 = vunpack.i.l.bf16 %v9215_v26 }
 0x4b9   : > { %5656 = vmatmul.mubr.bf16.gmra.mrb[20].mxu1 %v13708_v32 }
 0x4ba   : > { %v5289_v37 = vsel %vm5262_vm5, %v13355_v2, %v9221_v55  ;;  %v5290_v16 = vsel %vm5262_vm5, %v13369_v21, %v9222_v17  ;;  %v13733_v58 = vpack.c.bf16 %v9217_v29, %v9216_v25  ;;  %v5327_v24 = vsel %vm1981_vm7, %v9211_v60, %v9216_v25  ;;  %v15853_v2 = vld [vmem:[#allocation113_spill] sm:$0xff] }
 0x4bb   : > { %v13736_v20 = vpack.c.bf16 %v5290_v16, %v5289_v37  ;;  %v9225_v43 = vpop.permute.xlu0 %9224  ;;  %v9230_v42 = vpop.permute.xlu1 %9229  ;;  %v5328_v49 = vsel %vm1981_vm7, %v9212_v30, %v9217_v29  ;;  %v15854_v21 = vld [vmem:[#allocation101_spill] sm:$0xff] }
 0x4bc   : > { %v9227_v35 = vunpack.i.h.bf16 %v9225_v43  ;;  %v9226_v14 = vunpack.i.l.bf16 %v9225_v43  ;;  %v9232_v36 = vunpack.i.h.bf16 %v9230_v42  ;;  %v9231_v26 = vunpack.i.l.bf16 %v9230_v42 }
 0x4bd   : > { %v13739_v32 = vpack.c.bf16 %v5328_v49, %v5327_v24 }
 0x4be   : > { %v5264_v41 = vsel %vm5262_vm5, %v15853_v2, %v9227_v35  ;;  %v5263_v22 = vsel %vm5262_vm5, %v15854_v21, %v9226_v14  ;;  %v13745_v45 = vpack.c.bf16 %v9232_v36, %v9231_v26  ;;  %v5329_v60 = vsel %vm1981_vm7, %v9221_v55, %v9231_v26 }
 0x4bf   : > { %15852 = vst [vmem:[#allocation62_spill] sm:$0xff] %v13739_v32  ;;  %v5343_v25 = vpack.c.bf16 %v5264_v41, %v5263_v22  ;;  %5662 = vmatprep.mubr.bf16.mxu1 %v13739_v32  ;;  %v9240_v30 = vpop.permute.xlu0 %9239  ;;  %v9235_v29 = vpop.permute.xlu1 %9234  ;;  %v5330_v37 = vsel %vm1981_vm7, %v9222_v17, %v9232_v36 }
 0x4c0   : > { %v9242_v16 = vunpack.i.h.bf16 %v9240_v30  ;;  %v9241_v24 = vunpack.i.l.bf16 %v9240_v30  ;;  %v9237_v43 = vunpack.i.h.bf16 %v9235_v29  ;;  %v9236_v42 = vunpack.i.l.bf16 %v9235_v29  ;;  %v15856_v29 = vld [vmem:[#allocation106_spill] sm:$0xff] }
 0x4c1   : > { %5663 = vmatmul.mubr.bf16.gmra.mrb[24].mxu1 %v13725_v28  ;;  %v13751_v49 = vpack.c.bf16 %v5330_v37, %v5329_v60  ;;  %v15857_v37 = vld [vmem:[#allocation78_spill] sm:$0xff] }
 0x4c2   : > { %v5291_v2 = vsel %vm5262_vm5, %v13421_v15, %v9241_v24  ;;  %v5292_v22 = vsel %vm5262_vm5, %v13389_v54, %v9242_v16  ;;  %v13757_v41 = vpack.c.bf16 %v9237_v43, %v9236_v42  ;;  %v5303_v55 = vsel %vm1981_vm7, %v9226_v14, %v9236_v42  ;;  %v9415_v15 = vld [vmem:[%s14892_s7 + $0x1a8] sm:$0xff]  }
 0x4c3   : > { %v13760_v26 = vpack.c.bf16 %v5292_v22, %v5291_v2  ;;  %5669 = vmatprep.mubr.bf16.mxu1 %v13751_v49  ;;  %v9245_v17 = vpop.permute.xlu0 %9244  ;;  %v5304_v36 = vsel %vm1981_vm7, %v9227_v35, %v9237_v43 }
 0x4c4   : > { %15855 = vst [vmem:[#allocation109_spill] sm:$0xff] %v13757_v41  ;;  %v9247_v21 = vunpack.i.h.bf16 %v9245_v17  ;;  %v9246_v60 = vunpack.i.l.bf16 %v9245_v17  ;;  %v5344_v30 = vpack.c.bf16 %v5304_v36, %v5303_v55 }
 0x4c6   : > { %v5266_v54 = vsel %vm5262_vm5, %v15856_v29, %v9247_v21  ;;  %v5265_v14 = vsel %vm5262_vm5, %v15857_v37, %v9246_v60  ;;  %5996 = vmatprep.mubr.bf16.mxu0 %v5344_v30  ;;  %v13783_v29 = vld [vmem:[%s14894_s9] sm:$0x3] }
 0x4c7   : > { %v5346_v42 = vpack.c.bf16 %v5266_v54, %v5265_v14  ;;  %5997 = vmatmul.mubr.bf16.vlgmr.msra.gmra.mrb[80].mxu0 %v5343_v25  ;;  %v9260_v2 = vpop.permute.xlu0 %9259  ;;  %v9250_v22 = vpop.permute.xlu1 %9249  ;;  %15858 = vst [vmem:[#allocation110_spill] sm:$0xff] %v13783_v29 }
 0x4c8   : > { %v9262_v41 = vunpack.i.h.bf16 %v9260_v2  ;;  %v9261_v35 = vunpack.i.l.bf16 %v9260_v2  ;;  %v9252_v43 = vunpack.i.h.bf16 %v9250_v22  ;;  %v9251_v17 = vunpack.i.l.bf16 %v9250_v22  ;;  %8584 = vmatpush3.bf16.msra.mxu0 %v13385_v61 }
 0x4c9   : > { %5670 = vmatmul.mubr.bf16.gmra.mrb[28].mxu1 %v13736_v20  ;;  %8585 = vmatprep.subr.bf16.mxu0 %v9415_v15 }
 0x4ca   : > { %v5293_v55 = vsel %vm5262_vm5, %v13413_v34, %v9261_v35  ;;  %v5294_v36 = vsel %vm5262_vm5, %v13427_v0, %v9262_v41  ;;  %v13777_v30 = vpack.c.bf16 %v9252_v43, %v9251_v17  ;;  %v5331_v25 = vsel %vm1981_vm7, %v9241_v24, %v9251_v17 }
 0x4cb   : > { %v13785_v54 = vpack.c.bf16 %v5294_v36, %v5293_v55  ;;  %v9255_v61 = vpop.permute.xlu1 %9254  ;;  %v5332_v37 = vsel %vm1981_vm7, %v9242_v16, %v9252_v43 }
 0x4cc   : > { %v9257_v14 = vunpack.i.h.bf16 %v9255_v61  ;;  %v9256_v2 = vunpack.i.l.bf16 %v9255_v61  ;;  %v13788_v34 = vpack.c.bf16 %v5332_v37, %v5331_v25  ;;  %8586 = vmatpush3.bf16.msra.mxu0 %v9415_v15 }
 0x4cd   : > { %15859 = vst [vmem:[#allocation63_spill] sm:$0xff] %v13785_v54  ;;  %8669 = vmatprep.subr.msk.bf16.mxu0 %vm834_vm0, %v13783_v29 }
 0x4ce   : > { %v13792_v0 = vpack.c.bf16 %v9257_v14, %v9256_v2  ;;  %5676 = vmatprep.mubr.bf16.mxu1 %v13788_v34  ;;  %v9270_v24 = vpop.permute.xlu0 %9269  ;;  %v5305_v22 = vsel %vm1981_vm7, %v9246_v60, %v9256_v2  ;;  %v5306_v17 = vsel %vm1981_vm7, %v9247_v21, %v9257_v14 }
 0x4cf   : > { %v9272_v55 = vunpack.i.h.bf16 %v9270_v24  ;;  %v9271_v36 = vunpack.i.l.bf16 %v9270_v24  ;;  %v9265_v16 = vpop.permute.xlu1 %9264  ;;  %v5347_v43 = vpack.c.bf16 %v5306_v17, %v5305_v22 }
 0x4d0   : > { %v9267_v61 = vunpack.i.h.bf16 %v9265_v16  ;;  %v9266_v25 = vunpack.i.l.bf16 %v9265_v16 }
 0x4d1   : > { %5677 = vmatmul.mubr.bf16.gmra.mrb[32].mxu1 %v13760_v26  ;;  %v5295_v15 = vsel %vm5262_vm5, %v13474_v13, %v9271_v36  ;;  %v5296_v37 = vsel %vm5262_vm5, %v13442_v1, %v9272_v55  ;;  %6003 = vmatprep.mubr.bf16.mxu0 %v5347_v43 }
 0x4d2   : > { %v13802_v29 = vpack.c.bf16 %v5296_v37, %v5295_v15  ;;  %v13804_v60 = vpack.c.bf16 %v9267_v61, %v9266_v25  ;;  %6004 = vmatmul.mubr.bf16.gmra.mrb[84].mxu0 %v5346_v42  ;;  %v5333_v21 = vsel %vm1981_vm7, %v9261_v35, %v9266_v25  ;;  %v5334_v14 = vsel %vm1981_vm7, %v9262_v41, %v9267_v61 }
 0x4d3   : > { %6010 = vmatprep.mubr.bf16.mxu0 %v13513_v50  ;;  %v13809_v2 = vpack.c.bf16 %v5334_v14, %v5333_v21 }
 0x4d4   : > { %15860 = vst [vmem:[#allocation97_spill] sm:$0xff] %v13802_v29 }
 0x4d5   : > { %5683 = vmatprep.mubr.bf16.mxu1 %v13809_v2 }
 0x4d7   : > { %v9280_v13 = vpop.permute.xlu0 %9279  ;;  %v9275_v24 = vpop.permute.xlu1 %9274 }
 0x4d8   : > { %v9282_v22 = vunpack.i.h.bf16 %v9280_v13  ;;  %v9281_v1 = vunpack.i.l.bf16 %v9280_v13  ;;  %v9277_v17 = vunpack.i.h.bf16 %v9275_v24  ;;  %v9276_v16 = vunpack.i.l.bf16 %v9275_v24 }
 0x4d9   : > { %5684 = vmatmul.mubr.bf16.gmra.mrb[36].mxu1 %v13785_v54 }
 0x4da   : > { %v5297_v42 = vsel %vm5262_vm5, %v13467_v4, %v9281_v1  ;;  %v5298_v41 = vsel %vm5262_vm5, %v13480_v63, %v9282_v22  ;;  %v13817_v35 = vpack.c.bf16 %v9277_v17, %v9276_v16  ;;  %6011 = vmatmul.mubr.bf16.gmra.mrb[88].mxu0 %v13462_v23  ;;  %v5335_v50 = vsel %vm1981_vm7, %v9271_v36, %v9276_v16 }
 0x4db   : > { %v13821_v43 = vpack.c.bf16 %v5298_v41, %v5297_v42  ;;  %6017 = vmatprep.mubr.bf16.mxu0 %v13535_v56  ;;  %v9285_v61 = vpop.permute.xlu1 %9284  ;;  %v5336_v25 = vsel %vm1981_vm7, %v9272_v55, %v9277_v17 }
 0x4dc   : > { %v9287_v15 = vunpack.i.h.bf16 %v9285_v61  ;;  %v9286_v37 = vunpack.i.l.bf16 %v9285_v61  ;;  %v13825_v4 = vpack.c.bf16 %v5336_v25, %v5335_v50  ;;  %v15868_v50 = vld [vmem:[#allocation77_spill] sm:$0xff] }
 0x4dd   : > { %15861 = vst [vmem:[#allocation120_spill] sm:$0xff] %v13821_v43 }
 0x4de   : > { %15862 = vst [vmem:[#allocation123_spill] sm:$0xff] %v13825_v4  ;;  %v13827_v21 = vpack.c.bf16 %v9287_v15, %v9286_v37  ;;  %5690 = vmatprep.mubr.bf16.mxu1 %v13825_v4  ;;  %v5337_v23 = vsel %vm1981_vm7, %v9281_v1, %v9286_v37  ;;  %v5338_v63 = vsel %vm1981_vm7, %v9282_v22, %v9287_v15 }
 0x4df   : > { %v13832_v36 = vpack.c.bf16 %v5338_v63, %v5337_v23  ;;  %v9436_v23 = vld [vmem:[%s14892_s7] sm:$0xff]   ;;  %v15872_v63 = vld [vmem:[#allocation85_spill] sm:$0xff] }
 0x4e1   : > { %15863 = vst [vmem:[#allocation100_spill] sm:$0xff] %v13832_v36  ;;  %5691 = vmatmul.mubr.bf16.gmra.mrb[40].mxu1 %v13802_v29 }
 0x4e2   : > { %5697 = vmatprep.mubr.bf16.mxu1 %v13832_v36  ;;  %6018 = vmatmul.mubr.bf16.gmra.mrb[92].mxu0 %v13500_v39 }
 0x4e3   : > { %6024 = vmatprep.mubr.bf16.mxu0 %v13580_v38 }
 0x4e7   : > { %v13838_v56 = vpop.permute.xlu0 %9289 }
 0x4e9   : > { %5698 = vmatmul.mubr.bf16.gmra.mrb[44].mxu1 %v13821_v43 }
 0x4ea   : > { %8515 = vmatprep.mubr.msk.bf16.mxu1 %vm5511_vm6, %v13502_v40  ;;  %v13844_v55 = vpop.permute.xlu1 %9294  ;;  %6025 = vmatmul.mubr.bf16.gmra.mrb[96].mxu0 %v13538_v18 }
 0x4eb   : > { %6031 = vmatprep.mubr.bf16.mxu0 %v13597_v57  ;;  %v13848_v14 = vpop.permute.xlu0 %9299  ;;  %v15898_v57 = vld [vmem:[#allocation9_spill] sm:$0xff] }
 0x4ec   : > { %15864 = vst [vmem:[#allocation134_spill] sm:$0xff] %v13848_v14  ;;  %v15179_v39 = vunpack.i.h.bf16 %v13848_v14  ;;  %v15180_v13 = vunpack.i.l.bf16 %v13848_v14 }
 0x4ee   : > { %v13858_v24 = vsel %vm5262_vm5, %v13521_v10, %v15179_v39  ;;  %v13864_v22 = vsel %vm5262_vm5, %v13557_v6, %v15180_v13  ;;  %v13866_v1 = vpop.permute.xlu1 %9304  ;;  %v9444_v39 = vld [vmem:[%s14892_s7 + $0x58] sm:$0xff]  }
 0x4ef   : > { %15865 = vst [vmem:[#allocation133_spill] sm:$0xff] %v13858_v24  ;;  %15866 = vst [vmem:[#allocation121_spill] sm:$0xff] %v13864_v22  ;;  %v15177_v16 = vunpack.i.h.bf16 %v13866_v1  ;;  %v15178_v42 = vunpack.i.l.bf16 %v13866_v1  ;;  %v7441_v41 = vpop.permute.xlu0 %7440  ;;  %v13949_v22 = vld [vmem:[%s9719_s25 + $0x80] sm:$0xff] }
 0x4f0   : > { %15867 = vst [vmem:[#allocation125_spill] sm:$0xff] %v13866_v1  ;;  %v7552_v10 = vsel %vm1981_vm7, %v15868_v50, %v7441_v41  ;;  %v9437_v50 = vld [vmem:[%s14892_s7 + $0x48] sm:$0xff]   ;;  %v15887_v29 = vrot.slane %v13949_v22, 7 }
 0x4f1   : > { %v13878_v61 = vsel %vm5262_vm5, %v13542_v7, %v15178_v42  ;;  %v13884_v6 = vsel %vm5262_vm5, %v13560_v5, %v15177_v16  ;;  %8516 = vmatmul.mubr.msk.bf16.vlgmr.msra.gmra.mrb[48].mxu1 %vm5511_vm6, %v13525_v46  ;;  %7584 = vst [vmem:[%s13888_s14] sm:$0xff] %v7552_v10  ;;  %v15871_v5 = vld [vmem:[#allocation80_spill] sm:$0xff] }
 0x4f2   : > { %15869 = vst [vmem:[#allocation145_spill] sm:$0xff] %v13878_v61  ;;  %15870 = vst [vmem:[#allocation137_spill] sm:$0xff] %v13884_v6  ;;  %8519 = vmatprep.mubr.msk.bf16.mxu1 %vm5511_vm6, %v13574_v27  ;;  %v7443_v7 = vpop.permute.xlu1 %7442  ;;  %6032 = vmatmul.mubr.bf16.gmra.mrb[100].mxu0 %v13585_v33  ;;  %v15876_v16 = vld [vmem:[#allocation112_spill] sm:$0xff] }
 0x4f3   : > { %v7553_v15 = vsel %vm1981_vm7, %v15871_v5, %v7443_v7  ;;  %6038 = vmatprep.mubr.bf16.mxu0 %v13637_v51  ;;  %v7445_v37 = vpop.permute.xlu0 %7444  ;;  %8661 = vmatpush3.bf16.msra.mxu1 %v9436_v23  ;;  %v15873_v7 = vld [vmem:[#allocation90_spill] sm:$0xff]  ;;  %v15896_v51 = vld [vmem:[#allocation7_spill] sm:$0xff] }
 0x4f4   : > { %7586 = vst [vmem:[%s13888_s14 + $0x10] sm:$0xff] %v7553_v15  ;;  %v7554_v41 = vsel %vm1981_vm7, %v15872_v63, %v7445_v37  ;;  %8654 = vmatprep.subr.bf16.mxu1 %v9437_v50  ;;  %v9438_v15 = vld [vmem:[%s14892_s7 + $0x8] sm:$0xff]   ;;  %v9439_v63 = vld [vmem:[%s14892_s7 + $0x50] sm:$0xff]   ;;  %v9440_v50 = vld [vmem:[%s9719_s25 + $0x20] sm:$0xff]  ;;  %v15897_v33 = vrot.slane %v15896_v51, 1 }
 0x4f5   : > { %7588 = vst [vmem:[%s13888_s14 + $0x20] sm:$0xff] %v7554_v41  ;;  %v15874_v37 = vld [vmem:[#allocation99_spill] sm:$0xff] }
 0x4f6   : > { %v7447_v10 = vpop.permute.xlu1 %7446 }
 0x4f7   : > { %v7555_v5 = vsel %vm1981_vm7, %v15873_v7, %v7447_v10  ;;  %v7449_v25 = vpop.permute.xlu0 %7448  ;;  %8662 = vmatpush3.bf16.msra.mxu1 %v9438_v15  ;;  %v9441_v10 = vld [vmem:[%s9719_s25 + $0x40] sm:$0xff] }
 0x4f8   : > { %7590 = vst [vmem:[%s13888_s14 + $0x30] sm:$0xff] %v7555_v5  ;;  %v7556_v23 = vsel %vm1981_vm7, %v15874_v37, %v7449_v25  ;;  %8655 = vmatprep.subr.bf16.mxu1 %v9439_v63  ;;  %v6772_v25 = vrot.slane %v9440_v50, 7  ;;  %v6778_v7 = vrot.slane %v9441_v10, 7  ;;  %v15875_v5 = vld [vmem:[#allocation104_spill] sm:$0xff]  ;;  %v9443_v63 = vld [vmem:[%s9719_s25 + $0x60] sm:$0xff] }
 0x4f9   : > { %8520 = vmatmul.mubr.msk.bf16.gmra.mrb[52].mxu1 %vm5511_vm6, %v13591_v19  ;;  %7592 = vst [vmem:[%s13888_s14 + $0x40] sm:$0xff] %v7556_v23  ;;  %v9442_v23 = vld [vmem:[%s14892_s7 + $0x10] sm:$0xff]   ;;  %v6784_v17 = vrot.slane %v9443_v63, 7 }
 0x4fa   : > { %8523 = vmatprep.mubr.msk.bf16.mxu1 %vm5511_vm6, %v13630_v53  ;;  %v7451_v41 = vpop.permute.xlu1 %7450  ;;  %6039 = vmatmul.mubr.bf16.gmra.mrb[104].mxu0 %v13608_v44 }
 0x4fb   : > { %v7557_v15 = vsel %vm1981_vm7, %v15875_v5, %v7451_v41  ;;  %6045 = vmatprep.mubr.bf16.mxu0 %v13649_v47  ;;  %v7453_v37 = vpop.permute.xlu0 %7452  ;;  %8663 = vmatpush3.bf16.msra.mxu1 %v9442_v23  ;;  %v15877_v5 = vld [vmem:[#allocation6_spill] sm:$0xff]  ;;  %v15894_v47 = vld [vmem:[#allocation17_spill] sm:$0xff] }
 0x4fc   : > { %7594 = vst [vmem:[%s13888_s14 + $0x50] sm:$0xff] %v7557_v15  ;;  %v7558_v42 = vsel %vm1981_vm7, %v15876_v16, %v7453_v37  ;;  %8656 = vmatprep.subr.bf16.mxu1 %v9444_v39  ;;  %v15878_v13 = vrot.slane %v15877_v5, 7  ;;  %v15879_v23 = vld [vmem:[#allocation10_spill] sm:$0xff]  ;;  %v15881_v37 = vld [vmem:[#allocation116_spill] sm:$0xff]  ;;  %v15895_v44 = vrot.slane %v15894_v47, 7 }
 0x4fd   : > { %7596 = vst [vmem:[%s13888_s14 + $0x60] sm:$0xff] %v7558_v42  ;;  %v15880_v6 = vrot.slane %v15879_v23, 7  ;;  %v9446_v42 = vld [vmem:[%s14892_s7 + $0x18] sm:$0xff]   ;;  %v9447_v16 = vld [vmem:[%s14892_s7 + $0x60] sm:$0xff]  }
 0x4fe   : > { %v7455_v41 = vpop.permute.xlu1 %7454  ;;  %v6774_v61 = vsel %vm1451_vm2, %v6772_v25, %v15878_v13  ;;  %v15882_v13 = vld [vmem:[#allocation15_spill] sm:$0xff] }
 0x4ff   : > { %v6780_v15 = vsel %vm1451_vm2, %v6778_v7, %v15880_v6  ;;  %v7559_v39 = vsel %vm1981_vm7, %v15881_v37, %v7455_v41  ;;  %v7457_v24 = vpop.permute.xlu0 %7456  ;;  %8664 = vmatpush3.bf16.msra.mxu1 %v9446_v42  ;;  %v15883_v5 = vrot.slane %v15882_v13, 7  ;;  %v15884_v6 = vld [vmem:[#allocation124_spill] sm:$0xff]  ;;  %v9448_v41 = vld [vmem:[%s9719_s25 + $0x28] sm:$0xff] }
 0x500   : > { %7598 = vst [vmem:[%s13888_s14 + $0x70] sm:$0xff] %v7559_v39  ;;  %v7560_v1 = vsel %vm1981_vm7, %v15884_v6, %v7457_v24  ;;  %8657 = vmatprep.subr.bf16.mxu1 %v9447_v16  ;;  %v6923_v37 = vrot.slane %v9448_v41, 1  ;;  %v6883_v42 = vadd.f32 %v9448_v41, %v6774_v61  ;;  %v9449_v13 = vld [vmem:[%s9719_s25 + $0x48] sm:$0xff]  ;;  %v15885_v6 = vld [vmem:[#allocation18_spill] sm:$0xff]  ;;  %v15888_v41 = vld [vmem:[#allocation129_spill] sm:$0xff] }
 0x501   : > { %v6786_v23 = vsel %vm1451_vm2, %v6784_v17, %v15883_v5  ;;  %8524 = vmatmul.mubr.msk.bf16.gmra.mrb[56].mxu1 %vm5511_vm6, %v13642_v48  ;;  %7600 = vst [vmem:[%s13888_s14 + $0x80] sm:$0xff] %v7560_v1  ;;  %v6887_v43 = vadd.f32 %v9449_v13, %v6780_v15  ;;  %v6930_v39 = vrot.slane %v9449_v13, 1  ;;  %v9450_v5 = vld [vmem:[%s9719_s25 + $0x68] sm:$0xff]  ;;  %v15886_v36 = vrot.slane %v15885_v6, 7  ;;  %v13981_v61 = vld [vmem:[%s9719_s25 + $0xa0] sm:$0xff] }
 0x502   : > { %v6937_v14 = vrot.slane %v9450_v5, 1  ;;  %8527 = vmatprep.mubr.msk.bf16.mxu1 %vm5511_vm6, %v13676_v11  ;;  %v7459_v24 = vpop.permute.xlu1 %7458  ;;  %6046 = vmatmul.mubr.bf16.gmra.mrb[108].mxu0 %v13633_v9  ;;  %v6891_v16 = vadd.f32 %v9450_v5, %v6786_v23  ;;  %v9452_v23 = vld [vmem:[%s14892_s7 + $0x20] sm:$0xff]   ;;  %v15889_v5 = vld [vmem:[#allocation136_spill] sm:$0xff] }
 0x503   : > { %v6792_v1 = vsel %vm1451_vm2, %v15887_v29, %v15886_v36  ;;  %v7561_v13 = vsel %vm1981_vm7, %v15888_v41, %v7459_v24  ;;  %6052 = vmatprep.mubr.bf16.mxu0 %v13683_v12  ;;  %v7461_v4 = vpop.permute.xlu0 %7460  ;;  %8665 = vmatpush3.bf16.msra.mxu1 %v9452_v23  ;;  %v9453_v29 = vld [vmem:[%s14892_s7 + $0x68] sm:$0xff]   ;;  %v15890_v36 = vld [vmem:[#allocation8_spill] sm:$0xff] }
 0x504   : > { %7602 = vst [vmem:[%s13888_s14 + $0x90] sm:$0xff] %v7561_v13  ;;  %v7562_v6 = vsel %vm1981_vm7, %v15889_v5, %v7461_v4  ;;  %8658 = vmatprep.subr.bf16.mxu1 %v9453_v29  ;;  %v15891_v15 = vrot.slane %v15890_v36, 7  ;;  %v15892_v41 = vld [vmem:[#allocation12_spill] sm:$0xff]  ;;  %v6874_v13 = vsel %vm1451_vm2, %v15895_v44, %v6784_v17  ;;  %v6924_v29 = vsel %vm1548_vm3, %v15897_v33, %v6923_v37 }
 0x505   : > { %v15893_v12 = vrot.slane %v15892_v41, 7  ;;  %7604 = vst [vmem:[%s13888_s14 + $0xa0] sm:$0xff] %v7562_v6  ;;  %v6890_v5 = vadd.f32 %v9443_v63, %v6874_v13  ;;  %v15900_v41 = vld [vmem:[#allocation11_spill] sm:$0xff] }
 0x506   : > { %v6872_v24 = vsel %vm1451_vm2, %v15891_v15, %v6772_v25  ;;  %v7463_v36 = vpop.permute.xlu1 %7462  ;;  %v15899_v25 = vrot.slane %v15898_v57, 1  ;;  %v9454_v57 = vld [vmem:[%s14892_s7 + $0x28] sm:$0xff]  }
 0x507   : > { %v6873_v9 = vsel %vm1451_vm2, %v15893_v12, %v6778_v7  ;;  %v6882_v23 = vadd.f32 %v9440_v50, %v6872_v24  ;;  %v15901_v12 = vrot.slane %v15900_v41, 1  ;;  %v15902_v7 = vld [vmem:[#allocation13_spill] sm:$0xff]  ;;  %v15904_v50 = vld [vmem:[#allocation14_spill] sm:$0xff]  ;;  %v7465_v63 = vpop.permute.xlu0 %7464  ;;  %8666 = vmatpush3.bf16.msra.mxu1 %v9454_v57 }
 0x508   : > { %v6886_v4 = vadd.f32 %v9441_v10, %v6873_v9  ;;  %v6926_v15 = vsel %vm1548_vm3, %v6923_v37, %v15899_v25  ;;  %v15903_v44 = vrot.slane %v15902_v7, 1  ;;  %v15905_v9 = vrot.slane %v15904_v50, 1  ;;  %v15906_v10 = vld [vmem:[#allocation141_spill] sm:$0xff]  ;;  %v15907_v37 = vld [vmem:[#allocation16_spill] sm:$0xff]  ;;  %v9456_v50 = vld [vmem:[%s9719_s25 + $0x88] sm:$0xff] }
 0x509   : > { %v6931_v47 = vsel %vm1548_vm3, %v15901_v12, %v6930_v39  ;;  %v7563_v33 = vsel %vm1981_vm7, %v15906_v10, %v7463_v36  ;;  %v15908_v6 = vrot.slane %v15907_v37, 1  ;;  %v7053_v13 = vadd.f32 %v6926_v15, %v6883_v42  ;;  %v15909_v25 = vld [vmem:[#allocation149_spill] sm:$0xff]  ;;  %v9455_v36 = vld [vmem:[%s14892_s7 + $0x70] sm:$0xff]   ;;  %8528 = vmatmul.mubr.msk.bf16.gmra.mrb[60].mxu1 %vm5511_vm6, %v13685_v3  ;;  %v14062_v57 = vld [vmem:[%s14892_s7 + $0x80] sm:$0xff]  }
 0x50a   : > { %v6933_v17 = vsel %vm1548_vm3, %v6930_v39, %v15903_v44  ;;  %v6938_v51 = vsel %vm1548_vm3, %v15905_v9, %v6937_v14  ;;  %v7052_v39 = vadd.f32 %v6924_v29, %v6882_v23  ;;  %7606 = vst [vmem:[%s13888_s14 + $0xb0] sm:$0xff] %v7563_v33  ;;  %v7564_v41 = vsel %vm1981_vm7, %v15909_v25, %v7465_v63  ;;  %v7467_v23 = vpop.permute.xlu1 %7466  ;;  %v15914_v10 = vld [vmem:[#allocation161_spill] sm:$0xff] }
 0x50b   : > { %v6940_v24 = vsel %vm1548_vm3, %v6937_v14, %v15908_v6  ;;  %8659 = vmatprep.subr.bf16.mxu1 %v9455_v36  ;;  %v7056_v12 = vadd.f32 %v6931_v47, %v6886_v4  ;;  %v7057_v7 = vadd.f32 %v6933_v17, %v6887_v43  ;;  %v7060_v44 = vadd.f32 %v6938_v51, %v6890_v5  ;;  %v15910_v43 = vld [vmem:[#allocation25_spill] sm:$0xff] }
 0x50c   : > { %v6944_v9 = vrot.slane %v9456_v50, 1  ;;  %7608 = vst [vmem:[%s13888_s14 + $0xc0] sm:$0xff] %v7564_v41  ;;  %v7061_v14 = vadd.f32 %v6940_v24, %v6891_v16  ;;  %v6895_v42 = vadd.f32 %v9456_v50, %v6792_v1  ;;  %8531 = vmatprep.mubr.msk.bf16.mxu1 %vm5511_vm6, %v13705_v8  ;;  %6053 = vmatmul.mubr.bf16.gmra.mrb[112].mxu0 %v13660_v62  ;;  %v15911_v5 = vrot.slane %v15910_v43, 7  ;;  %v15913_v17 = vld [vmem:[#allocation153_spill] sm:$0xff]  ;;  %v7469_v16 = vpop.permute.xlu0 %7468  ;;  %v9457_v1 = vld [vmem:[%s14892_s7 + $0x30] sm:$0xff]   ;;  %v15920_v43 = vld [vmem:[#allocation19_spill] sm:$0xff] }
 0x50d   : > { %v7092_v29 = vadd.f32 %v7056_v12, %v7052_v39  ;;  %v7093_v4 = vadd.f32 %v7057_v7, %v7053_v13  ;;  %v15912_v15 = vrot.slane %v13981_v61, 7  ;;  %v7565_v51 = vsel %vm1981_vm7, %v15913_v17, %v7467_v23  ;;  %6059 = vmatprep.mubr.bf16.mxu0 %v13690_v52  ;;  %8667 = vmatpush3.bf16.msra.mxu1 %v9457_v1  ;;  %v9458_v63 = vld [vmem:[%s14892_s7 + $0x78] sm:$0xff]   ;;  %v15916_v39 = vld [vmem:[#allocation20_spill] sm:$0xff] }
 0x50e   : > { %7610 = vst [vmem:[%s13888_s14 + $0xd0] sm:$0xff] %v7565_v51  ;;  %v7566_v33 = vsel %vm1981_vm7, %v15914_v10, %v7469_v16  ;;  %8660 = vmatprep.subr.bf16.mxu1 %v9458_v63  ;;  %v15915_v24 = vrot.slane %v13949_v22, 7  ;;  %v15917_v13 = vrot.slane %v15916_v39, 7  ;;  %v15918_v36 = vld [vmem:[#allocation21_spill] sm:$0xff]  ;;  %v7097_v1 = vadd.f32 %v7061_v14, %v7057_v7  ;;  %v15922_v10 = vld [vmem:[#allocation162_spill] sm:$0xff] }
 0x50f   : > { %v6798_v47 = vsel %vm1451_vm2, %v15912_v15, %v15911_v5  ;;  %v7124_v37 = vadd.f32 %v7092_v29, %v7060_v44  ;;  %v7125_v6 = vadd.f32 %v7093_v4, %v7061_v14  ;;  %7612 = vst [vmem:[%s13888_s14 + $0xe0] sm:$0xff] %v7566_v33  ;;  %v15919_v50 = vrot.slane %v15918_v36, 1  ;;  %v7471_v15 = vpop.permute.xlu1 %7470  ;;  %v9459_v33 = vld [vmem:[%s14892_s7 + $0x38] sm:$0xff]   ;;  %v15925_v36 = vld [vmem:[#allocation27_spill] sm:$0xff] }
 0x510   : > { %v6875_v25 = vsel %vm1451_vm2, %v15917_v13, %v15915_v24  ;;  %v15921_v5 = vrot.slane %v15920_v43, 1  ;;  %v7096_v4 = vadd.f32 %v7060_v44, %v7056_v12  ;;  %v9460_v24 = vld [vmem:[%s9719_s25 + $0xa8] sm:$0xff]  ;;  %v15927_v43 = vld [vmem:[#allocation24_spill] sm:$0xff] }
 0x511   : > { %v6894_v41 = vadd.f32 %v13949_v22, %v6875_v25  ;;  %v6945_v23 = vsel %vm1548_vm3, %v15919_v50, %v6944_v9  ;;  %v14077_v17 = vmul.f32 0.11111111, %v7124_v37  ;;  %v14079_v51 = vmul.f32 0.11111111, %v7125_v6  ;;  %8668 = vmatpush3.bf16.msra.mxu1 %v9459_v33  ;;  %v9461_v6 = vld [vmem:[%s9719_s25 + $0xc0] sm:$0xff] }
 0x512   : > { %v6947_v29 = vsel %vm1548_vm3, %v6944_v9, %v15921_v5  ;;  %v7567_v22 = vsel %vm1981_vm7, %v15922_v10, %v7471_v15  ;;  %v6951_v9 = vrot.slane %v9460_v24, 1  ;;  %8547 = vmatprep.subr.bf16.mxu1 %v14062_v57  ;;  %8532 = vmatmul.mubr.msk.bf16.gmra.mrb[64].mxu1 %vm5511_vm6, %v13713_v31  ;;  %v6802_v39 = vrot.slane %v9461_v6, 7  ;;  %v15923_v25 = vld [vmem:[#allocation86_spill] sm:$0xff] }
 0x513   : > { %v7065_v16 = vadd.f32 %v6947_v29, %v6895_v42  ;;  %v7064_v63 = vadd.f32 %v6945_v23, %v6894_v41  ;;  %7614 = vst [vmem:[%s13888_s14 + $0xf0] sm:$0xff] %v7567_v22  ;;  %v6899_v42 = vadd.f32 %v9460_v24, %v6798_v47  ;;  %8535 = vmatprep.mubr.msk.bf16.mxu1 %vm5511_vm6, %v13733_v58  ;;  %v15924_v47 = vrot.slane %v13981_v61, 7 }
 0x514   : > { %6060 = vmatmul.mubr.bf16.gmra.mrb[116].mxu0 %v13679_v59  ;;  %v15926_v50 = vrot.slane %v15925_v36, 7  ;;  %v15928_v5 = vrot.slane %v15927_v43, 1  ;;  %v9464_v59 = vld [vmem:[%s9719_s25 + $0xe8] sm:$0xff] }
 0x515   : > { %v7129_v37 = vadd.f32 %v7097_v1, %v7065_v16  ;;  %v7128_v7 = vadd.f32 %v7096_v4, %v7064_v63  ;;  %6066 = vmatprep.mubr.bf16.mxu0 %v15923_v25  ;;  %v15929_v4 = vld [vmem:[#allocation26_spill] sm:$0xff]  ;;  %v7100_v10 = vadd.f32 %v7064_v63, %v7060_v44  ;;  %v15941_v25 = vld [vmem:[#allocation37_spill] sm:$0xff] }
 0x516   : > { %v6876_v23 = vsel %vm1451_vm2, %v15926_v50, %v15924_v47  ;;  %v6952_v29 = vsel %vm1548_vm3, %v15928_v5, %v6951_v9  ;;  %v15930_v15 = vrot.slane %v15929_v4, 1  ;;  %v9462_v5 = vld [vmem:[%s9719_s25 + $0xc8] sm:$0xff] }
 0x517   : > { %v14097_v13 = vmul.f32 0.11111111, %v7129_v37  ;;  %v14100_v41 = vmul.f32 0.11111111, %v7128_v7  ;;  %v6898_v33 = vadd.f32 %v13981_v61, %v6876_v23  ;;  %v7101_v37 = vadd.f32 %v7065_v16, %v7061_v14  ;;  %v15931_v7 = vld [vmem:[#allocation28_spill] sm:$0xff]  ;;  %v15933_v61 = vld [vmem:[#allocation94_spill] sm:$0xff] }
 0x518   : > { %v6954_v1 = vsel %vm1548_vm3, %v6951_v9, %v15930_v15  ;;  %v15932_v36 = vrot.slane %v15931_v7, 7  ;;  %v6958_v12 = vrot.slane %v9462_v5, 1  ;;  %v9463_v15 = vld [vmem:[%s9719_s25 + $0xe0] sm:$0xff]  ;;  %v15934_v14 = vld [vmem:[#allocation65_spill] sm:$0xff]  ;;  %v15935_v23 = vld [vmem:[#allocation32_spill] sm:$0xff] }
 0x519   : > { %v7069_v24 = vadd.f32 %v6954_v1, %v6899_v42  ;;  %v7068_v50 = vadd.f32 %v6952_v29, %v6898_v33  ;;  %v6808_v22 = vrot.slane %v9463_v15, 7  ;;  %v15936_v29 = vrot.slane %v15935_v23, 7  ;;  %v15937_v33 = vld [vmem:[#allocation31_spill] sm:$0xff]  ;;  %v15939_v7 = vld [vmem:[#allocation33_spill] sm:$0xff] }
 0x51a   : > { %v6804_v47 = vsel %vm1451_vm2, %v6802_v39, %v15932_v36  ;;  %8536 = vmatmul.mubr.msk.bf16.gmra.mrb[68].mxu1 %vm5511_vm6, %v13745_v45  ;;  %v15940_v36 = vrot.slane %v15939_v7, 1  ;;  %v15942_v23 = vrot.slane %v15941_v25, 7  ;;  %v9465_v7 = vld [vmem:[%s9719_s25 + $0x100] sm:$0xff]  ;;  %v15944_v25 = vld [vmem:[#allocation39_spill] sm:$0xff] }
 0x51b   : > { %v7133_v43 = vadd.f32 %v7101_v37, %v7069_v24  ;;  %v6903_v4 = vadd.f32 %v9462_v5, %v6804_v47  ;;  %v7132_v44 = vadd.f32 %v7100_v10, %v7068_v50  ;;  %8539 = vmatprep.mubr.msk.bf16.mxu1 %vm5511_vm6, %v13777_v30  ;;  %v6877_v1 = vsel %vm1451_vm2, %v15936_v29, %v6802_v39 }
 0x51c   : > { %6067 = vmatmul.mubr.bf16.gmra.mrb[120].mxu0 %v15933_v61  ;;  %v15938_v10 = vrot.slane %v15937_v33, 1  ;;  %v6961_v47 = vsel %vm1548_vm3, %v6958_v12, %v15940_v36  ;;  %v7105_v61 = vadd.f32 %v7069_v24, %v7065_v16  ;;  %v6810_v39 = vsel %vm1451_vm2, %v6808_v22, %v15942_v23  ;;  %v15943_v16 = vld [vmem:[#allocation96_spill] sm:$0xff] }
 0x51d   : > { %v14122_v9 = vmul.f32 0.11111111, %v7133_v43  ;;  %6073 = vmatprep.mubr.bf16.mxu0 %v15934_v14  ;;  %v14129_v42 = vmul.f32 0.11111111, %v7132_v44  ;;  %v7104_v43 = vadd.f32 %v7068_v50, %v7064_v63  ;;  %v6902_v14 = vadd.f32 %v9461_v6, %v6877_v1 }
 0x51e   : > { %v6959_v37 = vsel %vm1548_vm3, %v15938_v10, %v6958_v12  ;;  %v7073_v44 = vadd.f32 %v6961_v47, %v6903_v4  ;;  %v6965_v10 = vrot.slane %v9464_v59, 1  ;;  %v6907_v52 = vadd.f32 %v9464_v59, %v6810_v39 }
 0x51f   : > { %v7072_v29 = vadd.f32 %v6959_v37, %v6902_v14  ;;  %v6814_v36 = vrot.slane %v9465_v7, 7  ;;  %v15945_v59 = vrot.slane %v15944_v25, 7  ;;  %v15948_v37 = vld [vmem:[#allocation38_spill] sm:$0xff] }
 0x520   : > { %v7137_v33 = vadd.f32 %v7105_v61, %v7073_v44  ;;  %v15946_v61 = vld [vmem:[#allocation36_spill] sm:$0xff]  ;;  %v15949_v47 = vrot.slane %v15948_v37, 1 }
 0x521   : > { %v7136_v12 = vadd.f32 %v7104_v43, %v7072_v29  ;;  %v6878_v4 = vsel %vm1451_vm2, %v15945_v59, %v6808_v22  ;;  %v15947_v14 = vrot.slane %v15946_v61, 1  ;;  %v7108_v23 = vadd.f32 %v7072_v29, %v7068_v50  ;;  %v9466_v61 = vld [vmem:[%s9719_s25 + $0x108] sm:$0xff]  ;;  %v15956_v37 = vld [vmem:[#allocation44_spill] sm:$0xff] }
 0x522   : > { %8540 = vmatmul.mubr.msk.bf16.gmra.mrb[72].mxu1 %vm5511_vm6, %v13804_v60  ;;  %v14148_v63 = vmul.f32 0.11111111, %v7137_v33  ;;  %v6968_v43 = vsel %vm1548_vm3, %v6965_v10, %v15949_v47  ;;  %v6906_v33 = vadd.f32 %v9463_v15, %v6878_v4  ;;  %v6972_v62 = vrot.slane %v9466_v61, 1 }
 0x523   : > { %8543 = vmatprep.mubr.msk.bf16.mxu1 %vm5511_vm6, %v13817_v35  ;;  %v14155_v6 = vmul.f32 0.11111111, %v7136_v12  ;;  %v6966_v1 = vsel %vm1548_vm3, %v15947_v14, %v6965_v10  ;;  %v7077_v5 = vadd.f32 %v6968_v43, %v6907_v52  ;;  %v7109_v12 = vadd.f32 %v7073_v44, %v7069_v24 }
 0x524   : > { %6074 = vmatmul.mubr.bf16.gmra.mrb[124].mxu0 %v15943_v16  ;;  %v7076_v22 = vadd.f32 %v6966_v1, %v6906_v33  ;;  %v15957_v47 = vrot.slane %v15956_v37, 1 }
 0x525   : > { %6080 = vmatprep.mubr.bf16.mxu0 %v13739_v32  ;;  %v15950_v32 = vld [vmem:[#allocation43_spill] sm:$0xff]  ;;  %v7141_v59 = vadd.f32 %v7109_v12, %v7077_v5 }
 0x526   : > { %v15951_v16 = vrot.slane %v15950_v32, 7  ;;  %v7140_v10 = vadd.f32 %v7108_v23, %v7076_v22  ;;  %v15952_v32 = vld [vmem:[#allocation45_spill] sm:$0xff]  ;;  %v6975_v43 = vsel %vm1548_vm3, %v6972_v62, %v15957_v47  ;;  %v7112_v23 = vadd.f32 %v7076_v22, %v7072_v29 }
 0x527   : > { %v14174_v50 = vmul.f32 0.11111111, %v7141_v59  ;;  %v15953_v24 = vrot.slane %v15952_v32, 7  ;;  %v7113_v59 = vadd.f32 %v7077_v5, %v7073_v44  ;;  %v9467_v32 = vld [vmem:[%s9719_s25 + $0x120] sm:$0xff] }
 0x528   : > { %v6816_v25 = vsel %vm1451_vm2, %v6814_v36, %v15951_v16  ;;  %v14179_v52 = vmul.f32 0.11111111, %v7140_v10  ;;  %v15954_v16 = vld [vmem:[#allocation42_spill] sm:$0xff] }
 0x529   : > { %v6911_v14 = vadd.f32 %v9466_v61, %v6816_v25  ;;  %v6879_v15 = vsel %vm1451_vm2, %v15953_v24, %v6814_v36  ;;  %v15955_v4 = vrot.slane %v15954_v16, 1  ;;  %v9417_v61 = vld [vmem:[%s14892_s7 + $0x88] sm:$0xff]   ;;  %v6820_v24 = vrot.slane %v9467_v32, 7  ;;  %v9418_v44 = vld [vmem:[%s14892_s7 + $0x160] sm:$0xff]  }
 0x52a   : > { %8544 = vmatmul.mubr.msk.bf16.gmra.mrb[76].mxu1 %vm5511_vm6, %v13827_v21  ;;  %v6910_v12 = vadd.f32 %v9465_v7, %v6879_v15  ;;  %v9468_v16 = vld [vmem:[%s9719_s25 + $0x128] sm:$0xff]  ;;  %v15958_v7 = vld [vmem:[#allocation109_spill] sm:$0xff] }
 0x52b   : > { %6101 = vmatprep.mubr.bf16.mxu1 %v13809_v2  ;;  %v6973_v1 = vsel %vm1548_vm3, %v15955_v4, %v6972_v62  ;;  %v7081_v25 = vadd.f32 %v6975_v43, %v6911_v14  ;;  %v6979_v4 = vrot.slane %v9468_v16, 1  ;;  %v15959_v15 = vld [vmem:[#allocation47_spill] sm:$0xff] }
 0x52c   : > { %6081 = vmatmul.mubr.bf16.gmra.mrb[128].mxu0 %v13725_v28  ;;  %v7080_v36 = vadd.f32 %v6973_v1, %v6910_v12  ;;  %v15960_v1 = vrot.slane %v15959_v15, 7 }
 0x52d   : > { %6087 = vmatprep.mubr.bf16.mxu0 %v13751_v49  ;;  %v7145_v10 = vadd.f32 %v7113_v59, %v7081_v25 }
 0x52e   : > { %v7144_v62 = vadd.f32 %v7112_v23, %v7080_v36  ;;  %v6822_v37 = vsel %vm1451_vm2, %v6820_v24, %v15960_v1  ;;  %v15963_v23 = vld [vmem:[#allocation46_spill] sm:$0xff]  ;;  %v7117_v1 = vadd.f32 %v7081_v25, %v7077_v5  ;;  %v9421_v5 = vld [vmem:[%s14892_s7 + $0x128] sm:$0xff]  }
 0x52f   : > { %v14198_v29 = vmul.f32 0.11111111, %v7145_v10  ;;  %v15964_v12 = vrot.slane %v15963_v23, 1  ;;  %v15965_v10 = vld [vmem:[#allocation50_spill] sm:$0xff]  ;;  %v6915_v39 = vadd.f32 %v9468_v16, %v6822_v37 }
 0x530   : > { %v14207_v14 = vmul.f32 0.11111111, %v7144_v62 }
 0x531   : > { %v6980_v59 = vsel %vm1548_vm3, %v15964_v12, %v6979_v4 }
 0x532   : > { %6102 = vmatmul.mubr.bf16.vlgmr.msra.gmra.mrb[80].mxu1 %v13785_v54  ;;  %v7116_v54 = vadd.f32 %v7080_v36, %v7076_v22 }
 0x533   : > { %8548 = vmatpush3.bf16.msra.mxu1 %v14062_v57  ;;  %8551 = vmatprep.mubr.msk.bf16.mxu1 %vm5511_vm6, %v15958_v7  ;;  %v15961_v57 = vld [vmem:[#allocation51_spill] sm:$0xff]  ;;  %v15966_v7 = vrot.slane %v15965_v10, 1 }
 0x534   : > { %6088 = vmatmul.mubr.bf16.gmra.mrb[132].mxu0 %v13736_v20  ;;  %8549 = vmatprep.subr.bf16.mxu1 %v9417_v61  ;;  %v15962_v47 = vrot.slane %v15961_v57, 7  ;;  %v9420_v57 = vld [vmem:[%s14892_s7 + $0x168] sm:$0xff]  }
 0x535   : > { %6094 = vmatprep.mubr.bf16.mxu0 %v13788_v34  ;;  %v6982_v62 = vsel %vm1548_vm3, %v6979_v4, %v15966_v7  ;;  %v9469_v4 = vld [vmem:[%s9719_s25 + $0x140] sm:$0xff]  ;;  %v9470_v10 = vld [vmem:[%s9719_s25 + $0x148] sm:$0xff]  ;;  %s7633_s25 = sshll.u32 %s13888_s14, 4  ;;  %s14822_s25 = int_to_ptr.vmem [resolvable:$true] %s7633_s25 }
 0x536   : > { %v6880_v43 = vsel %vm1451_vm2, %v15962_v47, %v6820_v24  ;;  %v9419_v24 = vld [vmem:[%s14892_s7 + $0x120] sm:$0xff]   ;;  %v7085_v23 = vadd.f32 %v6982_v62, %v6915_v39  ;;  %v6826_v12 = vrot.slane %v9469_v4, 7  ;;  %v6986_v7 = vrot.slane %v9470_v10, 1  ;;  %v9422_v39 = vld [vmem:[%s14892_s7 + $0x170] sm:$0xff]   ;;  %s9471_s29 = scalar_lea.vmem %s14822_s25, 4096  ;;  %p9478_p2 = scmp.lt.s32.totalorder %s14822_s25, %s9476_s13 }
 0x537   : > { %v6914_v15 = vadd.f32 %v9467_v32, %v6880_v43  ;;  %8550 = vmatpush3.bf16.msra.mxu1 %v9417_v61  ;;  %p9472_p13 = scmp.ne.s32.totalorder %s14822_s25, %s9471_s29  ;;  %p9479_p4 = scmp.lt.s32.totalorder %s9477_s2, %s9471_s29 }
 0x538   : > { %8364 = vmatprep.subr.bf16.mxu1 %v9418_v44  ;;  %v7149_v61 = vadd.f32 %v7117_v1, %v7085_v23  ;;  %v15969_v44 = vld [vmem:[#allocation57_spill] sm:$0xff] }
 0x539   : > { %v7084_v47 = vadd.f32 %v6980_v59, %v6914_v15  ;;  %v15970_v37 = vrot.slane %v15969_v44, 7  ;;  %v15971_v59 = vld [vmem:[#allocation55_spill] sm:$0xff]  ;;  %v9424_v44 = vld [vmem:[%s14892_s7 + $0x178] sm:$0xff]   ;;  %p9473_p0 = pnand %p9472_p13, %p9685_p3  ;;  %p9480_p5 = por %p9479_p4, %p9478_p2 }
 0x53a   : > { %8552 = vmatmul.mubr.msk.bf16.vlgmr.msra.gmra.mrb[84].mxu1 %vm5511_vm6, %v13792_v0  ;;  %v14245_v0 = vmul.f32 0.11111111, %v7149_v61  ;;  %v15972_v62 = vrot.slane %v15971_v59, 1 }
 0x53b   : > { %v7148_v22 = vadd.f32 %v7116_v54, %v7084_v47  ;;  %8555 = vmatprep.mubr.msk.bf16.mxu1 %vm5511_vm6, %v13502_v40  ;;  %8365 = vmatpush3.bf16.msra.mxu1 %v9419_v24  ;;  %v15967_v40 = vld [vmem:[#allocation52_spill] sm:$0xff]  ;;  %v6881_v43 = vsel %vm1451_vm2, %v15970_v37, %v6826_v12  ;;  %p9474_p1 = pneg %p9473_p0 }
 0x53c   : > { %6095 = vmatmul.mubr.bf16.gmra.mrb[136].mxu0 %v13760_v26  ;;  %8366 = vmatprep.subr.bf16.mxu1 %v9420_v57  ;;  %v15968_v54 = vrot.slane %v15967_v40, 7  ;;  %v6987_v15 = vsel %vm1548_vm3, %v15972_v62, %v6986_v7  ;;  %v15973_v24 = vld [vmem:[#allocation56_spill] sm:$0xff]  ;;  %v6918_v61 = vadd.f32 %v9469_v4, %v6881_v43  ;;  %v7120_v40 = vadd.f32 %v7084_v47, %v7080_v36  ;;  %v9428_v62 = vld [vmem:[%s14892_s7 + $0x188] sm:$0xff]  }
 0x53d   : > { %v14243_v32 = vmul.f32 0.11111111, %v7148_v22  ;;  %8587 = vmatprep.mubr.msk.bf16.mxu0 %vm5511_vm6, %v13574_v27  ;;  %v15974_v1 = vrot.slane %v15973_v24, 1  ;;  %v9429_v24 = vld [vmem:[%s14892_s7 + $0x148] sm:$0xff]   ;;  %p9481_p6 = pnand %p9480_p5, %p9474_p1 }
 0x53e   : > { %v6828_v16 = vsel %vm1451_vm2, %v6826_v12, %v15968_v54  ;;  %v9423_v54 = vld [vmem:[%s14892_s7 + $0x130] sm:$0xff]   ;;  %v7121_v12 = vadd.f32 %v7085_v23, %v7081_v25  ;;  %v7088_v37 = vadd.f32 %v6987_v15, %v6918_v61  ;;  %v9425_v25 = vld [vmem:[%s14892_s7 + $0x138] sm:$0xff]  }
 0x53f   : > { %v6989_v57 = vsel %vm1548_vm3, %v6986_v7, %v15974_v1  ;;  %v7200_v22 = vpack.c.bf16 %v14245_v0, %v14243_v32  ;;  %v6919_v33 = vadd.f32 %v9470_v10, %v6828_v16  ;;  %8367 = vmatpush3.bf16.msra.mxu1 %v9421_v5  ;;  %v15975_v7 = vld [vmem:[#allocation110_spill] sm:$0xff]  ;;  %v9430_v1 = vld [vmem:[%s14892_s7 + $0x190] sm:$0xff]  }
 0x540   : > { %8368 = vmatprep.subr.bf16.mxu1 %v9422_v39  ;;  %v7261_v4 = vsel %vm834_vm0, %v15975_v7, 0  ;;  %v7152_v36 = vadd.f32 %v7120_v40, %v7088_v37  ;;  %v9427_v16 = vld [vmem:[%s14892_s7 + $0x140] sm:$0xff]   ;;  %v9431_v40 = vld [vmem:[%s14892_s7 + $0x150] sm:$0xff]  }
 0x541   : > { %v7089_v59 = vadd.f32 %v6989_v57, %v6919_v33 }
 0x542   : > { %8556 = vmatmul.mubr.msk.bf16.gmra.mrb[88].mxu1 %vm5511_vm6, %v13525_v46  ;;  %v9426_v46 = vld [vmem:[%s14892_s7 + $0x180] sm:$0xff]   ;;  %v14283_v33 = vmul.f32 0.11111111, %v7152_v36 }
 0x543   : > { %v7153_v47 = vadd.f32 %v7121_v12, %v7089_v59  ;;  %8559 = vmatprep.mubr.msk.bf16.mxu1 %vm5511_vm6, %v13574_v27  ;;  %8369 = vmatpush3.bf16.msra.mxu1 %v9423_v54  ;;  %v9432_v12 = vld [vmem:[%s14892_s7 + $0x198] sm:$0xff]  }
 0x544   : > { %8588 = vmatmul.mubr.msk.bf16.vlgmr.msra.gmra.mrb[140].mxu0 %vm5511_vm6, %v13591_v19  ;;  %8370 = vmatprep.subr.bf16.mxu1 %v9424_v44  ;;  %v8120_v10 = vpop.f32.mrb[240].mxu1  ;;  %v9433_v44 = vld [vmem:[%s14892_s7 + $0x158] sm:$0xff]  }
 0x545   : > { %v14285_v23 = vmul.f32 0.11111111, %v7153_v47  ;;  %8620 = vmatpush3.bf16.msra.mxu0 %v7261_v4  ;;  %8591 = vmatprep.mubr.msk.bf16.mxu0 %vm5511_vm6, %v13630_v53  ;;  %v8121_v27 = vpop.f32.mrb[241].mxu1 }
 0x546   : > { %v8123_v39 = vpop.f32.mrb[242].mxu1 }
 0x547   : > { %v7202_v5 = vpack.c.bf16 %v14285_v23, %v14283_v33  ;;  %8371 = vmatpush3.bf16.msra.mxu1 %v9425_v25  ;;  %v8124_v43 = vpop.f32.mrb[243].mxu1 }
 0x548   : > { %8372 = vmatprep.subr.bf16.mxu1 %v9426_v46  ;;  %v14297_v15 = vadd.f32 %v8124_v43, %v8123_v39  ;;  %v9291_v43 = vunpack.i.l.bf16 %v13838_v56 }
 0x54a   : > { %8560 = vmatmul.mubr.msk.bf16.gmra.mrb[92].mxu1 %vm5511_vm6, %v13591_v19 }
 0x54b   : > { %8563 = vmatprep.mubr.msk.bf16.mxu1 %vm5511_vm6, %v13630_v53  ;;  %8373 = vmatpush3.bf16.msra.mxu1 %v9427_v16  ;;  %v9292_v16 = vunpack.i.h.bf16 %v13838_v56 }
 0x54c   : > { %8592 = vmatmul.mubr.msk.bf16.gmra.mrb[144].mxu0 %vm5511_vm6, %v13642_v48  ;;  %8374 = vmatprep.subr.bf16.mxu1 %v9428_v62  ;;  %v8126_v57 = vpop.f32.mrb[244].mxu1 }
 0x54d   : > { %8595 = vmatprep.mubr.msk.bf16.mxu0 %vm5511_vm6, %v13676_v11  ;;  %v8127_v19 = vpop.f32.mrb[245].mxu1 }
 0x54e   : > { %v14313_v61 = vadd.f32 %v8127_v19, %v8126_v57  ;;  %v8129_v53 = vpop.f32.mrb[246].mxu1  ;;  %v9296_v57 = vunpack.i.l.bf16 %v13844_v55 }
 0x54f   : > { %8375 = vmatpush3.bf16.msra.mxu1 %v9429_v24  ;;  %v8130_v54 = vpop.f32.mrb[247].mxu1 }
 0x550   : > { %8376 = vmatprep.subr.bf16.mxu1 %v9430_v1 }
 0x552   : > { %8564 = vmatmul.mubr.msk.bf16.gmra.mrb[96].mxu1 %vm5511_vm6, %v13642_v48 }
 0x553   : > { %8567 = vmatprep.mubr.msk.bf16.mxu1 %vm5511_vm6, %v13676_v11  ;;  %8377 = vmatpush3.bf16.msra.mxu1 %v9431_v40 }
 0x554   : > { %8596 = vmatmul.mubr.msk.bf16.gmra.mrb[148].mxu0 %vm5511_vm6, %v13685_v3  ;;  %8378 = vmatprep.subr.bf16.mxu1 %v9432_v12  ;;  %v8132_v37 = vpop.f32.mrb[248].mxu1  ;;  %v15977_v12 = vpack.c.bf16 %v14079_v51, %v14077_v17  ;;  %v15983_v17 = vpack.c.bf16 %v14097_v13, %v14100_v41  ;;  %v15989_v13 = vpack.c.bf16 %v14122_v9, %v14129_v42 }
 0x555   : > { %8599 = vmatprep.mubr.msk.bf16.mxu0 %vm5511_vm6, %v13705_v8  ;;  %v8133_v59 = vpop.f32.mrb[249].mxu1  ;;  %v15995_v9 = vpack.c.bf16 %v14148_v63, %v14155_v6  ;;  %v16001_v6 = vpack.c.bf16 %v14174_v50, %v14179_v52  ;;  %v16007_v52 = vpack.c.bf16 %v14198_v29, %v14207_v14 }
 0x556   : > { %v8135_v7 = vpop.f32.mrb[250].mxu1 }
 0x557   : > { %8379 = vmatpush3.bf16.msra.mxu1 %v9433_v44  ;;  %v8136_v48 = vpop.f32.mrb[251].mxu1 }
 0x558   : > { %v14332_v4 = vadd.f32 %v8136_v48, %v8135_v7  ;;  %v15978_v48 = vld [vmem:[#allocation75_spill] sm:$0xff] }
 0x55a   : > { %8568 = vmatmul.mubr.msk.bf16.gmra.mrb[100].mxu1 %vm5511_vm6, %v13685_v3 }
 0x55b   : > { %8571 = vmatprep.mubr.msk.bf16.mxu1 %vm5511_vm6, %v13705_v8 }
 0x55c   : > { %8600 = vmatmul.mubr.msk.bf16.gmra.mrb[152].mxu0 %vm5511_vm6, %v13713_v31  ;;  %v8138_v11 = vpop.f32.mrb[252].mxu1 }
 0x55d   : > { %8603 = vmatprep.mubr.msk.bf16.mxu0 %vm5511_vm6, %v13733_v58  ;;  %v8139_v36 = vpop.f32.mrb[253].mxu1 }
 0x55e   : > { %v14342_v47 = vadd.f32 %v8139_v36, %v8138_v11  ;;  %v8141_v25 = vpop.f32.mrb[254].mxu1  ;;  %v15979_v11 = vld [vmem:[#allocation131_spill] sm:$0xff]  ;;  %v15981_v36 = vld [vmem:[#allocation22_spill] sm:$0xff] }
 0x55f   : > { %v8142_v46 = vpop.f32.mrb[255].mxu1 }
 0x562   : > { %8572 = vmatmul.mubr.msk.bf16.gmra.mrb[104].mxu1 %vm5511_vm6, %v13713_v31 }
 0x563   : > { %8575 = vmatprep.mubr.msk.bf16.mxu1 %vm5511_vm6, %v13733_v58 }
 0x564   : > { %8604 = vmatmul.mubr.msk.bf16.gmra.mrb[156].mxu0 %vm5511_vm6, %v13745_v45  ;;  %v8144_v3 = vpop.f32.mrb[0].mxu1 }
 0x565   : > { %8607 = vmatprep.mubr.msk.bf16.mxu0 %vm5511_vm6, %v13777_v30  ;;  %v8145_v8 = vpop.f32.mrb[1].mxu1 }
 0x566   : > { %v8147_v10 = vpop.f32.mrb[2].mxu1 }
 0x567   : > { %v8148_v27 = vpop.f32.mrb[3].mxu1 }
 0x568   : > { %v14352_v39 = vadd.f32 %v8148_v27, %v8147_v10  ;;  %v15984_v27 = vld [vmem:[#allocation114_spill] sm:$0xff] }
 0x56a   : > { %8576 = vmatmul.mubr.msk.bf16.gmra.mrb[108].mxu1 %vm5511_vm6, %v13745_v45  ;;  %v5399_v45 = vpack.c.bf16 %v9292_v16, %v9291_v43 }
 0x56b   : > { %8579 = vmatprep.mubr.msk.bf16.mxu1 %vm5511_vm6, %v13777_v30 }
 0x56c   : > { %8608 = vmatmul.mubr.msk.bf16.gmra.mrb[160].mxu0 %vm5511_vm6, %v13804_v60  ;;  %v8150_v31 = vpop.f32.mrb[4].mxu1 }
 0x56d   : > { %8611 = vmatprep.mubr.msk.bf16.mxu0 %vm5511_vm6, %v13817_v35  ;;  %v8151_v58 = vpop.f32.mrb[5].mxu1  ;;  %v9297_v35 = vunpack.i.h.bf16 %v13844_v55 }
 0x56e   : > { %v14364_v62 = vadd.f32 %v8151_v58, %v8150_v31  ;;  %v8153_v24 = vpop.f32.mrb[6].mxu1  ;;  %v15985_v31 = vld [vmem:[#allocation138_spill] sm:$0xff] }
 0x56f   : > { %v8154_v1 = vpop.f32.mrb[7].mxu1  ;;  %v15986_v58 = vld [vmem:[#allocation30_spill] sm:$0xff]  ;;  %v15987_v24 = vld [vmem:[#allocation29_spill] sm:$0xff] }
 0x570   : > { %v15988_v1 = vpack.c.bf16 %v15986_v58, %v15987_v24 }
 0x572   : > { %8580 = vmatmul.mubr.msk.bf16.gmra.mrb[112].mxu1 %vm5511_vm6, %v13804_v60 }
 0x573   : > { %6400 = vmatprep.mubr.bf16.mxu1 %v13580_v38  ;;  %v5402_v38 = vpack.c.bf16 %v9297_v35, %v9296_v57 }
 0x574   : > { %8612 = vmatmul.mubr.msk.bf16.gmra.mrb[164].mxu0 %vm5511_vm6, %v13827_v21  ;;  %v8156_v30 = vpop.f32.mrb[8].mxu1  ;;  %v15976_v21 = vld [vmem:[#allocation64_spill] sm:$0xff] }
 0x575   : > { %8615 = vmatprep.mubr.msk.bf16.mxu0 %vm5511_vm6, %v5399_v45  ;;  %v8157_v19 = vpop.f32.mrb[9].mxu1 }
 0x576   : > { %v8159_v53 = vpop.f32.mrb[10].mxu1 }
 0x577   : > { %v8160_v60 = vpop.f32.mrb[11].mxu1 }
 0x578   : > { %v14378_v40 = vadd.f32 %v8160_v60, %v8159_v53  ;;  %v15990_v60 = vld [vmem:[#allocation126_spill] sm:$0xff] }
 0x57a   : > { %6401 = vmatmul.mubr.bf16.vlgmr.msra.gmra.mrb[116].mxu1 %v13538_v18  ;;  %v15980_v18 = vld [vmem:[#allocation23_spill] sm:$0xff] }
 0x57b   : > { %6407 = vmatprep.mubr.bf16.mxu1 %v15976_v21  ;;  %v15982_v25 = vpack.c.bf16 %v15980_v18, %v15981_v36  ;;  %v15992_v21 = vld [vmem:[#allocation35_spill] sm:$0xff] }
 0x57c   : > { %8616 = vmatmul.mubr.msk.bf16.gmra.mrb[168].mxu0 %vm5511_vm6, %v5402_v38  ;;  %v8162_v54 = vpop.f32.mrb[12].mxu1  ;;  %v15991_v38 = vld [vmem:[#allocation150_spill] sm:$0xff]  ;;  %v15997_v18 = vld [vmem:[#allocation95_spill] sm:$0xff] }
 0x57d   : > { %8621 = vmatprep.mubr.msk.bf16.mxu0 %vm761_vm1, %v15977_v12  ;;  %v8163_v44 = vpop.f32.mrb[13].mxu1 }
 0x57e   : > { %v14391_v37 = vadd.f32 %v8163_v44, %v8162_v54  ;;  %v8165_v59 = vpop.f32.mrb[14].mxu1  ;;  %v15993_v54 = vld [vmem:[#allocation34_spill] sm:$0xff] }
 0x57f   : > { %v8166_v7 = vpop.f32.mrb[15].mxu1  ;;  %v15994_v12 = vpack.c.bf16 %v15992_v21, %v15993_v54 }
 0x582   : > { %6408 = vmatmul.mubr.bf16.gmra.mrb[120].mxu1 %v15978_v48 }
 0x583   : > { %6414 = vmatprep.mubr.bf16.mxu1 %v15979_v11  ;;  %v15996_v11 = vld [vmem:[#allocation143_spill] sm:$0xff] }
 0x584   : > { %8622 = vmatmul.mubr.msk.bf16.vlgmr.msra.gmra.mrb[172].mxu0 %vm761_vm1, %v15982_v25  ;;  %v8168_v46 = vpop.f32.mrb[16].mxu1 }
 0x585   : > { %8625 = vmatprep.mubr.msk.bf16.mxu0 %vm761_vm1, %v15983_v17  ;;  %v8169_v51 = vpop.f32.mrb[17].mxu1  ;;  %v15998_v46 = vld [vmem:[#allocation41_spill] sm:$0xff]  ;;  %v15999_v17 = vld [vmem:[#allocation40_spill] sm:$0xff] }
 0x586   : > { %v8171_v3 = vpop.f32.mrb[18].mxu1  ;;  %v16000_v51 = vpack.c.bf16 %v15998_v46, %v15999_v17 }
 0x587   : > { %v8172_v8 = vpop.f32.mrb[19].mxu1 }
 0x588   : > { %v14403_v10 = vadd.f32 %v8172_v8, %v8171_v3 }
 0x58a   : > { %6415 = vmatmul.mubr.bf16.gmra.mrb[124].mxu1 %v15984_v27 }
 0x58b   : > { %6421 = vmatprep.mubr.bf16.mxu1 %v15985_v31 }
 0x58c   : > { %8626 = vmatmul.mubr.msk.bf16.gmra.mrb[176].mxu0 %vm761_vm1, %v15988_v1  ;;  %v8174_v45 = vpop.f32.mrb[20].mxu1 }
 0x58d   : > { %8629 = vmatprep.mubr.msk.bf16.mxu0 %vm761_vm1, %v15989_v13  ;;  %v8175_v41 = vpop.f32.mrb[21].mxu1  ;;  %v16003_v13 = vld [vmem:[#allocation86_spill] sm:$0xff] }
 0x58e   : > { %v14415_v30 = vadd.f32 %v8175_v41, %v8174_v45  ;;  %v8177_v19 = vpop.f32.mrb[22].mxu1  ;;  %v16002_v45 = vld [vmem:[#allocation108_spill] sm:$0xff]  ;;  %v16004_v41 = vld [vmem:[#allocation49_spill] sm:$0xff] }
 0x58f   : > { %v8178_v53 = vpop.f32.mrb[23].mxu1  ;;  %v16005_v19 = vld [vmem:[#allocation48_spill] sm:$0xff] }
 0x590   : > { %v16006_v53 = vpack.c.bf16 %v16004_v41, %v16005_v19 }
 0x592   : > { %6422 = vmatmul.mubr.bf16.gmra.mrb[128].mxu1 %v15990_v60 }
 0x593   : > { %6428 = vmatprep.mubr.bf16.mxu1 %v15991_v38 }
 0x594   : > { %8630 = vmatmul.mubr.msk.bf16.gmra.mrb[180].mxu0 %vm761_vm1, %v15994_v12  ;;  %v8180_v44 = vpop.f32.mrb[24].mxu1 }
 0x595   : > { %8633 = vmatprep.mubr.msk.bf16.mxu0 %vm761_vm1, %v15995_v9  ;;  %v8181_v42 = vpop.f32.mrb[25].mxu1 }
 0x596   : > { %v8183_v59 = vpop.f32.mrb[26].mxu1 }
 0x597   : > { %v8184_v7 = vpop.f32.mrb[27].mxu1 }
 0x598   : > { %v14427_v48 = vadd.f32 %v8184_v7, %v8183_v59  ;;  %v16008_v7 = vld [vmem:[#allocation94_spill] sm:$0xff] }
 0x59a   : > { %6429 = vmatmul.mubr.bf16.gmra.mrb[132].mxu1 %v15996_v11  ;;  %v8250_v36 = vpop.f32.mrb[80].mxu0  ;;  %v16009_v11 = vld [vmem:[#allocation65_spill] sm:$0xff] }
 0x59b   : > { %6435 = vmatprep.mubr.bf16.mxu1 %v15997_v18  ;;  %v8251_v25 = vpop.f32.mrb[81].mxu0  ;;  %v16010_v18 = vld [vmem:[#allocation54_spill] sm:$0xff]  ;;  %v16011_v36 = vld [vmem:[#allocation53_spill] sm:$0xff] }
 0x59c   : > { %8634 = vmatmul.mubr.msk.bf16.gmra.mrb[184].mxu0 %vm761_vm1, %v16000_v51  ;;  %v8186_v3 = vpop.f32.mrb[28].mxu1  ;;  %v8253_v63 = vpop.f32.mrb[82].mxu0  ;;  %v16012_v25 = vpack.c.bf16 %v16010_v18, %v16011_v36 }
 0x59d   : > { %8637 = vmatprep.mubr.msk.bf16.mxu0 %vm761_vm1, %v16001_v6  ;;  %v8187_v8 = vpop.f32.mrb[29].mxu1  ;;  %v8254_v27 = vpop.f32.mrb[83].mxu0 }
 0x59e   : > { %v14439_v31 = vadd.f32 %v8187_v8, %v8186_v3  ;;  %v8189_v58 = vpop.f32.mrb[30].mxu1  ;;  %v14441_v24 = vadd.f32 %v8254_v27, %v8253_v63  ;;  %v16013_v27 = vld [vmem:[#allocation96_spill] sm:$0xff] }
 0x59f   : > { %v8190_v1 = vpop.f32.mrb[31].mxu1 }
 0x5a0   : > { %v16014_v1 = vld [vmem:[#allocation62_spill] sm:$0xff] }
 0x5a2   : > { %6436 = vmatmul.mubr.bf16.gmra.mrb[136].mxu1 %v16002_v45  ;;  %v16015_v45 = vld [vmem:[#allocation59_spill] sm:$0xff] }
 0x5a3   : > { %6442 = vmatprep.mubr.bf16.mxu1 %v16003_v13  ;;  %v16016_v13 = vld [vmem:[#allocation58_spill] sm:$0xff] }
 0x5a4   : > { %8638 = vmatmul.mubr.msk.bf16.gmra.mrb[188].mxu0 %vm761_vm1, %v16006_v53  ;;  %v8192_v50 = vpop.f32.mrb[32].mxu1  ;;  %v16017_v41 = vpack.c.bf16 %v16015_v45, %v16016_v13 }
 0x5a5   : > { %8641 = vmatprep.mubr.msk.bf16.mxu0 %vm761_vm1, %v16007_v52  ;;  %v8193_v60 = vpop.f32.mrb[33].mxu1  ;;  %v8256_v38 = vpop.f32.mrb[84].mxu0 }
 0x5a6   : > { %v8195_v21 = vpop.f32.mrb[34].mxu1  ;;  %v8257_v54 = vpop.f32.mrb[85].mxu0 }
 0x5a7   : > { %v8196_v12 = vpop.f32.mrb[35].mxu1  ;;  %v8258_v44 = vadd.f32 %v8257_v54, %v8256_v38  ;;  %v8259_v9 = vpop.f32.mrb[86].mxu0  ;;  %v16018_v54 = vld [vmem:[#allocation61_spill] sm:$0xff] }
 0x5a8   : > { %v14453_v42 = vadd.f32 %v8196_v12, %v8195_v21  ;;  %v8260_v59 = vpop.f32.mrb[87].mxu0  ;;  %v16019_v12 = vld [vmem:[#allocation60_spill] sm:$0xff] }
 0x5a9   : > { %v16020_v9 = vpack.c.bf16 %v16018_v54, %v16019_v12 }
 0x5aa   : > { %6443 = vmatmul.mubr.bf16.gmra.mrb[140].mxu1 %v16008_v7 }
 0x5ab   : > { %6449 = vmatprep.mubr.bf16.mxu1 %v16009_v11 }
 0x5ac   : > { %8642 = vmatmul.mubr.msk.bf16.gmra.mrb[192].mxu0 %vm761_vm1, %v16012_v25  ;;  %v8198_v29 = vpop.f32.mrb[36].mxu1 }
 0x5ad   : > { %8645 = vmatprep.mubr.msk.bf16.mxu0 %vm761_vm1, %v7200_v22  ;;  %v8199_v14 = vpop.f32.mrb[37].mxu1  ;;  %v8262_v46 = vpop.f32.mrb[88].mxu0 }
 0x5ae   : > { %v14465_v17 = vadd.f32 %v8199_v14, %v8198_v29  ;;  %v8201_v51 = vpop.f32.mrb[38].mxu1  ;;  %v8263_v3 = vpop.f32.mrb[89].mxu0 }
 0x5af   : > { %v8202_v63 = vpop.f32.mrb[39].mxu1  ;;  %v8265_v6 = vpop.f32.mrb[90].mxu0 }
 0x5b0   : > { %v8266_v8 = vpop.f32.mrb[91].mxu0 }
 0x5b1   : > { %v8267_v58 = vadd.f32 %v8266_v8, %v8265_v6 }
 0x5b2   : > { %6450 = vmatmul.mubr.bf16.gmra.mrb[144].mxu1 %v16013_v27 }
 0x5b3   : > { %6456 = vmatprep.mubr.bf16.mxu1 %v16014_v1 }
 0x5b4   : > { %8646 = vmatmul.mubr.msk.bf16.gmra.mrb[196].mxu0 %vm761_vm1, %v16017_v41  ;;  %v8204_v32 = vpop.f32.mrb[40].mxu1 }
 0x5b5   : > { %8649 = vmatprep.mubr.msk.bf16.mxu0 %vm761_vm1, %v7202_v5  ;;  %v8205_v0 = vpop.f32.mrb[41].mxu1  ;;  %v8268_v22 = vpop.f32.mrb[92].mxu0 }
 0x5b6   : > { %v8207_v19 = vpop.f32.mrb[42].mxu1  ;;  %v8269_v53 = vpop.f32.mrb[93].mxu0 }
 0x5b7   : > { %v8208_v50 = vpop.f32.mrb[43].mxu1  ;;  %v8270_v52 = vadd.f32 %v8269_v53, %v8268_v22  ;;  %v8271_v60 = vpop.f32.mrb[94].mxu0 }
 0x5b8   : > { %v14477_v38 = vadd.f32 %v8208_v50, %v8207_v19  ;;  %v8272_v21 = vpop.f32.mrb[95].mxu0  ;;  %v16022_v50 = vld [vmem:[#allocation123_spill] sm:$0xff] }
 0x5ba   : > { %6457 = vmatmul.mubr.bf16.gmra.mrb[148].mxu1 %v13725_v28 }
 0x5bb   : > { %6463 = vmatprep.mubr.bf16.mxu1 %v13751_v49 }
 0x5bc   : > { %8650 = vmatmul.mubr.msk.bf16.gmra.mrb[200].mxu0 %vm761_vm1, %v16020_v9  ;;  %v8210_v33 = vpop.f32.mrb[44].mxu1 }
 0x5bd   : > { %v8211_v23 = vpop.f32.mrb[45].mxu1  ;;  %v8274_v5 = vpop.f32.mrb[96].mxu0 }
 0x5be   : > { %v14485_v59 = vadd.f32 %v8211_v23, %v8210_v33  ;;  %v8213_v7 = vpop.f32.mrb[46].mxu1  ;;  %v8275_v11 = vpop.f32.mrb[97].mxu0 }
 0x5bf   : > { %v8214_v18 = vpop.f32.mrb[47].mxu1  ;;  %v8277_v36 = vpop.f32.mrb[98].mxu0  ;;  %v16023_v11 = vld [vmem:[#allocation97_spill] sm:$0xff] }
 0x5c0   : > { %v8278_v25 = vpop.f32.mrb[99].mxu0  ;;  %v16024_v18 = vld [vmem:[#allocation100_spill] sm:$0xff] }
 0x5c1   : > { %v8279_v28 = vadd.f32 %v8278_v25, %v8277_v36 }
 0x5c2   : > { %6464 = vmatmul.mubr.bf16.gmra.mrb[152].mxu1 %v13736_v20 }
 0x5c3   : > { %6470 = vmatprep.mubr.bf16.mxu1 %v13788_v34 }
 0x5c4   : > { %v8517_v49 = vpop.f32.mrb[48].mxu1 }
 0x5c5   : > { %v5747_v29 = vadd.f32 %v8517_v49, %v14313_v61  ;;  %v5739_v14 = vpop.f32.mrb[49].mxu1  ;;  %v8280_v46 = vpop.f32.mrb[100].mxu0 }
 0x5c6   : > { %v8518_v51 = vpop.f32.mrb[50].mxu1  ;;  %v8281_v3 = vpop.f32.mrb[101].mxu0 }
 0x5c7   : > { %v5741_v63 = vpop.f32.mrb[51].mxu1  ;;  %v8282_v6 = vadd.f32 %v8281_v3, %v8280_v46  ;;  %v8283_v8 = vpop.f32.mrb[102].mxu0  ;;  %v14490_v27 = vadd.f32 %v8258_v44, %v5747_v29  ;;  %v16025_v29 = vld [vmem:[#allocation134_spill] sm:$0xff] }
 0x5c8   : > { %v5742_v1 = vadd.f32 %v14297_v15, %v5741_v63  ;;  %v8284_v45 = vpop.f32.mrb[103].mxu0  ;;  %v16026_v14 = vunpack.i.l.bf16 %v16025_v29 }
 0x5ca   : > { %6471 = vmatmul.mubr.bf16.gmra.mrb[156].mxu1 %v13760_v26  ;;  %v14496_v20 = vadd.f32 %v14441_v24, %v5742_v1  ;;  %v16021_v26 = vld [vmem:[#allocation63_spill] sm:$0xff]  ;;  %v5339_v46 = vsel %vm1981_vm7, %v16026_v14, %v9291_v43 }
 0x5cb   : > { %6477 = vmatprep.mubr.bf16.mxu1 %v13809_v2 }
 0x5cc   : > { %v8521_v34 = vpop.f32.mrb[52].mxu1 }
 0x5cd   : > { %v5761_v61 = vadd.f32 %v8521_v34, %v14342_v47  ;;  %v5753_v13 = vpop.f32.mrb[53].mxu1  ;;  %v8286_v41 = vpop.f32.mrb[104].mxu0  ;;  %v16028_v34 = vld [vmem:[#allocation120_spill] sm:$0xff] }
 0x5ce   : > { %v8522_v32 = vpop.f32.mrb[54].mxu1  ;;  %v8287_v0 = vpop.f32.mrb[105].mxu0 }
 0x5cf   : > { %v5755_v22 = vpop.f32.mrb[55].mxu1  ;;  %v8289_v44 = vpop.f32.mrb[106].mxu0  ;;  %v14499_v19 = vadd.f32 %v8270_v52, %v5761_v61  ;;  %v16029_v32 = vld [vmem:[#allocation125_spill] sm:$0xff] }
 0x5d0   : > { %v5756_v15 = vadd.f32 %v14332_v4, %v5755_v22  ;;  %v8290_v53 = vpop.f32.mrb[107].mxu0  ;;  %v16030_v0 = vunpack.i.l.bf16 %v16029_v32 }
 0x5d1   : > { %v8291_v2 = vadd.f32 %v8290_v53, %v8289_v44 }
 0x5d2   : > { %6478 = vmatmul.mubr.bf16.gmra.mrb[160].mxu1 %v16021_v26  ;;  %v14504_v24 = vadd.f32 %v8267_v58, %v5756_v15  ;;  %v5341_v22 = vsel %vm1981_vm7, %v16030_v0, %v9296_v57 }
 0x5d3   : > { %6484 = vmatprep.mubr.bf16.mxu1 %v16022_v50 }
 0x5d4   : > { %v8525_v60 = vpop.f32.mrb[56].mxu1 }
 0x5d5   : > { %v5775_v47 = vadd.f32 %v8525_v60, %v14364_v62  ;;  %v5767_v21 = vpop.f32.mrb[57].mxu1  ;;  %v8292_v54 = vpop.f32.mrb[108].mxu0 }
 0x5d6   : > { %v8526_v12 = vpop.f32.mrb[58].mxu1  ;;  %v8293_v9 = vpop.f32.mrb[109].mxu0  ;;  %v16032_v21 = vld [vmem:[#allocation133_spill] sm:$0xff] }
 0x5d7   : > { %v5769_v33 = vpop.f32.mrb[59].mxu1  ;;  %v8294_v52 = vadd.f32 %v8293_v9, %v8292_v54  ;;  %v8295_v23 = vpop.f32.mrb[110].mxu0  ;;  %v14507_v5 = vadd.f32 %v8282_v6, %v5775_v47  ;;  %v16033_v54 = vld [vmem:[#allocation121_spill] sm:$0xff] }
 0x5d8   : > { %v5770_v4 = vadd.f32 %v14352_v39, %v5769_v33  ;;  %v8296_v7 = vpop.f32.mrb[111].mxu0  ;;  %v16027_v39 = vunpack.i.h.bf16 %v16025_v29  ;;  %v16034_v12 = vpack.c.bf16 %v16032_v21, %v16033_v54 }
 0x5da   : > { %6485 = vmatmul.mubr.bf16.gmra.mrb[164].mxu1 %v16023_v11  ;;  %v14512_v58 = vadd.f32 %v8279_v28, %v5770_v4  ;;  %v5340_v51 = vsel %vm1981_vm7, %v16027_v39, %v9292_v16 }
 0x5db   : > { %6491 = vmatprep.mubr.bf16.mxu1 %v16024_v18  ;;  %v5398_v1 = vpack.c.bf16 %v5340_v51, %v5339_v46 }
 0x5dc   : > { %v8529_v36 = vpop.f32.mrb[60].mxu1 }
 0x5dd   : > { %v5789_v62 = vadd.f32 %v8529_v36, %v14391_v37  ;;  %v5781_v25 = vpop.f32.mrb[61].mxu1  ;;  %v16035_v36 = vld [vmem:[#allocation137_spill] sm:$0xff] }
 0x5de   : > { %v8530_v3 = vpop.f32.mrb[62].mxu1 }
 0x5df   : > { %v8298_v49 = vpop.f32.mrb[112].mxu0  ;;  %v5783_v63 = vpop.f32.mrb[63].mxu1  ;;  %v14525_v8 = vadd.f32 %v8294_v52, %v5789_v62  ;;  %v16036_v62 = vld [vmem:[#allocation145_spill] sm:$0xff] }
 0x5e0   : > { %v8299_v28 = vpop.f32.mrb[113].mxu0  ;;  %v5784_v37 = vadd.f32 %v14378_v40, %v5783_v63  ;;  %v16031_v40 = vunpack.i.h.bf16 %v16029_v32  ;;  %v16037_v25 = vpack.c.bf16 %v16035_v36, %v16036_v62 }
 0x5e1   : > { %v8301_v6 = vpop.f32.mrb[114].mxu0 }
 0x5e2   : > { %v8302_v45 = vpop.f32.mrb[115].mxu0  ;;  %6492 = vmatmul.mubr.bf16.gmra.mrb[168].mxu1 %v16028_v34  ;;  %v14529_v43 = vadd.f32 %v8291_v2, %v5784_v37  ;;  %v5342_v44 = vsel %vm1981_vm7, %v16031_v40, %v9297_v35 }
 0x5e3   : > { %v8303_v61 = vadd.f32 %v8302_v45, %v8301_v6  ;;  %6498 = vmatprep.mubr.bf16.mxu1 %v5398_v1  ;;  %v5401_v60 = vpack.c.bf16 %v5342_v44, %v5341_v22 }
 0x5e5   : > { %v8533_v56 = vpop.f32.mrb[64].mxu1 }
 0x5e6   : > { %v5803_v13 = vadd.f32 %v8533_v56, %v14415_v30  ;;  %v5795_v16 = vpop.f32.mrb[65].mxu1 }
 0x5e7   : > { %v8304_v41 = vpop.f32.mrb[116].mxu0  ;;  %v8534_v15 = vpop.f32.mrb[66].mxu1 }
 0x5e8   : > { %v8305_v53 = vpop.f32.mrb[117].mxu0  ;;  %v5797_v26 = vpop.f32.mrb[67].mxu1 }
 0x5e9   : > { %v8306_v2 = vadd.f32 %v8305_v53, %v8304_v41  ;;  %v8307_v50 = vpop.f32.mrb[118].mxu0  ;;  %v5798_v30 = vadd.f32 %v14403_v10, %v5797_v26 }
 0x5ea   : > { %v8308_v47 = vpop.f32.mrb[119].mxu0  ;;  %6499 = vmatmul.mubr.bf16.gmra.mrb[172].mxu1 %v16034_v12 }
 0x5eb   : > { %v14546_v57 = vadd.f32 %v8306_v2, %v5803_v13  ;;  %6505 = vmatprep.mubr.bf16.mxu1 %v5401_v60  ;;  %v14548_v55 = vadd.f32 %v8303_v61, %v5798_v30 }
 0x5ed   : > { %v8537_v9 = vpop.f32.mrb[68].mxu1 }
 0x5ee   : > { %v5817_v35 = vadd.f32 %v8537_v9, %v14439_v31  ;;  %v5809_v33 = vpop.f32.mrb[69].mxu1 }
 0x5ef   : > { %v8310_v52 = vpop.f32.mrb[120].mxu0  ;;  %v8538_v23 = vpop.f32.mrb[70].mxu1 }
 0x5f0   : > { %v8311_v4 = vpop.f32.mrb[121].mxu0  ;;  %v5811_v7 = vpop.f32.mrb[71].mxu1 }
 0x5f1   : > { %v8313_v10 = vpop.f32.mrb[122].mxu0  ;;  %v5812_v11 = vadd.f32 %v14427_v48, %v5811_v7 }
 0x5f2   : > { %v8314_v18 = vpop.f32.mrb[123].mxu0  ;;  %6506 = vmatmul.mubr.bf16.gmra.mrb[176].mxu1 %v16037_v25 }
 0x5f3   : > { %v8315_v49 = vadd.f32 %v8314_v18, %v8313_v10 }
 0x5f5   : > { %v14555_v29 = vadd.f32 %v8315_v49, %v5812_v11  ;;  %v8541_v14 = vpop.f32.mrb[72].mxu1 }
 0x5f6   : > { %v5831_v46 = vadd.f32 %v8541_v14, %v14465_v17  ;;  %v5823_v31 = vpop.f32.mrb[73].mxu1 }
 0x5f7   : > { %v8316_v39 = vpop.f32.mrb[124].mxu0  ;;  %v8542_v51 = vpop.f32.mrb[74].mxu1 }
 0x5f8   : > { %v8317_v3 = vpop.f32.mrb[125].mxu0  ;;  %v5825_v28 = vpop.f32.mrb[75].mxu1 }
 0x5f9   : > { %v8318_v63 = vadd.f32 %v8317_v3, %v8316_v39  ;;  %v8319_v6 = vpop.f32.mrb[126].mxu0  ;;  %v5826_v48 = vadd.f32 %v14453_v42, %v5825_v28 }
 0x5fa   : > { %v8320_v37 = vpop.f32.mrb[127].mxu0 }
 0x5fb   : > { %v14559_v1 = vadd.f32 %v8318_v63, %v5817_v35 }
 0x5fd   : > { %v8545_v45 = vpop.f32.mrb[76].mxu1 }
 0x5fe   : > { %v5845_v34 = vadd.f32 %v8545_v45, %v14485_v59  ;;  %v5837_v61 = vpop.f32.mrb[77].mxu1 }
 0x5ff   : > { %v8322_v56 = vpop.f32.mrb[128].mxu0  ;;  %v8546_v13 = vpop.f32.mrb[78].mxu1 }
 0x600   : > { %v8323_v16 = vpop.f32.mrb[129].mxu0  ;;  %v5839_v17 = vpop.f32.mrb[79].mxu1 }
 0x601   : > { %v8325_v41 = vpop.f32.mrb[130].mxu0  ;;  %v5840_v32 = vadd.f32 %v14477_v38, %v5839_v17 }
 0x602   : > { %v8326_v0 = vpop.f32.mrb[131].mxu0 }
 0x603   : > { %v8327_v22 = vadd.f32 %v8326_v0, %v8325_v41 }
 0x605   : > { %v14563_v40 = vadd.f32 %v8327_v22, %v5826_v48  ;;  %v8340_v44 = vpop.f32.mrb[80].mxu1 }
 0x606   : > { %v8341_v42 = vpop.f32.mrb[81].mxu1 }
 0x607   : > { %v8342_v15 = vadd.f32 %v8341_v42, %v8340_v44  ;;  %v8343_v53 = vpop.f32.mrb[82].mxu1  ;;  %v8328_v26 = vpop.f32.mrb[132].mxu0 }
 0x608   : > { %v8344_v2 = vpop.f32.mrb[83].mxu1  ;;  %v8329_v50 = vpop.f32.mrb[133].mxu0 }
 0x609   : > { %v8330_v59 = vadd.f32 %v8329_v50, %v8328_v26  ;;  %v8331_v30 = vpop.f32.mrb[134].mxu0  ;;  %v14565_v60 = vadd.f32 %v8342_v15, %v5845_v34 }
 0x60a   : > { %v8332_v47 = vpop.f32.mrb[135].mxu0 }
 0x60b   : > { %v14567_v21 = vadd.f32 %v8330_v59, %v5831_v46 }
 0x60d   : > { %v8553_v54 = vpop.f32.mrb[84].mxu1 }
 0x60e   : > { %v14570_v38 = vadd.f32 %v8553_v54, %v14490_v27  ;;  %v6143_v12 = vpop.f32.mrb[85].mxu1 }
 0x60f   : > { %v8554_v9 = vpop.f32.mrb[86].mxu1  ;;  %v8334_v35 = vpop.f32.mrb[136].mxu0 }
 0x610   : > { %v6145_v33 = vpop.f32.mrb[87].mxu1  ;;  %v8335_v52 = vpop.f32.mrb[137].mxu0 }
 0x611   : > { %v14573_v23 = vadd.f32 %v6145_v33, %v14496_v20  ;;  %v8337_v4 = vpop.f32.mrb[138].mxu0 }
 0x612   : > { %v8338_v7 = vpop.f32.mrb[139].mxu0 }
 0x613   : > { %v8339_v10 = vadd.f32 %v8338_v7, %v8337_v4 }
 0x615   : > { %v8557_v11 = vpop.f32.mrb[88].mxu1  ;;  %v14575_v18 = vadd.f32 %v8339_v10, %v5840_v32 }
 0x616   : > { %v14578_v36 = vadd.f32 %v8557_v11, %v14499_v19  ;;  %v6157_v62 = vpop.f32.mrb[89].mxu1 }
 0x617   : > { %v8558_v27 = vpop.f32.mrb[90].mxu1  ;;  %v14580_v25 = vpop.f32.mrb[140].mxu0 }
 0x618   : > { %v6159_v49 = vpop.f32.mrb[91].mxu1  ;;  %v6547_v14 = vpop.f32.mrb[141].mxu0 }
 0x619   : > { %v14583_v46 = vadd.f32 %v6159_v49, %v14504_v24  ;;  %v8590_v20 = vpop.f32.mrb[142].mxu0 }
 0x61a   : > { %v14585_v31 = vpop.f32.mrb[143].mxu0 }
 0x61d   : > { %v8561_v39 = vpop.f32.mrb[92].mxu1 }
 0x61e   : > { %v14588_v51 = vadd.f32 %v8561_v39, %v14507_v5  ;;  %v6171_v3 = vpop.f32.mrb[93].mxu1 }
 0x61f   : > { %v8562_v28 = vpop.f32.mrb[94].mxu1  ;;  %v14590_v19 = vpop.f32.mrb[144].mxu0 }
 0x620   : > { %v6173_v63 = vpop.f32.mrb[95].mxu1  ;;  %v6561_v6 = vpop.f32.mrb[145].mxu0 }
 0x621   : > { %v14593_v48 = vadd.f32 %v6173_v63, %v14512_v58  ;;  %v8594_v37 = vpop.f32.mrb[146].mxu0 }
 0x622   : > { %v14595_v45 = vpop.f32.mrb[147].mxu0 }
 0x625   : > { %v8565_v24 = vpop.f32.mrb[96].mxu1 }
 0x626   : > { %v14598_v34 = vadd.f32 %v8565_v24, %v14525_v8  ;;  %v6185_v61 = vpop.f32.mrb[97].mxu1 }
 0x627   : > { %v8566_v56 = vpop.f32.mrb[98].mxu1  ;;  %v14600_v5 = vpop.f32.mrb[148].mxu0 }
 0x628   : > { %v6187_v13 = vpop.f32.mrb[99].mxu1  ;;  %v6575_v16 = vpop.f32.mrb[149].mxu0 }
 0x629   : > { %v14603_v17 = vadd.f32 %v6187_v13, %v14529_v43  ;;  %v8598_v41 = vpop.f32.mrb[150].mxu0 }
 0x62a   : > { %v14605_v32 = vpop.f32.mrb[151].mxu0 }
 0x62d   : > { %v8569_v58 = vpop.f32.mrb[100].mxu1 }
 0x62e   : > { %v14608_v0 = vadd.f32 %v8569_v58, %v14546_v57  ;;  %v6199_v22 = vpop.f32.mrb[101].mxu1 }
 0x62f   : > { %v8570_v44 = vpop.f32.mrb[102].mxu1  ;;  %v14610_v8 = vpop.f32.mrb[152].mxu0 }
 0x630   : > { %v6201_v42 = vpop.f32.mrb[103].mxu1  ;;  %v6589_v15 = vpop.f32.mrb[153].mxu0  ;;  %v14658_v44 = vld [vmem:[%s14895_s10] ss:$0 sm:$0xff] }
 0x631   : > { %v14613_v53 = vadd.f32 %v6201_v42, %v14548_v55  ;;  %v8602_v26 = vpop.f32.mrb[154].mxu0 }
 0x632   : > { %v14615_v2 = vpop.f32.mrb[155].mxu0 }
 0x635   : > { %v8573_v43 = vpop.f32.mrb[104].mxu1 }
 0x636   : > { %v14618_v50 = vadd.f32 %v8573_v43, %v14559_v1  ;;  %v6213_v59 = vpop.f32.mrb[105].mxu1 }
 0x637   : > { %v8574_v30 = vpop.f32.mrb[106].mxu1  ;;  %v14620_v57 = vpop.f32.mrb[156].mxu0 }
 0x638   : > { %v6215_v47 = vpop.f32.mrb[107].mxu1  ;;  %v6603_v54 = vpop.f32.mrb[157].mxu0 }
 0x639   : > { %v14623_v12 = vadd.f32 %v6215_v47, %v14555_v29  ;;  %v8606_v9 = vpop.f32.mrb[158].mxu0 }
 0x63a   : > { %v14625_v35 = vpop.f32.mrb[159].mxu0 }
 0x63d   : > { %v8577_v55 = vpop.f32.mrb[108].mxu1 }
 0x63e   : > { %v14628_v33 = vadd.f32 %v8577_v55, %v14567_v21  ;;  %v6227_v52 = vpop.f32.mrb[109].mxu1 }
 0x63f   : > { %v8578_v4 = vpop.f32.mrb[110].mxu1  ;;  %v14630_v1 = vpop.f32.mrb[160].mxu0 }
 0x640   : > { %v6229_v7 = vpop.f32.mrb[111].mxu1  ;;  %v6617_v10 = vpop.f32.mrb[161].mxu0 }
 0x641   : > { %v14633_v11 = vadd.f32 %v6229_v7, %v14563_v40  ;;  %v8610_v62 = vpop.f32.mrb[162].mxu0 }
 0x642   : > { %v14635_v27 = vpop.f32.mrb[163].mxu0 }
 0x645   : > { %v8581_v29 = vpop.f32.mrb[112].mxu1 }
 0x646   : > { %v14638_v49 = vadd.f32 %v8581_v29, %v14565_v60  ;;  %v6241_v14 = vpop.f32.mrb[113].mxu1 }
 0x647   : > { %v8582_v20 = vpop.f32.mrb[114].mxu1  ;;  %v14640_v21 = vpop.f32.mrb[164].mxu0 }
 0x648   : > { %v6243_v39 = vpop.f32.mrb[115].mxu1  ;;  %v6631_v3 = vpop.f32.mrb[165].mxu0 }
 0x649   : > { %v14643_v28 = vadd.f32 %v6243_v39, %v14575_v18  ;;  %v8614_v63 = vpop.f32.mrb[166].mxu0 }
 0x64a   : > { %v14645_v6 = vpop.f32.mrb[167].mxu0 }
 0x64d   : > { %v8380_v40 = vpop.f32.mrb[116].mxu1 }
 0x64e   : > { %v8381_v37 = vpop.f32.mrb[117].mxu1 }
 0x64f   : > { %v8383_v24 = vpop.f32.mrb[118].mxu1  ;;  %v14647_v61 = vpop.f32.mrb[168].mxu0 }
 0x650   : > { %v8384_v56 = vpop.f32.mrb[119].mxu1  ;;  %v6645_v60 = vpop.f32.mrb[169].mxu0 }
 0x651   : > { %v8385_v13 = vadd.f32 %v8384_v56, %v8383_v24  ;;  %v8618_v16 = vpop.f32.mrb[170].mxu0 }
 0x652   : > { %v14649_v41 = vpop.f32.mrb[171].mxu0 }
 0x653   : > { %v6550_v58 = vadd.f32 %v8385_v13, %v14585_v31 }
 0x655   : > { %v14653_v22 = vadd.f32 %v6550_v58, %v14573_v23  ;;  %v8386_v18 = vpop.f32.mrb[120].mxu1 }
 0x656   : > { %v8387_v42 = vpop.f32.mrb[121].mxu1 }
 0x657   : > { %v8388_v15 = vadd.f32 %v8387_v42, %v8386_v18  ;;  %v8389_v26 = vpop.f32.mrb[122].mxu1  ;;  %v8623_v43 = vpop.f32.mrb[172].mxu0 }
 0x658   : > { %v8390_v59 = vpop.f32.mrb[123].mxu1  ;;  %v7305_v30 = vadd.f32 %v8623_v43, %v14658_v44  ;;  %v7297_v47 = vpop.f32.mrb[173].mxu0 }
 0x659   : > { %v6555_v54 = vadd.f32 %v14580_v25, %v8388_v15  ;;  %v8624_v31 = vpop.f32.mrb[174].mxu0 }
 0x65a   : > { %v7409_v9 = vmax.f32 %v7305_v30, 0.0  ;;  %v7299_v23 = vpop.f32.mrb[175].mxu0 }
 0x65b   : > { %v14663_v55 = vadd.f32 %v6555_v54, %v14570_v38  ;;  %v7300_v52 = vadd.f32 %v14658_v44, %v7299_v23 }
 0x65c   : > { %7506 = vrot.lane.b32.xlu1 %v7409_v9, %s9570_s0 }
 0x65d   : > { %v7408_v4 = vmax.f32 %v7300_v52, 0.0  ;;  %v8392_v7 = vpop.f32.mrb[124].mxu1 }
 0x65e   : > { %v8393_v10 = vpop.f32.mrb[125].mxu1 }
 0x65f   : > { %v8395_v62 = vpop.f32.mrb[126].mxu1  ;;  %v8627_v29 = vpop.f32.mrb[176].mxu0  ;;  %7504 = vrot.lane.b32.xlu0 %v7408_v4, %s9570_s0 }
 0x660   : > { %v8396_v14 = vpop.f32.mrb[127].mxu1  ;;  %v7319_v25 = vadd.f32 %v8627_v29, %v14658_v44  ;;  %v7311_v20 = vpop.f32.mrb[177].mxu0 }
 0x661   : > { %v8397_v39 = vadd.f32 %v8396_v14, %v8395_v62  ;;  %v8628_v3 = vpop.f32.mrb[178].mxu0 }
 0x662   : > { %v7411_v63 = vmax.f32 %v7319_v25, 0.0  ;;  %v7313_v38 = vpop.f32.mrb[179].mxu0 }
 0x663   : > { %v6564_v40 = vadd.f32 %v8397_v39, %v14595_v45  ;;  %v7314_v37 = vadd.f32 %v14658_v44, %v7313_v38 }
 0x664   : > { %7510 = vrot.lane.b32.xlu1 %v7411_v63, %s9570_s0 }
 0x665   : > { %v14673_v24 = vadd.f32 %v6564_v40, %v14583_v46  ;;  %v7410_v56 = vmax.f32 %v7314_v37, 0.0  ;;  %v8398_v60 = vpop.f32.mrb[128].mxu1 }
 0x666   : > { %v8399_v13 = vpop.f32.mrb[129].mxu1 }
 0x667   : > { %v8400_v16 = vadd.f32 %v8399_v13, %v8398_v60  ;;  %v8401_v58 = vpop.f32.mrb[130].mxu1  ;;  %v8631_v18 = vpop.f32.mrb[180].mxu0  ;;  %7508 = vrot.lane.b32.xlu0 %v7410_v56, %s9570_s0 }
 0x668   : > { %v8402_v42 = vpop.f32.mrb[131].mxu1  ;;  %v7333_v15 = vadd.f32 %v8631_v18, %v14658_v44  ;;  %v7325_v26 = vpop.f32.mrb[181].mxu0 }
 0x669   : > { %v6569_v45 = vadd.f32 %v14590_v19, %v8400_v16  ;;  %v8632_v43 = vpop.f32.mrb[182].mxu0 }
 0x66a   : > { %v7413_v59 = vmax.f32 %v7333_v15, 0.0  ;;  %v7327_v30 = vpop.f32.mrb[183].mxu0 }
 0x66b   : > { %v14679_v46 = vadd.f32 %v6569_v45, %v14578_v36  ;;  %v7328_v47 = vadd.f32 %v14658_v44, %v7327_v30 }
 0x66c   : > { %7514 = vrot.lane.b32.xlu1 %v7413_v59, %s9570_s0 }
 0x66d   : > { %v7412_v54 = vmax.f32 %v7328_v47, 0.0  ;;  %v8404_v31 = vpop.f32.mrb[132].mxu1 }
 0x66e   : > { %v8405_v9 = vpop.f32.mrb[133].mxu1 }
 0x66f   : > { %v8407_v23 = vpop.f32.mrb[134].mxu1  ;;  %v8635_v52 = vpop.f32.mrb[184].mxu0  ;;  %7512 = vrot.lane.b32.xlu0 %v7412_v54, %s9570_s0 }
 0x670   : > { %v8408_v4 = vpop.f32.mrb[135].mxu1  ;;  %v7347_v19 = vadd.f32 %v8635_v52, %v14658_v44  ;;  %v7339_v7 = vpop.f32.mrb[185].mxu0 }
 0x671   : > { %v8409_v10 = vadd.f32 %v8408_v4, %v8407_v23  ;;  %v8636_v62 = vpop.f32.mrb[186].mxu0 }
 0x672   : > { %v7415_v29 = vmax.f32 %v7347_v19, 0.0  ;;  %v7341_v36 = vpop.f32.mrb[187].mxu0 }
 0x673   : > { %v6578_v14 = vadd.f32 %v8409_v10, %v14605_v32  ;;  %v7342_v25 = vadd.f32 %v14658_v44, %v7341_v36 }
 0x674   : > { %7518 = vrot.lane.b32.xlu1 %v7415_v29, %s9570_s0 }
 0x675   : > { %v14689_v20 = vadd.f32 %v6578_v14, %v14593_v48  ;;  %v7414_v39 = vmax.f32 %v7342_v25, 0.0  ;;  %v8410_v3 = vpop.f32.mrb[136].mxu1 }
 0x676   : > { %v8411_v63 = vpop.f32.mrb[137].mxu1 }
 0x677   : > { %v8412_v38 = vadd.f32 %v8411_v63, %v8410_v3  ;;  %v8413_v40 = vpop.f32.mrb[138].mxu1  ;;  %v8639_v37 = vpop.f32.mrb[188].mxu0  ;;  %7516 = vrot.lane.b32.xlu0 %v7414_v39, %s9570_s0 }
 0x678   : > { %v8414_v56 = vpop.f32.mrb[139].mxu1  ;;  %v7361_v60 = vadd.f32 %v8639_v37, %v14658_v44  ;;  %v7353_v13 = vpop.f32.mrb[189].mxu0 }
 0x679   : > { %v6583_v32 = vadd.f32 %v14600_v5, %v8412_v38  ;;  %v8640_v16 = vpop.f32.mrb[190].mxu0 }
 0x67a   : > { %v7417_v58 = vmax.f32 %v7361_v60, 0.0  ;;  %v7355_v18 = vpop.f32.mrb[191].mxu0 }
 0x67b   : > { %v14695_v48 = vadd.f32 %v6583_v32, %v14588_v51  ;;  %v7356_v42 = vadd.f32 %v14658_v44, %v7355_v18 }
 0x67c   : > { %7522 = vrot.lane.b32.xlu1 %v7417_v58, %s9570_s0 }
 0x67d   : > { %v7416_v15 = vmax.f32 %v7356_v42, 0.0  ;;  %v8416_v26 = vpop.f32.mrb[140].mxu1 }
 0x67e   : > { %v8417_v45 = vpop.f32.mrb[141].mxu1 }
 0x67f   : > { %v8419_v43 = vpop.f32.mrb[142].mxu1  ;;  %v8643_v59 = vpop.f32.mrb[192].mxu0  ;;  %7520 = vrot.lane.b32.xlu0 %v7416_v15, %s9570_s0 }
 0x680   : > { %v8420_v30 = vpop.f32.mrb[143].mxu1  ;;  %v7375_v5 = vadd.f32 %v8643_v59, %v14658_v44  ;;  %v7367_v47 = vpop.f32.mrb[193].mxu0 }
 0x681   : > { %v8421_v54 = vadd.f32 %v8420_v30, %v8419_v43  ;;  %v8644_v31 = vpop.f32.mrb[194].mxu0 }
 0x682   : > { %v7419_v9 = vmax.f32 %v7375_v5, 0.0  ;;  %v7369_v51 = vpop.f32.mrb[195].mxu0 }
 0x683   : > { %v6592_v23 = vadd.f32 %v8421_v54, %v14615_v2  ;;  %v7370_v52 = vadd.f32 %v14658_v44, %v7369_v51 }
 0x684   : > { %7526 = vrot.lane.b32.xlu1 %v7419_v9, %s9570_s0 }
 0x685   : > { %v14705_v4 = vadd.f32 %v6592_v23, %v14603_v17  ;;  %v7418_v19 = vmax.f32 %v7370_v52, 0.0  ;;  %v8422_v7 = vpop.f32.mrb[144].mxu1 }
 0x686   : > { %v8423_v10 = vpop.f32.mrb[145].mxu1 }
 0x687   : > { %v8424_v62 = vadd.f32 %v8423_v10, %v8422_v7  ;;  %v8425_v29 = vpop.f32.mrb[146].mxu1  ;;  %v8647_v36 = vpop.f32.mrb[196].mxu0  ;;  %7524 = vrot.lane.b32.xlu0 %v7418_v19, %s9570_s0 }
 0x688   : > { %v8426_v14 = vpop.f32.mrb[147].mxu1  ;;  %v7389_v25 = vadd.f32 %v8647_v36, %v14658_v44  ;;  %v7381_v39 = vpop.f32.mrb[197].mxu0 }
 0x689   : > { %v6597_v2 = vadd.f32 %v14610_v8, %v8424_v62  ;;  %v8648_v3 = vpop.f32.mrb[198].mxu0 }
 0x68a   : > { %v7421_v63 = vmax.f32 %v7389_v25, 0.0  ;;  %v7383_v38 = vpop.f32.mrb[199].mxu0 }
 0x68b   : > { %v14711_v17 = vadd.f32 %v6597_v2, %v14598_v34  ;;  %v7384_v40 = vadd.f32 %v14658_v44, %v7383_v38 }
 0x68c   : > { %7530 = vrot.lane.b32.xlu1 %v7421_v63, %s9570_s0 }
 0x68d   : > { %v7420_v37 = vmax.f32 %v7384_v40, 0.0  ;;  %v8428_v56 = vpop.f32.mrb[148].mxu1 }
 0x68e   : > { %v8429_v60 = vpop.f32.mrb[149].mxu1 }
 0x68f   : > { %v8431_v13 = vpop.f32.mrb[150].mxu1  ;;  %v8651_v32 = vpop.f32.mrb[200].mxu0  ;;  %7528 = vrot.lane.b32.xlu0 %v7420_v37, %s9570_s0 }
 0x690   : > { %v8432_v16 = vpop.f32.mrb[151].mxu1  ;;  %v7403_v8 = vadd.f32 %v8651_v32, %v14658_v44  ;;  %v7395_v58 = vpop.f32.mrb[201].mxu0 }
 0x691   : > { %v8433_v18 = vadd.f32 %v8432_v16, %v8431_v13  ;;  %v8652_v42 = vpop.f32.mrb[202].mxu0 }
 0x692   : > { %v7423_v15 = vmax.f32 %v7403_v8, 0.0  ;;  %v7397_v34 = vpop.f32.mrb[203].mxu0 }
 0x693   : > { %v6606_v26 = vadd.f32 %v8433_v18, %v14625_v35  ;;  %v7398_v45 = vadd.f32 %v14658_v44, %v7397_v34 }
 0x694   : > { %7534 = vrot.lane.b32.xlu1 %v7423_v15, %s9570_s0 }
 0x695   : > { %v14721_v43 = vadd.f32 %v6606_v26, %v14613_v53  ;;  %v7422_v59 = vmax.f32 %v7398_v45, 0.0  ;;  %v8434_v30 = vpop.f32.mrb[152].mxu1 }
 0x696   : > { %v8435_v5 = vpop.f32.mrb[153].mxu1 }
 0x697   : > { %v8436_v47 = vadd.f32 %v8435_v5, %v8434_v30  ;;  %v8437_v54 = vpop.f32.mrb[154].mxu1  ;;  %7532 = vrot.lane.b32.xlu0 %v7422_v59, %s9570_s0  ;;  %s16038_s0 = sand.u32 1, %s9541_s18  }
 0x698   : > { %v8438_v31 = vpop.f32.mrb[155].mxu1  ;;  %s14833_s15 = scalar_lea.sflag [#allocation3], %s16038_s0 }
 0x699   : > { %v6611_v9 = vadd.f32 %v14620_v57, %v8436_v47 }
 0x69b   : > { %v14726_v51 = vadd.f32 %v6611_v9, %v14608_v0 }
 0x69d   : > { %v8440_v35 = vpop.f32.mrb[156].mxu1 }
 0x69e   : > { %v8441_v44 = vpop.f32.mrb[157].mxu1 }
 0x69f   : > { %v8443_v23 = vpop.f32.mrb[158].mxu1 }
 0x6a0   : > { %v8444_v52 = vpop.f32.mrb[159].mxu1 }
 0x6a1   : > { %v8445_v19 = vadd.f32 %v8444_v52, %v8443_v23 }
 0x6a3   : > { %v6620_v53 = vadd.f32 %v8445_v19, %v14635_v27 }
 0x6a5   : > { %v14730_v7 = vadd.f32 %v6620_v53, %v14623_v12  ;;  %v8446_v10 = vpop.f32.mrb[160].mxu1 }
 0x6a6   : > { %v8447_v62 = vpop.f32.mrb[161].mxu1 }
 0x6a7   : > { %v8448_v29 = vadd.f32 %v8447_v62, %v8446_v10  ;;  %v8449_v36 = vpop.f32.mrb[162].mxu1 }
 0x6a8   : > { %v8450_v14 = vpop.f32.mrb[163].mxu1 }
 0x6a9   : > { %v6625_v57 = vadd.f32 %v14630_v1, %v8448_v29 }
 0x6ab   : > { %v14734_v0 = vadd.f32 %v6625_v57, %v14618_v50 }
 0x6ad   : > { %v8452_v25 = vpop.f32.mrb[164].mxu1 }
 0x6ae   : > { %v8453_v39 = vpop.f32.mrb[165].mxu1 }
 0x6af   : > { %v8455_v2 = vpop.f32.mrb[166].mxu1 }
 0x6b0   : > { %v8456_v3 = vpop.f32.mrb[167].mxu1 }
 0x6b1   : > { %v8457_v63 = vadd.f32 %v8456_v3, %v8455_v2 }
 0x6b3   : > { %v6634_v27 = vadd.f32 %v8457_v63, %v14645_v6 }
 0x6b5   : > { %v14738_v12 = vadd.f32 %v6634_v27, %v14633_v11  ;;  %v8458_v38 = vpop.f32.mrb[168].mxu1 }
 0x6b6   : > { %v8459_v40 = vpop.f32.mrb[169].mxu1 }
 0x6b7   : > { %v8460_v37 = vadd.f32 %v8459_v40, %v8458_v38  ;;  %v8461_v56 = vpop.f32.mrb[170].mxu1 }
 0x6b8   : > { %v8462_v60 = vpop.f32.mrb[171].mxu1 }
 0x6b9   : > { %v6639_v1 = vadd.f32 %v14640_v21, %v8460_v37 }
 0x6bb   : > { %v14742_v50 = vadd.f32 %v6639_v1, %v14628_v33  ;;  %v14751_v33 = vld [vmem:[%s14893_s8] ss:$0 sm:$0xff] }
 0x6bc   : > { %v6681_v26 = vadd.f32 %v14751_v33, %v14663_v55  ;;  %v6683_v54 = vadd.f32 %v14751_v33, %v14679_v46  ;;  %v6685_v44 = vadd.f32 %v14751_v33, %v14695_v48  ;;  %v6684_v52 = vadd.f32 %v14751_v33, %v14689_v20 }
 0x6bd   : > { %v8464_v13 = vpop.f32.mrb[172].mxu1  ;;  %v6687_v62 = vadd.f32 %v14751_v33, %v14711_v17  ;;  %v6686_v36 = vadd.f32 %v14751_v33, %v14705_v4  ;;  %v6689_v39 = vadd.f32 %v14751_v33, %v14726_v51  ;;  %v6688_v3 = vadd.f32 %v14751_v33, %v14721_v43 }
 0x6be   : > { %v8465_v32 = vpop.f32.mrb[173].mxu1  ;;  %v6697_v59 = vmax.f32 %v6681_v26, 0.0  ;;  %v6699_v31 = vmax.f32 %v6683_v54, 0.0  ;;  %v6701_v19 = vmax.f32 %v6685_v44, 0.0  ;;  %v6700_v10 = vmax.f32 %v6684_v52, 0.0 }
 0x6bf   : > { %v8467_v16 = vpop.f32.mrb[174].mxu1  ;;  %v6703_v14 = vmax.f32 %v6687_v62, 0.0  ;;  %v6702_v25 = vmax.f32 %v6686_v36, 0.0  ;;  %v6705_v63 = vmax.f32 %v6689_v39, 0.0  ;;  %v6704_v38 = vmax.f32 %v6688_v3, 0.0 }
 0x6c0   : > { %v8468_v8 = vpop.f32.mrb[175].mxu1  ;;  %v6691_v40 = vadd.f32 %v14751_v33, %v14734_v0  ;;  %v6690_v56 = vadd.f32 %v14751_v33, %v14730_v7  ;;  %v6693_v0 = vadd.f32 %v14751_v33, %v14742_v50  ;;  %v6692_v7 = vadd.f32 %v14751_v33, %v14738_v12 }
 0x6c1   : > { %v8469_v58 = vadd.f32 %v8468_v8, %v8467_v16 }
 0x6c2   : > { %v6707_v43 = vmax.f32 %v6691_v40, 0.0  ;;  %v6706_v13 = vmax.f32 %v6690_v56, 0.0  ;;  %v6709_v8 = vmax.f32 %v6693_v0, 0.0 }
 0x6c3   : > { %v6648_v6 = vadd.f32 %v8469_v58, %v14649_v41  ;;  %v6680_v41 = vadd.f32 %v14751_v33, %v14653_v22 }
 0x6c5   : > { %v14746_v11 = vadd.f32 %v6648_v6, %v14643_v28  ;;  %v8470_v18 = vpop.f32.mrb[176].mxu1  ;;  %v6696_v47 = vmax.f32 %v6680_v41, 0.0 }
 0x6c6   : > { %v8471_v42 = vpop.f32.mrb[177].mxu1 }
 0x6c7   : > { %v8472_v15 = vadd.f32 %v8471_v42, %v8470_v18  ;;  %v8473_v34 = vpop.f32.mrb[178].mxu1  ;;  %v6708_v18 = vmax.f32 %v6692_v7, 0.0  ;;  %v6694_v12 = vadd.f32 %v14751_v33, %v14746_v11 }
 0x6c8   : > { %v8474_v21 = vpop.f32.mrb[179].mxu1 }
 0x6c9   : > { %v6653_v45 = vadd.f32 %v14647_v61, %v8472_v15 }
 0x6cb   : > { %v14757_v28 = vadd.f32 %v6653_v45, %v14638_v49  ;;  %v6682_v49 = vadd.f32 %v14751_v33, %v14673_v24  ;;  %v6710_v45 = vmax.f32 %v6694_v12, 0.0 }
 0x6cd   : > { %v6698_v35 = vmax.f32 %v6682_v49, 0.0  ;;  %v6695_v50 = vadd.f32 %v14751_v33, %v14757_v28 }
 0x6ce   : > { %v7507_v30 = vpop.permute.xlu1 %7506 }
 0x6cf   : > { %v7569_v5 = vsel %vm5262_vm5, %v6697_v59, %v7507_v30  ;;  %v6711_v34 = vmax.f32 %v6695_v50, 0.0 }
 0x6d0   : > { %7587 = vst [vmem:[%s13888_s14 + $0x18] sm:$0xff] %v7569_v5 }
 0x6d1   : > { %v7505_v55 = vpop.permute.xlu0 %7504 }
 0x6d2   : > { %v7568_v61 = vsel %vm5262_vm5, %v6696_v47, %v7505_v55 }
 0x6d3   : > { %7585 = vst [vmem:[%s13888_s14 + $0x8] sm:$0xff] %v7568_v61 }
 0x6d6   : > { %v7511_v22 = vpop.permute.xlu1 %7510 }
 0x6d7   : > { %v7571_v9 = vsel %vm5262_vm5, %v6699_v31, %v7511_v22 }
 0x6d8   : > { %7591 = vst [vmem:[%s13888_s14 + $0x38] sm:$0xff] %v7571_v9 }
 0x6d9   : > { %v7509_v23 = vpop.permute.xlu0 %7508 }
 0x6da   : > { %v7570_v46 = vsel %vm5262_vm5, %v6698_v35, %v7509_v23 }
 0x6db   : > { %7589 = vst [vmem:[%s13888_s14 + $0x28] sm:$0xff] %v7570_v46 }
 0x6de   : > { %v7515_v24 = vpop.permute.xlu1 %7514 }
 0x6df   : > { %v7573_v53 = vsel %vm5262_vm5, %v6701_v19, %v7515_v24 }
 0x6e0   : > { %7595 = vst [vmem:[%s13888_s14 + $0x58] sm:$0xff] %v7573_v53 }
 0x6e1   : > { %v7513_v29 = vpop.permute.xlu0 %7512 }
 0x6e2   : > { %v7572_v48 = vsel %vm5262_vm5, %v6700_v10, %v7513_v29 }
 0x6e3   : > { %7593 = vst [vmem:[%s13888_s14 + $0x48] sm:$0xff] %v7572_v48 }
 0x6e6   : > { %v7519_v20 = vpop.permute.xlu1 %7518 }
 0x6e7   : > { %v7575_v57 = vsel %vm5262_vm5, %v6703_v14, %v7519_v20 }
 0x6e8   : > { %7599 = vst [vmem:[%s13888_s14 + $0x78] sm:$0xff] %v7575_v57 }
 0x6e9   : > { %v7517_v2 = vpop.permute.xlu0 %7516 }
 0x6ea   : > { %v7574_v17 = vsel %vm5262_vm5, %v6702_v25, %v7517_v2 }
 0x6eb   : > { %7597 = vst [vmem:[%s13888_s14 + $0x68] sm:$0xff] %v7574_v17 }
 0x6ee   : > { %v7523_v4 = vpop.permute.xlu1 %7522 }
 0x6ef   : > { %v7577_v27 = vsel %vm5262_vm5, %v6705_v63, %v7523_v4 }
 0x6f0   : > { %7603 = vst [vmem:[%s13888_s14 + $0x98] sm:$0xff] %v7577_v27 }
 0x6f1   : > { %v7521_v37 = vpop.permute.xlu0 %7520 }
 0x6f2   : > { %v7576_v51 = vsel %vm5262_vm5, %v6704_v38, %v7521_v37 }
 0x6f3   : > { %7601 = vst [vmem:[%s13888_s14 + $0x88] sm:$0xff] %v7576_v51 }
 0x6f6   : > { %v7527_v60 = vpop.permute.xlu1 %7526 }
 0x6f7   : > { %v7579_v1 = vsel %vm5262_vm5, %v6707_v43, %v7527_v60 }
 0x6f8   : > { %7607 = vst [vmem:[%s13888_s14 + $0xb8] sm:$0xff] %v7579_v1 }
 0x6f9   : > { %v7525_v32 = vpop.permute.xlu0 %7524 }
 0x6fa   : > { %v7578_v16 = vsel %vm5262_vm5, %v6706_v13, %v7525_v32 }
 0x6fb   : > { %7605 = vst [vmem:[%s13888_s14 + $0xa8] sm:$0xff] %v7578_v16 }
 0x6fe   : > { %v7531_v58 = vpop.permute.xlu1 %7530 }
 0x6ff   : > { %v7581_v6 = vsel %vm5262_vm5, %v6709_v8, %v7531_v58 }
 0x700   : > { %7611 = vst [vmem:[%s13888_s14 + $0xd8] sm:$0xff] %v7581_v6 }
 0x701   : > { %v7529_v42 = vpop.permute.xlu0 %7528 }
 0x702   : > { %v7580_v15 = vsel %vm5262_vm5, %v6708_v18, %v7529_v42 }
 0x703   : > { %7609 = vst [vmem:[%s13888_s14 + $0xc8] sm:$0xff] %v7580_v15 }
 0x706   : > { %v7535_v21 = vpop.permute.xlu1 %7534 }
 0x707   : > { %v7583_v26 = vsel %vm5262_vm5, %v6711_v34, %v7535_v21 }
 0x708   : > { %7615 = vst [vmem:[%s13888_s14 + $0xf8] sm:$0xff] %v7583_v26 }
 0x709   : > { %v7533_v28 = vpop.permute.xlu0 %7532 }
 0x70a   : > { %v7582_v11 = vsel %vm5262_vm5, %v6710_v45, %v7533_v28 }
 0x70b   : > { %7613 = vst [vmem:[%s13888_s14 + $0xe8] sm:$0xff] %v7582_v11 }
 0x70c   : > { %9484 = shalt.err (!%p9481_p6)
}
 0x70d   : > { %s9485_s14 = scalar_lea.hbm %s14827_s1, 4096  ;;  %s9489_s21 = scalar_lea.hbm %s14896_s11, 16384 }
 0x70e   : > { %p9486_p7 = scmp.ne.s32.totalorder %s14827_s1, %s9485_s14  ;;  %p9490_p11 = scmp.lt.u32.totalorder %s14827_s1, %s14896_s11 }
 0x70f   : > { %p9491_p12 = scmp.lt.u32.totalorder %s9489_s21, %s9485_s14  ;;  %p9493_p0 = scmp.lt.u32.totalorder %s9485_s14, %s14827_s1 }
 0x710   : > { %p9487_p9 = pnand %p9486_p7, %p9685_p3 }
 0x711   : > { %p9492_p13 = por %p9491_p12, %p9490_p11 }
 0x712   : > { %p9488_p10 = pneg %p9487_p9 }
 0x713   : > { %p9494_p1 = por %p9493_p0, %p9492_p13 }
 0x715   : > { %p9495_p2 = pnand %p9494_p1, %p9488_p10 }
 0x717   : > { %9498 = shalt.err (!%p9495_p2)
}
 0x718   : > { %s9572_s2 = smov 256   ;;  %s9573_s29 = smov 16  }
 0x719   : > { %8671 = dma.vmem_to_hbm [thread:$0]  (%p9685_p3), %s14822_s25, 4096, %s14827_s1, %s14833_s15, %s9572_s2, %s9572_s2, %s9573_s29  }
 0x71a PF: > { %p8677_p4 = scmp.ge.s32.totalorder %s9565_s24, 2  ;;  %s7648_s13 = sand.u32 1, %s9537_s17  }
 0x71b   : > { %s7649_s14 = scalar_lea.sflag [#allocation3], %s7648_s13 }
 0x71c   : > { %p8674_p5 = pnand %p8677_p4, %p9694_p8 }
 0x71e   : > { %9532 = dma.done.wait (!%p8674_p5), %s7649_s14, 4096  }
 0x71f   : > { %9534 = vsyncadd (!%p8674_p5), %s7649_s14, 4294963200  ;;  %s24_s24 = sadd.s32 1, %s9565_s24   ;;  %s16039_s30 = sld [smem:[#allocation5_spill]] }
 0x720   : > { %p21_p6 = scmp.ge.s32.totalorder %s24_s24, 6   ;;  %s16040_s17 = smov %s9541_s18 }
 0x721   : > { %s16041_s18 = smov %s9545_s19  ;;  %s16042_s19 = smov %s9703_s16 }
 0x722   : > { %s16043_s20 = smov %s9557_s22  ;;  %s16044_s21 = smov %s9561_s23 }
 0x723   : > { %s16046_s23 = smov %s16052_s28  ;;  %23 = sbr.rel (!%p21_p6) target bundleno = 9 (0x9), region = 100 }
 0x725   : > { %s16045_s22 = smov %s16039_s30 }
 0x72a   :  { %7654 = vsyncpa [#allocation3], 1 }
 0x72b   :  { %7656 = vsyncpa [#allocation3 + $0x1], 1 }

</bundles_post_ra>
